<compile_context>
chip_gen: v6e
topology: v6e:2x2x1
jax: 0.10.0
libtpu: 0.0.40
codegen_flags: <defaults>
</compile_context>

<pallas_src>
import functools

import jax
import jax.numpy as jnp
from jax import lax
from jax.experimental import pallas as pl
from jax.experimental.pallas import tpu as pltpu

EPS = 1e-5


# --------------------------------------------------------------------- helpers
def _pick_rows_per_strip(H, W, target_rows=512):
    """Image rows per strip; strips always cover whole image rows."""
    if H * W <= 2 * target_rows:
        return H                           # small image: single strip
    r = min(H, max(1, target_rows // W))
    while H % r != 0:
        r -= 1
    if H // r > 32:                        # bound unroll for awkward H
        return H
    return r


def _conv3x3_strips(pad_ref, w_ref, out_ref, left_m, right_m, *, W, C, base, L, HW):
    """3x3 'same' conv over the bf16 padded scratch, strip by strip.

    pad_ref : (HW + 2*base, C) bf16.  Rows [base, base+HW) hold the image in
              flat o = y*W + x order; the halo rows above/below are zero.
    Raw f32 conv output is written to out_ref (the kernel's output block,
    reused as temporary storage).  Per-channel sum / sum-of-squares are
    accumulated while each strip accumulator is live (fused IN statistics).
    Returns (mean, inv_std), each (1, C) f32.
    """
    nstrips = HW // L
    ssum = jnp.zeros((1, C), jnp.float32)
    ssq = jnp.zeros((1, C), jnp.float32)
    for t in range(nstrips):
        s = t * L
        acc = jnp.zeros((L, C), jnp.float32)
        for dy in range(3):
            # One aligned bf16 patch shared by the three dx taps of this dy.
            patch = pad_ref[pl.ds(base + (dy - 1) * W + s, L), :]
            for dx in range(3):
                r = jnp.dot(patch, w_ref[dy * 3 + dx],
                            preferred_element_type=jnp.float32)
                if dx == 1:                                   # centre tap
                    acc = acc + r
                elif dx == 0:     # input x-1: result contributes one slot down
                    acc = acc + jnp.where(left_m, 0.0, pltpu.roll(r, 1, 0))
                else:             # input x+1: result contributes one slot up
                    acc = acc + jnp.where(right_m, 0.0, pltpu.roll(r, L - 1, 0))
        ssum = ssum + jnp.sum(acc, axis=0, keepdims=True)
        ssq = ssq + jnp.sum(acc * acc, axis=0, keepdims=True)
        out_ref[pl.ds(s, L), :] = acc
    inv_n = 1.0 / HW
    mean = ssum * inv_n
    var = ssq * inv_n - mean * mean          # biased variance (InstanceNorm2d)
    return mean, lax.rsqrt(var + EPS)


# ---------------------------------------------------------------------- kernel
def _block_kernel(x_ref, w1_ref, w2_ref, o_ref, pad_ref, *, H, W, C, base, L):
    HW = H * W
    nstrips = HW // L

    # Hoisted column masks (integer iota + rem, built once at full (L, C)).
    col = lax.rem(lax.broadcasted_iota(jnp.int32, (L, C), 0), W)
    left_m = col == 0                        # output column x == 0
    right_m = col == W - 1                   # output column x == W-1

    # Zero the vertical halo; load bf16(x) into the interior (conv1 input).
    halo = jnp.zeros((base, C), jnp.bfloat16)
    pad_ref[pl.ds(0, base), :] = halo
    pad_ref[pl.ds(base + HW, base), :] = halo
    for t in range(nstrips):
        s = t * L
        pad_ref[pl.ds(base + s, L), :] = x_ref[pl.ds(s, L), :].astype(jnp.bfloat16)

    # conv1 (raw output parked in o_ref) with fused IN statistics.
    mean1, inv1 = _conv3x3_strips(pad_ref, w1_ref, o_ref, left_m, right_m,
                                  W=W, C=C, base=base, L=L, HW=HW)

    # normalize + ReLU + bf16 cast -> conv2 input (halo rows are still zero).
    for t in range(nstrips):
        s = t * L
        h = (o_ref[pl.ds(s, L), :] - mean1) * inv1
        pad_ref[pl.ds(base + s, L), :] = jnp.maximum(h, 0.0).astype(jnp.bfloat16)

    # conv2 (raw output overwrites o_ref) with fused IN statistics.
    mean2, inv2 = _conv3x3_strips(pad_ref, w2_ref, o_ref, left_m, right_m,
                                  W=W, C=C, base=base, L=L, HW=HW)

    # residual:  out = x + IN(conv2)   (x re-read per strip, never kept live)
    for t in range(nstrips):
        s = t * L
        y = (o_ref[pl.ds(s, L), :] - mean2) * inv2
        o_ref[pl.ds(s, L), :] = x_ref[pl.ds(s, L), :] + y


# -------------------------------------------------------------------- wrappers
def residual_block_flat(xf, w1f, w2f, H, W):
    """xf: (B, H*W, C) f32 channels-last; w*: (9, Cin, Cout) bf16 (tap = dy*3+dx)."""
    B, HW, C = xf.shape
    assert HW == H * W
    rows = _pick_rows_per_strip(H, W)
    L = rows * W                              # strip length (whole rows)
    base = ((max(W, 8) + 15) // 16) * 16      # vertical halo, bf16-aligned, >= W

    kernel = functools.partial(_block_kernel, H=H, W=W, C=C, base=base, L=L)

    # VMEM budget: double-buffered x/out blocks + double-buffered weights +
    # bf16 padded scratch + strip-sized temporaries, with ~2x headroom.
    x_block = HW * C * 4
    w_block = 9 * C * C * 2
    scratch = (HW + 2 * base) * C * 2
    temps = 8 * L * C * 4
    need = 2 * 2 * x_block + 2 * 2 * w_block + scratch + temps
    vmem_limit = int(min(max(2 * need, 32 << 20), 64 << 20))

    return pl.pallas_call(
        kernel,
        out_shape=jax.ShapeDtypeStruct((B, HW, C), jnp.float32),
        grid_spec=pltpu.PrefetchScalarGridSpec(
            num_scalar_prefetch=0,
            grid=(B,),
            in_specs=[
                pl.BlockSpec((None, HW, C), lambda b: (b, 0, 0)),   # x (per image)
                # Weights are grid-constant (re-used, never re-fetched).
                # TODO(synk): single-buffer them (pipeline_mode=pl.Buffered(1))
                # once verified safe on all deployed jax versions (~2.25 MiB @ C=256).
                pl.BlockSpec((9, C, C), lambda b: (0, 0, 0)),       # w1
                pl.BlockSpec((9, C, C), lambda b: (0, 0, 0)),       # w2
            ],
            out_specs=pl.BlockSpec((None, HW, C), lambda b: (b, 0, 0)),
            scratch_shapes=[pltpu.VMEM((HW + 2 * base, C), jnp.bfloat16)],
        ),
        compiler_params=pltpu.CompilerParams(
            dimension_semantics=("parallel",),   # images independent (v7x 2 TCs)
            vmem_limit_bytes=vmem_limit,
        ),
    )(xf, w1f, w2f)


def residual_block(x_nchw, w1, b1, w2, b2):
    """x_nchw: (B, C, H, W) f32; w*: (3, 3, Cin, Cout) HWIO; b*: (1, C).

    b1/b2 are accepted for API fidelity with the PyTorch module but unused: a
    conv bias followed by a non-affine InstanceNorm cancels exactly.
    For chains of residual blocks, keep activations in the (B, H*W, C) layout
    and call residual_block_flat directly so the NCHW<->flat transposes happen
    only once per chain instead of once per block.
    """
    del b1, b2
    B, C, H, W = x_nchw.shape
    x = jnp.transpose(x_nchw, (0, 2, 3, 1)).astype(jnp.float32).reshape(B, H * W, C)
    w1f = w1.reshape(9, C, C).astype(jnp.bfloat16)
    w2f = w2.reshape(9, C, C).astype(jnp.bfloat16)
    out = residual_block_flat(x, w1f, w2f, H, W)
    return jnp.transpose(out.reshape(B, H, W, C), (0, 3, 1, 2))


# --------------------------------------------------------------- pure-JAX check
def residual_block_ref(x_nchw, w1, b1, w2, b2, matmul_dtype=jnp.float32):
    """Reference. matmul_dtype=bfloat16 mirrors the kernel's MXU operand precision."""
    x = jnp.transpose(x_nchw, (0, 2, 3, 1)).astype(jnp.float32)

    def conv(z, w, b):
        y = lax.conv_general_dilated(
            z.astype(matmul_dtype), w.astype(matmul_dtype),
            window_strides=(1, 1), padding=((1, 1), (1, 1)),
            dimension_numbers=("NHWC", "HWIO", "NHWC"),
            preferred_element_type=jnp.float32)
        return y + b                          # b: (1, C) broadcasts over NHWC

    def inorm(z):
        m = jnp.mean(z, axis=(1, 2), keepdims=True)
        v = jnp.mean((z - m) ** 2, axis=(1, 2), keepdims=True)
        return (z - m) * lax.rsqrt(v + EPS)

    h = jnp.maximum(inorm(conv(x, w1, b1)), 0.0)
    y = inorm(conv(h, w2, b2))
    return jnp.transpose(x + y, (0, 3, 1, 2))


# ------------------------------------------------------------------------ main
if __name__ == "__main__":
    B, C, H, W = 2, 32, 16, 16   # small test shapes (module default channels=256)
    key = jax.random.PRNGKey(0)
    kx, kw1, kb1, kw2, kb2 = jax.random.split(key, 5)

    # Deterministic PyTorch-like Conv2d init: U(-1/sqrt(fan_in), 1/sqrt(fan_in))
    fan_in = C * 3 * 3
    bound = 1.0 / (fan_in ** 0.5)
    w1 = jax.random.uniform(kw1, (3, 3, C, C), jnp.float32, -bound, bound)
    b1 = jax.random.uniform(kb1, (1, C), jnp.float32, -bound, bound)
    w2 = jax.random.uniform(kw2, (3, 3, C, C), jnp.float32, -bound, bound)
    b2 = jax.random.uniform(kb2, (1, C), jnp.float32, -bound, bound)

    x = jax.random.normal(kx, (B, C, H, W), jnp.float32)

    out = jax.block_until_ready(residual_block(x, w1, b1, w2, b2))
    ref_bf16 = jax.block_until_ready(
        residual_block_ref(x, w1, b1, w2, b2, matmul_dtype=jnp.bfloat16))
    ref_f32 = jax.block_until_ready(
        residual_block_ref(x, w1, b1, w2, b2, matmul_dtype=jnp.float32))

    assert out.shape == (B, C, H, W)
    # Check vs a reference using the same bf16-operand / f32-accumulate matmul
    # precision as the kernel's MXU path.
    err_bf16 = float(jnp.max(jnp.abs(out - ref_bf16)))
    assert jnp.allclose(out, ref_bf16, atol=1e-2, rtol=1e-2), err_bf16
    # Loose check vs the full-f32 (PyTorch-arithmetic) reference; the gap is the
    # expected bf16 operand rounding of the two convs.
    err_f32 = float(jnp.max(jnp.abs(out - ref_f32)))
    assert jnp.allclose(out, ref_f32, atol=5e-2, rtol=5e-2), err_f32
    print("KERNEL_OK")
</pallas_src>

<mosaic_0001>
module attributes {stable_mosaic.version = 11 : i64} {
  func.func @_block_kernel(%arg0: i32, %arg1: memref<1x256x32xf32, #tpu.memory_space<vmem>>, %arg2: memref<9x32x32xbf16, #tpu.memory_space<vmem>>, %arg3: memref<9x32x32xbf16, #tpu.memory_space<vmem>>, %arg4: memref<1x256x32xf32, #tpu.memory_space<vmem>>, %arg5: memref<288x32xbf16, #tpu.memory_space<vmem>>) attributes {dimension_semantics = [#tpu.dimension_semantics<parallel>], iteration_bounds = array<i64: 2>, scalar_prefetch = 0 : i64, scratch_operands = 1 : i64, tpu.core_type = #tpu.core_type<tc>, window_params = [{transform_indices = @transform_0, window_bounds = array<i64: 1, 256, 32>}, {pipeline_mode = #tpu.pipeline_mode<synchronous>, transform_indices = @transform_1, window_bounds = array<i64: 9, 32, 32>}, {pipeline_mode = #tpu.pipeline_mode<synchronous>, transform_indices = @transform_2, window_bounds = array<i64: 9, 32, 32>}, {transform_indices = @transform_3, window_bounds = array<i64: 1, 256, 32>}]} {
    %0 = tpu.iota {dimensions = array<i32: 0>} : vector<256x32xi32>
    %c16_i32 = arith.constant 16 : i32
    %1 = vector.broadcast %c16_i32 : i32 to vector<256x32xi32>
    %2 = arith.remsi %0, %1 : vector<256x32xi32>
    %c0_i32 = arith.constant 0 : i32
    %3 = vector.broadcast %c0_i32 : i32 to vector<256x32xi32>
    %4 = arith.cmpi eq, %2, %3 : vector<256x32xi32>
    %c15_i32 = arith.constant 15 : i32
    %5 = vector.broadcast %c15_i32 : i32 to vector<256x32xi32>
    %6 = arith.cmpi eq, %2, %5 : vector<256x32xi32>
    %cst = arith.constant 0.000000e+00 : bf16
    %7 = vector.broadcast %cst : bf16 to vector<16x32xbf16>
    %c0 = arith.constant 0 : index
    %c0_0 = arith.constant 0 : index
    %8 = vector.load %arg5[%c0, %c0_0] : memref<288x32xbf16, #tpu.memory_space<vmem>>, vector<16x32xbf16>
    tpu.vector_store %arg5[%c0, %c0_0], %7 {strides = array<i32>} : memref<288x32xbf16, #tpu.memory_space<vmem>>, vector<16x32xbf16>,
    %c272 = arith.constant 272 : index
    %c0_1 = arith.constant 0 : index
    %9 = vector.load %arg5[%c272, %c0_1] : memref<288x32xbf16, #tpu.memory_space<vmem>>, vector<16x32xbf16>
    tpu.vector_store %arg5[%c272, %c0_1], %7 {strides = array<i32>} : memref<288x32xbf16, #tpu.memory_space<vmem>>, vector<16x32xbf16>,
    %c0_2 = arith.constant 0 : index
    %c0_3 = arith.constant 0 : index
    %c0_4 = arith.constant 0 : index
    %10 = vector.load %arg1[%c0_2, %c0_3, %c0_4] : memref<1x256x32xf32, #tpu.memory_space<vmem>>, vector<1x256x32xf32>
    %11 = vector.shape_cast %10 : vector<1x256x32xf32> to vector<256x32xf32>
    %12 = arith.truncf %11 : vector<256x32xf32> to vector<256x32xbf16>
    %c16 = arith.constant 16 : index
    %c0_5 = arith.constant 0 : index
    %13 = vector.load %arg5[%c16, %c0_5] : memref<288x32xbf16, #tpu.memory_space<vmem>>, vector<256x32xbf16>
    tpu.vector_store %arg5[%c16, %c0_5], %12 {strides = array<i32>} : memref<288x32xbf16, #tpu.memory_space<vmem>>, vector<256x32xbf16>,
    %cst_6 = arith.constant 0.000000e+00 : f32
    %14 = vector.broadcast %cst_6 : f32 to vector<1x32xf32>
    %cst_7 = arith.constant 0.000000e+00 : f32
    %15 = vector.broadcast %cst_7 : f32 to vector<1x32xf32>
    %cst_8 = arith.constant 0.000000e+00 : f32
    %16 = vector.broadcast %cst_8 : f32 to vector<256x32xf32>
    %c0_9 = arith.constant 0 : index
    %c0_10 = arith.constant 0 : index
    %17 = vector.load %arg5[%c0_9, %c0_10] : memref<288x32xbf16, #tpu.memory_space<vmem>>, vector<256x32xbf16>
    %c0_11 = arith.constant 0 : index
    %c0_12 = arith.constant 0 : index
    %c0_13 = arith.constant 0 : index
    %18 = vector.load %arg2[%c0_11, %c0_12, %c0_13] : memref<9x32x32xbf16, #tpu.memory_space<vmem>>, vector<1x32x32xbf16>
    %19 = vector.shape_cast %18 : vector<1x32x32xbf16> to vector<32x32xbf16>
    %cst_14 = arith.constant dense<0.000000e+00> : vector<256x32xf32>
    %20 = tpu.matmul %17, %19, %cst_14 {dimension_numbers = #tpu.dot_dimension_numbers<[1], [0], [0], [1], [0, 0, 1, 1], [], []>} : vector<256x32xbf16>, vector<32x32xbf16>, vector<256x32xf32> -> vector<256x32xf32>
    %c1_i32 = arith.constant 1 : i32
    %21 = tpu.dynamic_rotate %20 by %c1_i32 dim 0 : vector<256x32xf32>, i32 -> vector<256x32xf32>
    %cst_15 = arith.constant 0.000000e+00 : f32
    %22 = vector.broadcast %cst_15 : f32 to vector<256x32xf32>
    %23 = arith.select %4, %22, %21 : vector<256x32xi1>, vector<256x32xf32>
    %24 = arith.addf %16, %23 : vector<256x32xf32>
    %c1 = arith.constant 1 : index
    %c0_16 = arith.constant 0 : index
    %c0_17 = arith.constant 0 : index
    %25 = vector.load %arg2[%c1, %c0_16, %c0_17] : memref<9x32x32xbf16, #tpu.memory_space<vmem>>, vector<1x32x32xbf16>
    %26 = vector.shape_cast %25 : vector<1x32x32xbf16> to vector<32x32xbf16>
    %cst_18 = arith.constant dense<0.000000e+00> : vector<256x32xf32>
    %27 = tpu.matmul %17, %26, %cst_18 {dimension_numbers = #tpu.dot_dimension_numbers<[1], [0], [0], [1], [0, 0, 1, 1], [], []>} : vector<256x32xbf16>, vector<32x32xbf16>, vector<256x32xf32> -> vector<256x32xf32>
    %28 = arith.addf %24, %27 : vector<256x32xf32>
    %c2 = arith.constant 2 : index
    %c0_19 = arith.constant 0 : index
    %c0_20 = arith.constant 0 : index
    %29 = vector.load %arg2[%c2, %c0_19, %c0_20] : memref<9x32x32xbf16, #tpu.memory_space<vmem>>, vector<1x32x32xbf16>
    %30 = vector.shape_cast %29 : vector<1x32x32xbf16> to vector<32x32xbf16>
    %cst_21 = arith.constant dense<0.000000e+00> : vector<256x32xf32>
    %31 = tpu.matmul %17, %30, %cst_21 {dimension_numbers = #tpu.dot_dimension_numbers<[1], [0], [0], [1], [0, 0, 1, 1], [], []>} : vector<256x32xbf16>, vector<32x32xbf16>, vector<256x32xf32> -> vector<256x32xf32>
    %c255_i32 = arith.constant 255 : i32
    %32 = tpu.dynamic_rotate %31 by %c255_i32 dim 0 : vector<256x32xf32>, i32 -> vector<256x32xf32>
    %cst_22 = arith.constant 0.000000e+00 : f32
    %33 = vector.broadcast %cst_22 : f32 to vector<256x32xf32>
    %34 = arith.select %6, %33, %32 : vector<256x32xi1>, vector<256x32xf32>
    %35 = arith.addf %28, %34 : vector<256x32xf32>
    %c16_23 = arith.constant 16 : index
    %c0_24 = arith.constant 0 : index
    %36 = vector.load %arg5[%c16_23, %c0_24] : memref<288x32xbf16, #tpu.memory_space<vmem>>, vector<256x32xbf16>
    %c3 = arith.constant 3 : index
    %c0_25 = arith.constant 0 : index
    %c0_26 = arith.constant 0 : index
    %37 = vector.load %arg2[%c3, %c0_25, %c0_26] : memref<9x32x32xbf16, #tpu.memory_space<vmem>>, vector<1x32x32xbf16>
    %38 = vector.shape_cast %37 : vector<1x32x32xbf16> to vector<32x32xbf16>
    %cst_27 = arith.constant dense<0.000000e+00> : vector<256x32xf32>
    %39 = tpu.matmul %36, %38, %cst_27 {dimension_numbers = #tpu.dot_dimension_numbers<[1], [0], [0], [1], [0, 0, 1, 1], [], []>} : vector<256x32xbf16>, vector<32x32xbf16>, vector<256x32xf32> -> vector<256x32xf32>
    %c1_i32_28 = arith.constant 1 : i32
    %40 = tpu.dynamic_rotate %39 by %c1_i32_28 dim 0 : vector<256x32xf32>, i32 -> vector<256x32xf32>
    %cst_29 = arith.constant 0.000000e+00 : f32
    %41 = vector.broadcast %cst_29 : f32 to vector<256x32xf32>
    %42 = arith.select %4, %41, %40 : vector<256x32xi1>, vector<256x32xf32>
    %43 = arith.addf %35, %42 : vector<256x32xf32>
    %c4 = arith.constant 4 : index
    %c0_30 = arith.constant 0 : index
    %c0_31 = arith.constant 0 : index
    %44 = vector.load %arg2[%c4, %c0_30, %c0_31] : memref<9x32x32xbf16, #tpu.memory_space<vmem>>, vector<1x32x32xbf16>
    %45 = vector.shape_cast %44 : vector<1x32x32xbf16> to vector<32x32xbf16>
    %cst_32 = arith.constant dense<0.000000e+00> : vector<256x32xf32>
    %46 = tpu.matmul %36, %45, %cst_32 {dimension_numbers = #tpu.dot_dimension_numbers<[1], [0], [0], [1], [0, 0, 1, 1], [], []>} : vector<256x32xbf16>, vector<32x32xbf16>, vector<256x32xf32> -> vector<256x32xf32>
    %47 = arith.addf %43, %46 : vector<256x32xf32>
    %c5 = arith.constant 5 : index
    %c0_33 = arith.constant 0 : index
    %c0_34 = arith.constant 0 : index
    %48 = vector.load %arg2[%c5, %c0_33, %c0_34] : memref<9x32x32xbf16, #tpu.memory_space<vmem>>, vector<1x32x32xbf16>
    %49 = vector.shape_cast %48 : vector<1x32x32xbf16> to vector<32x32xbf16>
    %cst_35 = arith.constant dense<0.000000e+00> : vector<256x32xf32>
    %50 = tpu.matmul %36, %49, %cst_35 {dimension_numbers = #tpu.dot_dimension_numbers<[1], [0], [0], [1], [0, 0, 1, 1], [], []>} : vector<256x32xbf16>, vector<32x32xbf16>, vector<256x32xf32> -> vector<256x32xf32>
    %c255_i32_36 = arith.constant 255 : i32
    %51 = tpu.dynamic_rotate %50 by %c255_i32_36 dim 0 : vector<256x32xf32>, i32 -> vector<256x32xf32>
    %cst_37 = arith.constant 0.000000e+00 : f32
    %52 = vector.broadcast %cst_37 : f32 to vector<256x32xf32>
    %53 = arith.select %6, %52, %51 : vector<256x32xi1>, vector<256x32xf32>
    %54 = arith.addf %47, %53 : vector<256x32xf32>
    %c32 = arith.constant 32 : index
    %c0_38 = arith.constant 0 : index
    %55 = vector.load %arg5[%c32, %c0_38] : memref<288x32xbf16, #tpu.memory_space<vmem>>, vector<256x32xbf16>
    %c6 = arith.constant 6 : index
    %c0_39 = arith.constant 0 : index
    %c0_40 = arith.constant 0 : index
    %56 = vector.load %arg2[%c6, %c0_39, %c0_40] : memref<9x32x32xbf16, #tpu.memory_space<vmem>>, vector<1x32x32xbf16>
    %57 = vector.shape_cast %56 : vector<1x32x32xbf16> to vector<32x32xbf16>
    %cst_41 = arith.constant dense<0.000000e+00> : vector<256x32xf32>
    %58 = tpu.matmul %55, %57, %cst_41 {dimension_numbers = #tpu.dot_dimension_numbers<[1], [0], [0], [1], [0, 0, 1, 1], [], []>} : vector<256x32xbf16>, vector<32x32xbf16>, vector<256x32xf32> -> vector<256x32xf32>
    %c1_i32_42 = arith.constant 1 : i32
    %59 = tpu.dynamic_rotate %58 by %c1_i32_42 dim 0 : vector<256x32xf32>, i32 -> vector<256x32xf32>
    %cst_43 = arith.constant 0.000000e+00 : f32
    %60 = vector.broadcast %cst_43 : f32 to vector<256x32xf32>
    %61 = arith.select %4, %60, %59 : vector<256x32xi1>, vector<256x32xf32>
    %62 = arith.addf %54, %61 : vector<256x32xf32>
    %c7 = arith.constant 7 : index
    %c0_44 = arith.constant 0 : index
    %c0_45 = arith.constant 0 : index
    %63 = vector.load %arg2[%c7, %c0_44, %c0_45] : memref<9x32x32xbf16, #tpu.memory_space<vmem>>, vector<1x32x32xbf16>
    %64 = vector.shape_cast %63 : vector<1x32x32xbf16> to vector<32x32xbf16>
    %cst_46 = arith.constant dense<0.000000e+00> : vector<256x32xf32>
    %65 = tpu.matmul %55, %64, %cst_46 {dimension_numbers = #tpu.dot_dimension_numbers<[1], [0], [0], [1], [0, 0, 1, 1], [], []>} : vector<256x32xbf16>, vector<32x32xbf16>, vector<256x32xf32> -> vector<256x32xf32>
    %66 = arith.addf %62, %65 : vector<256x32xf32>
    %c8 = arith.constant 8 : index
    %c0_47 = arith.constant 0 : index
    %c0_48 = arith.constant 0 : index
    %67 = vector.load %arg2[%c8, %c0_47, %c0_48] : memref<9x32x32xbf16, #tpu.memory_space<vmem>>, vector<1x32x32xbf16>
    %68 = vector.shape_cast %67 : vector<1x32x32xbf16> to vector<32x32xbf16>
    %cst_49 = arith.constant dense<0.000000e+00> : vector<256x32xf32>
    %69 = tpu.matmul %55, %68, %cst_49 {dimension_numbers = #tpu.dot_dimension_numbers<[1], [0], [0], [1], [0, 0, 1, 1], [], []>} : vector<256x32xbf16>, vector<32x32xbf16>, vector<256x32xf32> -> vector<256x32xf32>
    %c255_i32_50 = arith.constant 255 : i32
    %70 = tpu.dynamic_rotate %69 by %c255_i32_50 dim 0 : vector<256x32xf32>, i32 -> vector<256x32xf32>
    %cst_51 = arith.constant 0.000000e+00 : f32
    %71 = vector.broadcast %cst_51 : f32 to vector<256x32xf32>
    %72 = arith.select %6, %71, %70 : vector<256x32xi1>, vector<256x32xf32>
    %73 = arith.addf %66, %72 : vector<256x32xf32>
    %cst_52 = arith.constant dense<0.000000e+00> : vector<32xf32>
    %74 = vector.multi_reduction <add>, %73, %cst_52 [0] : vector<256x32xf32> to vector<32xf32>
    %75 = vector.shape_cast %74 : vector<32xf32> to vector<1x32xf32>
    %76 = arith.addf %14, %75 : vector<1x32xf32>
    %77 = arith.mulf %73, %73 : vector<256x32xf32>
    %cst_53 = arith.constant dense<0.000000e+00> : vector<32xf32>
    %78 = vector.multi_reduction <add>, %77, %cst_53 [0] : vector<256x32xf32> to vector<32xf32>
    %79 = vector.shape_cast %78 : vector<32xf32> to vector<1x32xf32>
    %80 = arith.addf %15, %79 : vector<1x32xf32>
    %c0_54 = arith.constant 0 : index
    %c0_55 = arith.constant 0 : index
    %c0_56 = arith.constant 0 : index
    %81 = vector.load %arg4[%c0_54, %c0_55, %c0_56] : memref<1x256x32xf32, #tpu.memory_space<vmem>>, vector<1x256x32xf32>
    %82 = vector.shape_cast %81 : vector<1x256x32xf32> to vector<256x32xf32>
    %83 = vector.shape_cast %73 : vector<256x32xf32> to vector<1x256x32xf32>
    tpu.vector_store %arg4[%c0_54, %c0_55, %c0_56], %83 {strides = array<i32>} : memref<1x256x32xf32, #tpu.memory_space<vmem>>, vector<1x256x32xf32>,
    %cst_57 = arith.constant 3.906250e-03 : f32
    %84 = vector.broadcast %cst_57 : f32 to vector<1x32xf32>
    %85 = arith.mulf %76, %84 : vector<1x32xf32>
    %cst_58 = arith.constant 3.906250e-03 : f32
    %86 = vector.broadcast %cst_58 : f32 to vector<1x32xf32>
    %87 = arith.mulf %80, %86 : vector<1x32xf32>
    %88 = arith.mulf %85, %85 : vector<1x32xf32>
    %89 = arith.subf %87, %88 : vector<1x32xf32>
    %cst_59 = arith.constant 9.99999974E-6 : f32
    %90 = vector.broadcast %cst_59 : f32 to vector<1x32xf32>
    %91 = arith.addf %89, %90 : vector<1x32xf32>
    %92 = math.rsqrt %91 : vector<1x32xf32>
    %c0_60 = arith.constant 0 : index
    %c0_61 = arith.constant 0 : index
    %c0_62 = arith.constant 0 : index
    %93 = vector.load %arg4[%c0_60, %c0_61, %c0_62] : memref<1x256x32xf32, #tpu.memory_space<vmem>>, vector<1x256x32xf32>
    %94 = vector.shape_cast %93 : vector<1x256x32xf32> to vector<256x32xf32>
    %95 = vector.broadcast %85 : vector<1x32xf32> to vector<256x32xf32>
    %96 = arith.subf %94, %95 : vector<256x32xf32>
    %97 = vector.broadcast %92 : vector<1x32xf32> to vector<256x32xf32>
    %98 = arith.mulf %96, %97 : vector<256x32xf32>
    %cst_63 = arith.constant 0.000000e+00 : f32
    %99 = vector.broadcast %cst_63 : f32 to vector<256x32xf32>
    %100 = arith.maximumf %98, %99 : vector<256x32xf32>
    %101 = arith.truncf %100 : vector<256x32xf32> to vector<256x32xbf16>
    %c16_64 = arith.constant 16 : index
    %c0_65 = arith.constant 0 : index
    %102 = vector.load %arg5[%c16_64, %c0_65] : memref<288x32xbf16, #tpu.memory_space<vmem>>, vector<256x32xbf16>
    tpu.vector_store %arg5[%c16_64, %c0_65], %101 {strides = array<i32>} : memref<288x32xbf16, #tpu.memory_space<vmem>>, vector<256x32xbf16>,
    %cst_66 = arith.constant 0.000000e+00 : f32
    %103 = vector.broadcast %cst_66 : f32 to vector<1x32xf32>
    %cst_67 = arith.constant 0.000000e+00 : f32
    %104 = vector.broadcast %cst_67 : f32 to vector<1x32xf32>
    %cst_68 = arith.constant 0.000000e+00 : f32
    %105 = vector.broadcast %cst_68 : f32 to vector<256x32xf32>
    %c0_69 = arith.constant 0 : index
    %c0_70 = arith.constant 0 : index
    %106 = vector.load %arg5[%c0_69, %c0_70] : memref<288x32xbf16, #tpu.memory_space<vmem>>, vector<256x32xbf16>
    %c0_71 = arith.constant 0 : index
    %c0_72 = arith.constant 0 : index
    %c0_73 = arith.constant 0 : index
    %107 = vector.load %arg3[%c0_71, %c0_72, %c0_73] : memref<9x32x32xbf16, #tpu.memory_space<vmem>>, vector<1x32x32xbf16>
    %108 = vector.shape_cast %107 : vector<1x32x32xbf16> to vector<32x32xbf16>
    %cst_74 = arith.constant dense<0.000000e+00> : vector<256x32xf32>
    %109 = tpu.matmul %106, %108, %cst_74 {dimension_numbers = #tpu.dot_dimension_numbers<[1], [0], [0], [1], [0, 0, 1, 1], [], []>} : vector<256x32xbf16>, vector<32x32xbf16>, vector<256x32xf32> -> vector<256x32xf32>
    %c1_i32_75 = arith.constant 1 : i32
    %110 = tpu.dynamic_rotate %109 by %c1_i32_75 dim 0 : vector<256x32xf32>, i32 -> vector<256x32xf32>
    %cst_76 = arith.constant 0.000000e+00 : f32
    %111 = vector.broadcast %cst_76 : f32 to vector<256x32xf32>
    %112 = arith.select %4, %111, %110 : vector<256x32xi1>, vector<256x32xf32>
    %113 = arith.addf %105, %112 : vector<256x32xf32>
    %c1_77 = arith.constant 1 : index
    %c0_78 = arith.constant 0 : index
    %c0_79 = arith.constant 0 : index
    %114 = vector.load %arg3[%c1_77, %c0_78, %c0_79] : memref<9x32x32xbf16, #tpu.memory_space<vmem>>, vector<1x32x32xbf16>
    %115 = vector.shape_cast %114 : vector<1x32x32xbf16> to vector<32x32xbf16>
    %cst_80 = arith.constant dense<0.000000e+00> : vector<256x32xf32>
    %116 = tpu.matmul %106, %115, %cst_80 {dimension_numbers = #tpu.dot_dimension_numbers<[1], [0], [0], [1], [0, 0, 1, 1], [], []>} : vector<256x32xbf16>, vector<32x32xbf16>, vector<256x32xf32> -> vector<256x32xf32>
    %117 = arith.addf %113, %116 : vector<256x32xf32>
    %c2_81 = arith.constant 2 : index
    %c0_82 = arith.constant 0 : index
    %c0_83 = arith.constant 0 : index
    %118 = vector.load %arg3[%c2_81, %c0_82, %c0_83] : memref<9x32x32xbf16, #tpu.memory_space<vmem>>, vector<1x32x32xbf16>
    %119 = vector.shape_cast %118 : vector<1x32x32xbf16> to vector<32x32xbf16>
    %cst_84 = arith.constant dense<0.000000e+00> : vector<256x32xf32>
    %120 = tpu.matmul %106, %119, %cst_84 {dimension_numbers = #tpu.dot_dimension_numbers<[1], [0], [0], [1], [0, 0, 1, 1], [], []>} : vector<256x32xbf16>, vector<32x32xbf16>, vector<256x32xf32> -> vector<256x32xf32>
    %c255_i32_85 = arith.constant 255 : i32
    %121 = tpu.dynamic_rotate %120 by %c255_i32_85 dim 0 : vector<256x32xf32>, i32 -> vector<256x32xf32>
    %cst_86 = arith.constant 0.000000e+00 : f32
    %122 = vector.broadcast %cst_86 : f32 to vector<256x32xf32>
    %123 = arith.select %6, %122, %121 : vector<256x32xi1>, vector<256x32xf32>
    %124 = arith.addf %117, %123 : vector<256x32xf32>
    %c16_87 = arith.constant 16 : index
    %c0_88 = arith.constant 0 : index
    %125 = vector.load %arg5[%c16_87, %c0_88] : memref<288x32xbf16, #tpu.memory_space<vmem>>, vector<256x32xbf16>
    %c3_89 = arith.constant 3 : index
    %c0_90 = arith.constant 0 : index
    %c0_91 = arith.constant 0 : index
    %126 = vector.load %arg3[%c3_89, %c0_90, %c0_91] : memref<9x32x32xbf16, #tpu.memory_space<vmem>>, vector<1x32x32xbf16>
    %127 = vector.shape_cast %126 : vector<1x32x32xbf16> to vector<32x32xbf16>
    %cst_92 = arith.constant dense<0.000000e+00> : vector<256x32xf32>
    %128 = tpu.matmul %125, %127, %cst_92 {dimension_numbers = #tpu.dot_dimension_numbers<[1], [0], [0], [1], [0, 0, 1, 1], [], []>} : vector<256x32xbf16>, vector<32x32xbf16>, vector<256x32xf32> -> vector<256x32xf32>
    %c1_i32_93 = arith.constant 1 : i32
    %129 = tpu.dynamic_rotate %128 by %c1_i32_93 dim 0 : vector<256x32xf32>, i32 -> vector<256x32xf32>
    %cst_94 = arith.constant 0.000000e+00 : f32
    %130 = vector.broadcast %cst_94 : f32 to vector<256x32xf32>
    %131 = arith.select %4, %130, %129 : vector<256x32xi1>, vector<256x32xf32>
    %132 = arith.addf %124, %131 : vector<256x32xf32>
    %c4_95 = arith.constant 4 : index
    %c0_96 = arith.constant 0 : index
    %c0_97 = arith.constant 0 : index
    %133 = vector.load %arg3[%c4_95, %c0_96, %c0_97] : memref<9x32x32xbf16, #tpu.memory_space<vmem>>, vector<1x32x32xbf16>
    %134 = vector.shape_cast %133 : vector<1x32x32xbf16> to vector<32x32xbf16>
    %cst_98 = arith.constant dense<0.000000e+00> : vector<256x32xf32>
    %135 = tpu.matmul %125, %134, %cst_98 {dimension_numbers = #tpu.dot_dimension_numbers<[1], [0], [0], [1], [0, 0, 1, 1], [], []>} : vector<256x32xbf16>, vector<32x32xbf16>, vector<256x32xf32> -> vector<256x32xf32>
    %136 = arith.addf %132, %135 : vector<256x32xf32>
    %c5_99 = arith.constant 5 : index
    %c0_100 = arith.constant 0 : index
    %c0_101 = arith.constant 0 : index
    %137 = vector.load %arg3[%c5_99, %c0_100, %c0_101] : memref<9x32x32xbf16, #tpu.memory_space<vmem>>, vector<1x32x32xbf16>
    %138 = vector.shape_cast %137 : vector<1x32x32xbf16> to vector<32x32xbf16>
    %cst_102 = arith.constant dense<0.000000e+00> : vector<256x32xf32>
    %139 = tpu.matmul %125, %138, %cst_102 {dimension_numbers = #tpu.dot_dimension_numbers<[1], [0], [0], [1], [0, 0, 1, 1], [], []>} : vector<256x32xbf16>, vector<32x32xbf16>, vector<256x32xf32> -> vector<256x32xf32>
    %c255_i32_103 = arith.constant 255 : i32
    %140 = tpu.dynamic_rotate %139 by %c255_i32_103 dim 0 : vector<256x32xf32>, i32 -> vector<256x32xf32>
    %cst_104 = arith.constant 0.000000e+00 : f32
    %141 = vector.broadcast %cst_104 : f32 to vector<256x32xf32>
    %142 = arith.select %6, %141, %140 : vector<256x32xi1>, vector<256x32xf32>
    %143 = arith.addf %136, %142 : vector<256x32xf32>
    %c32_105 = arith.constant 32 : index
    %c0_106 = arith.constant 0 : index
    %144 = vector.load %arg5[%c32_105, %c0_106] : memref<288x32xbf16, #tpu.memory_space<vmem>>, vector<256x32xbf16>
    %c6_107 = arith.constant 6 : index
    %c0_108 = arith.constant 0 : index
    %c0_109 = arith.constant 0 : index
    %145 = vector.load %arg3[%c6_107, %c0_108, %c0_109] : memref<9x32x32xbf16, #tpu.memory_space<vmem>>, vector<1x32x32xbf16>
    %146 = vector.shape_cast %145 : vector<1x32x32xbf16> to vector<32x32xbf16>
    %cst_110 = arith.constant dense<0.000000e+00> : vector<256x32xf32>
    %147 = tpu.matmul %144, %146, %cst_110 {dimension_numbers = #tpu.dot_dimension_numbers<[1], [0], [0], [1], [0, 0, 1, 1], [], []>} : vector<256x32xbf16>, vector<32x32xbf16>, vector<256x32xf32> -> vector<256x32xf32>
    %c1_i32_111 = arith.constant 1 : i32
    %148 = tpu.dynamic_rotate %147 by %c1_i32_111 dim 0 : vector<256x32xf32>, i32 -> vector<256x32xf32>
    %cst_112 = arith.constant 0.000000e+00 : f32
    %149 = vector.broadcast %cst_112 : f32 to vector<256x32xf32>
    %150 = arith.select %4, %149, %148 : vector<256x32xi1>, vector<256x32xf32>
    %151 = arith.addf %143, %150 : vector<256x32xf32>
    %c7_113 = arith.constant 7 : index
    %c0_114 = arith.constant 0 : index
    %c0_115 = arith.constant 0 : index
    %152 = vector.load %arg3[%c7_113, %c0_114, %c0_115] : memref<9x32x32xbf16, #tpu.memory_space<vmem>>, vector<1x32x32xbf16>
    %153 = vector.shape_cast %152 : vector<1x32x32xbf16> to vector<32x32xbf16>
    %cst_116 = arith.constant dense<0.000000e+00> : vector<256x32xf32>
    %154 = tpu.matmul %144, %153, %cst_116 {dimension_numbers = #tpu.dot_dimension_numbers<[1], [0], [0], [1], [0, 0, 1, 1], [], []>} : vector<256x32xbf16>, vector<32x32xbf16>, vector<256x32xf32> -> vector<256x32xf32>
    %155 = arith.addf %151, %154 : vector<256x32xf32>
    %c8_117 = arith.constant 8 : index
    %c0_118 = arith.constant 0 : index
    %c0_119 = arith.constant 0 : index
    %156 = vector.load %arg3[%c8_117, %c0_118, %c0_119] : memref<9x32x32xbf16, #tpu.memory_space<vmem>>, vector<1x32x32xbf16>
    %157 = vector.shape_cast %156 : vector<1x32x32xbf16> to vector<32x32xbf16>
    %cst_120 = arith.constant dense<0.000000e+00> : vector<256x32xf32>
    %158 = tpu.matmul %144, %157, %cst_120 {dimension_numbers = #tpu.dot_dimension_numbers<[1], [0], [0], [1], [0, 0, 1, 1], [], []>} : vector<256x32xbf16>, vector<32x32xbf16>, vector<256x32xf32> -> vector<256x32xf32>
    %c255_i32_121 = arith.constant 255 : i32
    %159 = tpu.dynamic_rotate %158 by %c255_i32_121 dim 0 : vector<256x32xf32>, i32 -> vector<256x32xf32>
    %cst_122 = arith.constant 0.000000e+00 : f32
    %160 = vector.broadcast %cst_122 : f32 to vector<256x32xf32>
    %161 = arith.select %6, %160, %159 : vector<256x32xi1>, vector<256x32xf32>
    %162 = arith.addf %155, %161 : vector<256x32xf32>
    %cst_123 = arith.constant dense<0.000000e+00> : vector<32xf32>
    %163 = vector.multi_reduction <add>, %162, %cst_123 [0] : vector<256x32xf32> to vector<32xf32>
    %164 = vector.shape_cast %163 : vector<32xf32> to vector<1x32xf32>
    %165 = arith.addf %103, %164 : vector<1x32xf32>
    %166 = arith.mulf %162, %162 : vector<256x32xf32>
    %cst_124 = arith.constant dense<0.000000e+00> : vector<32xf32>
    %167 = vector.multi_reduction <add>, %166, %cst_124 [0] : vector<256x32xf32> to vector<32xf32>
    %168 = vector.shape_cast %167 : vector<32xf32> to vector<1x32xf32>
    %169 = arith.addf %104, %168 : vector<1x32xf32>
    %c0_125 = arith.constant 0 : index
    %c0_126 = arith.constant 0 : index
    %c0_127 = arith.constant 0 : index
    %170 = vector.load %arg4[%c0_125, %c0_126, %c0_127] : memref<1x256x32xf32, #tpu.memory_space<vmem>>, vector<1x256x32xf32>
    %171 = vector.shape_cast %170 : vector<1x256x32xf32> to vector<256x32xf32>
    %172 = vector.shape_cast %162 : vector<256x32xf32> to vector<1x256x32xf32>
    tpu.vector_store %arg4[%c0_125, %c0_126, %c0_127], %172 {strides = array<i32>} : memref<1x256x32xf32, #tpu.memory_space<vmem>>, vector<1x256x32xf32>,
    %cst_128 = arith.constant 3.906250e-03 : f32
    %173 = vector.broadcast %cst_128 : f32 to vector<1x32xf32>
    %174 = arith.mulf %165, %173 : vector<1x32xf32>
    %cst_129 = arith.constant 3.906250e-03 : f32
    %175 = vector.broadcast %cst_129 : f32 to vector<1x32xf32>
    %176 = arith.mulf %169, %175 : vector<1x32xf32>
    %177 = arith.mulf %174, %174 : vector<1x32xf32>
    %178 = arith.subf %176, %177 : vector<1x32xf32>
    %cst_130 = arith.constant 9.99999974E-6 : f32
    %179 = vector.broadcast %cst_130 : f32 to vector<1x32xf32>
    %180 = arith.addf %178, %179 : vector<1x32xf32>
    %181 = math.rsqrt %180 : vector<1x32xf32>
    %c0_131 = arith.constant 0 : index
    %c0_132 = arith.constant 0 : index
    %c0_133 = arith.constant 0 : index
    %182 = vector.load %arg4[%c0_131, %c0_132, %c0_133] : memref<1x256x32xf32, #tpu.memory_space<vmem>>, vector<1x256x32xf32>
    %183 = vector.shape_cast %182 : vector<1x256x32xf32> to vector<256x32xf32>
    %184 = vector.broadcast %174 : vector<1x32xf32> to vector<256x32xf32>
    %185 = arith.subf %183, %184 : vector<256x32xf32>
    %186 = vector.broadcast %181 : vector<1x32xf32> to vector<256x32xf32>
    %187 = arith.mulf %185, %186 : vector<256x32xf32>
    %c0_134 = arith.constant 0 : index
    %c0_135 = arith.constant 0 : index
    %c0_136 = arith.constant 0 : index
    %188 = vector.load %arg1[%c0_134, %c0_135, %c0_136] : memref<1x256x32xf32, #tpu.memory_space<vmem>>, vector<1x256x32xf32>
    %189 = vector.shape_cast %188 : vector<1x256x32xf32> to vector<256x32xf32>
    %190 = arith.addf %189, %187 : vector<256x32xf32>
    %c0_137 = arith.constant 0 : index
    %c0_138 = arith.constant 0 : index
    %c0_139 = arith.constant 0 : index
    %191 = vector.load %arg4[%c0_137, %c0_138, %c0_139] : memref<1x256x32xf32, #tpu.memory_space<vmem>>, vector<1x256x32xf32>
    %192 = vector.shape_cast %191 : vector<1x256x32xf32> to vector<256x32xf32>
    %193 = vector.shape_cast %190 : vector<256x32xf32> to vector<1x256x32xf32>
    tpu.vector_store %arg4[%c0_137, %c0_138, %c0_139], %193 {strides = array<i32>} : memref<1x256x32xf32, #tpu.memory_space<vmem>>, vector<1x256x32xf32>,
    return
  }
  func.func @transform_0(%arg0: i32) -> (i32, i32, i32) {
    %c0_i32 = arith.constant 0 : i32
    %c0_i32_0 = arith.constant 0 : i32
    %c0_i32_1 = arith.constant 0 : i32
    return %arg0, %c0_i32, %c0_i32_0 : i32, i32, i32
  }
  func.func @transform_1(%arg0: i32) -> (i32, i32, i32) {
    %c0_i32 = arith.constant 0 : i32
    %c0_i32_0 = arith.constant 0 : i32
    %c0_i32_1 = arith.constant 0 : i32
    %c0_i32_2 = arith.constant 0 : i32
    return %c0_i32, %c0_i32_0, %c0_i32_1 : i32, i32, i32
  }
  func.func @transform_2(%arg0: i32) -> (i32, i32, i32) {
    %c0_i32 = arith.constant 0 : i32
    %c0_i32_0 = arith.constant 0 : i32
    %c0_i32_1 = arith.constant 0 : i32
    %c0_i32_2 = arith.constant 0 : i32
    return %c0_i32, %c0_i32_0, %c0_i32_1 : i32, i32, i32
  }
  func.func @transform_3(%arg0: i32) -> (i32, i32, i32) {
    %c0_i32 = arith.constant 0 : i32
    %c0_i32_0 = arith.constant 0 : i32
    %c0_i32_1 = arith.constant 0 : i32
    return %arg0, %c0_i32, %c0_i32_0 : i32, i32, i32
  }
}

</mosaic_0001>

<bundles_post_ra>
// kernel: tpu_custom_call.1
= control target key start
LH: loop header
LB: loop body
LE: loop exit
PB: predicated region body
PF: predicated region fallthrough
CT: control target
= control target key end

     0   :  { %s9311_s12 = smov 0   ;;  %s13733_s0 = inlined_call_operand.vmem [shape: f32[2,256,32], index: 0, kind: input, shape index: {}]   ;;  %s13734_s1 = inlined_call_operand.vmem [shape: bf16[9,32,32], index: 1, kind: input, shape index: {}]   ;;  %s13735_s2 = inlined_call_operand.vmem [shape: bf16[9,32,32], index: 2, kind: input, shape index: {}]   ;;  %s13736_s3 = inlined_call_operand.vmem [shape: f32[2,256,32], index: 3, kind: output, shape index: {}]  }
   0x1 LB: > { %s7538_s13 = sadd.s32 4294967295, %s9288_s12   ;;  %p7542_p0 = scmp.ge.s32.totalorder %s9288_s12, 1  ;;  %s9288_s12 = sphi %s9311_s12, %s13_s12  }
   0x2   : > { %p137_p1 = scmp.lt.s32.totalorder %s9288_s12, 3 }
   0x4   : > { %p138_p2 = pnand %p7542_p0, %p137_p1 }
   0x6   : > { %141 = sbr.rel (%p138_p2) target bundleno = 1343 (0x53f), region = 32 }
   0xb   : > { %v9144_v0 = vld [vmem:[%s13734_s1 + $0x8] sm:$0xff]   ;;  %vm13747_vm0 = vcmask 257024   ;;  %v9145_v1 = vld [vmem:[%s13734_s1 + $0x18] sm:$0xff]   ;;  %v9146_v2 = vld [vmem:[%s13734_s1] sm:$0xff]   ;;  %v9290_v3 = vmov 0   ;;  %p161_p3 = scmp.lt.s32.totalorder %s7538_s13, 1 }
   0xc   : > { %8487 = vmatprep.subr.bf16.mxu0 %v9144_v0  ;;  %494 = vst.msk [vmem:[#allocation2] sm:$0xf] %vm13747_vm0, %v9290_v3  ;;  %495 = vst.msk [vmem:[#allocation2 + $0x4] sm:$0xf] %vm13747_vm0, %v9290_v3  ;;  %8523 = vmatprep.subr.bf16.mxu1 %v9145_v1  ;;  %v9147_v4 = vld [vmem:[%s13734_s1 + $0x10] sm:$0xff]   ;;  %v9338_v5 = vld [vmem:[%s13734_s1 + $0x28] sm:$0xff]  }
   0xd   : > { %496 = vst.msk [vmem:[#allocation2 + $0x88] sm:$0xf] %vm13747_vm0, %v9290_v3  ;;  %497 = vst.msk [vmem:[#allocation2 + $0x8c] sm:$0xf] %vm13747_vm0, %v9290_v3  ;;  %8488 = vmatpush3.bf16.msra.mxu0 %v9144_v0  ;;  %8524 = vmatpush3.bf16.msra.mxu1 %v9145_v1  ;;  %s15185_s13 = smov (!%p161_p3, %s7538_s13), 1  ;;  %v9345_v6 = vld [vmem:[%s13734_s1 + $0x38] sm:$0xff]  }
   0xe   : > { %8489 = vmatprep.subr.bf16.mxu0 %v9146_v2  ;;  %8525 = vmatprep.subr.bf16.mxu1 %v9147_v4  ;;  %s8097_s26 = sshll.u32 %s15185_s13, 8  ;;  %vm13748_vm1 = vcmask 261120   ;;  %v9158_v53 = vld [vmem:[%s13734_s1 + $0x20] sm:$0xff]  }
   0xf   : > { %s9354_s29 = scalar_lea.vmem %s13733_s0, %s8097_s26  ;;  %s11110_s6 = scalar_lea.vmem %s13736_s3, %s8097_s26 }
  0x10   : > { %v498_v8 = vld [vmem:[%s9354_s29] sm:$0xff]  ;;  %v499_v9 = vld [vmem:[%s9354_s29 + $0x8] sm:$0xff]  ;;  %v500_v10 = vld [vmem:[%s9354_s29 + $0x10] sm:$0xff] }
  0x11   : > { %8490 = vmatpush3.bf16.msra.mxu0 %v9146_v2  ;;  %8526 = vmatpush3.bf16.msra.mxu1 %v9147_v4  ;;  %v8099_v11 = vpack.c.bf16 %v498_v8, %v498_v8  ;;  %v8100_v12 = vpack.c.bf16 %v499_v9, %v499_v9  ;;  %v501_v13 = vld [vmem:[%s9354_s29 + $0x18] sm:$0xff]  ;;  %v8101_v14 = vpack.c.bf16 %v500_v10, %v500_v10  ;;  %v502_v15 = vld [vmem:[%s9354_s29 + $0x20] sm:$0xff]  ;;  %v503_v16 = vld [vmem:[%s9354_s29 + $0x28] sm:$0xff] }
  0x12   : > { %8559 = vmatprep.subr.bf16.mxu0 %v9338_v5  ;;  %8595 = vmatprep.subr.bf16.mxu1 %v9345_v6  ;;  %v8102_v17 = vpack.c.bf16 %v501_v13, %v501_v13  ;;  %v8103_v18 = vpack.c.bf16 %v502_v15, %v502_v15  ;;  %v8104_v19 = vpack.c.bf16 %v503_v16, %v503_v16  ;;  %v504_v20 = vld [vmem:[%s9354_s29 + $0x30] sm:$0xff]  ;;  %v505_v21 = vld [vmem:[%s9354_s29 + $0x38] sm:$0xff]  ;;  %v506_v22 = vld [vmem:[%s9354_s29 + $0x40] sm:$0xff] }
  0x13   : > { %v9356_v7 = vld [vmem:[#allocation2] sm:$0xff]   ;;  %658 = vst.msk [vmem:[#allocation2 + $0x8] sm:$0xf] %vm13747_vm0, %v8099_v11  ;;  %659 = vst.msk [vmem:[#allocation2 + $0xc] sm:$0xf] %vm13747_vm0, %v8100_v12  ;;  %v8105_v23 = vpack.c.bf16 %v504_v20, %v504_v20  ;;  %v8106_v24 = vpack.c.bf16 %v505_v21, %v505_v21  ;;  %v507_v25 = vld [vmem:[%s9354_s29 + $0x48] sm:$0xff]  ;;  %v8107_v26 = vpack.c.bf16 %v506_v22, %v506_v22 }
  0x14   : > { %8491 = vmatprep.mubr.msk.bf16.mxu0 %vm13748_vm1, %v9356_v7  ;;  %8527 = vmatprep.mubr.msk.bf16.mxu1 %vm13748_vm1, %v9356_v7  ;;  %660 = vst.msk [vmem:[#allocation2 + $0x10] sm:$0xf] %vm13747_vm0, %v8101_v14  ;;  %v508_v27 = vld [vmem:[%s9354_s29 + $0x50] sm:$0xff]  ;;  %v509_v28 = vld [vmem:[%s9354_s29 + $0x58] sm:$0xff]  ;;  %661 = vst.msk [vmem:[#allocation2 + $0x14] sm:$0xf] %vm13747_vm0, %v8102_v17  ;;  %v8108_v29 = vpack.c.bf16 %v507_v25, %v507_v25 }
  0x15   : > { %662 = vst.msk [vmem:[#allocation2 + $0x18] sm:$0xf] %vm13747_vm0, %v8103_v18  ;;  %663 = vst.msk [vmem:[#allocation2 + $0x1c] sm:$0xf] %vm13747_vm0, %v8104_v19  ;;  %v8109_v30 = vpack.c.bf16 %v508_v27, %v508_v27  ;;  %v8110_v31 = vpack.c.bf16 %v509_v28, %v509_v28  ;;  %v510_v32 = vld [vmem:[%s9354_s29 + $0x60] sm:$0xff]  ;;  %v511_v33 = vld [vmem:[%s9354_s29 + $0x68] sm:$0xff] }
  0x16   : > { %v512_v34 = vld [vmem:[%s9354_s29 + $0x70] sm:$0xff]  ;;  %664 = vst.msk [vmem:[#allocation2 + $0x20] sm:$0xf] %vm13747_vm0, %v8105_v23  ;;  %665 = vst.msk [vmem:[#allocation2 + $0x24] sm:$0xf] %vm13747_vm0, %v8106_v24  ;;  %v8111_v35 = vpack.c.bf16 %v510_v32, %v510_v32  ;;  %v8112_v36 = vpack.c.bf16 %v511_v33, %v511_v33  ;;  %v513_v37 = vld [vmem:[%s9354_s29 + $0x78] sm:$0xff] }
  0x17   : > { %666 = vst.msk [vmem:[#allocation2 + $0x28] sm:$0xf] %vm13747_vm0, %v8107_v26  ;;  %v8113_v38 = vpack.c.bf16 %v512_v34, %v512_v34  ;;  %v514_v39 = vld [vmem:[%s9354_s29 + $0x80] sm:$0xff]  ;;  %v515_v40 = vld [vmem:[%s9354_s29 + $0x88] sm:$0xff]  ;;  %667 = vst.msk [vmem:[#allocation2 + $0x2c] sm:$0xf] %vm13747_vm0, %v8108_v29  ;;  %v8114_v41 = vpack.c.bf16 %v513_v37, %v513_v37 }
  0x18   : > { %668 = vst.msk [vmem:[#allocation2 + $0x30] sm:$0xf] %vm13747_vm0, %v8109_v30  ;;  %669 = vst.msk [vmem:[#allocation2 + $0x34] sm:$0xf] %vm13747_vm0, %v8110_v31  ;;  %v8115_v42 = vpack.c.bf16 %v514_v39, %v514_v39  ;;  %v8116_v43 = vpack.c.bf16 %v515_v40, %v515_v40  ;;  %v516_v44 = vld [vmem:[%s9354_s29 + $0x90] sm:$0xff]  ;;  %v517_v45 = vld [vmem:[%s9354_s29 + $0x98] sm:$0xff] }
  0x19   : > { %v518_v46 = vld [vmem:[%s9354_s29 + $0xa0] sm:$0xff]  ;;  %670 = vst.msk [vmem:[#allocation2 + $0x38] sm:$0xf] %vm13747_vm0, %v8111_v35  ;;  %671 = vst.msk [vmem:[#allocation2 + $0x3c] sm:$0xf] %vm13747_vm0, %v8112_v36  ;;  %v8117_v47 = vpack.c.bf16 %v516_v44, %v516_v44  ;;  %v8118_v48 = vpack.c.bf16 %v517_v45, %v517_v45  ;;  %v519_v49 = vld [vmem:[%s9354_s29 + $0xa8] sm:$0xff] }
  0x1a   : > { %672 = vst.msk [vmem:[#allocation2 + $0x40] sm:$0xf] %vm13747_vm0, %v8113_v38  ;;  %v8119_v50 = vpack.c.bf16 %v518_v46, %v518_v46  ;;  %v520_v51 = vld [vmem:[%s9354_s29 + $0xb0] sm:$0xff]  ;;  %v521_v52 = vld [vmem:[%s9354_s29 + $0xb8] sm:$0xff]  ;;  %673 = vst.msk [vmem:[#allocation2 + $0x44] sm:$0xf] %vm13747_vm0, %v8114_v41  ;;  %v8120_v54 = vpack.c.bf16 %v519_v49, %v519_v49 }
  0x1b   : > { %674 = vst.msk [vmem:[#allocation2 + $0x48] sm:$0xf] %vm13747_vm0, %v8115_v42  ;;  %675 = vst.msk [vmem:[#allocation2 + $0x4c] sm:$0xf] %vm13747_vm0, %v8116_v43  ;;  %v8121_v55 = vpack.c.bf16 %v520_v51, %v520_v51  ;;  %v8122_v56 = vpack.c.bf16 %v521_v52, %v521_v52  ;;  %v522_v57 = vld [vmem:[%s9354_s29 + $0xc0] sm:$0xff]  ;;  %v523_v58 = vld [vmem:[%s9354_s29 + $0xc8] sm:$0xff]  ;;  %v172_v51 = vlaneseq }
  0x1c   : > { %v524_v59 = vld [vmem:[%s9354_s29 + $0xd0] sm:$0xff]  ;;  %676 = vst.msk [vmem:[#allocation2 + $0x50] sm:$0xf] %vm13747_vm0, %v8117_v47  ;;  %677 = vst.msk [vmem:[#allocation2 + $0x54] sm:$0xf] %vm13747_vm0, %v8118_v48  ;;  %v8123_v60 = vpack.c.bf16 %v522_v57, %v522_v57  ;;  %v8124_v61 = vpack.c.bf16 %v523_v58, %v523_v58  ;;  %v525_v62 = vld [vmem:[%s9354_s29 + $0xd8] sm:$0xff] }
  0x1d   : > { %678 = vst.msk [vmem:[#allocation2 + $0x58] sm:$0xf] %vm13747_vm0, %v8119_v50  ;;  %v8125_v63 = vpack.c.bf16 %v524_v59, %v524_v59  ;;  %v526_v0 = vld [vmem:[%s9354_s29 + $0xe0] sm:$0xff]  ;;  %v527_v1 = vld [vmem:[%s9354_s29 + $0xe8] sm:$0xff]  ;;  %679 = vst.msk [vmem:[#allocation2 + $0x5c] sm:$0xf] %vm13747_vm0, %v8120_v54  ;;  %v8126_v3 = vpack.c.bf16 %v525_v62, %v525_v62 }
  0x1e   : > { %v9417_v2 = vld [vmem:[#allocation2 + $0x8] sm:$0xff]   ;;  %680 = vst.msk [vmem:[#allocation2 + $0x60] sm:$0xf] %vm13747_vm0, %v8121_v55  ;;  %681 = vst.msk [vmem:[#allocation2 + $0x64] sm:$0xf] %vm13747_vm0, %v8122_v56  ;;  %v8127_v4 = vpack.c.bf16 %v526_v0, %v526_v0  ;;  %v8128_v8 = vpack.c.bf16 %v527_v1, %v527_v1  ;;  %v9422_v9 = vld [vmem:[#allocation2 + $0x10] sm:$0xff]  }
  0x1f   : > { %682 = vst.msk [vmem:[#allocation2 + $0x68] sm:$0xf] %vm13747_vm0, %v8123_v60  ;;  %683 = vst.msk [vmem:[#allocation2 + $0x6c] sm:$0xf] %vm13747_vm0, %v8124_v61  ;;  %8492 = vmatmul.mubr.msk.bf16.vlgmr.msra.gmra.mxu0 %vm13748_vm1, %v9417_v2  ;;  %8528 = vmatmul.mubr.msk.bf16.vlgmr.msra.gmra.mxu1 %vm13748_vm1, %v9417_v2  ;;  %v9167_v10 = vld [vmem:[%s13734_s1 + $0x30] sm:$0xff]   ;;  %v9169_v11 = vld [vmem:[%s13734_s1 + $0x48] sm:$0xff]  }
  0x20   : > { %684 = vst.msk [vmem:[#allocation2 + $0x70] sm:$0xf] %vm13747_vm0, %v8125_v63  ;;  %685 = vst.msk [vmem:[#allocation2 + $0x74] sm:$0xf] %vm13747_vm0, %v8126_v3  ;;  %8560 = vmatpush3.bf16.msra.mxu0 %v9338_v5  ;;  %8495 = vmatprep.mubr.msk.bf16.mxu0 %vm13748_vm1, %v9422_v9  ;;  %v9446_v12 = vld [vmem:[#allocation2 + $0x18] sm:$0xff]   ;;  %v9448_v13 = vld [vmem:[#allocation2 + $0x20] sm:$0xff]  }
  0x21   : > { %686 = vst.msk [vmem:[#allocation2 + $0x78] sm:$0xf] %vm13747_vm0, %v8127_v4  ;;  %687 = vst.msk [vmem:[#allocation2 + $0x7c] sm:$0xf] %vm13747_vm0, %v8128_v8  ;;  %8531 = vmatprep.mubr.msk.bf16.mxu1 %vm13748_vm1, %v9422_v9  ;;  %8561 = vmatprep.subr.bf16.mxu0 %v9158_v53  ;;  %v9458_v5 = vld [vmem:[#allocation2 + $0x28] sm:$0xff]   ;;  %v9470_v14 = vld [vmem:[#allocation2 + $0x38] sm:$0xff]  }
  0x22   : > { %8596 = vmatpush3.bf16.msra.mxu1 %v9345_v6  ;;  %v9460_v6 = vld [vmem:[#allocation2 + $0x30] sm:$0xff]   ;;  %v9472_v15 = vld [vmem:[#allocation2 + $0x40] sm:$0xff]   ;;  %v9482_v16 = vld [vmem:[#allocation2 + $0x48] sm:$0xff]   ;;  %v9638_v52 = vshrl.u32 %v172_v51, 7  ;;  %v13928_v8 = vmov 0 }
  0x23   : > { %8597 = vmatprep.subr.bf16.mxu1 %v9167_v10  ;;  %v9484_v17 = vld [vmem:[#allocation2 + $0x50] sm:$0xff]   ;;  %v529_v19 = vld [vmem:[%s9354_s29 + $0xf8] sm:$0xff]  ;;  %v9521_v28 = vld [vmem:[#allocation2 + $0x8] sm:$0xff]  }
  0x24   : > { %8562 = vmatpush3.bf16.msra.mxu0 %v9158_v53  ;;  %v528_v18 = vld [vmem:[%s9354_s29 + $0xf0] sm:$0xff]  ;;  %v8130_v21 = vpack.c.bf16 %v529_v19, %v529_v19  ;;  %v9186_v22 = vld [vmem:[%s13734_s1 + $0x58] sm:$0xff]   ;;  %v9178_v31 = vld [vmem:[%s13734_s1 + $0x40] sm:$0xff]   ;;  %v175_v55 = vadd.s32 16, %v9638_v52  ;;  %v177_v62 = vadd.s32 32, %v9638_v52  ;;  %vm13769_vm2 = vcmp.lt.s32.totalorder %v9638_v52, 1 }
  0x25   : > { %8631 = vmatprep.subr.bf16.mxu0 %v9169_v11  ;;  %v8129_v20 = vpack.c.bf16 %v528_v18, %v528_v18  ;;  %v9501_v23 = vld [vmem:[#allocation2 + $0x58] sm:$0xff]   ;;  %v9503_v24 = vld [vmem:[#allocation2 + $0x60] sm:$0xff]   ;;  %v9170_v29 = vld [vmem:[#allocation2 + $0x10] sm:$0xff]  }
  0x26   : > { %8598 = vmatpush3.bf16.msra.mxu1 %v9167_v10  ;;  %689 = vst.msk [vmem:[#allocation2 + $0x84] sm:$0xf] %vm13747_vm0, %v8130_v21  ;;  %v9163_v25 = vld [vmem:[#allocation2 + $0x68] sm:$0xff]   ;;  %v9529_v30 = vld [vmem:[#allocation2 + $0x18] sm:$0xff]   ;;  %v9187_v32 = vld [vmem:[%s13734_s1 + $0x50] sm:$0xff]   ;;  %v223_v61 = vand.u32 15, %v175_v55 }
  0x27   : > { %8496 = vmatmul.mubr.msk.bf16.gmra.mxu0 %vm13748_vm1, %v9446_v12  ;;  %8532 = vmatmul.mubr.msk.bf16.gmra.mxu1 %vm13748_vm1, %v9446_v12  ;;  %688 = vst.msk [vmem:[#allocation2 + $0x80] sm:$0xf] %vm13747_vm0, %v8129_v20  ;;  %v9513_v26 = vld [vmem:[#allocation2 + $0x70] sm:$0xff]   ;;  %v9172_v33 = vld [vmem:[#allocation2 + $0x20] sm:$0xff]   ;;  %v9173_v34 = vld [vmem:[#allocation2 + $0x28] sm:$0xff]  }
  0x28   : > { %8499 = vmatprep.mubr.msk.bf16.mxu0 %vm13748_vm1, %v9448_v13  ;;  %8535 = vmatprep.mubr.msk.bf16.mxu1 %vm13748_vm1, %v9448_v13  ;;  %v9165_v27 = vld [vmem:[#allocation2 + $0x78] sm:$0xff]   ;;  %v9174_v36 = vld [vmem:[#allocation2 + $0x30] sm:$0xff]   ;;  %v9176_v38 = vld [vmem:[#allocation2 + $0x40] sm:$0xff]   ;;  %vm9666_vm3 = vcmp.eq.s32.totalorder %v223_v61, 0  ;;  %v185_v61 = vadd.s32 96, %v9638_v52 }
  0x29   : > { %8667 = vmatprep.subr.bf16.mxu1 %v9186_v22  ;;  %v9190_v35 = vld [vmem:[%s13734_s1 + $0x78] sm:$0xff]   ;;  %v9177_v39 = vld [vmem:[#allocation2 + $0x48] sm:$0xff]   ;;  %v9179_v40 = vld [vmem:[#allocation2 + $0x50] sm:$0xff]   ;;  %v13929_v8 = vsel %vm9666_vm3, 4294967295, %v13928_v8 }
  0x2a   : > { %v9175_v37 = vld [vmem:[#allocation2 + $0x38] sm:$0xff]   ;;  %v9181_v42 = vld [vmem:[#allocation2 + $0x60] sm:$0xff]   ;;  %v9182_v43 = vld [vmem:[#allocation2 + $0x68] sm:$0xff]   ;;  %13930 = vst [vmem:[#allocation3_spill] sm:$0xff] %v13929_v8 }
  0x2b   : > { %v9180_v41 = vld [vmem:[#allocation2 + $0x58] sm:$0xff]   ;;  %v9183_v44 = vld [vmem:[#allocation2 + $0x70] sm:$0xff]   ;;  %v9189_v47 = vld [vmem:[%s13734_s1 + $0x60] sm:$0xff]  }
  0x2c   : > { %v9184_v45 = vld [vmem:[#allocation2 + $0x78] sm:$0xff]   ;;  %v9194_v48 = vld [vmem:[%s13734_s1 + $0x70] sm:$0xff]   ;;  %v9192_v49 = vld [vmem:[%s13734_s1 + $0x88] sm:$0xff]  }
  0x2d   : > { %v9630_v50 = vld [vmem:[#allocation2 + $0x10] sm:$0xff]   ;;  %v9640_v53 = vld [vmem:[#allocation2 + $0x18] sm:$0xff]   ;;  %v9642_v54 = vld [vmem:[#allocation2 + $0x20] sm:$0xff]  }
  0x2e   : > { %v9185_v46 = vld [vmem:[#allocation2 + $0x80] sm:$0xff]   ;;  %v9662_v1 = vld [vmem:[#allocation2 + $0x28] sm:$0xff]   ;;  %v9664_v4 = vld [vmem:[#allocation2 + $0x30] sm:$0xff]  }
  0x2f   : > { %8500 = vmatmul.mubr.msk.bf16.gmra.mxu0 %vm13748_vm1, %v9458_v5  ;;  %8536 = vmatmul.mubr.msk.bf16.gmra.mxu1 %vm13748_vm1, %v9458_v5  ;;  %v9202_v56 = vld [vmem:[%s13734_s1 + $0x80] sm:$0xff]  }
  0x30   : > { %8503 = vmatprep.mubr.msk.bf16.mxu0 %vm13748_vm1, %v9460_v6  ;;  %8539 = vmatprep.mubr.msk.bf16.mxu1 %vm13748_vm1, %v9460_v6 }
  0x37   : > { %8504 = vmatmul.mubr.msk.bf16.gmra.mxu0 %vm13748_vm1, %v9470_v14  ;;  %8540 = vmatmul.mubr.msk.bf16.gmra.mxu1 %vm13748_vm1, %v9470_v14 }
  0x38   : > { %8507 = vmatprep.mubr.msk.bf16.mxu0 %vm13748_vm1, %v9472_v15  ;;  %8543 = vmatprep.mubr.msk.bf16.mxu1 %vm13748_vm1, %v9472_v15 }
  0x3f   : > { %8508 = vmatmul.mubr.msk.bf16.gmra.mxu0 %vm13748_vm1, %v9482_v16  ;;  %8544 = vmatmul.mubr.msk.bf16.gmra.mxu1 %vm13748_vm1, %v9482_v16 }
  0x40   : > { %8511 = vmatprep.mubr.msk.bf16.mxu0 %vm13748_vm1, %v9484_v17  ;;  %8547 = vmatprep.mubr.msk.bf16.mxu1 %vm13748_vm1, %v9484_v17 }
  0x47   : > { %8512 = vmatmul.mubr.msk.bf16.gmra.mxu0 %vm13748_vm1, %v9501_v23  ;;  %8548 = vmatmul.mubr.msk.bf16.gmra.mxu1 %vm13748_vm1, %v9501_v23 }
  0x48   : > { %8515 = vmatprep.mubr.msk.bf16.mxu0 %vm13748_vm1, %v9503_v24  ;;  %8551 = vmatprep.mubr.msk.bf16.mxu1 %vm13748_vm1, %v9503_v24 }
  0x4f   : > { %8516 = vmatmul.mubr.msk.bf16.gmra.mxu0 %vm13748_vm1, %v9163_v25  ;;  %8552 = vmatmul.mubr.msk.bf16.gmra.mxu1 %vm13748_vm1, %v9163_v25 }
  0x50   : > { %8519 = vmatprep.mubr.msk.bf16.mxu0 %vm13748_vm1, %v9513_v26  ;;  %8555 = vmatprep.mubr.msk.bf16.mxu1 %vm13748_vm1, %v9513_v26 }
  0x57   : > { %8520 = vmatmul.mubr.msk.bf16.gmra.mxu0 %vm13748_vm1, %v9165_v27  ;;  %8556 = vmatmul.mubr.msk.bf16.gmra.mxu1 %vm13748_vm1, %v9165_v27 }
  0x58   : > { %8563 = vmatprep.mubr.msk.bf16.mxu0 %vm13748_vm1, %v9356_v7  ;;  %8599 = vmatprep.mubr.msk.bf16.mxu1 %vm13748_vm1, %v9521_v28  ;;  %v9188_v7 = vld [vmem:[%s13734_s1 + $0x68] sm:$0xff]  }
  0x5f   : > { %8564 = vmatmul.mubr.msk.bf16.vlgmr.msra.gmra.mxu0 %vm13748_vm1, %v9417_v2  ;;  %8600 = vmatmul.mubr.msk.bf16.vlgmr.msra.gmra.mxu1 %vm13748_vm1, %v9170_v29 }
  0x60   : > { %8632 = vmatpush3.bf16.msra.mxu0 %v9169_v11  ;;  %8567 = vmatprep.mubr.msk.bf16.mxu0 %vm13748_vm1, %v9422_v9  ;;  %v179_v11 = vadd.s32 48, %v9638_v52 }
  0x61   : > { %8603 = vmatprep.mubr.msk.bf16.mxu1 %vm13748_vm1, %v9529_v30  ;;  %8633 = vmatprep.subr.bf16.mxu0 %v9178_v31 }
  0x62   : > { %8668 = vmatpush3.bf16.msra.mxu1 %v9186_v22 }
  0x63   : > { %8669 = vmatprep.subr.bf16.mxu1 %v9187_v32 }
  0x64   : > { %8634 = vmatpush3.bf16.msra.mxu0 %v9178_v31 }
  0x65   : > { %8703 = vmatprep.subr.bf16.mxu0 %v9188_v7 }
  0x66   : > { %8670 = vmatpush3.bf16.msra.mxu1 %v9187_v32 }
  0x67   : > { %8568 = vmatmul.mubr.msk.bf16.gmra.mxu0 %vm13748_vm1, %v9446_v12  ;;  %8604 = vmatmul.mubr.msk.bf16.gmra.mxu1 %vm13748_vm1, %v9172_v33 }
  0x68   : > { %8571 = vmatprep.mubr.msk.bf16.mxu0 %vm13748_vm1, %v9448_v13  ;;  %8607 = vmatprep.mubr.msk.bf16.mxu1 %vm13748_vm1, %v9173_v34 }
  0x69   : > { %8739 = vmatprep.subr.bf16.mxu1 %v9190_v35 }
  0x6f   : > { %8572 = vmatmul.mubr.msk.bf16.gmra.mxu0 %vm13748_vm1, %v9458_v5  ;;  %8608 = vmatmul.mubr.msk.bf16.gmra.mxu1 %vm13748_vm1, %v9174_v36 }
  0x70   : > { %8575 = vmatprep.mubr.msk.bf16.mxu0 %vm13748_vm1, %v9460_v6  ;;  %8611 = vmatprep.mubr.msk.bf16.mxu1 %vm13748_vm1, %v9175_v37  ;;  %v237_v6 = vand.u32 15, %v177_v62 }
  0x72   : > { %vm9694_vm4 = vcmp.eq.s32.totalorder %v237_v6, 0 }
  0x77   : > { %8576 = vmatmul.mubr.msk.bf16.gmra.mxu0 %vm13748_vm1, %v9470_v14  ;;  %8612 = vmatmul.mubr.msk.bf16.gmra.mxu1 %vm13748_vm1, %v9176_v38 }
  0x78   : > { %8579 = vmatprep.mubr.msk.bf16.mxu0 %vm13748_vm1, %v9472_v15  ;;  %8615 = vmatprep.mubr.msk.bf16.mxu1 %vm13748_vm1, %v9177_v39 }
  0x7f   : > { %8580 = vmatmul.mubr.msk.bf16.gmra.mxu0 %vm13748_vm1, %v9482_v16  ;;  %8616 = vmatmul.mubr.msk.bf16.gmra.mxu1 %vm13748_vm1, %v9179_v40 }
  0x80   : > { %8583 = vmatprep.mubr.msk.bf16.mxu0 %vm13748_vm1, %v9484_v17  ;;  %8619 = vmatprep.mubr.msk.bf16.mxu1 %vm13748_vm1, %v9180_v41 }
  0x87   : > { %8584 = vmatmul.mubr.msk.bf16.gmra.mxu0 %vm13748_vm1, %v9501_v23  ;;  %8620 = vmatmul.mubr.msk.bf16.gmra.mxu1 %vm13748_vm1, %v9181_v42  ;;  %v251_v23 = vand.u32 15, %v179_v11  ;;  %v9747_v11 = vld [vmem:[#allocation2 + $0x50] sm:$0xff]  }
  0x88   : > { %8587 = vmatprep.mubr.msk.bf16.mxu0 %vm13748_vm1, %v9503_v24  ;;  %8623 = vmatprep.mubr.msk.bf16.mxu1 %vm13748_vm1, %v9182_v43 }
  0x89   : > { %vm9709_vm5 = vcmp.eq.s32.totalorder %v251_v23, 0 }
  0x8f   : > { %8588 = vmatmul.mubr.msk.bf16.gmra.mxu0 %vm13748_vm1, %v9163_v25  ;;  %8624 = vmatmul.mubr.msk.bf16.gmra.mxu1 %vm13748_vm1, %v9183_v44  ;;  %v13931_v25 = vmov 0 }
  0x90   : > { %8591 = vmatprep.mubr.msk.bf16.mxu0 %vm13748_vm1, %v9513_v26  ;;  %8627 = vmatprep.mubr.msk.bf16.mxu1 %vm13748_vm1, %v9184_v45  ;;  %v13932_v25 = vsel %vm9694_vm4, 4294967295, %v13931_v25  ;;  %v181_v26 = vadd.s32 64, %v9638_v52 }
  0x91   : > { %13933 = vst [vmem:[#allocation4_spill] sm:$0xff] %v13932_v25 }
  0x97   : > { %8592 = vmatmul.mubr.msk.bf16.gmra.mxu0 %vm13748_vm1, %v9165_v27  ;;  %8628 = vmatmul.mubr.msk.bf16.gmra.mxu1 %vm13748_vm1, %v9185_v46 }
  0x98   : > { %8635 = vmatprep.mubr.msk.bf16.mxu0 %vm13748_vm1, %v9521_v28  ;;  %8671 = vmatprep.mubr.msk.bf16.mxu1 %vm13748_vm1, %v9521_v28 }
  0x9f   : > { %8636 = vmatmul.mubr.msk.bf16.vlgmr.msra.gmra.mxu0 %vm13748_vm1, %v9170_v29  ;;  %8672 = vmatmul.mubr.msk.bf16.vlgmr.msra.gmra.mxu1 %vm13748_vm1, %v9170_v29 }
  0xa0   : > { %8704 = vmatpush3.bf16.msra.mxu0 %v9188_v7  ;;  %8639 = vmatprep.mubr.msk.bf16.mxu0 %vm13748_vm1, %v9529_v30 }
  0xa1   : > { %8675 = vmatprep.mubr.msk.bf16.mxu1 %vm13748_vm1, %v9529_v30  ;;  %8705 = vmatprep.subr.bf16.mxu0 %v9189_v47  ;;  %v9701_v30 = vld [vmem:[#allocation2 + $0x38] sm:$0xff]  }
  0xa2   : > { %8740 = vmatpush3.bf16.msra.mxu1 %v9190_v35  ;;  %v13934_v35 = vmov 0 }
  0xa3   : > { %8741 = vmatprep.subr.bf16.mxu1 %v9194_v48  ;;  %v13935_v35 = vsel %vm9709_vm5, 4294967295, %v13934_v35 }
  0xa4   : > { %8706 = vmatpush3.bf16.msra.mxu0 %v9189_v47  ;;  %13936 = vst [vmem:[#allocation5_spill] sm:$0xff] %v13935_v35 }
  0xa5   : > { %8775 = vmatprep.subr.bf16.mxu0 %v9192_v49 }
  0xa6   : > { %8742 = vmatpush3.bf16.msra.mxu1 %v9194_v48 }
  0xa7   : > { %8640 = vmatmul.mubr.msk.bf16.gmra.mxu0 %vm13748_vm1, %v9172_v33  ;;  %8676 = vmatmul.mubr.msk.bf16.gmra.mxu1 %vm13748_vm1, %v9172_v33  ;;  %v9705_v33 = vld [vmem:[#allocation2 + $0x40] sm:$0xff]  }
  0xa8   : > { %8643 = vmatprep.mubr.msk.bf16.mxu0 %vm13748_vm1, %v9173_v34  ;;  %8679 = vmatprep.mubr.msk.bf16.mxu1 %vm13748_vm1, %v9173_v34 }
  0xaf   : > { %8644 = vmatmul.mubr.msk.bf16.gmra.mxu0 %vm13748_vm1, %v9174_v36  ;;  %8680 = vmatmul.mubr.msk.bf16.gmra.mxu1 %vm13748_vm1, %v9174_v36 }
  0xb0   : > { %8647 = vmatprep.mubr.msk.bf16.mxu0 %vm13748_vm1, %v9175_v37  ;;  %8683 = vmatprep.mubr.msk.bf16.mxu1 %vm13748_vm1, %v9175_v37 }
  0xb7   : > { %8648 = vmatmul.mubr.msk.bf16.gmra.mxu0 %vm13748_vm1, %v9176_v38  ;;  %8684 = vmatmul.mubr.msk.bf16.gmra.mxu1 %vm13748_vm1, %v9176_v38  ;;  %v183_v38 = vadd.s32 80, %v9638_v52 }
  0xb8   : > { %8651 = vmatprep.mubr.msk.bf16.mxu0 %vm13748_vm1, %v9177_v39  ;;  %8687 = vmatprep.mubr.msk.bf16.mxu1 %vm13748_vm1, %v9177_v39 }
  0xbf   : > { %8652 = vmatmul.mubr.msk.bf16.gmra.mxu0 %vm13748_vm1, %v9179_v40  ;;  %8688 = vmatmul.mubr.msk.bf16.gmra.mxu1 %vm13748_vm1, %v9179_v40 }
  0xc0   : > { %8655 = vmatprep.mubr.msk.bf16.mxu0 %vm13748_vm1, %v9180_v41  ;;  %8691 = vmatprep.mubr.msk.bf16.mxu1 %vm13748_vm1, %v9180_v41 }
  0xc7   : > { %8656 = vmatmul.mubr.msk.bf16.gmra.mxu0 %vm13748_vm1, %v9181_v42  ;;  %8692 = vmatmul.mubr.msk.bf16.gmra.mxu1 %vm13748_vm1, %v9181_v42  ;;  %v265_v42 = vand.u32 15, %v181_v26 }
  0xc8   : > { %8659 = vmatprep.mubr.msk.bf16.mxu0 %vm13748_vm1, %v9182_v43  ;;  %8695 = vmatprep.mubr.msk.bf16.mxu1 %vm13748_vm1, %v9182_v43 }
  0xc9   : > { %vm9736_vm6 = vcmp.eq.s32.totalorder %v265_v42, 0 }
  0xcf   : > { %8660 = vmatmul.mubr.msk.bf16.gmra.mxu0 %vm13748_vm1, %v9183_v44  ;;  %8696 = vmatmul.mubr.msk.bf16.gmra.mxu1 %vm13748_vm1, %v9183_v44 }
  0xd0   : > { %8663 = vmatprep.mubr.msk.bf16.mxu0 %vm13748_vm1, %v9184_v45  ;;  %8699 = vmatprep.mubr.msk.bf16.mxu1 %vm13748_vm1, %v9184_v45 }
  0xd7   : > { %8664 = vmatmul.mubr.msk.bf16.gmra.mxu0 %vm13748_vm1, %v9185_v46  ;;  %8700 = vmatmul.mubr.msk.bf16.gmra.mxu1 %vm13748_vm1, %v9185_v46 }
  0xd8   : > { %8707 = vmatprep.mubr.msk.bf16.mxu0 %vm13748_vm1, %v9630_v50  ;;  %8743 = vmatprep.mubr.msk.bf16.mxu1 %vm13748_vm1, %v9630_v50 }
  0xdf   : > { %v8493_v57 = vpop.f32.mrf.mxu0  ;;  %v8529_v58 = vpop.f32.mrf.mxu1  ;;  %8708 = vmatmul.mubr.msk.bf16.vlgmr.msra.gmra.mxu0 %vm13748_vm1, %v9640_v53  ;;  %8744 = vmatmul.mubr.msk.bf16.vlgmr.msra.gmra.mxu1 %vm13748_vm1, %v9640_v53 }
  0xe0   : > { %8776 = vmatpush3.bf16.msra.mxu0 %v9192_v49  ;;  %8711 = vmatprep.mubr.msk.bf16.mxu0 %vm13748_vm1, %v9642_v54  ;;  %v1030_v2 = vrot.slane %v8493_v57, 7 }
  0xe1   : > { %v9654_v59 = vpop.f32.mrf.mxu0  ;;  %v9656_v60 = vpop.f32.mrf.mxu1  ;;  %8747 = vmatprep.mubr.msk.bf16.mxu1 %vm13748_vm1, %v9642_v54  ;;  %8777 = vmatprep.subr.bf16.mxu0 %v9202_v56 }
  0xe2   : > { %v13737_v12 = vrot.slane %v9654_v59, 7 }
  0xe3   : > { %v8494_v63 = vpop.f32.mrf.mxu0  ;;  %v8530_v0 = vpop.f32.mrf.mxu1 }
  0xe4   : > { %v1031_v3 = vrot.slane %v8494_v63, 7  ;;  %8778 = vmatpush3.bf16.msra.mxu0 %v9202_v56  ;;  %v279_v56 = vand.u32 15, %v183_v38  ;;  %v189_v38 = vadd.s32 128, %v9638_v52 }
  0xe5   : > { %v904_v9 = vpop.f32.mrf.mxu0  ;;  %v1211_v10 = vpop.f32.mrf.mxu1 }
  0xe6   : > { %v1089_v13 = vsel %vm13769_vm2, %v1030_v2, %v1031_v3  ;;  %v1029_v5 = vrot.slane %v904_v9, 7  ;;  %vm9751_vm7 = vcmp.eq.s32.totalorder %v279_v56, 0  ;;  %v13946_v56 = vmov 0 }
  0xe7   : > { %v9674_v14 = vadd.f32 %v8530_v0, %v1089_v13  ;;  %v8497_v15 = vpop.f32.mrf.mxu0  ;;  %v8533_v16 = vpop.f32.mrf.mxu1  ;;  %8712 = vmatmul.mubr.msk.bf16.gmra.mxu0 %vm13748_vm1, %v9662_v1  ;;  %8748 = vmatmul.mubr.msk.bf16.gmra.mxu1 %vm13748_vm1, %v9662_v1 }
  0xe8   : > { %v1090_v17 = vsel %vm13769_vm2, %v1029_v5, %v1030_v2  ;;  %v1091_v18 = vsel %vm13769_vm2, %v13737_v12, %v1029_v5  ;;  %8715 = vmatprep.mubr.msk.bf16.mxu0 %vm13748_vm1, %v9664_v4  ;;  %8751 = vmatprep.mubr.msk.bf16.mxu1 %vm13748_vm1, %v9664_v4  ;;  %v1034_v31 = vrot.slane %v8497_v15, 7  ;;  %v9743_v2 = vld [vmem:[#allocation2 + $0x48] sm:$0xff]   ;;  %v13940_v5 = vmov 0 }
  0xe9   : > { %v1095_v19 = vsel %vm9666_vm3, 0.0, %v1090_v17  ;;  %v9692_v20 = vadd.f32 %v1211_v10, %v1091_v18  ;;  %v917_v21 = vpop.f32.mrf.mxu0  ;;  %v1224_v22 = vpop.f32.mrf.mxu1  ;;  %v13941_v5 = vsel %vm9751_vm7, 4294967295, %v13940_v5 }
  0xea   : > { %v1032_v24 = vrot.slane %v917_v21, 7  ;;  %v9699_v27 = vadd.f32 %v8529_v58, %v1095_v19  ;;  %v13937_v58 = vmov 0  ;;  %13942 = vst [vmem:[#allocation7_spill] sm:$0xff] %v13941_v5  ;;  %v293_v21 = vand.u32 15, %v185_v61 }
  0xeb   : > { %v8498_v28 = vpop.f32.mrf.mxu0  ;;  %v8534_v29 = vpop.f32.mrf.mxu1  ;;  %v13938_v58 = vsel %vm9736_vm6, 4294967295, %v13937_v58  ;;  %v191_v61 = vadd.s32 144, %v9638_v52 }
  0xec   : > { %v1088_v32 = vsel %vm13769_vm2, %v1031_v3, %v1032_v24  ;;  %v1035_v7 = vrot.slane %v8498_v28, 7  ;;  %13939 = vst [vmem:[#allocation6_spill] sm:$0xff] %v13938_v58  ;;  %vm9778_vm8 = vcmp.eq.s32.totalorder %v293_v21, 0 }
  0xed   : > { %v1097_v34 = vsel %vm9694_vm4, 0.0, %v1088_v32  ;;  %v920_v36 = vpop.f32.mrf.mxu0  ;;  %v1227_v37 = vpop.f32.mrf.mxu1 }
  0xee   : > { %v9714_v39 = vadd.f32 %v1224_v22, %v1097_v34  ;;  %v1085_v40 = vsel %vm13769_vm2, %v1034_v31, %v1035_v7  ;;  %v1033_v41 = vrot.slane %v920_v36, 7 }
  0xef   : > { %v9718_v43 = vadd.f32 %v8534_v29, %v1085_v40  ;;  %v8501_v44 = vpop.f32.mrf.mxu0  ;;  %v8537_v45 = vpop.f32.mrf.mxu1  ;;  %8716 = vmatmul.mubr.msk.bf16.gmra.mxu0 %vm13748_vm1, %v9701_v30  ;;  %8752 = vmatmul.mubr.msk.bf16.gmra.mxu1 %vm13748_vm1, %v9701_v30 }
  0xf0   : > { %v1086_v46 = vsel %vm13769_vm2, %v1033_v41, %v1034_v31  ;;  %v1087_v47 = vsel %vm13769_vm2, %v1032_v24, %v1033_v41  ;;  %8719 = vmatprep.mubr.msk.bf16.mxu0 %vm13748_vm1, %v9705_v33  ;;  %8755 = vmatprep.mubr.msk.bf16.mxu1 %vm13748_vm1, %v9705_v33  ;;  %v1038_v3 = vrot.slane %v8501_v44, 7  ;;  %v9785_v44 = vld [vmem:[#allocation2 + $0x58] sm:$0xff]  }
  0xf1   : > { %v1099_v48 = vsel %vm9709_vm5, 0.0, %v1086_v46  ;;  %v9734_v49 = vadd.f32 %v1227_v37, %v1087_v47  ;;  %v933_v51 = vpop.f32.mrf.mxu0  ;;  %v1240_v55 = vpop.f32.mrf.mxu1  ;;  %v13943_v37 = vmov 0 }
  0xf2   : > { %v1036_v57 = vrot.slane %v933_v51, 7  ;;  %v9741_v62 = vadd.f32 %v8533_v16, %v1099_v48  ;;  %v187_v16 = vadd.s32 112, %v9638_v52  ;;  %v13944_v37 = vsel %vm9778_vm8, 4294967295, %v13943_v37  ;;  %v9789_v51 = vld [vmem:[#allocation2 + $0x60] sm:$0xff]  }
  0xf3   : > { %v8502_v63 = vpop.f32.mrf.mxu0  ;;  %v8538_v0 = vpop.f32.mrf.mxu1  ;;  %13945 = vst [vmem:[#allocation8_spill] sm:$0xff] %v13944_v37 }
  0xf4   : > { %v1084_v9 = vsel %vm13769_vm2, %v1035_v7, %v1036_v57  ;;  %v1039_v10 = vrot.slane %v8502_v63, 7  ;;  %v307_v34 = vand.u32 15, %v187_v16 }
  0xf5   : > { %v1101_v13 = vsel %vm9736_vm6, 0.0, %v1084_v9  ;;  %v936_v6 = vpop.f32.mrf.mxu0  ;;  %v1243_v15 = vpop.f32.mrf.mxu1  ;;  %v321_v9 = vand.u32 15, %v189_v38  ;;  %v9827_v38 = vld [vmem:[#allocation2 + $0x68] sm:$0xff]  }
  0xf6   : > { %v9756_v17 = vadd.f32 %v1240_v55, %v1101_v13  ;;  %v1081_v18 = vsel %vm13769_vm2, %v1038_v3, %v1039_v10  ;;  %v1037_v19 = vrot.slane %v936_v6, 7  ;;  %vm9793_vm9 = vcmp.eq.s32.totalorder %v307_v34, 0 }
  0xf7   : > { %v9760_v22 = vadd.f32 %v8538_v0, %v1081_v18  ;;  %v8505_v23 = vpop.f32.mrf.mxu0  ;;  %v8541_v24 = vpop.f32.mrf.mxu1  ;;  %8720 = vmatmul.mubr.msk.bf16.gmra.mxu0 %vm13748_vm1, %v9743_v2  ;;  %8756 = vmatmul.mubr.msk.bf16.gmra.mxu1 %vm13748_vm1, %v9743_v2  ;;  %v13947_v56 = vsel %vm9793_vm9, 4294967295, %v13946_v56  ;;  %vm9820_vm10 = vcmp.eq.s32.totalorder %v321_v9, 0 }
  0xf8   : > { %v1082_v26 = vsel %vm13769_vm2, %v1037_v19, %v1038_v3  ;;  %v1083_v28 = vsel %vm13769_vm2, %v1036_v57, %v1037_v19  ;;  %8723 = vmatprep.mubr.msk.bf16.mxu0 %vm13748_vm1, %v9747_v11  ;;  %8759 = vmatprep.mubr.msk.bf16.mxu1 %vm13748_vm1, %v9747_v11  ;;  %v1042_v46 = vrot.slane %v8505_v23, 7  ;;  %13948 = vst [vmem:[#allocation9_spill] sm:$0xff] %v13947_v56 }
  0xf9   : > { %v1103_v29 = vsel %vm9751_vm7, 0.0, %v1082_v26  ;;  %v9776_v31 = vadd.f32 %v1243_v15, %v1083_v28  ;;  %v949_v32 = vpop.f32.mrf.mxu0  ;;  %v1256_v7 = vpop.f32.mrf.mxu1  ;;  %v335_v26 = vand.u32 15, %v191_v61  ;;  %v195_v61 = vadd.s32 176, %v9638_v52 }
  0xfa   : > { %v1040_v36 = vrot.slane %v949_v32, 7  ;;  %v9783_v40 = vadd.f32 %v8537_v45, %v1103_v29  ;;  %v13949_v29 = vmov 0  ;;  %v193_v32 = vadd.s32 160, %v9638_v52 }
  0xfb   : > { %v8506_v41 = vpop.f32.mrf.mxu0  ;;  %v8542_v42 = vpop.f32.mrf.mxu1  ;;  %v13950_v29 = vsel %vm9820_vm10, 4294967295, %v13949_v29  ;;  %vm9835_vm11 = vcmp.eq.s32.totalorder %v335_v26, 0 }
  0xfc   : > { %v1080_v47 = vsel %vm13769_vm2, %v1039_v10, %v1040_v36  ;;  %v1043_v48 = vrot.slane %v8506_v41, 7  ;;  %13951 = vst [vmem:[#allocation10_spill] sm:$0xff] %v13950_v29  ;;  %v349_v9 = vand.u32 15, %v193_v32 }
  0xfd   : > { %v1105_v55 = vsel %vm9778_vm8, 0.0, %v1080_v47  ;;  %v952_v45 = vpop.f32.mrf.mxu0  ;;  %v1259_v57 = vpop.f32.mrf.mxu1  ;;  %v9831_v47 = vld [vmem:[#allocation2 + $0x70] sm:$0xff]  }
  0xfe   : > { %v9798_v63 = vadd.f32 %v1256_v7, %v1105_v55  ;;  %v1077_v0 = vsel %vm13769_vm2, %v1042_v46, %v1043_v48  ;;  %v1041_v3 = vrot.slane %v952_v45, 7  ;;  %v13952_v45 = vmov 0 }
  0xff   : > { %v9802_v10 = vadd.f32 %v8542_v42, %v1077_v0  ;;  %v8509_v13 = vpop.f32.mrf.mxu0  ;;  %v8545_v6 = vpop.f32.mrf.mxu1  ;;  %8724 = vmatmul.mubr.msk.bf16.gmra.mxu0 %vm13748_vm1, %v9785_v44  ;;  %8760 = vmatmul.mubr.msk.bf16.gmra.mxu1 %vm13748_vm1, %v9785_v44  ;;  %v13953_v45 = vsel %vm9835_vm11, 4294967295, %v13952_v45  ;;  %vm9864_vm12 = vcmp.eq.s32.totalorder %v349_v9, 0  ;;  %v13962_v9 = vmov 0 }
 0x100   : > { %v1078_v15 = vsel %vm13769_vm2, %v1041_v3, %v1042_v46  ;;  %v1079_v16 = vsel %vm13769_vm2, %v1040_v36, %v1041_v3  ;;  %8727 = vmatprep.mubr.msk.bf16.mxu0 %vm13748_vm1, %v9789_v51  ;;  %8763 = vmatprep.mubr.msk.bf16.mxu1 %vm13748_vm1, %v9789_v51  ;;  %v1046_v41 = vrot.slane %v8509_v13, 7  ;;  %13954 = vst [vmem:[#allocation11_spill] sm:$0xff] %v13953_v45 }
 0x101   : > { %v1107_v18 = vsel %vm9793_vm9, 0.0, %v1078_v15  ;;  %v9818_v19 = vadd.f32 %v1259_v57, %v1079_v16  ;;  %v965_v21 = vpop.f32.mrf.mxu0  ;;  %v1272_v23 = vpop.f32.mrf.mxu1 }
 0x102   : > { %v1044_v28 = vrot.slane %v965_v21, 7  ;;  %v9825_v7 = vadd.f32 %v8541_v24, %v1107_v18 }
 0x103   : > { %v8510_v34 = vpop.f32.mrf.mxu0  ;;  %v8546_v36 = vpop.f32.mrf.mxu1 }
 0x104   : > { %v1076_v42 = vsel %vm13769_vm2, %v1043_v48, %v1044_v28  ;;  %v1047_v46 = vrot.slane %v8510_v34, 7  ;;  %v363_v34 = vand.u32 15, %v195_v61 }
 0x105   : > { %v1109_v55 = vsel %vm9820_vm10, 0.0, %v1076_v42  ;;  %v968_v24 = vpop.f32.mrf.mxu0  ;;  %v9839_v57 = vpop.f32.mrf.mxu1  ;;  %v13957_v42 = vmov 0 }
 0x106   : > { %v9842_v0 = vadd.f32 %v1272_v23, %v1109_v55  ;;  %v1073_v48 = vsel %vm13769_vm2, %v1046_v41, %v1047_v46  ;;  %v1045_v3 = vrot.slane %v968_v24, 7  ;;  %v13958_v42 = vsel %vm9864_vm12, 4294967295, %v13957_v42 }
 0x107   : > { %v9846_v13 = vadd.f32 %v8546_v36, %v1073_v48  ;;  %v8513_v15 = vpop.f32.mrf.mxu0  ;;  %v8549_v16 = vpop.f32.mrf.mxu1  ;;  %8728 = vmatmul.mubr.msk.bf16.gmra.mxu0 %vm13748_vm1, %v9827_v38  ;;  %8764 = vmatmul.mubr.msk.bf16.gmra.mxu1 %vm13748_vm1, %v9827_v38  ;;  %13959 = vst [vmem:[#allocation14_spill] sm:$0xff] %v13958_v42  ;;  %v9871_v48 = vld [vmem:[#allocation2 + $0x78] sm:$0xff]   ;;  %vm9879_vm13 = vcmp.eq.s32.totalorder %v363_v34, 0 }
 0x108   : > { %13955 = vst [vmem:[#allocation12_spill] sm:$0xff] %v9842_v0  ;;  %v1074_v18 = vsel %vm13769_vm2, %v1045_v3, %v1046_v41  ;;  %v9856_v21 = vsel %vm13769_vm2, %v1044_v28, %v1045_v3  ;;  %8731 = vmatprep.mubr.msk.bf16.mxu0 %vm13748_vm1, %v9831_v47  ;;  %8767 = vmatprep.mubr.msk.bf16.mxu1 %vm13748_vm1, %v9831_v47  ;;  %v197_v28 = vadd.s32 192, %v9638_v52  ;;  %13960 = vst [vmem:[#allocation15_spill] sm:$0xff] %v9871_v48 }
 0x109   : > { %13956 = vst [vmem:[#allocation13_spill] sm:$0xff] %v9846_v13  ;;  %v1111_v23 = vsel %vm9835_vm11, 0.0, %v1074_v18  ;;  %v981_v26 = vpop.f32.mrf.mxu0  ;;  %v1288_v32 = vpop.f32.mrf.mxu1  ;;  %v1050_v3 = vrot.slane %v8513_v15, 7  ;;  %v9875_v13 = vld [vmem:[#allocation2 + $0x80] sm:$0xff]   ;;  %v13963_v9 = vsel %vm9879_vm13, 4294967295, %v13962_v9 }
 0x10a   : > { %v1048_v36 = vrot.slane %v981_v26, 7  ;;  %v9869_v41 = vadd.f32 %v8545_v6, %v1111_v23  ;;  %13961 = vst [vmem:[#allocation16_spill] sm:$0xff] %v9875_v13  ;;  %13964 = vst [vmem:[#allocation17_spill] sm:$0xff] %v13963_v9  ;;  %v199_v26 = vadd.s32 208, %v9638_v52 }
 0x10b   : > { %v8514_v55 = vpop.f32.mrf.mxu0  ;;  %v8550_v24 = vpop.f32.mrf.mxu1 }
 0x10c   : > { %v1072_v18 = vsel %vm13769_vm2, %v1047_v46, %v1048_v36  ;;  %v1051_v12 = vrot.slane %v8514_v55, 7  ;;  %v377_v55 = vand.u32 15, %v197_v28 }
 0x10d   : > { %v1113_v61 = vsel %vm9864_vm12, 0.0, %v1072_v18  ;;  %v984_v6 = vpop.f32.mrf.mxu0  ;;  %v9883_v23 = vpop.f32.mrf.mxu1  ;;  %vm14010_vm12 = vcmp.lt.s32.totalorder %v9638_v52, 1 }
 0x10e   : > { %13965 = vst [vmem:[#allocation18_spill] sm:$0xff] %v9883_v23  ;;  %v9886_v0 = vadd.f32 %v1288_v32, %v1113_v61  ;;  %v1069_v46 = vsel %vm13769_vm2, %v1050_v3, %v1051_v12  ;;  %v1049_v15 = vrot.slane %v984_v6, 7  ;;  %v391_v6 = vand.u32 15, %v199_v26  ;;  %v9915_v23 = vld [vmem:[#allocation2 + $0x88] sm:$0xff]  }
 0x10f   : > { %v9890_v45 = vadd.f32 %v8550_v24, %v1069_v46  ;;  %v8517_v42 = vpop.f32.mrf.mxu0  ;;  %v8553_v18 = vpop.f32.mrf.mxu1  ;;  %8732 = vmatmul.mubr.msk.bf16.gmra.mxu0 %vm13748_vm1, %v9871_v48  ;;  %8768 = vmatmul.mubr.msk.bf16.gmra.mxu1 %vm13748_vm1, %v9871_v48  ;;  %vm9908_vm14 = vcmp.eq.s32.totalorder %v377_v55, 0  ;;  %13973 = vst [vmem:[#allocation24_spill] sm:$0xff] %v9915_v23  ;;  %v13974_v55 = vmov 0 }
 0x110   : > { %13966 = vst [vmem:[#allocation19_spill] sm:$0xff] %v9886_v0  ;;  %v1070_v34 = vsel %vm13769_vm2, %v1049_v15, %v1050_v3  ;;  %v9900_v32 = vsel %vm13769_vm2, %v1048_v36, %v1049_v15  ;;  %8735 = vmatprep.mubr.msk.bf16.mxu0 %vm13748_vm1, %v9875_v13  ;;  %8771 = vmatprep.mubr.msk.bf16.mxu1 %vm13748_vm1, %v9875_v13  ;;  %v201_v36 = vadd.s32 224, %v9638_v52  ;;  %v1054_v13 = vrot.slane %v8517_v42, 7 }
 0x111   : > { %13967 = vst [vmem:[#allocation20_spill] sm:$0xff] %v9890_v45  ;;  %13968 = vst [vmem:[#allocation21_spill] sm:$0xff] %v9900_v32  ;;  %v1115_v28 = vsel %vm9879_vm13, 0.0, %v1070_v34  ;;  %v997_v24 = vpop.f32.mrf.mxu0  ;;  %v1304_v61 = vpop.f32.mrf.mxu1  ;;  %v13969_v45 = vmov 0  ;;  %vm9921_vm15 = vcmp.eq.s32.totalorder %v391_v6, 0 }
 0x112   : > { %v1052_v46 = vrot.slane %v997_v24, 7  ;;  %v13970_v45 = vsel %vm9908_vm14, 4294967295, %v13969_v45  ;;  %v9913_v3 = vadd.f32 %v8549_v16, %v1115_v28  ;;  %v13975_v55 = vsel %vm9921_vm15, 4294967295, %v13974_v55 }
 0x113   : > { %13971 = vst [vmem:[#allocation22_spill] sm:$0xff] %v13970_v45  ;;  %v8518_v15 = vpop.f32.mrf.mxu0  ;;  %v8554_v0 = vpop.f32.mrf.mxu1  ;;  %13976 = vst [vmem:[#allocation25_spill] sm:$0xff] %v13975_v55  ;;  %v203_v16 = vadd.s32 240, %v9638_v52 }
 0x114   : > { %13972 = vst [vmem:[#allocation23_spill] sm:$0xff] %v9913_v3  ;;  %v1068_v34 = vsel %vm13769_vm2, %v1051_v12, %v1052_v46  ;;  %v1055_v9 = vrot.slane %v8518_v15, 7  ;;  %v405_v12 = vand.u32 15, %v201_v36 }
 0x115   : > { %v1117_v26 = vsel %vm9908_vm14, 0.0, %v1068_v34  ;;  %v1000_v24 = vpop.f32.mrf.mxu0  ;;  %v9925_v32 = vpop.f32.mrf.mxu1 }
 0x116   : > { %13977 = vst [vmem:[#allocation26_spill] sm:$0xff] %v9925_v32  ;;  %v9928_v28 = vadd.f32 %v1304_v61, %v1117_v26  ;;  %v1065_v42 = vsel %vm13769_vm2, %v1054_v13, %v1055_v9  ;;  %v1053_v3 = vrot.slane %v1000_v24, 7  ;;  %v209_v26 = vand.u32 15, %v9638_v52 }
 0x117   : > { %v9932_v15 = vadd.f32 %v8554_v0, %v1065_v42  ;;  %v8521_v45 = vpop.f32.mrf.mxu0  ;;  %v8557_v34 = vpop.f32.mrf.mxu1  ;;  %8736 = vmatmul.mubr.msk.bf16.gmra.mxu0 %vm13748_vm1, %v9915_v23  ;;  %8772 = vmatmul.mubr.msk.bf16.gmra.mxu1 %vm13748_vm1, %v9915_v23  ;;  %v419_v42 = vand.u32 15, %v203_v16  ;;  %vm9949_vm0 = vcmp.eq.s32.totalorder %v405_v12, 0  ;;  %v13988_v12 = vmov 0 }
 0x118   : > { %13978 = vst [vmem:[#allocation27_spill] sm:$0xff] %v9928_v28  ;;  %v1066_v6 = vsel %vm13769_vm2, %v1053_v3, %v1054_v13  ;;  %v9942_v61 = vsel %vm13769_vm2, %v1052_v46, %v1053_v3  ;;  %8779 = vmatprep.mubr.msk.bf16.mxu0 %vm13748_vm1, %v9630_v50  ;;  %v13981_v28 = vmov 0  ;;  %v1058_v32 = vrot.slane %v8521_v45, 7 }
 0x119   : > { %13979 = vst [vmem:[#allocation28_spill] sm:$0xff] %v9932_v15  ;;  %13980 = vst [vmem:[#allocation29_spill] sm:$0xff] %v9942_v61  ;;  %v1119_v0 = vsel %vm9921_vm15, 0.0, %v1066_v6  ;;  %v1013_v36 = vpop.f32.mrf.mxu0  ;;  %v1320_v24 = vpop.f32.mrf.mxu1  ;;  %v13982_v28 = vsel %vm9949_vm0, 4294967295, %v13981_v28  ;;  %vm9957_vm1 = vcmp.eq.s32.totalorder %v209_v26, 0  ;;  %v13985_v50 = vmov 0 }
 0x11a   : > { %v1056_v15 = vrot.slane %v1013_v36, 7  ;;  %13983 = vst [vmem:[#allocation30_spill] sm:$0xff] %v13982_v28  ;;  %v9953_v13 = vadd.f32 %v8553_v18, %v1119_v0  ;;  %v13986_v50 = vsel %vm9957_vm1, 4294967295, %v13985_v50  ;;  %vm9963_vm15 = vcmp.eq.s32.totalorder %v419_v42, 0 }
 0x11b   : > { %v8522_v46 = vpop.f32.mrf.mxu0  ;;  %v8558_v3 = vpop.f32.mrf.mxu1  ;;  %13987 = vst [vmem:[#allocation32_spill] sm:$0xff] %v13986_v50  ;;  %v13989_v12 = vsel %vm9963_vm15, 4294967295, %v13988_v12  ;;  %v174_v45 = vadd.s32 8, %v9638_v52 }
 0x11c   : > { %13984 = vst [vmem:[#allocation31_spill] sm:$0xff] %v9953_v13  ;;  %v1064_v61 = vsel %vm13769_vm2, %v1055_v9, %v1056_v15  ;;  %v1059_v6 = vrot.slane %v8522_v46, 7  ;;  %13990 = vst [vmem:[#allocation33_spill] sm:$0xff] %v13989_v12  ;;  %v13993_v9 = vrot.slane %v9654_v59, 7  ;;  %v178_v59 = vadd.s32 40, %v9638_v52 }
 0x11d   : > { %v1121_v16 = vsel %vm9949_vm0, 0.0, %v1064_v61  ;;  %v1016_v18 = vpop.f32.mrf.mxu0  ;;  %v9967_v0 = vpop.f32.mrf.mxu1  ;;  %vm13995_vm0 = vcmask 261120   ;;  %v14003_v13 = vmov 0 }
 0x11e   : > { %13991 = vst [vmem:[#allocation34_spill] sm:$0xff] %v9967_v0  ;;  %v9970_v36 = vadd.f32 %v1320_v24, %v1121_v16  ;;  %v1092_v26 = vsel %vm13769_vm2, %v1059_v6, %v13993_v9  ;;  %v1061_v46 = vsel %vm13769_vm2, %v1058_v32, %v1059_v6  ;;  %v1057_v61 = vrot.slane %v1016_v18, 7 }
 0x11f   : > { %v1093_v42 = vsel %vm9957_vm1, 0.0, %v1092_v26  ;;  %v9980_v28 = vadd.f32 %v8558_v3, %v1061_v46  ;;  %v8565_v55 = vpop.f32.mrf.mxu0  ;;  %v8601_v0 = vpop.f32.mrf.mxu1  ;;  %8780 = vmatmul.mubr.msk.bf16.vlgmr.msra.gmra.mxu0 %vm13995_vm0, %v9640_v53  ;;  %v176_v24 = vadd.s32 24, %v9638_v52  ;;  %vm13997_vm1 = vmmov %vm13995_vm0  ;;  %v216_v26 = vand.u32 15, %v174_v45 }
 0x120   : > { %13992 = vst [vmem:[#allocation35_spill] sm:$0xff] %v9970_v36  ;;  %v1062_v16 = vsel %vm13769_vm2, %v1057_v61, %v1058_v32  ;;  %v9990_v6 = vsel %vm13769_vm2, %v1056_v15, %v1057_v61  ;;  %8783 = vmatprep.mubr.msk.bf16.mxu0 %vm13997_vm1, %v9642_v54  ;;  %v1335_v9 = vadd.f32 %v9656_v60, %v1093_v42  ;;  %v180_v46 = vadd.s32 56, %v9638_v52 }
 0x121   : > { %13994 = vst [vmem:[#allocation36_spill] sm:$0xff] %v9980_v28  ;;  %13996 = vst [vmem:[#allocation37_spill] sm:$0xff] %v9990_v6  ;;  %v1123_v3 = vsel %vm9963_vm15, 0.0, %v1062_v16  ;;  %v9996_v18 = vpop.f32.mrf.mxu0  ;;  %v9998_v53 = vpop.f32.mrf.mxu1  ;;  %vm13825_vm0 = vcmp.lt.s32.totalorder %v9638_v52, 7  ;;  %v230_v61 = vand.u32 15, %v176_v24  ;;  %v244_v54 = vand.u32 15, %v178_v59 }
 0x122   : > { %v10002_v32 = vadd.f32 %v8557_v34, %v1123_v3  ;;  %v182_v36 = vadd.s32 72, %v9638_v52  ;;  %v1547_v16 = vrot.slane %v8565_v55, 1  ;;  %v2014_v12 = vrot.slane %v8601_v0, 7 }
 0x123   : > { %v8566_v28 = vpop.f32.mrf.mxu0  ;;  %v8602_v15 = vpop.f32.mrf.mxu1  ;;  %vm10007_vm1 = vcmp.eq.s32.totalorder %v216_v26, 15  ;;  %v13999_v42 = vmov 0  ;;  %v258_v34 = vand.u32 15, %v180_v46  ;;  %vm14002_vm15 = vcmask 261120  }
 0x124   : > { %13998 = vst [vmem:[#allocation38_spill] sm:$0xff] %v10002_v32  ;;  %v1548_v6 = vrot.slane %v8566_v28, 1  ;;  %v2015_v50 = vrot.slane %v8602_v15, 7  ;;  %v14000_v42 = vsel %vm10007_vm1, 4294967295, %v13999_v42  ;;  %v13778_v28 = vrot.slane %v9996_v18, 1 }
 0x125   : > { %v1421_v60 = vpop.f32.mrf.mxu0  ;;  %v1888_v45 = vpop.f32.mrf.mxu1  ;;  %14001 = vst [vmem:[#allocation39_spill] sm:$0xff] %v14000_v42  ;;  %vm10019_vm14 = vcmp.eq.s32.totalorder %v230_v61, 15  ;;  %vm10023_vm13 = vcmp.eq.s32.totalorder %v244_v54, 15  ;;  %v14006_v46 = vmov 0  ;;  %v10056_v42 = vadd.s32 120, %v9638_v52 }
 0x126   : > { %v1606_v3 = vsel %vm13825_vm0, %v1547_v16, %v1548_v6  ;;  %v1546_v24 = vrot.slane %v1421_v60, 1  ;;  %v2013_v59 = vrot.slane %v1888_v45, 7  ;;  %v2072_v55 = vsel %vm13769_vm2, %v2014_v12, %v2015_v50  ;;  %vm14009_vm2 = vmmov %vm14002_vm15 }
 0x127   : > { %v8569_v0 = vpop.f32.mrf.mxu0  ;;  %v8605_v15 = vpop.f32.mrf.mxu1  ;;  %8784 = vmatmul.mubr.msk.bf16.gmra.mxu0 %vm14002_vm15, %v9662_v1  ;;  %v1644_v26 = vadd.f32 %v1606_v3, %v9699_v27  ;;  %v14004_v13 = vsel %vm10019_vm14, 4294967295, %v14003_v13  ;;  %v14007_v46 = vsel %vm10023_vm13, 4294967295, %v14006_v46  ;;  %v184_v1 = vadd.s32 88, %v9638_v52 }
 0x128   : > { %14005 = vst [vmem:[#allocation40_spill] sm:$0xff] %v14004_v13  ;;  %14008 = vst [vmem:[#allocation41_spill] sm:$0xff] %v14007_v46  ;;  %v1607_v60 = vsel %vm13825_vm0, %v1546_v24, %v1547_v16  ;;  %8787 = vmatprep.mubr.msk.bf16.mxu0 %vm14009_vm2, %v9664_v4  ;;  %v2073_v45 = vsel %vm14010_vm12, %v2013_v59, %v2014_v12  ;;  %v272_v27 = vand.u32 15, %v182_v36  ;;  %v14011_v4 = vrot.slane %v9998_v53, 7 }
 0x129   : > { %v1434_v61 = vpop.f32.mrf.mxu0  ;;  %v1901_v3 = vpop.f32.mrf.mxu1  ;;  %v2078_v54 = vsel %vm9666_vm3, 0.0, %v2073_v45  ;;  %v1608_v32 = vsel %vm13825_vm0, %v13778_v28, %v1546_v24  ;;  %v1611_v16 = vsel %vm10007_vm1, 0.0, %v1607_v60  ;;  %vm14012_vm2 = vmmov %vm14010_vm12  ;;  %vm10050_vm12 = vcmp.eq.s32.totalorder %v258_v34, 15 }
 0x12a   : > { %v2074_v12 = vsel %vm14012_vm2, %v14011_v4, %v2013_v59  ;;  %v1549_v23 = vrot.slane %v1434_v61, 1  ;;  %v2016_v36 = vrot.slane %v1901_v3, 7  ;;  %v10046_v48 = vadd.f32 %v2078_v54, %v1644_v26  ;;  %vm14018_vm15 = vmmov %vm14012_vm2 }
 0x12b   : > { %v10048_v29 = vadd.f32 %v1608_v32, %v1335_v9  ;;  %v14015_v45 = vmov 0  ;;  %v1551_v8 = vrot.slane %v8569_v0, 1  ;;  %v8570_v24 = vpop.f32.mrf.mxu0  ;;  %v8606_v28 = vpop.f32.mrf.mxu1  ;;  %v1643_v60 = vadd.f32 %v1611_v16, %v9692_v20 }
 0x12c   : > { %14013 = vst [vmem:[#allocation42_spill] sm:$0xff] %v10046_v48  ;;  %v14016_v45 = vsel %vm10050_vm12, 4294967295, %v14015_v45  ;;  %v186_v59 = vadd.s32 104, %v9638_v52  ;;  %v1605_v26 = vsel %vm13825_vm0, %v1548_v6, %v1549_v23  ;;  %v1552_v61 = vrot.slane %v8570_v24, 1 }
 0x12d   : > { %14014 = vst [vmem:[#allocation43_spill] sm:$0xff] %v10048_v29  ;;  %14017 = vst [vmem:[#allocation44_spill] sm:$0xff] %v14016_v45  ;;  %v2019_v9 = vrot.slane %v8606_v28, 7  ;;  %v2071_v32 = vsel %vm14018_vm15, %v2015_v50, %v2016_v36  ;;  %v2018_v34 = vrot.slane %v8605_v15, 7  ;;  %v1437_v3 = vpop.f32.mrf.mxu0  ;;  %v1904_v0 = vpop.f32.mrf.mxu1  ;;  %v1613_v54 = vsel %vm10019_vm14, 0.0, %v1605_v26 }
 0x12e   : > { %v10065_v20 = vadd.f32 %v2074_v12, %v1643_v60  ;;  %v286_v16 = vand.u32 15, %v184_v1  ;;  %v1602_v4 = vsel %vm13825_vm0, %v1551_v8, %v1552_v61  ;;  %v1550_v29 = vrot.slane %v1437_v3, 1 }
 0x12f   : > { %v2017_v48 = vrot.slane %v1904_v0, 7  ;;  %v1645_v6 = vadd.f32 %v1613_v54, %v9674_v14  ;;  %vm10070_vm2 = vcmp.eq.s32.totalorder %v272_v27, 15  ;;  %v14020_v28 = vmov 0  ;;  %v8573_v50 = vpop.f32.mrf.mxu0  ;;  %v8609_v15 = vpop.f32.mrf.mxu1 }
 0x130   : > { %14019 = vst [vmem:[#allocation45_spill] sm:$0xff] %v10065_v20  ;;  %v14021_v28 = vsel %vm10070_vm2, 4294967295, %v14020_v28  ;;  %vm14023_vm15 = vcmask 261120   ;;  %v1648_v12 = vadd.f32 %v1602_v4, %v9741_v62  ;;  %vm14024_vm3 = vcmp.lt.s32.totalorder %v9638_v52, 1 }
 0x131   : > { %14022 = vst [vmem:[#allocation46_spill] sm:$0xff] %v14021_v28  ;;  %8788 = vmatmul.mubr.msk.bf16.gmra.mxu0 %vm14023_vm15, %v9701_v30  ;;  %v2068_v1 = vsel %vm14024_vm3, %v2018_v34, %v2019_v9  ;;  %v314_v24 = vand.u32 15, %v10056_v42  ;;  %v300_v60 = vand.u32 15, %v186_v59  ;;  %v1603_v14 = vsel %vm13825_vm0, %v1550_v29, %v1551_v8  ;;  %vm14025_vm1 = vmmov %vm14023_vm15  ;;  %v1450_v62 = vpop.f32.mrf.mxu0  ;;  %v1917_v3 = vpop.f32.mrf.mxu1 }
 0x132   : > { %8791 = vmatprep.mubr.msk.bf16.mxu0 %vm14025_vm1, %v9705_v33  ;;  %v10084_v27 = vadd.f32 %v2072_v55, %v1645_v6  ;;  %v2080_v26 = vsel %vm9694_vm4, 0.0, %v2071_v32  ;;  %v10089_v30 = vadd.s32 136, %v9638_v52  ;;  %v2069_v42 = vsel %vm14024_vm3, %v2017_v48, %v2018_v34  ;;  %vm14026_vm1 = vmmov %vm14024_vm3 }
 0x133   : > { %v1604_v59 = vsel %vm13825_vm0, %v1549_v23, %v1550_v29  ;;  %v1615_v8 = vsel %vm10023_vm13, 0.0, %v1603_v14  ;;  %v2070_v33 = vsel %vm14026_vm1, %v2016_v36, %v2017_v48  ;;  %v1553_v55 = vrot.slane %v1450_v62, 1  ;;  %v8574_v6 = vpop.f32.mrf.mxu0  ;;  %v8610_v29 = vpop.f32.mrf.mxu1  ;;  %vm14030_vm3 = vmmov %vm14026_vm1 }
 0x134   : > { %v2020_v0 = vrot.slane %v1917_v3, 7  ;;  %v2082_v32 = vsel %vm9709_vm5, 0.0, %v2069_v42  ;;  %v1646_v54 = vadd.f32 %v1604_v59, %v9714_v39  ;;  %vm10102_vm15 = vcmp.eq.s32.totalorder %v286_v16, 15 }
 0x135   : > { %v14027_v4 = vmov 0  ;;  %v1555_v34 = vrot.slane %v8573_v50, 1  ;;  %v10106_v23 = vadd.f32 %v2082_v32, %v1648_v12  ;;  %v1647_v14 = vadd.f32 %v1615_v8, %v9734_v49  ;;  %v1453_v42 = vpop.f32.mrf.mxu0  ;;  %v1920_v59 = vpop.f32.mrf.mxu1 }
 0x136   : > { %v14028_v4 = vsel %vm10102_vm15, 4294967295, %v14027_v4  ;;  %v10110_v48 = vadd.s32 152, %v9638_v52  ;;  %v1601_v36 = vsel %vm13825_vm0, %v1552_v61, %v1553_v55  ;;  %v1556_v62 = vrot.slane %v8574_v6, 1 }
 0x137   : > { %14029 = vst [vmem:[#allocation47_spill] sm:$0xff] %v14028_v4  ;;  %v2023_v3 = vrot.slane %v8610_v29, 7  ;;  %v10114_v39 = vadd.f32 %v2080_v26, %v1646_v54  ;;  %v2022_v16 = vrot.slane %v8609_v15, 7  ;;  %v1617_v50 = vsel %vm10050_vm12, 0.0, %v1601_v36  ;;  %v8577_v15 = vpop.f32.mrf.mxu0  ;;  %v8613_v54 = vpop.f32.mrf.mxu1 }
 0x138   : > { %v10118_v12 = vadd.f32 %v2070_v33, %v1647_v14  ;;  %v2067_v49 = vsel %vm14030_vm3, %v2019_v9, %v2020_v0  ;;  %v1598_v8 = vsel %vm13825_vm0, %v1555_v34, %v1556_v62  ;;  %v1554_v32 = vrot.slane %v1453_v42, 1 }
 0x139   : > { %v2021_v61 = vrot.slane %v1920_v59, 7  ;;  %v1649_v6 = vadd.f32 %v1617_v50, %v9718_v43  ;;  %vm10125_vm1 = vcmp.eq.s32.totalorder %v300_v60, 15  ;;  %v14031_v26 = vmov 0  ;;  %v1466_v36 = vpop.f32.mrf.mxu0  ;;  %v1933_v42 = vpop.f32.mrf.mxu1 }
 0x13a   : > { %v14032_v26 = vsel %vm10125_vm1, 4294967295, %v14031_v26  ;;  %vm14034_vm5 = vcmask 261120   ;;  %v1652_v33 = vadd.f32 %v1598_v8, %v9783_v40  ;;  %v2064_v9 = vsel %vm14030_vm3, %v2022_v16, %v2023_v3 }
 0x13b   : > { %14033 = vst [vmem:[#allocation48_spill] sm:$0xff] %v14032_v26  ;;  %8792 = vmatmul.mubr.msk.bf16.gmra.mxu0 %vm14034_vm5, %v9743_v2  ;;  %v342_v29 = vand.u32 15, %v10110_v48  ;;  %v328_v14 = vand.u32 15, %v10089_v30  ;;  %v1599_v43 = vsel %vm13825_vm0, %v1554_v32, %v1555_v34  ;;  %vm14035_vm4 = vmmov %vm14034_vm5  ;;  %v10140_v60 = vadd.f32 %v2068_v1, %v1649_v6  ;;  %v8578_v6 = vpop.f32.mrf.mxu0 }
 0x13c   : > { %8795 = vmatprep.mubr.msk.bf16.mxu0 %vm14035_vm4, %v9747_v11  ;;  %v2084_v2 = vsel %vm9736_vm6, 0.0, %v2067_v49  ;;  %v10145_v40 = vadd.s32 168, %v9638_v52  ;;  %vm14036_vm5 = vmmov %vm14030_vm3  ;;  %v1600_v30 = vsel %vm13825_vm0, %v1553_v55, %v1554_v32  ;;  %v1619_v34 = vsel %vm10070_vm2, 0.0, %v1599_v43  ;;  %v8614_v55 = vpop.f32.mrf.mxu1 }
 0x13d   : > { %v2065_v48 = vsel %vm14036_vm5, %v2021_v61, %v2022_v16  ;;  %vm14037_vm4 = vmmov %vm14030_vm3  ;;  %v1557_v1 = vrot.slane %v1466_v36, 1  ;;  %v2024_v59 = vrot.slane %v1933_v42, 7  ;;  %v1650_v49 = vadd.f32 %v1600_v30, %v9756_v17 }
 0x13e   : > { %v2066_v11 = vsel %vm14037_vm4, %v2020_v0, %v2021_v61  ;;  %v2086_v50 = vsel %vm9751_vm7, 0.0, %v2065_v48  ;;  %vm10158_vm3 = vcmp.eq.s32.totalorder %v314_v24, 15  ;;  %v14038_v8 = vmov 0  ;;  %v1469_v48 = vpop.f32.mrf.mxu0  ;;  %v1936_v30 = vpop.f32.mrf.mxu1  ;;  %vm14041_vm5 = vmmov %vm14037_vm4 }
 0x13f   : > { %v14039_v8 = vsel %vm10158_vm3, 4294967295, %v14038_v8  ;;  %v1559_v16 = vrot.slane %v8577_v15, 1  ;;  %v10162_v32 = vadd.f32 %v2086_v50, %v1652_v33  ;;  %v1651_v43 = vadd.f32 %v1619_v34, %v9776_v31  ;;  %vm14043_vm7 = vmmov %vm14041_vm5 }
 0x140   : > { %14040 = vst [vmem:[#allocation49_spill] sm:$0xff] %v14039_v8  ;;  %v10166_v0 = vadd.s32 184, %v9638_v52  ;;  %v1597_v61 = vsel %vm13825_vm0, %v1556_v62, %v1557_v1  ;;  %v1560_v36 = vrot.slane %v8578_v6, 1  ;;  %v2027_v42 = vrot.slane %v8614_v55, 7 }
 0x141   : > { %v10170_v17 = vadd.f32 %v2084_v2, %v1650_v49  ;;  %v2026_v24 = vrot.slane %v8613_v54, 7  ;;  %v1621_v15 = vsel %vm10102_vm15, 0.0, %v1597_v61  ;;  %v10174_v33 = vadd.f32 %v2066_v11, %v1651_v43  ;;  %v8581_v2 = vpop.f32.mrf.mxu0  ;;  %v8617_v49 = vpop.f32.mrf.mxu1 }
 0x142   : > { %v2063_v31 = vsel %vm14041_vm5, %v2023_v3, %v2024_v59  ;;  %v1594_v34 = vsel %vm13825_vm0, %v1559_v16, %v1560_v36  ;;  %v1558_v50 = vrot.slane %v1469_v48, 1  ;;  %v2025_v62 = vrot.slane %v1936_v30, 7 }
 0x143   : > { %v1653_v6 = vadd.f32 %v1621_v15, %v9760_v22  ;;  %vm14042_vm4 = vcmask 261120   ;;  %v1656_v54 = vadd.f32 %v1594_v34, %v9825_v7  ;;  %v2060_v11 = vsel %vm14043_vm7, %v2026_v24, %v2027_v42  ;;  %v1482_v61 = vpop.f32.mrf.mxu0 }
 0x144   : > { %8796 = vmatmul.mubr.msk.bf16.gmra.mxu0 %vm14042_vm4, %v9785_v44  ;;  %vm10186_vm6 = vcmp.eq.s32.totalorder %v328_v14, 15  ;;  %v14044_v55 = vmov 0  ;;  %v356_v3 = vand.u32 15, %v10145_v40  ;;  %v1595_v43 = vsel %vm13825_vm0, %v1558_v50, %v1559_v16  ;;  %vm14047_vm5 = vmmov %vm14042_vm4  ;;  %v1949_v14 = vpop.f32.mrf.mxu1 }
 0x145   : > { %v14045_v55 = vsel %vm10186_vm6, 4294967295, %v14044_v55  ;;  %8799 = vmatprep.mubr.msk.bf16.mxu0 %vm14047_vm5, %v9789_v51  ;;  %v10195_v22 = vadd.f32 %v2064_v9, %v1653_v6  ;;  %v2088_v44 = vsel %vm9778_vm8, 0.0, %v2063_v31  ;;  %v370_v7 = vand.u32 15, %v10166_v0  ;;  %vm14048_vm4 = vmmov %vm14043_vm7  ;;  %v8582_v34 = vpop.f32.mrf.mxu0 }
 0x146   : > { %14046 = vst [vmem:[#allocation50_spill] sm:$0xff] %v14045_v55  ;;  %v2061_v48 = vsel %vm14043_vm7, %v2025_v62, %v2026_v24  ;;  %v1596_v40 = vsel %vm13825_vm0, %v1557_v1, %v1558_v50  ;;  %v1623_v16 = vsel %vm10125_vm1, 0.0, %v1595_v43  ;;  %v2062_v51 = vsel %vm14048_vm4, %v2024_v59, %v2025_v62  ;;  %v8618_v1 = vpop.f32.mrf.mxu1  ;;  %vm14053_vm7 = vmmov %vm14048_vm4 }
 0x147   : > { %v1561_v9 = vrot.slane %v1482_v61, 1  ;;  %v2028_v30 = vrot.slane %v1949_v14, 7  ;;  %v2090_v15 = vsel %vm9793_vm9, 0.0, %v2061_v48  ;;  %v1654_v0 = vadd.f32 %v1596_v40, %v9798_v63  ;;  %v1485_v14 = vpop.f32.mrf.mxu0 }
 0x148   : > { %vm10211_vm5 = vcmp.eq.s32.totalorder %v342_v29, 15  ;;  %v14049_v31 = vmov 0  ;;  %v1563_v24 = vrot.slane %v8581_v2, 1  ;;  %v10215_v50 = vadd.f32 %v2090_v15, %v1656_v54  ;;  %v1952_v48 = vpop.f32.mrf.mxu1 }
 0x149   : > { %v14050_v31 = vsel %vm10211_vm5, 4294967295, %v14049_v31  ;;  %v1655_v6 = vadd.f32 %v1623_v16, %v9818_v19  ;;  %v10219_v59 = vadd.s32 200, %v9638_v52  ;;  %v1593_v62 = vsel %vm13825_vm0, %v1560_v36, %v1561_v9 }
 0x14a   : > { %14051 = vst [vmem:[#allocation51_spill] sm:$0xff] %v14050_v31  ;;  %v1564_v43 = vrot.slane %v8582_v34, 1  ;;  %v2031_v61 = vrot.slane %v8618_v1, 7  ;;  %v10223_v63 = vadd.f32 %v2088_v44, %v1654_v0  ;;  %v2030_v29 = vrot.slane %v8617_v49, 7  ;;  %v8585_v49 = vpop.f32.mrf.mxu0  ;;  %v8621_v0 = vpop.f32.mrf.mxu1 }
 0x14b   : > { %v1625_v2 = vsel %vm10158_vm3, 0.0, %v1593_v62  ;;  %v10227_v54 = vadd.f32 %v2062_v51, %v1655_v6  ;;  %v2059_v19 = vsel %vm14053_vm7, %v2027_v42, %v2028_v30  ;;  %v1562_v16 = vrot.slane %v1485_v14, 1 }
 0x14c   : > { %v1590_v40 = vsel %vm13825_vm0, %v1563_v24, %v1564_v43  ;;  %v2029_v36 = vrot.slane %v1952_v48, 7  ;;  %v1657_v15 = vadd.f32 %v1625_v2, %v9802_v10  ;;  %vm10234_vm4 = vcmp.eq.s32.totalorder %v356_v3, 15  ;;  %v1498_v62 = vpop.f32.mrf.mxu0  ;;  %v1965_v14 = vpop.f32.mrf.mxu1 }
 0x14d   : > { %14052 = vst [vmem:[#allocation52_spill] sm:$0xff] %v10227_v54  ;;  %v14054_v44 = vmov 0  ;;  %vm14057_vm9 = vcmask 261120   ;;  %v1660_v51 = vadd.f32 %v1590_v40, %v9869_v41  ;;  %v2056_v42 = vsel %vm14053_vm7, %v2030_v29, %v2031_v61 }
 0x14e   : > { %v14055_v44 = vsel %vm10234_vm4, 4294967295, %v14054_v44  ;;  %8800 = vmatmul.mubr.msk.bf16.gmra.mxu0 %vm14057_vm9, %v9827_v38  ;;  %v200_v34 = vadd.s32 216, %v9638_v52  ;;  %v384_v1 = vand.u32 15, %v10219_v59  ;;  %v1352_v10 = vadd.f32 %v9839_v57, %v9856_v21  ;;  %vm14058_vm8 = vmmov %vm14057_vm9  ;;  %v8586_v35 = vpop.f32.mrf.mxu0 }
 0x14f   : > { %14056 = vst [vmem:[#allocation53_spill] sm:$0xff] %v14055_v44  ;;  %v1591_v3 = vsel %vm13825_vm0, %v1562_v16, %v1563_v24  ;;  %8803 = vmatprep.mubr.msk.bf16.mxu0 %vm14058_vm8, %v9831_v47  ;;  %v10251_v6 = vadd.f32 %v2060_v11, %v1657_v15  ;;  %v2092_v41 = vsel %vm9820_vm10, 0.0, %v2059_v19  ;;  %vm14060_vm9 = vmmov %vm14053_vm7  ;;  %v1592_v59 = vsel %vm13825_vm0, %v1561_v9, %v1562_v16  ;;  %v14062_v19 = vld [vmem:[#allocation12_spill] sm:$0xff]  ;;  %v8622_v9 = vpop.f32.mrf.mxu1 }
 0x150   : > { %v2057_v48 = vsel %vm14060_vm9, %v2029_v36, %v2030_v29  ;;  %v1627_v57 = vsel %vm10186_vm6, 0.0, %v1591_v3  ;;  %v2058_v21 = vsel %vm14053_vm7, %v2028_v30, %v2029_v36  ;;  %v1565_v47 = vrot.slane %v1498_v62, 1  ;;  %vm14067_vm9 = vmmov %vm14053_vm7 }
 0x151   : > { %v2032_v11 = vrot.slane %v1965_v14, 7  ;;  %v2094_v2 = vsel %vm9835_vm11, 0.0, %v2057_v48  ;;  %v1658_v40 = vadd.f32 %v1592_v59, %v14062_v19  ;;  %vm10266_vm8 = vcmp.eq.s32.totalorder %v370_v7, 15  ;;  %v1501_v59 = vpop.f32.mrf.mxu0  ;;  %v1968_v7 = vpop.f32.mrf.mxu1  ;;  %vm14072_vm11 = vmmov %vm14067_vm9 }
 0x152   : > { %v14063_v15 = vmov 0  ;;  %v1567_v29 = vrot.slane %v8585_v49, 1  ;;  %v10270_v16 = vadd.f32 %v2094_v2, %v1660_v51  ;;  %v1659_v3 = vadd.f32 %v1627_v57, %v1352_v10  ;;  %vm14082_vm6 = vmmov %vm14072_vm11 }
 0x153   : > { %v14064_v15 = vsel %vm10266_vm8, 4294967295, %v14063_v15  ;;  %v398_v20 = vand.u32 15, %v200_v34  ;;  %v1589_v30 = vsel %vm13825_vm0, %v1564_v43, %v1565_v47  ;;  %v1568_v36 = vrot.slane %v8586_v35, 1  ;;  %v14068_v35 = vld [vmem:[#allocation13_spill] sm:$0xff]  ;;  %v8625_v2 = vpop.f32.mrf.mxu1 }
 0x154   : > { %14065 = vst [vmem:[#allocation12_spill] sm:$0xff] %v14064_v15  ;;  %v2035_v62 = vrot.slane %v8622_v9, 7  ;;  %v10274_v14 = vadd.f32 %v2092_v41, %v1658_v40  ;;  %v2034_v48 = vrot.slane %v8621_v0, 7  ;;  %v1629_v19 = vsel %vm10211_vm5, 0.0, %v1589_v30  ;;  %v8589_v41 = vpop.f32.mrf.mxu0  ;;  %v14069_v0 = vld [vmem:[#allocation15_spill] sm:$0xff]  ;;  %v14076_v30 = vld [vmem:[#allocation21_spill] sm:$0xff] }
 0x155   : > { %v10278_v49 = vadd.f32 %v2058_v21, %v1659_v3  ;;  %v2055_v51 = vsel %vm14067_vm9, %v2031_v61, %v2032_v11  ;;  %v1586_v34 = vsel %vm13825_vm0, %v1567_v29, %v1568_v36  ;;  %v1566_v10 = vrot.slane %v1501_v59, 1  ;;  %v14071_v40 = vld [vmem:[#allocation23_spill] sm:$0xff]  ;;  %v14077_v59 = vld [vmem:[#allocation18_spill] sm:$0xff]  ;;  %v1981_v24 = vpop.f32.mrf.mxu1 }
 0x156   : > { %v2033_v43 = vrot.slane %v1968_v7, 7  ;;  %v1661_v57 = vadd.f32 %v1629_v19, %v14068_v35  ;;  %vm14070_vm7 = vcmask 261120   ;;  %v1664_v9 = vadd.f32 %v1586_v34, %v14071_v40  ;;  %v14078_v35 = vld [vmem:[#allocation16_spill] sm:$0xff]  ;;  %v14080_v34 = vld [vmem:[#allocation14_spill] sm:$0xff] }
 0x157   : > { %14066 = vst [vmem:[#allocation54_spill] sm:$0xff] %v10278_v49  ;;  %8804 = vmatmul.mubr.msk.bf16.gmra.mxu0 %vm14070_vm7, %v14069_v0  ;;  %v2052_v21 = vsel %vm14072_vm11, %v2034_v48, %v2035_v62  ;;  %vm10290_vm10 = vcmp.eq.s32.totalorder %v384_v1, 15  ;;  %v14073_v3 = vmov 0  ;;  %v204_v61 = vadd.s32 248, %v9638_v52  ;;  %vm14079_vm9 = vmmov %vm14070_vm7  ;;  %v1514_v1 = vpop.f32.mrf.mxu0 }
 0x158   : > { %v14074_v3 = vsel %vm10290_vm10, 4294967295, %v14073_v3  ;;  %v1356_v7 = vadd.f32 %v14077_v59, %v14076_v30  ;;  %v1587_v19 = vsel %vm13825_vm0, %v1566_v10, %v1567_v29  ;;  %8807 = vmatprep.mubr.msk.bf16.mxu0 %vm14079_vm9, %v14078_v35  ;;  %v10301_v0 = vadd.f32 %v2056_v42, %v1661_v57  ;;  %v14083_v57 = vld [vmem:[#allocation17_spill] sm:$0xff] }
 0x159   : > { %14075 = vst [vmem:[#allocation13_spill] sm:$0xff] %v14074_v3  ;;  %vm14081_vm7 = vnez %v14080_v34  ;;  %v2053_v38 = vsel %vm14072_vm11, %v2033_v43, %v2034_v48  ;;  %v1588_v49 = vsel %vm13825_vm0, %v1565_v47, %v1566_v10  ;;  %v1631_v30 = vsel %vm10234_vm4, 0.0, %v1587_v19  ;;  %v8590_v31 = vpop.f32.mrf.mxu0  ;;  %v8626_v47 = vpop.f32.mrf.mxu1 }
 0x15a   : > { %v2096_v40 = vsel %vm14081_vm7, 0.0, %v2055_v51  ;;  %v2054_v29 = vsel %vm14082_vm6, %v2032_v11, %v2033_v43  ;;  %v1569_v59 = vrot.slane %v1514_v1, 1  ;;  %v2036_v42 = vrot.slane %v1981_v24, 7  ;;  %v14085_v51 = vld [vmem:[#allocation19_spill] sm:$0xff] }
 0x15b   : > { %vm14084_vm9 = vnez %v14083_v57  ;;  %v1662_v34 = vadd.f32 %v1588_v49, %v14085_v51  ;;  %vm10316_vm7 = vcmp.eq.s32.totalorder %v398_v20, 15  ;;  %v14086_v55 = vmov 0  ;;  %v1517_v49 = vpop.f32.mrf.mxu0  ;;  %v1984_v20 = vpop.f32.mrf.mxu1 }
 0x15c   : > { %v2098_v35 = vsel %vm14084_vm9, 0.0, %v2053_v38  ;;  %v14087_v55 = vsel %vm10316_vm7, 4294967295, %v14086_v55  ;;  %v1571_v48 = vrot.slane %v8589_v41, 1  ;;  %v1663_v19 = vadd.f32 %v1631_v30, %v1356_v7  ;;  %vm14094_vm9 = vmmov %vm14082_vm6 }
 0x15d   : > { %14088 = vst [vmem:[#allocation15_spill] sm:$0xff] %v14087_v55  ;;  %v10320_v10 = vadd.f32 %v2098_v35, %v1664_v9  ;;  %v426_v44 = vand.u32 15, %v204_v61  ;;  %v1585_v11 = vsel %vm13825_vm0, %v1568_v36, %v1569_v59  ;;  %v1572_v24 = vrot.slane %v8590_v31, 1  ;;  %v14090_v31 = vld [vmem:[#allocation20_spill] sm:$0xff]  ;;  %v14093_v35 = vld [vmem:[#allocation31_spill] sm:$0xff] }
 0x15e   : > { %v2039_v43 = vrot.slane %v8626_v47, 7  ;;  %v10324_v1 = vadd.f32 %v2096_v40, %v1662_v34  ;;  %v2038_v38 = vrot.slane %v8625_v2, 7  ;;  %v1633_v51 = vsel %vm10266_vm8, 0.0, %v1585_v11  ;;  %v8593_v34 = vpop.f32.mrf.mxu0  ;;  %v10335_v40 = vpop.f32.mrf.mxu1  ;;  %v14091_v2 = vld [vmem:[#allocation24_spill] sm:$0xff]  ;;  %v14098_v11 = vld [vmem:[#allocation29_spill] sm:$0xff] }
 0x15f   : > { %v10328_v41 = vadd.f32 %v2054_v29, %v1663_v19  ;;  %v2051_v9 = vsel %vm14082_vm6, %v2035_v62, %v2036_v42  ;;  %v1582_v61 = vsel %vm13825_vm0, %v1571_v48, %v1572_v24  ;;  %v1570_v7 = vrot.slane %v1517_v49, 1  ;;  %v14099_v49 = vld [vmem:[#allocation26_spill] sm:$0xff]  ;;  %v14129_v55 = vld [vmem:[#allocation36_spill] sm:$0xff] }
 0x160   : > { %v2037_v36 = vrot.slane %v1984_v20, 7  ;;  %v1665_v30 = vadd.f32 %v1633_v51, %v14090_v31  ;;  %vm14092_vm11 = vcmask 261120   ;;  %v1668_v47 = vadd.f32 %v1582_v61, %v14093_v35  ;;  %v1530_v35 = vpop.f32.mrf.mxu0  ;;  %v10355_v57 = vpop.f32.mrf.mxu1 }
 0x161   : > { %14089 = vst [vmem:[#allocation23_spill] sm:$0xff] %v10328_v41  ;;  %8808 = vmatmul.mubr.msk.bf16.gmra.mxu0 %vm14092_vm11, %v14091_v2  ;;  %v2048_v29 = vsel %vm14094_vm9, %v2038_v38, %v2039_v43  ;;  %vm10342_vm4 = vcmp.eq.s32.totalorder %v426_v44, 15  ;;  %v14095_v62 = vmov 0  ;;  %v202_v19 = vadd.s32 232, %v9638_v52  ;;  %v14100_v2 = vld [vmem:[#allocation22_spill] sm:$0xff]  ;;  %vm14102_vm11 = vmmov %vm14094_vm9 }
 0x162   : > { %v14096_v62 = vsel %vm10342_vm4, 4294967295, %v14095_v62  ;;  %v1360_v20 = vadd.f32 %v14099_v49, %v14098_v11  ;;  %v1583_v51 = vsel %vm13825_vm0, %v1570_v7, %v1571_v48  ;;  %v10351_v31 = vadd.f32 %v2052_v21, %v1665_v30  ;;  %v14103_v49 = vld [vmem:[#allocation25_spill] sm:$0xff]  ;;  %v8594_v37 = vpop.f32.mrf.mxu0 }
 0x163   : > { %14097 = vst [vmem:[#allocation21_spill] sm:$0xff] %v14096_v62  ;;  %vm14101_vm6 = vnez %v14100_v2  ;;  %v2049_v44 = vsel %vm14094_vm9, %v2037_v36, %v2038_v38  ;;  %v1584_v41 = vsel %vm13825_vm0, %v1569_v59, %v1570_v7  ;;  %v1635_v11 = vsel %vm10290_vm10, 0.0, %v1583_v51  ;;  %v14105_v2 = vld [vmem:[#allocation27_spill] sm:$0xff]  ;;  %v8630_v38 = vpop.f32.mrf.mxu1 }
 0x164   : > { %v2100_v61 = vsel %vm14101_vm6, 0.0, %v2051_v9  ;;  %v2050_v48 = vsel %vm14102_vm11, %v2036_v42, %v2037_v36  ;;  %v1573_v21 = vrot.slane %v1530_v35, 1  ;;  %v2040_v30 = vrot.slane %v10355_v57, 7  ;;  %v1533_v35 = vpop.f32.mrf.mxu0  ;;  %vm14109_vm11 = vmmov %vm14094_vm9 }
 0x165   : > { %vm14104_vm6 = vnez %v14103_v49  ;;  %v1666_v15 = vadd.f32 %v1584_v41, %v14105_v2  ;;  %v1575_v56 = vrot.slane %v8593_v34, 1  ;;  %v1667_v59 = vadd.f32 %v1635_v11, %v1360_v20 }
 0x166   : > { %v2102_v9 = vsel %vm14104_vm6, 0.0, %v2049_v44  ;;  %v412_v7 = vand.u32 15, %v202_v19  ;;  %v1581_v51 = vsel %vm13825_vm0, %v1572_v24, %v1573_v21  ;;  %v1576_v3 = vrot.slane %v8594_v37, 1  ;;  %v2000_v44 = vpop.f32.mrf.mxu1  ;;  %v8637_v20 = vpop.f32.mrf.mxu0 }
 0x167   : > { %v10369_v54 = vadd.f32 %v2102_v9, %v1668_v47  ;;  %v2043_v42 = vrot.slane %v8630_v38, 7  ;;  %v10373_v36 = vadd.f32 %v2100_v61, %v1666_v15  ;;  %v2042_v57 = vrot.slane %v10335_v40, 7  ;;  %v14111_v9 = vld [vmem:[#allocation38_spill] sm:$0xff] }
 0x168   : > { %v1637_v41 = vsel %vm10316_vm7, 0.0, %v1581_v51  ;;  %v10378_v34 = vadd.f32 %v2050_v48, %v1667_v59  ;;  %v2047_v47 = vsel %vm14094_vm9, %v2039_v43, %v2040_v30  ;;  %v1578_v19 = vsel %vm13825_vm0, %v1575_v56, %v1576_v3  ;;  %v10388_v2 = vpop.f32.mrf.mxu1  ;;  %v14110_v48 = vld [vmem:[#allocation28_spill] sm:$0xff] }
 0x169   : > { %v14107_v37 = vrot.slane %v9996_v18, 1  ;;  %v1574_v24 = vrot.slane %v1533_v35, 1  ;;  %v2041_v40 = vrot.slane %v2000_v44, 7  ;;  %v14108_v61 = vrot.slane %v9998_v53, 7  ;;  %v14117_v35 = vld [vmem:[#allocation32_spill] sm:$0xff]  ;;  %v14119_v44 = vld [vmem:[#allocation30_spill] sm:$0xff] }
 0x16a   : > { %14106 = vst [vmem:[#allocation18_spill] sm:$0xff] %v10378_v34  ;;  %v1669_v43 = vadd.f32 %v1637_v41, %v14110_v48  ;;  %v1672_v38 = vadd.f32 %v1578_v19, %v14111_v9  ;;  %vm10396_vm9 = vcmp.eq.s32.totalorder %v412_v7, 15  ;;  %v14112_v59 = vmov 0  ;;  %v2191_v48 = vpop.f32.mrf.mxu0  ;;  %v10410_v19 = vpop.f32.mrf.mxu1 }
 0x16b   : > { %v1609_v15 = vsel %vm13825_vm0, %v1576_v3, %v14107_v37  ;;  %v2075_v11 = vsel %vm14109_vm11, %v2043_v42, %v14108_v61  ;;  %v14113_v59 = vsel %vm10396_vm9, 4294967295, %v14112_v59  ;;  %v1579_v18 = vsel %vm13825_vm0, %v1574_v24, %v1575_v56  ;;  %v14115_v3 = vld [vmem:[#allocation42_spill] sm:$0xff]  ;;  %v14121_v61 = vld [vmem:[#allocation43_spill] sm:$0xff]  ;;  %14122 = vst [vmem:[#allocation20_spill] sm:$0xff] %v10410_v19 }
 0x16c   : > { %14114 = vst [vmem:[#allocation16_spill] sm:$0xff] %v14113_v59  ;;  %v10403_v51 = vadd.f32 %v8637_v20, %v14115_v3  ;;  %vm14118_vm6 = vnez %v14117_v35  ;;  %vm14120_vm10 = vnez %v14119_v44  ;;  %v10412_v7 = vadd.f32 %v2048_v29, %v1669_v43  ;;  %v14123_v20 = vld [vmem:[#allocation37_spill] sm:$0xff]  ;;  %v14124_v3 = vld [vmem:[#allocation34_spill] sm:$0xff]  ;;  %v8638_v29 = vpop.f32.mrf.mxu0  ;;  %v10427_v43 = vpop.f32.mrf.mxu1 }
 0x16d   : > { %v2076_v53 = vsel %vm14118_vm6, 0.0, %v2075_v11  ;;  %v2104_v37 = vsel %vm14120_vm10, 0.0, %v2047_v47  ;;  %v2045_v9 = vsel %vm14109_vm11, %v2041_v40, %v2042_v57  ;;  %v1580_v56 = vsel %vm13825_vm0, %v1573_v21, %v1574_v24  ;;  %v14125_v11 = vld [vmem:[#allocation33_spill] sm:$0xff]  ;;  %v14127_v47 = vld [vmem:[#allocation35_spill] sm:$0xff]  ;;  %vm14132_vm0 = vmmov %vm14109_vm11 }
 0x16e   : > { %14116 = vst [vmem:[#allocation19_spill] sm:$0xff] %v10403_v51  ;;  %v2108_v41 = vadd.f32 %v2076_v53, %v14121_v61  ;;  %v1364_v35 = vadd.f32 %v14124_v3, %v14123_v20  ;;  %vm14126_vm6 = vnez %v14125_v11  ;;  %v1670_v49 = vadd.f32 %v1580_v56, %v14127_v47 }
 0x16f   : > { %v2106_v44 = vsel %vm14126_vm6, 0.0, %v2045_v9  ;;  %v1641_v53 = vsel %vm10342_vm4, 0.0, %v1609_v15  ;;  %v2044_v24 = vsel %vm14109_vm11, %v2042_v57, %v2043_v42  ;;  %v10435_v20 = vadd.f32 %v8638_v29, %v10084_v27 }
 0x170   : > { %v10425_v61 = vadd.f32 %v2191_v48, %v2108_v41  ;;  %v10429_v34 = vadd.f32 %v2106_v44, %v1672_v38  ;;  %v1673_v21 = vadd.f32 %v1641_v53, %v14129_v55  ;;  %v10437_v9 = vadd.f32 %v2104_v37, %v1670_v49  ;;  %v10441_v41 = vpop.f32.mrf.mxu0  ;;  %v10443_v48 = vpop.f32.mrf.mxu1 }
 0x171   : > { %v1639_v15 = vsel %vm10396_vm9, 0.0, %v1579_v18  ;;  %14130 = vst [vmem:[#allocation31_spill] sm:$0xff] %v10441_v41  ;;  %14131 = vst [vmem:[#allocation29_spill] sm:$0xff] %v10443_v48  ;;  %v2046_v55 = vsel %vm14132_vm0, %v2040_v30, %v2041_v40  ;;  %vm14155_vm0 = vcmp.lt.s32.totalorder %v9638_v52, 7 }
 0x172   : > { %14128 = vst [vmem:[#allocation24_spill] sm:$0xff] %v10425_v61  ;;  %v10445_v56 = vadd.f32 %v2044_v24, %v1673_v21  ;;  %v1671_v38 = vadd.f32 %v1639_v15, %v1364_v35  ;;  %v8641_v44 = vpop.f32.mrf.mxu0  ;;  %v10449_v42 = vpop.f32.mrf.mxu1  ;;  %vm14156_vm11 = vmmov %vm14155_vm0 }
 0x173   : > { %v10454_v49 = vadd.f32 %v8641_v44, %v10106_v23  ;;  %vm14159_vm6 = vmmov %vm14155_vm0 }
 0x174   : > { %v10451_v27 = vadd.f32 %v2046_v55, %v1671_v38  ;;  %v2207_v57 = vpop.f32.mrf.mxu0  ;;  %v10456_v18 = vpop.f32.mrf.mxu1 }
 0x175   : > { %14133 = vst [vmem:[#allocation26_spill] sm:$0xff] %v10454_v49  ;;  %v10459_v37 = vadd.f32 %v2207_v57, %v10114_v39 }
 0x176   : > { %v8642_v3 = vpop.f32.mrf.mxu0  ;;  %v10461_v47 = vpop.f32.mrf.mxu1 }
 0x177   : > { %v10464_v35 = vadd.f32 %v8642_v3, %v10140_v60 }
 0x178   : > { %v10466_v30 = vpop.f32.mrf.mxu0  ;;  %v10468_v40 = vpop.f32.mrf.mxu1 }
 0x17a   : > { %v8645_v53 = vpop.f32.mrf.mxu0  ;;  %v10470_v29 = vpop.f32.mrf.mxu1 }
 0x17b   : > { %v10473_v23 = vadd.f32 %v8645_v53, %v10162_v32 }
 0x17c   : > { %v2223_v21 = vpop.f32.mrf.mxu0  ;;  %v10475_v24 = vpop.f32.mrf.mxu1 }
 0x17d   : > { %v10478_v39 = vadd.f32 %v2223_v21, %v10170_v17 }
 0x17e   : > { %v8646_v15 = vpop.f32.mrf.mxu0  ;;  %v10480_v38 = vpop.f32.mrf.mxu1 }
 0x17f   : > { %v10483_v60 = vadd.f32 %v8646_v15, %v10195_v22 }
 0x180   : > { %v10485_v55 = vpop.f32.mrf.mxu0  ;;  %v10487_v44 = vpop.f32.mrf.mxu1 }
 0x182   : > { %v8649_v57 = vpop.f32.mrf.mxu0  ;;  %v10489_v3 = vpop.f32.mrf.mxu1 }
 0x183   : > { %v10492_v32 = vadd.f32 %v8649_v57, %v10215_v50 }
 0x184   : > { %v2239_v53 = vpop.f32.mrf.mxu0  ;;  %v10494_v11 = vpop.f32.mrf.mxu1 }
 0x185   : > { %14134 = vst [vmem:[#allocation27_spill] sm:$0xff] %v10492_v32  ;;  %v10497_v17 = vadd.f32 %v2239_v53, %v10223_v63 }
 0x186   : > { %v8650_v21 = vpop.f32.mrf.mxu0  ;;  %v10499_v61 = vpop.f32.mrf.mxu1 }
 0x187   : > { %v10502_v22 = vadd.f32 %v8650_v21, %v10251_v6 }
 0x188   : > { %v10504_v15 = vpop.f32.mrf.mxu0  ;;  %v10506_v49 = vpop.f32.mrf.mxu1 }
 0x18a   : > { %v8653_v62 = vpop.f32.mrf.mxu0  ;;  %v10508_v41 = vpop.f32.mrf.mxu1 }
 0x18b   : > { %14135 = vst [vmem:[#allocation28_spill] sm:$0xff] %v10508_v41  ;;  %v10511_v50 = vadd.f32 %v8653_v62, %v10270_v16 }
 0x18c   : > { %v2255_v57 = vpop.f32.mrf.mxu0  ;;  %v10513_v51 = vpop.f32.mrf.mxu1 }
 0x18d   : > { %14136 = vst [vmem:[#allocation38_spill] sm:$0xff] %v10511_v50  ;;  %v10516_v63 = vadd.f32 %v2255_v57, %v10274_v14 }
 0x18e   : > { %v8654_v53 = vpop.f32.mrf.mxu0  ;;  %v10518_v48 = vpop.f32.mrf.mxu1 }
 0x18f   : > { %14137 = vst [vmem:[#allocation42_spill] sm:$0xff] %v10516_v63  ;;  %v10521_v6 = vadd.f32 %v8654_v53, %v10301_v0 }
 0x190   : > { %v10523_v21 = vpop.f32.mrf.mxu0  ;;  %v10525_v19 = vpop.f32.mrf.mxu1 }
 0x191   : > { %14138 = vst [vmem:[#allocation43_spill] sm:$0xff] %v10521_v6  ;;  %14139 = vst [vmem:[#allocation37_spill] sm:$0xff] %v10523_v21 }
 0x192   : > { %v8657_v32 = vpop.f32.mrf.mxu0  ;;  %v10527_v41 = vpop.f32.mrf.mxu1 }
 0x193   : > { %14140 = vst [vmem:[#allocation34_spill] sm:$0xff] %v10527_v41  ;;  %v10530_v16 = vadd.f32 %v8657_v32, %v10320_v10 }
 0x194   : > { %v2271_v62 = vpop.f32.mrf.mxu0  ;;  %v10532_v50 = vpop.f32.mrf.mxu1 }
 0x195   : > { %14141 = vst [vmem:[#allocation35_spill] sm:$0xff] %v10530_v16  ;;  %v10535_v14 = vadd.f32 %v2271_v62, %v10324_v1 }
 0x196   : > { %v8658_v57 = vpop.f32.mrf.mxu0  ;;  %v10537_v63 = vpop.f32.mrf.mxu1 }
 0x197   : > { %14142 = vst [vmem:[#allocation36_spill] sm:$0xff] %v10535_v14  ;;  %14143 = vst [vmem:[#allocation55_spill] sm:$0xff] %v10537_v63  ;;  %v10540_v0 = vadd.f32 %v8658_v57, %v10351_v31 }
 0x198   : > { %v10542_v53 = vpop.f32.mrf.mxu0  ;;  %v10544_v6 = vpop.f32.mrf.mxu1 }
 0x199   : > { %14144 = vst [vmem:[#allocation56_spill] sm:$0xff] %v10540_v0  ;;  %14145 = vst [vmem:[#allocation57_spill] sm:$0xff] %v10542_v53 }
 0x19a   : > { %v8661_v41 = vpop.f32.mrf.mxu0  ;;  %v10546_v21 = vpop.f32.mrf.mxu1 }
 0x19b   : > { %14146 = vst [vmem:[#allocation58_spill] sm:$0xff] %v10546_v21  ;;  %v10549_v10 = vadd.f32 %v8661_v41, %v10369_v54 }
 0x19c   : > { %v2287_v32 = vpop.f32.mrf.mxu0  ;;  %v10551_v16 = vpop.f32.mrf.mxu1 }
 0x19d   : > { %14147 = vst [vmem:[#allocation59_spill] sm:$0xff] %v10549_v10  ;;  %v10554_v1 = vadd.f32 %v2287_v32, %v10373_v36  ;;  %v2532_v32 = vrot.slane %v10456_v18, 1 }
 0x19e   : > { %v8662_v62 = vpop.f32.mrf.mxu0  ;;  %v10556_v14 = vpop.f32.mrf.mxu1 }
 0x19f   : > { %14148 = vst [vmem:[#allocation60_spill] sm:$0xff] %v10554_v1  ;;  %v10559_v31 = vadd.f32 %v8662_v62, %v10412_v7 }
 0x1a0   : > { %v10561_v57 = vpop.f32.mrf.mxu0  ;;  %v10563_v0 = vpop.f32.mrf.mxu1 }
 0x1a1   : > { %14149 = vst [vmem:[#allocation61_spill] sm:$0xff] %v10559_v31  ;;  %14150 = vst [vmem:[#allocation62_spill] sm:$0xff] %v10561_v57  ;;  %v13832_v57 = vrot.slane %v10427_v43, 1 }
 0x1a2   : > { %v8665_v21 = vpop.f32.mrf.mxu0  ;;  %v8701_v53 = vpop.f32.mrf.mxu1 }
 0x1a3   : > { %v2348_v54 = vadd.f32 %v8665_v21, %v10429_v34  ;;  %v2558_v63 = vrot.slane %v8701_v53, 1 }
 0x1a4   : > { %v2303_v41 = vpop.f32.mrf.mxu0  ;;  %v10566_v10 = vpop.f32.mrf.mxu1 }
 0x1a5   : > { %v10569_v36 = vadd.f32 %v2303_v41, %v10437_v9 }
 0x1a6   : > { %v8666_v1 = vpop.f32.mrf.mxu0  ;;  %v10572_v7 = vpop.f32.mrf.mxu1 }
 0x1a7   : > { %14151 = vst [vmem:[#allocation63_spill] sm:$0xff] %v10569_v36  ;;  %14152 = vst [vmem:[#allocation64_spill] sm:$0xff] %v10572_v7  ;;  %v10575_v62 = vadd.f32 %v8666_v1, %v10445_v56  ;;  %v13830_v31 = vrot.slane %v10572_v7, 1  ;;  %v2587_v56 = vsel %vm14156_vm11, %v13832_v57, %v2532_v32 }
 0x1a8   : > { %v2306_v34 = vpop.f32.mrf.mxu0  ;;  %v10579_v21 = vpop.f32.mrf.mxu1  ;;  %vm14166_vm11 = vmmov %vm14155_vm0 }
 0x1a9   : > { %14153 = vst [vmem:[#allocation65_spill] sm:$0xff] %v10575_v62  ;;  %14154 = vst [vmem:[#allocation66_spill] sm:$0xff] %v10579_v21  ;;  %v2560_v9 = vsel %vm14155_vm0, %v2558_v63, %v13830_v31  ;;  %v13833_v18 = vrot.slane %v10579_v21, 1  ;;  %v2347_v62 = vadd.f32 %v2306_v34, %v10451_v27 }
 0x1aa   : > { %v10590_v53 = vadd.f32 %v2560_v9, %v2348_v54  ;;  %v10592_v1 = vpop.f32.mrf.mxu0  ;;  %v10594_v41 = vpop.f32.mrf.mxu1  ;;  %v2595_v54 = vsel %vm10019_vm14, 0.0, %v2587_v56 }
 0x1ab   : > { %14158 = vst [vmem:[#allocation68_spill] sm:$0xff] %v10594_v41  ;;  %v2561_v31 = vsel %vm14159_vm6, %v13833_v18, %v2558_v63  ;;  %v2533_v41 = vrot.slane %v10468_v40, 1  ;;  %v13839_v63 = vrot.slane %v10592_v1, 7  ;;  %vm14164_vm6 = vcmp.lt.s32.totalorder %v9638_v52, 1 }
 0x1ac   : > { %14157 = vst [vmem:[#allocation67_spill] sm:$0xff] %v10590_v53  ;;  %v10601_v36 = vpop.f32.mrf.mxu0  ;;  %v10603_v7 = vpop.f32.mrf.mxu1  ;;  %v2621_v57 = vsel %vm10396_vm9, 0.0, %v2561_v31  ;;  %v2536_v53 = vrot.slane %v10475_v24, 1  ;;  %v2627_v31 = vadd.f32 %v2595_v54, %v10435_v20  ;;  %vm14167_vm9 = vmmov %vm14155_vm0 }
 0x1ad   : > { %14160 = vst [vmem:[#allocation69_spill] sm:$0xff] %v10603_v7  ;;  %v10609_v9 = vadd.f32 %v2621_v57, %v2347_v62  ;;  %v13842_v7 = vrot.slane %v10461_v47, 1  ;;  %v13843_v57 = vrot.slane %v10449_v42, 1  ;;  %v2586_v54 = vsel %vm14167_vm9, %v2532_v32, %v2533_v41  ;;  %vm14168_vm9 = vmmov %vm14164_vm6 }
 0x1ae   : > { %v8710_v27 = vpop.f32.mrf.mxu0  ;;  %v10612_v34 = vpop.f32.mrf.mxu1 }
 0x1af   : > { %14161 = vst [vmem:[#allocation70_spill] sm:$0xff] %v10609_v9  ;;  %14162 = vst [vmem:[#allocation71_spill] sm:$0xff] %v10612_v34  ;;  %v2997_v18 = vrot.slane %v8710_v27, 7  ;;  %v2583_v40 = vsel %vm14155_vm0, %v13842_v7, %v2536_v53  ;;  %v2585_v20 = vsel %vm14166_vm11, %v2533_v41, %v13843_v57  ;;  %v2537_v34 = vrot.slane %v10487_v44, 1 }
 0x1b0   : > { %v10617_v21 = vpop.f32.mrf.mxu0  ;;  %v10620_v59 = vpop.f32.mrf.mxu1  ;;  %v2599_v7 = vsel %vm10050_vm12, 0.0, %v2583_v40  ;;  %v2597_v57 = vsel %vm10023_vm13, 0.0, %v2585_v20  ;;  %v2323_v40 = vadd.f32 %v10466_v30, %v10118_v12  ;;  %v2538_v44 = vrot.slane %v10470_v29, 1  ;;  %vm14171_vm0 = vmmov %vm14168_vm9 }
 0x1b1   : > { %14163 = vst [vmem:[#allocation72_spill] sm:$0xff] %v10620_v59  ;;  %v3054_v24 = vsel %vm14164_vm6, %v13839_v63, %v2997_v18  ;;  %vm14169_vm6 = vnez %v13932_v25  ;;  %v2631_v20 = vadd.f32 %v2599_v7, %v10464_v35 }
 0x1b2   : > { %v10631_v62 = vpop.f32.mrf.mxu0  ;;  %v10633_v56 = vadd.f32 %v3054_v24, %v2627_v31  ;;  %v10635_v27 = vpop.f32.mrf.mxu1  ;;  %v2540_v31 = vrot.slane %v10494_v11, 1  ;;  %v2539_v11 = vrot.slane %v10480_v38, 1  ;;  %v2629_v35 = vadd.f32 %v2597_v57, %v2323_v40 }
 0x1b3   : > { %14165 = vst [vmem:[#allocation73_spill] sm:$0xff] %v10635_v27  ;;  %v2628_v27 = vadd.f32 %v2586_v54, %v10459_v37 }
 0x1b4   : > { %v2883_v63 = vpop.f32.mrf.mxu0  ;;  %v10643_v13 = vpop.f32.mrf.mxu1  ;;  %v2579_v30 = vsel %vm14166_vm11, %v2539_v11, %v2540_v31 }
 0x1b5   : > { %v2998_v9 = vrot.slane %v2883_v63, 7  ;;  %v2603_v57 = vsel %vm10102_vm15, 0.0, %v2579_v30 }
 0x1b6   : > { %v8714_v24 = vpop.f32.mrf.mxu0  ;;  %v10649_v59 = vpop.f32.mrf.mxu1 }
 0x1b7   : > { %v3001_v41 = vrot.slane %v8714_v24, 7  ;;  %v3053_v63 = vsel %vm14168_vm9, %v2997_v18, %v2998_v9  ;;  %v14170_v18 = vrot.slane %v10631_v62, 7  ;;  %vm14173_vm9 = vmmov %vm14166_vm11 }
 0x1b8   : > { %v10660_v45 = vpop.f32.mrf.mxu0  ;;  %v3062_v37 = vsel %vm14169_vm6, 0.0, %v3053_v63  ;;  %v10665_v54 = vpop.f32.mrf.mxu1  ;;  %v2581_v29 = vsel %vm14173_vm9, %v2537_v34, %v2538_v44  ;;  %vm14174_vm6 = vmmov %vm14171_vm0 }
 0x1b9   : > { %v13852_v24 = vrot.slane %v10660_v45, 7  ;;  %v10669_v32 = vadd.f32 %v3062_v37, %v2628_v27  ;;  %v3050_v12 = vsel %vm14171_vm0, %v14170_v18, %v3001_v41  ;;  %vm14175_vm12 = vmmov %vm14173_vm9 }
 0x1ba   : > { %v8717_v38 = vpop.f32.mrf.mxu0  ;;  %v10677_v63 = vadd.f32 %v3050_v12, %v2631_v20  ;;  %v10679_v7 = vpop.f32.mrf.mxu1  ;;  %v2582_v37 = vsel %vm14175_vm12, %v2536_v53, %v2537_v34  ;;  %vm14176_vm0 = vmmov %vm14173_vm9  ;;  %v2601_v53 = vsel %vm10070_vm2, 0.0, %v2581_v29  ;;  %v2541_v34 = vrot.slane %v10506_v49, 1 }
 0x1bb   : > { %14172 = vst [vmem:[#allocation74_spill] sm:$0xff] %v10679_v7  ;;  %v3052_v27 = vsel %vm14174_vm6, %v2998_v9, %v13852_v24  ;;  %v2580_v40 = vsel %vm14176_vm0, %v2538_v44, %v2539_v11  ;;  %v2632_v9 = vadd.f32 %v2582_v37, %v10478_v39  ;;  %vm14177_vm12 = vmmov %vm14174_vm6  ;;  %v2327_v11 = vadd.f32 %v10485_v55, %v10174_v33 }
 0x1bc   : > { %v2899_v18 = vpop.f32.mrf.mxu0  ;;  %v10689_v25 = vadd.f32 %v3052_v27, %v2629_v35  ;;  %v10691_v46 = vpop.f32.mrf.mxu1  ;;  %v3004_v35 = vrot.slane %v8717_v38, 7  ;;  %v2543_v44 = vrot.slane %v10499_v61, 1  ;;  %vm14178_vm6 = vnez %v13938_v58  ;;  %vm14179_vm11 = vmmov %vm14177_vm12  ;;  %v14192_v58 = vld [vmem:[#allocation27_spill] sm:$0xff] }
 0x1bd   : > { %v3002_v20 = vrot.slane %v2899_v18, 7  ;;  %v2635_v37 = vadd.f32 %v2603_v57, %v10483_v60  ;;  %v2542_v49 = vrot.slane %v10489_v3, 1  ;;  %v2634_v33 = vadd.f32 %v2580_v40, %v10473_v23  ;;  %vm14181_vm9 = vmmov %vm14176_vm0 }
 0x1be   : > { %v8718_v7 = vpop.f32.mrf.mxu0  ;;  %v10699_v24 = vpop.f32.mrf.mxu1  ;;  %v14180_v61 = vrot.slane %v10513_v51, 1  ;;  %v2633_v60 = vadd.f32 %v2601_v53, %v2327_v11 }
 0x1bf   : > { %v3005_v27 = vrot.slane %v8718_v7, 7  ;;  %v3049_v30 = vsel %vm14177_vm12, %v3001_v41, %v3002_v20  ;;  %v2577_v3 = vsel %vm14176_vm0, %v2541_v34, %v2542_v49  ;;  %vm14183_vm12 = vmmov %vm14179_vm11 }
 0x1c0   : > { %v2902_v18 = vpop.f32.mrf.mxu0  ;;  %v3066_v39 = vsel %vm14178_vm6, 0.0, %v3049_v30  ;;  %v10712_v12 = vpop.f32.mrf.mxu1  ;;  %v2575_v55 = vsel %vm14181_vm9, %v2543_v44, %v14180_v61  ;;  %vm14184_vm6 = vmmov %vm14176_vm0  ;;  %vm14185_vm9 = vnez %v13941_v5 }
 0x1c1   : > { %v3003_v38 = vrot.slane %v2902_v18, 7  ;;  %v10715_v7 = vadd.f32 %v3066_v39, %v2632_v9  ;;  %v3046_v41 = vsel %vm14179_vm11, %v3004_v35, %v3005_v27  ;;  %v2578_v40 = vsel %vm14184_vm6, %v2540_v31, %v2541_v34  ;;  %vm14186_vm6 = vmmov %vm14179_vm11  ;;  %v14188_v31 = vld [vmem:[#allocation8_spill] sm:$0xff] }
 0x1c2   : > { %v8721_v29 = vpop.f32.mrf.mxu0  ;;  %v10724_v30 = vadd.f32 %v3046_v41, %v2635_v37  ;;  %v10726_v57 = vpop.f32.mrf.mxu1 }
 0x1c3   : > { %14182 = vst [vmem:[#allocation75_spill] sm:$0xff] %v10726_v57  ;;  %v3047_v9 = vsel %vm14183_vm12, %v3003_v38, %v3004_v35  ;;  %v3048_v23 = vsel %vm14179_vm11, %v3002_v20, %v3003_v38  ;;  %v2607_v35 = vsel %vm10158_vm3, 0.0, %v2575_v55  ;;  %v2576_v20 = vsel %vm14176_vm0, %v2542_v49, %v2543_v44  ;;  %vm14191_vm11 = vmmov %vm14186_vm6  ;;  %v14215_v57 = vld [vmem:[#allocation10_spill] sm:$0xff] }
 0x1c4   : > { %v3068_v18 = vsel %vm14185_vm9, 0.0, %v3047_v9  ;;  %v2915_v39 = vpop.f32.mrf.mxu0  ;;  %v10738_v37 = vadd.f32 %v3048_v23, %v2633_v60  ;;  %v10740_v53 = vpop.f32.mrf.mxu1  ;;  %v2636_v38 = vadd.f32 %v2578_v40, %v10497_v17  ;;  %v2605_v9 = vsel %vm10125_vm1, 0.0, %v2577_v3  ;;  %v14190_v3 = vld [vmem:[#allocation28_spill] sm:$0xff]  ;;  %vm14198_vm9 = vmmov %vm14176_vm0 }
 0x1c5   : > { %v10743_v41 = vadd.f32 %v3068_v18, %v2634_v33  ;;  %v3006_v61 = vrot.slane %v2915_v39, 7  ;;  %v2545_v33 = vrot.slane %v10525_v19, 1  ;;  %v3008_v23 = vrot.slane %v8721_v29, 7  ;;  %v14187_v39 = vld [vmem:[#allocation52_spill] sm:$0xff] }
 0x1c6   : > { %v8722_v34 = vpop.f32.mrf.mxu0  ;;  %v10751_v60 = vpop.f32.mrf.mxu1  ;;  %v2331_v44 = vadd.f32 %v10504_v15, %v14187_v39  ;;  %v2547_v49 = vrot.slane %v10518_v48, 1  ;;  %vm14189_vm12 = vnez %v14188_v31  ;;  %v2639_v40 = vadd.f32 %v2607_v35, %v10502_v22 }
 0x1c7   : > { %v3009_v18 = vrot.slane %v8722_v34, 7  ;;  %v3045_v55 = vsel %vm14186_vm6, %v3005_v27, %v3006_v61  ;;  %v2546_v19 = vrot.slane %v14190_v3, 1  ;;  %v2638_v15 = vadd.f32 %v2576_v20, %v14192_v58  ;;  %vm14195_vm6 = vmmov %vm14176_vm0  ;;  %v14199_v3 = vld [vmem:[#allocation20_spill] sm:$0xff] }
 0x1c8   : > { %v2918_v11 = vpop.f32.mrf.mxu0  ;;  %v3070_v17 = vsel %vm14189_vm12, 0.0, %v3045_v55  ;;  %v10764_v5 = vpop.f32.mrf.mxu1  ;;  %v14193_v48 = vrot.slane %v10532_v50, 1  ;;  %v2637_v22 = vadd.f32 %v2605_v9, %v2331_v44  ;;  %vm14196_vm12 = vmmov %vm14191_vm11  ;;  %v14197_v20 = vrot.slane %v10513_v51, 1  ;;  %v14204_v51 = vld [vmem:[#allocation29_spill] sm:$0xff] }
 0x1c9   : > { %v3007_v29 = vrot.slane %v2918_v11, 7  ;;  %v10767_v34 = vadd.f32 %v3070_v17, %v2636_v38  ;;  %v3042_v27 = vsel %vm14191_vm11, %v3008_v23, %v3009_v18  ;;  %v2573_v11 = vsel %vm14195_vm6, %v2545_v33, %v2546_v19 }
 0x1ca   : > { %v2571_v39 = vsel %vm14176_vm0, %v2547_v49, %v14193_v48  ;;  %v8725_v55 = vpop.f32.mrf.mxu0  ;;  %v10776_v31 = vadd.f32 %v3042_v27, %v2639_v40  ;;  %v10778_v35 = vpop.f32.mrf.mxu1  ;;  %v2574_v17 = vsel %vm14198_vm9, %v14197_v20, %v2545_v33  ;;  %v14200_v9 = vrot.slane %v10427_v43, 1  ;;  %v14202_v48 = vld [vmem:[#allocation9_spill] sm:$0xff]  ;;  %vm14207_vm9 = vmmov %vm14176_vm0 }
 0x1cb   : > { %14194 = vst [vmem:[#allocation52_spill] sm:$0xff] %v10778_v35  ;;  %v3043_v38 = vsel %vm14196_vm12, %v3007_v29, %v3008_v23  ;;  %v3044_v58 = vsel %vm14191_vm11, %v3006_v61, %v3007_v29  ;;  %v14201_v44 = vrot.slane %v10388_v2, 1  ;;  %vm14203_vm6 = vnez %v14202_v48  ;;  %v14212_v29 = vld [vmem:[#allocation54_spill] sm:$0xff]  ;;  %v14213_v40 = vld [vmem:[#allocation37_spill] sm:$0xff] }
 0x1cc   : > { %v3072_v23 = vsel %vm14203_vm6, 0.0, %v3043_v38  ;;  %v2931_v8 = vpop.f32.mrf.mxu0  ;;  %v10799_v26 = vadd.f32 %v3044_v58, %v2637_v22  ;;  %v10801_v61 = vpop.f32.mrf.mxu1  ;;  %v2611_v43 = vsel %vm10211_vm5, 0.0, %v2571_v39  ;;  %v2572_v4 = vsel %vm14207_vm9, %v2546_v19, %v2547_v49  ;;  %v14208_v38 = vld [vmem:[#allocation42_spill] sm:$0xff]  ;;  %v14214_v19 = vld [vmem:[#allocation55_spill] sm:$0xff]  ;;  %vm14219_vm9 = vmmov %vm14191_vm11 }
 0x1cd   : > { %v2588_v27 = vsel %vm14176_vm0, %v14201_v44, %v14200_v9  ;;  %v10804_v33 = vadd.f32 %v3072_v23, %v2638_v15  ;;  %v3010_v20 = vrot.slane %v2931_v8, 7  ;;  %v2640_v48 = vadd.f32 %v2574_v17, %v14208_v38  ;;  %v14210_v58 = vld [vmem:[#allocation50_spill] sm:$0xff]  ;;  %v14217_v38 = vld [vmem:[#allocation43_spill] sm:$0xff]  ;;  %vm14225_vm6 = vmmov %vm14219_vm9 }
 0x1ce   : > { %v8726_v44 = vpop.f32.mrf.mxu0  ;;  %v10812_v22 = vpop.f32.mrf.mxu1  ;;  %vm14211_vm12 = vnez %v14210_v58  ;;  %v2549_v15 = vrot.slane %v10544_v6, 1  ;;  %v3012_v23 = vrot.slane %v8725_v55, 7  ;;  %v2335_v49 = vadd.f32 %v14213_v40, %v14212_v29  ;;  %v14218_v58 = vld [vmem:[#allocation34_spill] sm:$0xff] }
 0x1cf   : > { %14205 = vst [vmem:[#allocation28_spill] sm:$0xff] %v10804_v33  ;;  %14209 = vst [vmem:[#allocation27_spill] sm:$0xff] %v10812_v22  ;;  %v2609_v28 = vsel %vm14211_vm12, 0.0, %v2573_v11  ;;  %v3013_v8 = vrot.slane %v8726_v44, 7  ;;  %v3041_v39 = vsel %vm14191_vm11, %v3009_v18, %v3010_v20  ;;  %v2551_v9 = vrot.slane %v14214_v19, 1  ;;  %v14221_v44 = vld [vmem:[#allocation38_spill] sm:$0xff] }
 0x1d0   : > { %v2934_v35 = vpop.f32.mrf.mxu0  ;;  %vm14216_vm0 = vnez %v14215_v57  ;;  %v2643_v33 = vadd.f32 %v2611_v43, %v14217_v38  ;;  %v2550_v11 = vrot.slane %v14218_v58, 1  ;;  %v10830_v18 = vpop.f32.mrf.mxu1  ;;  %v2642_v40 = vadd.f32 %v2572_v4, %v14221_v44  ;;  %v14229_v38 = vld [vmem:[#allocation19_spill] sm:$0xff] }
 0x1d1   : > { %v3074_v17 = vsel %vm14216_vm0, 0.0, %v3041_v39  ;;  %v3011_v22 = vrot.slane %v2934_v35, 7  ;;  %v3038_v55 = vsel %vm14219_vm9, %v3012_v23, %v3013_v8  ;;  %14220 = vst [vmem:[#allocation20_spill] sm:$0xff] %v10830_v18  ;;  %v14222_v29 = vrot.slane %v10551_v16, 1  ;;  %vm14226_vm9 = vmmov %vm14225_vm6 }
 0x1d2   : > { %v10826_v6 = vadd.f32 %v3074_v17, %v2640_v48  ;;  %vm14223_vm11 = vcmp.lt.s32.totalorder %v9638_v52, 7  ;;  %v8729_v39 = vpop.f32.mrf.mxu0  ;;  %v10837_v57 = vadd.f32 %v3038_v55, %v2643_v33  ;;  %v2641_v43 = vadd.f32 %v2609_v28, %v2335_v49  ;;  %v14230_v33 = vld [vmem:[#allocation45_spill] sm:$0xff]  ;;  %v14231_v55 = vld [vmem:[#allocation31_spill] sm:$0xff] }
 0x1d3   : > { %v2567_v19 = vsel %vm14223_vm11, %v2551_v9, %v14222_v29  ;;  %vm14224_vm0 = vmmov %vm14223_vm11  ;;  %v3039_v48 = vsel %vm14225_vm6, %v3011_v22, %v3012_v23  ;;  %v3040_v58 = vsel %vm14226_vm9, %v3010_v20, %v3011_v22  ;;  %v14227_v4 = vrot.slane %v10532_v50, 1  ;;  %v14232_v49 = vld [vmem:[#allocation11_spill] sm:$0xff] }
 0x1d4   : > { %v2569_v35 = vsel %vm14224_vm0, %v2549_v15, %v2550_v11  ;;  %vm14228_vm5 = vmmov %vm14224_vm0  ;;  %v10850_v44 = vadd.f32 %v2588_v27, %v14229_v38  ;;  %v10854_v28 = vadd.f32 %v14231_v55, %v14230_v33  ;;  %vm14233_vm0 = vnez %v14232_v49  ;;  %v2947_v18 = vpop.f32.mrf.mxu0  ;;  %v14242_v49 = vld [vmem:[#allocation53_spill] sm:$0xff]  ;;  %v14244_v38 = vld [vmem:[#allocation23_spill] sm:$0xff] }
 0x1d5   : > { %v2570_v17 = vsel %vm14228_vm5, %v14227_v4, %v2549_v15  ;;  %v3076_v29 = vsel %vm14233_vm0, 0.0, %v3039_v48  ;;  %v10858_v23 = vadd.f32 %v3040_v58, %v2641_v43  ;;  %v14235_v20 = vrot.slane %v10388_v2, 1  ;;  %vm14237_vm6 = vmmov %vm14228_vm5  ;;  %v10870_v4 = vpop.f32.mrf.mxu1  ;;  %v14241_v58 = vld [vmem:[#allocation36_spill] sm:$0xff]  ;;  %v14246_v48 = vld [vmem:[#allocation14_spill] sm:$0xff] }
 0x1d6   : > { %v14236_v50 = vrot.slane %v14204_v51, 1  ;;  %v10868_v27 = vadd.f32 %v3076_v29, %v2642_v40  ;;  %v3014_v15 = vrot.slane %v2947_v18, 7  ;;  %14239 = vst [vmem:[#allocation54_spill] sm:$0xff] %v10870_v4  ;;  %v2615_v33 = vsel %vm10266_vm8, 0.0, %v2567_v19  ;;  %v8730_v2 = vpop.f32.mrf.mxu0  ;;  %v14245_v19 = vld [vmem:[#allocation57_spill] sm:$0xff] }
 0x1d7   : > { %14234 = vst [vmem:[#allocation29_spill] sm:$0xff] %v10858_v23  ;;  %v2568_v43 = vsel %vm14228_vm5, %v2550_v11, %v2551_v9  ;;  %v2644_v55 = vadd.f32 %v2570_v17, %v14241_v58  ;;  %vm14243_vm11 = vnez %v14242_v49  ;;  %v2553_v40 = vrot.slane %v10563_v0, 1  ;;  %v14248_v17 = vld [vmem:[#allocation56_spill] sm:$0xff]  ;;  %v14249_v49 = vld [vmem:[#allocation58_spill] sm:$0xff]  ;;  %vm14250_vm5 = vmmov %vm14226_vm9 }
 0x1d8   : > { %v10866_v22 = vsel %vm14237_vm6, %v14236_v50, %v14235_v20  ;;  %14238 = vst [vmem:[#allocation42_spill] sm:$0xff] %v10868_v27  ;;  %v2613_v20 = vsel %vm14243_vm11, 0.0, %v2569_v35  ;;  %v3016_v29 = vrot.slane %v8729_v39, 7  ;;  %v3017_v18 = vrot.slane %v8730_v2, 7  ;;  %v2950_v11 = vpop.f32.mrf.mxu0  ;;  %v10892_v39 = vpop.f32.mrf.mxu1  ;;  %vm14257_vm0 = vmmov %vm14250_vm5 }
 0x1d9   : > { %v3037_v50 = vsel %vm14226_vm9, %v3013_v8, %v3014_v15  ;;  %v2339_v4 = vadd.f32 %v14245_v19, %v14244_v38  ;;  %v2555_v9 = vrot.slane %v10556_v14, 1  ;;  %vm14247_vm6 = vnez %v14246_v48  ;;  %v14256_v19 = vld [vmem:[#allocation35_spill] sm:$0xff] }
 0x1da   : > { %v3078_v27 = vsel %vm14247_vm6, 0.0, %v3037_v50  ;;  %v2647_v58 = vadd.f32 %v2615_v33, %v14248_v17  ;;  %v2554_v35 = vrot.slane %v14249_v49, 1  ;;  %v3015_v23 = vrot.slane %v2950_v11, 7 }
 0x1db   : > { %v10890_v0 = vadd.f32 %v3078_v27, %v2644_v55  ;;  %v3034_v8 = vsel %vm14250_vm5, %v3016_v29, %v3017_v18  ;;  %v14251_v38 = vrot.slane %v14204_v51, 1  ;;  %v14252_v14 = vrot.slane %v14199_v3, 1  ;;  %v8733_v27 = vpop.f32.mrf.mxu0 }
 0x1dc   : > { %vm14253_vm9 = vcmp.lt.s32.totalorder %v9638_v52, 7  ;;  %v14254_v33 = vrot.slane %v10566_v10, 1  ;;  %v10908_v55 = vadd.f32 %v3034_v8, %v2647_v58  ;;  %v2645_v50 = vadd.f32 %v2613_v20, %v2339_v4  ;;  %v14261_v8 = vld [vmem:[#allocation17_spill] sm:$0xff] }
 0x1dd   : > { %v10902_v2 = vsel %vm14253_vm9, %v14252_v14, %v14251_v38  ;;  %vm14255_vm6 = vmmov %vm14253_vm9  ;;  %v2646_v11 = vadd.f32 %v2568_v43, %v14256_v19  ;;  %v3035_v51 = vsel %vm14250_vm5, %v3015_v23, %v3016_v29  ;;  %v3036_v17 = vsel %vm14257_vm0, %v3014_v15, %v3015_v23  ;;  %v2963_v43 = vpop.f32.mrf.mxu0 }
 0x1de   : > { %v2563_v49 = vsel %vm14255_vm6, %v2555_v9, %v14254_v33  ;;  %v14258_v38 = vrot.slane %v10551_v16, 1  ;;  %vm14259_vm9 = vmmov %vm14255_vm6  ;;  %v2995_v58 = vrot.slane %v10617_v21, 7  ;;  %v10924_v20 = vadd.f32 %v3036_v17, %v2645_v50  ;;  %v10930_v16 = vpop.f32.mrf.mxu1  ;;  %v14269_v50 = vld [vmem:[#allocation18_spill] sm:$0xff] }
 0x1df   : > { %vm14260_vm8 = vmmov %vm14255_vm6  ;;  %vm14262_vm6 = vnez %v14261_v8  ;;  %v3018_v15 = vrot.slane %v2963_v43, 7  ;;  %v14267_v21 = vrot.slane %v10449_v42, 1  ;;  %v14270_v17 = vld [vmem:[#allocation62_spill] sm:$0xff]  ;;  %v3020_v48 = vrot.slane %v8733_v27, 7 }
 0x1e0   : > { %v2566_v14 = vsel %vm14259_vm9, %v14258_v38, %v2553_v40  ;;  %v2565_v33 = vsel %vm14260_vm8, %v2553_v40, %v2554_v35  ;;  %v3080_v4 = vsel %vm14262_vm6, 0.0, %v3035_v51  ;;  %vm14263_vm5 = vmmov %vm14260_vm8  ;;  %v2619_v38 = vsel %vm10316_vm7, 0.0, %v2563_v49  ;;  %v14275_v49 = vld [vmem:[#allocation13_spill] sm:$0xff] }
 0x1e1   : > { %v2564_v29 = vsel %vm14263_vm5, %v2554_v35, %v2555_v9  ;;  %v10928_v23 = vadd.f32 %v3080_v4, %v2646_v11  ;;  %v14266_v40 = vrot.slane %v10461_v47, 1  ;;  %vm14268_vm8 = vmmov %vm14263_vm5  ;;  %v2343_v8 = vadd.f32 %v14270_v17, %v14269_v50  ;;  %v14271_v9 = vld [vmem:[#allocation39_spill] sm:$0xff]  ;;  %v8734_v11 = vpop.f32.mrf.mxu0  ;;  %v14273_v4 = vld [vmem:[#allocation60_spill] sm:$0xff] }
 0x1e2   : > { %vm14272_vm0 = vnez %v14271_v9  ;;  %v2648_v43 = vadd.f32 %v2566_v14, %v14273_v4  ;;  %v3021_v19 = vrot.slane %v8734_v11, 7  ;;  %vm14274_vm9 = vcmp.lt.s32.totalorder %v9638_v52, 1  ;;  %v14282_v14 = vld [vmem:[#allocation61_spill] sm:$0xff]  ;;  %v10959_v4 = vpop.f32.mrf.mxu1 }
 0x1e3   : > { %14264 = vst [vmem:[#allocation37_spill] sm:$0xff] %v10928_v23  ;;  %v2584_v51 = vsel %vm14268_vm8, %v14267_v21, %v14266_v40  ;;  %v2593_v35 = vsel %vm14272_vm0, 0.0, %v10866_v22  ;;  %v3033_v47 = vsel %vm14274_vm9, %v3017_v18, %v3018_v15  ;;  %vm14276_vm5 = vnez %v14275_v49  ;;  %v14277_v23 = vld [vmem:[#allocation59_spill] sm:$0xff]  ;;  %vm14279_vm8 = vmmov %vm14274_vm9  ;;  %v2966_v17 = vpop.f32.mrf.mxu0  ;;  %v14280_v22 = vld [vmem:[#allocation22_spill] sm:$0xff] }
 0x1e4   : > { %v2617_v42 = vsel %vm14276_vm5, 0.0, %v2565_v33  ;;  %v2650_v40 = vadd.f32 %v2564_v29, %v14277_v23  ;;  %v14278_v21 = vrot.slane %v10592_v1, 7  ;;  %vm14281_vm6 = vnez %v14280_v22  ;;  %vm14283_vm9 = vmmov %vm14279_vm8  ;;  %v14285_v29 = vld [vmem:[#allocation64_spill] sm:$0xff] }
 0x1e5   : > { %v3082_v9 = vsel %vm14281_vm6, 0.0, %v3033_v47  ;;  %v2651_v27 = vadd.f32 %v2619_v38, %v14282_v14  ;;  %v2994_v11 = vrot.slane %v10601_v36, 7  ;;  %v3019_v18 = vrot.slane %v2966_v17, 7  ;;  %vm14290_vm6 = vmmov %vm14283_vm9  ;;  %v8737_v17 = vpop.f32.mrf.mxu0  ;;  %v14291_v14 = vld [vmem:[#allocation3_spill] sm:$0xff] }
 0x1e6   : > { %v3055_v50 = vsel %vm14279_vm8, %v2995_v58, %v14278_v21  ;;  %v10961_v49 = vadd.f32 %v3082_v9, %v2648_v43  ;;  %v3030_v33 = vsel %vm14283_vm9, %v3020_v48, %v3021_v19  ;;  %v14284_v1 = vrot.slane %v14199_v3, 1  ;;  %vm14293_vm7 = vmmov %vm14290_vm6 }
 0x1e7   : > { %v14286_v23 = vrot.slane %v14285_v29, 1  ;;  %vm14287_vm8 = vcmp.lt.s32.totalorder %v9638_v52, 7  ;;  %v14288_v47 = vrot.slane %v10631_v62, 7  ;;  %v14289_v38 = vrot.slane %v10660_v45, 7  ;;  %vm14294_vm5 = vmmov %vm14290_vm6  ;;  %v14296_v29 = vld [vmem:[#allocation25_spill] sm:$0xff] }
 0x1e8   : > { %v10977_v9 = vadd.f32 %v3030_v33, %v2651_v27  ;;  %v2649_v43 = vadd.f32 %v2617_v42, %v2343_v8  ;;  %vm14292_vm9 = vnez %v14291_v14  ;;  %v3056_v3 = vsel %vm14293_vm7, %v2994_v11, %v2995_v58  ;;  %v2979_v27 = vpop.f32.mrf.mxu0  ;;  %v14298_v8 = vld [vmem:[#allocation66_spill] sm:$0xff] }
 0x1e9   : > { %v2591_v21 = vsel %vm14287_vm8, %v14286_v23, %v14284_v1  ;;  %v3051_v36 = vsel %vm14290_vm6, %v14289_v38, %v14288_v47  ;;  %v3060_v22 = vsel %vm14292_vm9, 0.0, %v3055_v50  ;;  %v3031_v1 = vsel %vm14294_vm5, %v3019_v18, %v3020_v48  ;;  %vm14295_vm8 = vmmov %vm14294_vm5  ;;  %v14302_v47 = vld [vmem:[#allocation5_spill] sm:$0xff]  ;;  %v11000_v38 = vpop.f32.mrf.mxu1 }
 0x1ea   : > { %v3032_v62 = vsel %vm14295_vm8, %v3018_v15, %v3019_v18  ;;  %v2625_v45 = vadd.f32 %v2593_v35, %v10854_v28  ;;  %vm14297_vm6 = vnez %v14296_v29  ;;  %v14299_v42 = vrot.slane %v14298_v8, 1  ;;  %v14308_v35 = vld [vmem:[#allocation30_spill] sm:$0xff] }
 0x1eb   : > { %v3084_v23 = vsel %vm14297_vm6, 0.0, %v3031_v1  ;;  %v10990_v33 = vadd.f32 %v3032_v62, %v2649_v43  ;;  %v14300_v50 = vrot.slane %v10566_v10, 1  ;;  %vm14301_vm7 = vcmp.lt.s32.totalorder %v9638_v52, 7  ;;  %v14305_v43 = vld [vmem:[#allocation26_spill] sm:$0xff]  ;;  %v8738_v10 = vpop.f32.mrf.mxu0 }
 0x1ec   : > { %vm14303_vm5 = vnez %v14302_v47  ;;  %v11002_v15 = vadd.f32 %v3084_v23, %v2650_v40  ;;  %v3022_v28 = vrot.slane %v2979_v27, 7  ;;  %v2623_v18 = vsel %vm10342_vm4, 0.0, %v2591_v21  ;;  %v14307_v47 = vld [vmem:[#allocation24_spill] sm:$0xff] }
 0x1ed   : > { %v2562_v58 = vsel %vm14301_vm7, %v14300_v50, %v14299_v42  ;;  %v3064_v48 = vsel %vm14303_vm5, 0.0, %v3051_v36  ;;  %v2630_v1 = vadd.f32 %v2584_v51, %v14305_v43  ;;  %v3092_v62 = vadd.f32 %v3060_v22, %v10850_v44  ;;  %v14306_v42 = vld [vmem:[#allocation63_spill] sm:$0xff]  ;;  %v2982_v27 = vpop.f32.mrf.mxu0  ;;  %v14309_v51 = vld [vmem:[#allocation65_spill] sm:$0xff]  ;;  %v3269_v44 = vpop.f32.mrf.mxu1  ;;  %vm14310_vm7 = vmmov %vm14295_vm8 }
 0x1ee   : > { %v3091_v8 = vadd.f32 %v3056_v3, %v2625_v45  ;;  %v3024_v29 = vrot.slane %v8737_v17, 7  ;;  %v3025_v14 = vrot.slane %v8738_v10, 7  ;;  %v2652_v50 = vadd.f32 %v2562_v58, %v14306_v42  ;;  %vm14311_vm6 = vmmov %vm14310_vm7  ;;  %v14312_v45 = vld [vmem:[#allocation71_spill] sm:$0xff]  ;;  %v14313_v58 = vld [vmem:[#allocation72_spill] sm:$0xff] }
 0x1ef   : > { %v3029_v36 = vsel %vm14295_vm8, %v3021_v19, %v3022_v28  ;;  %v2624_v40 = vadd.f32 %v10902_v2, %v14307_v47  ;;  %v3096_v23 = vadd.f32 %v3064_v48, %v2630_v1  ;;  %v2655_v43 = vadd.f32 %v2623_v18, %v14309_v51  ;;  %v8781_v48 = vpop.f32.mrf.mxu0  ;;  %v14314_v18 = vld [vmem:[#allocation68_spill] sm:$0xff]  ;;  %vm14317_vm8 = vmmov %vm14310_vm7  ;;  %v14323_v51 = vld [vmem:[#allocation70_spill] sm:$0xff] }
 0x1f0   : > { %v3086_v21 = vsel %vm14120_vm10, 0.0, %v3029_v36  ;;  %v3057_v22 = vsel %vm14310_vm7, %v3025_v14, %v2994_v11  ;;  %v3023_v17 = vrot.slane %v2982_v27, 7  ;;  %v3026_v19 = vsel %vm14311_vm6, %v3024_v29, %v3025_v14  ;;  %v14315_v14 = vld [vmem:[#allocation32_spill] sm:$0xff]  ;;  %v14318_v36 = vld [vmem:[#allocation33_spill] sm:$0xff]  ;;  %vm14320_vm10 = vmmov %vm14317_vm8 }
 0x1f1   : > { %v11018_v3 = vadd.f32 %v3086_v21, %v2652_v50  ;;  %v11024_v2 = vadd.f32 %v14312_v45, %v10633_v56  ;;  %v3301_v47 = vadd.f32 %v14313_v58, %v3091_v8  ;;  %v11027_v1 = vadd.f32 %v3026_v19, %v2655_v43  ;;  %v11048_v27 = vpop.f32.mrf.mxu0  ;;  %v14327_v19 = vld [vmem:[#allocation20_spill] sm:$0xff]  ;;  %v14329_v58 = vld [vmem:[#allocation75_spill] sm:$0xff] }
 0x1f2   : > { %v3302_v10 = vadd.f32 %v14314_v18, %v3092_v62  ;;  %v11032_v11 = vadd.f32 %v10643_v13, %v10669_v32  ;;  %v11036_v42 = vadd.f32 %v10649_v59, %v10677_v63  ;;  %vm14316_vm6 = vnez %v14315_v14  ;;  %v14321_v59 = vld [vmem:[#allocation73_spill] sm:$0xff] }
 0x1f3   : > { %v3058_v50 = vsel %vm14316_vm6, 0.0, %v3057_v22  ;;  %v3027_v56 = vsel %vm14317_vm8, %v3023_v17, %v3024_v29  ;;  %v11044_v8 = vadd.f32 %v10665_v54, %v10689_v25  ;;  %vm14319_vm7 = vnez %v14318_v36  ;;  %v8770_v25 = vpop.f32.mrf.mxu1  ;;  %v14322_v54 = vld [vmem:[#allocation67_spill] sm:$0xff] }
 0x1f4   : > { %v3088_v62 = vsel %vm14319_vm7, 0.0, %v3027_v56  ;;  %v3028_v13 = vsel %vm14320_vm10, %v3022_v28, %v3023_v17  ;;  %v11053_v32 = vadd.f32 %v14321_v59, %v3096_v23  ;;  %v11057_v63 = vadd.f32 %v10691_v46, %v10715_v7  ;;  %v8782_v23 = vpop.f32.mrf.mxu0 }
 0x1f5   : > { %v11061_v29 = vadd.f32 %v10699_v24, %v10724_v30  ;;  %v11064_v21 = vadd.f32 %v3088_v62, %v14322_v54  ;;  %v11067_v43 = vadd.f32 %v3028_v13, %v14323_v51  ;;  %v11071_v28 = vadd.f32 %v10712_v12, %v10738_v37  ;;  %v14324_v24 = vld [vmem:[#allocation74_spill] sm:$0xff]  ;;  %v14333_v13 = vld [vmem:[#allocation69_spill] sm:$0xff] }
 0x1f6   : > { %v11075_v46 = vadd.f32 %v10740_v53, %v10767_v34  ;;  %v3090_v7 = vadd.f32 %v3058_v50, %v2624_v40  ;;  %v11079_v30 = vadd.f32 %v14324_v24, %v10743_v41  ;;  %v11083_v22 = vadd.f32 %v10751_v60, %v10776_v31  ;;  %v14325_v34 = vld [vmem:[#allocation27_spill] sm:$0xff]  ;;  %v14326_v41 = vld [vmem:[#allocation29_spill] sm:$0xff]  ;;  %v3386_v31 = vpop.f32.mrf.mxu0  ;;  %v14328_v60 = vld [vmem:[#allocation28_spill] sm:$0xff] }
 0x1f7   : > { %v11087_v17 = vadd.f32 %v10764_v5, %v10799_v26  ;;  %v3512_v12 = vrot.slane %v8781_v48, 1  ;;  %v3513_v37 = vrot.slane %v8782_v23, 1  ;;  %v11091_v53 = vadd.f32 %v10801_v61, %v10826_v6  ;;  %v3272_v5 = vpop.f32.mrf.mxu1  ;;  %v14331_v6 = vld [vmem:[#allocation42_spill] sm:$0xff]  ;;  %v14332_v48 = vld [vmem:[#allocation52_spill] sm:$0xff] }
 0x1f8   : > { %v11095_v40 = vadd.f32 %v14325_v34, %v10837_v57  ;;  %v11099_v45 = vadd.f32 %v14327_v19, %v14326_v41  ;;  %v11103_v18 = vadd.f32 %v14329_v58, %v14328_v60  ;;  %v3510_v26 = vrot.slane %v11048_v27, 1  ;;  %v8785_v51 = vpop.f32.mrf.mxu0  ;;  %v14337_v34 = vld [vmem:[#allocation54_spill] sm:$0xff] }
 0x1f9   : > { %vm14330_vm10 = vcmp.lt.s32.totalorder %v9638_v52, 7  ;;  %v3511_v61 = vrot.slane %v3386_v31, 1  ;;  %v11117_v50 = vadd.f32 %v14332_v48, %v14331_v6  ;;  %v11121_v56 = vadd.f32 %v10892_v39, %v10890_v0  ;;  %v14336_v39 = vld [vmem:[#allocation37_spill] sm:$0xff]  ;;  %v11155_v19 = vpop.f32.mrf.mxu1  ;;  %v9213_v48 = vld [vmem:[%s13735_s2 + $0x10] sm:$0xff]  }
 0x1fa   : > { %v3570_v57 = vsel %vm14330_vm10, %v3512_v12, %v3513_v37  ;;  %v11125_v62 = vadd.f32 %v10930_v16, %v10908_v55  ;;  %v3300_v59 = vadd.f32 %v14333_v13, %v3090_v7  ;;  %v11130_v23 = vadd.f32 %v10959_v4, %v10924_v20  ;;  %vm14334_vm8 = vmmov %vm14330_vm10  ;;  %v14339_v20 = vld [vmem:[#allocation39_spill] sm:$0xff]  ;;  %v9211_v6 = vld [vmem:[%s13735_s2] sm:$0xff]  }
 0x1fb   : > { %v3608_v54 = vadd.f32 %v3570_v57, %v3302_v10  ;;  %v3571_v24 = vsel %vm14334_vm8, %v3511_v61, %v3512_v12  ;;  %vm14335_vm10 = vmmov %vm14334_vm8  ;;  %v11140_v55 = vadd.f32 %v14337_v34, %v14336_v39  ;;  %v11143_v16 = vadd.f32 %v3269_v44, %v10961_v49  ;;  %v3399_v12 = vpop.f32.mrf.mxu0  ;;  %v9214_v13 = vld [vmem:[#allocation2] sm:$0xff]   ;;  %v3285_v34 = vpop.f32.mrf.mxu1 }
 0x1fc   : > { %v3572_v0 = vsel %vm14335_vm10, %v3510_v26, %v3511_v61  ;;  %v11146_v10 = vadd.f32 %v8770_v25, %v10977_v9  ;;  %vm14338_vm7 = vcmask 261120   ;;  %v3575_v4 = vsel %vm14272_vm0, 0.0, %v3571_v24  ;;  %v9210_v9 = vld [vmem:[%s13735_s2 + $0x8] sm:$0xff]  }
 0x1fd   : > { %3812 = vst.msk [vmem:[%s11110_s6 + $0x10] sm:$0xff] %vm14338_vm7, %v3608_v54  ;;  %v3606_v7 = vadd.f32 %v3572_v0, %v3300_v59  ;;  %v11153_v41 = vadd.f32 %v3272_v5, %v10990_v33  ;;  %v3607_v31 = vadd.f32 %v3575_v4, %v3301_v47  ;;  %v3514_v60 = vrot.slane %v3399_v12, 1  ;;  %vm14340_vm8 = vmmov %vm14338_vm7  ;;  %v11167_v5 = vpop.f32.mrf.mxu0  ;;  %v9212_v47 = vld [vmem:[%s13735_s2 + $0x18] sm:$0xff]   ;;  %8811 = vmatprep.subr.bf16.mxu1 %v9210_v9 }
 0x1fe   : > { %v11159_v49 = vadd.f32 %v11000_v38, %v11002_v15  ;;  %v3710_v44 = vmul.f32 %v3608_v54, %v3608_v54  ;;  %v3516_v33 = vrot.slane %v8785_v51, 1  ;;  %vm14341_vm10 = vmmov %vm14338_vm7  ;;  %vm14343_vm6 = vcmp.lt.s32.totalorder %v9638_v52, 7  ;;  %v14346_v0 = vld [vmem:[#allocation40_spill] sm:$0xff]  ;;  %8812 = vmatpush3.bf16.msra.mxu1 %v9210_v9  ;;  %8847 = vmatprep.subr.bf16.mxu0 %v9212_v47 }
 0x1ff   : > { %v3638_v25 = vsel %vm14338_vm7, %v3606_v7, 0.0  ;;  %v3708_v58 = vmul.f32 %v3606_v7, %v3606_v7  ;;  %3810 = vst.msk [vmem:[%s11110_s6] sm:$0xff] %vm14340_vm8, %v3606_v7  ;;  %v3639_v38 = vsel %vm14341_vm10, %v3607_v31, 0.0  ;;  %v3709_v15 = vmul.f32 %v3607_v31, %v3607_v31  ;;  %vm14342_vm0 = vmmov %vm14338_vm7  ;;  %v3402_v39 = vpop.f32.mrf.mxu0  ;;  %8813 = vmatprep.subr.bf16.mxu1 %v9211_v6  ;;  %8848 = vmatpush3.bf16.msra.mxu0 %v9212_v47 }
 0x200   : > { %3811 = vst.msk [vmem:[%s11110_s6 + $0x8] sm:$0xff] %vm14342_vm0, %v3607_v31  ;;  %v3569_v57 = vsel %vm14343_vm6, %v3513_v37, %v3514_v60  ;;  %v3517_v61 = vrot.slane %v11167_v5, 1  ;;  %vm14344_vm7 = vmmov %vm14342_vm0  ;;  %v3640_v51 = vadd.f32 %v3639_v38, %v3638_v25  ;;  %v3515_v31 = vrot.slane %v3402_v39, 1  ;;  %8849 = vmatprep.subr.bf16.mxu0 %v9213_v48  ;;  %v14354_v39 = vld [vmem:[#allocation41_spill] sm:$0xff] }
 0x201   : > { %v3641_v59 = vsel %vm14344_vm7, %v3608_v54, 0.0  ;;  %vm14345_vm8 = vmmov %vm14342_vm0  ;;  %v3577_v37 = vsel %vm10019_vm14, 0.0, %v3569_v57  ;;  %v3741_v4 = vsel %vm14342_vm0, %v3709_v15, 0.0  ;;  %v9215_v54 = vld [vmem:[%s13735_s2 + $0x28] sm:$0xff]   ;;  %v8789_v38 = vpop.f32.mrf.mxu0  ;;  %v11207_v57 = vadd.f32 %v3285_v34, %v11018_v3 }
 0x202   : > { %v3740_v24 = vsel %vm14345_vm8, %v3708_v58, 0.0  ;;  %v3609_v7 = vadd.f32 %v3577_v37, %v11024_v2  ;;  %v3566_v12 = vsel %vm14343_vm6, %v3516_v33, %v3517_v61  ;;  %vm14347_vm10 = vmmov %vm14342_vm0  ;;  %v3642_v58 = vadd.f32 %v3641_v59, %v3640_v51  ;;  %8814 = vmatpush3.bf16.msra.mxu1 %v9211_v6 }
 0x203   : > { %v3743_v25 = vsel %vm14347_vm10, %v3710_v44, 0.0  ;;  %v3742_v9 = vadd.f32 %v3741_v4, %v3740_v24  ;;  %v3612_v5 = vadd.f32 %v3566_v12, %v11053_v32  ;;  %vm14348_vm7 = vmmov %vm14342_vm0  ;;  %v3567_v47 = vsel %vm14343_vm6, %v3515_v31, %v3516_v33  ;;  %v3415_v24 = vpop.f32.mrf.mxu0  ;;  %8850 = vmatpush3.bf16.msra.mxu0 %v9213_v48  ;;  %8883 = vmatprep.subr.bf16.mxu1 %v9215_v54 }
 0x204   : > { %8815 = vmatprep.mubr.msk.bf16.mxu1 %vm14348_vm7, %v9214_v13  ;;  %vm14349_vm8 = vmmov %vm14342_vm0  ;;  %v3711_v15 = vmul.f32 %v3609_v7, %v3609_v7  ;;  %3813 = vst.msk [vmem:[%s11110_s6 + $0x18] sm:$0xff] %vm14342_vm0, %v3609_v7  ;;  %v3520_v4 = vrot.slane %v8789_v38, 1  ;;  %v14362_v38 = vld [vmem:[#allocation44_spill] sm:$0xff] }
 0x205   : > { %v3643_v2 = vsel %vm14349_vm8, %v3609_v7, 0.0  ;;  %vm14350_vm14 = vmmov %vm14343_vm6  ;;  %v3744_v59 = vadd.f32 %v3743_v25, %v3742_v9  ;;  %v3714_v51 = vmul.f32 %v3612_v5, %v3612_v5  ;;  %v3649_v33 = vsel %vm14342_vm0, %v3612_v5, 0.0  ;;  %v8790_v12 = vpop.f32.mrf.mxu0 }
 0x206   : > { %v3568_v44 = vsel %vm14350_vm14, %v3514_v60, %v3515_v31  ;;  %vm14351_vm10 = vmmov %vm14342_vm0  ;;  %v3644_v32 = vadd.f32 %v3643_v2, %v3642_v58  ;;  %v3579_v60 = vsel %vm10023_vm13, 0.0, %v3567_v47  ;;  %v3518_v7 = vrot.slane %v3415_v24, 1 }
 0x207   : > { %8851 = vmatprep.mubr.msk.bf16.mxu0 %vm14351_vm10, %v9214_v13  ;;  %vm14352_vm7 = vmmov %vm14342_vm0  ;;  %v3610_v13 = vadd.f32 %v3568_v44, %v11032_v11  ;;  %v3611_v34 = vadd.f32 %v3579_v60, %v11044_v8  ;;  %v3521_v9 = vrot.slane %v8790_v12, 1  ;;  %v3418_v48 = vpop.f32.mrf.mxu0 }
 0x208   : > { %3816 = vst.msk [vmem:[%s11110_s6 + $0x30] sm:$0xff] %vm14352_vm7, %v3612_v5  ;;  %vm14353_vm8 = vmmov %vm14342_vm0  ;;  %v3519_v47 = vrot.slane %v3418_v48, 1 }
 0x209   : > { %v3745_v37 = vsel %vm14353_vm8, %v3711_v15, 0.0  ;;  %vm14355_vm14 = vmmov %vm14342_vm0  ;;  %v3712_v25 = vmul.f32 %v3610_v13, %v3610_v13  ;;  %v3713_v5 = vmul.f32 %v3611_v34, %v3611_v34  ;;  %v8793_v24 = vpop.f32.mrf.mxu0 }
 0x20a   : > { %v3746_v3 = vadd.f32 %v3745_v37, %v3744_v59  ;;  %v3751_v6 = vsel %vm14355_vm14, %v3714_v51, 0.0  ;;  %vm14356_vm6 = vmmov %vm14342_vm0  ;;  %vm14363_vm14 = vnez %v14362_v38 }
 0x20b   : > { %v3645_v31 = vsel %vm14356_vm6, %v3610_v13, 0.0  ;;  %vm14357_vm10 = vmmov %vm14342_vm0 }
 0x20c   : > { %3814 = vst.msk [vmem:[%s11110_s6 + $0x20] sm:$0xff] %vm14357_vm10, %v3610_v13  ;;  %v3646_v58 = vadd.f32 %v3645_v31, %v3644_v32  ;;  %vm14358_vm7 = vmmov %vm14342_vm0  ;;  %v3524_v13 = vrot.slane %v8793_v24, 1 }
 0x20d   : > { %v3647_v11 = vsel %vm14358_vm7, %v3611_v34, 0.0  ;;  %vm14359_vm8 = vmmov %vm14342_vm0  ;;  %vm14360_vm0 = vcmp.lt.s32.totalorder %v9638_v52, 7 }
 0x20e   : > { %3815 = vst.msk [vmem:[%s11110_s6 + $0x28] sm:$0xff] %vm14359_vm8, %v3611_v34  ;;  %v3565_v8 = vsel %vm14360_vm0, %v3517_v61, %v3518_v7  ;;  %vm14361_vm13 = vmmov %vm14356_vm6  ;;  %v3648_v44 = vadd.f32 %v3647_v11, %v3646_v58 }
 0x20f   : > { %v3747_v54 = vsel %vm14361_vm13, %v3712_v25, 0.0  ;;  %v3581_v2 = vsel %vm14363_vm14, 0.0, %v3565_v8  ;;  %vm14364_vm6 = vmmov %vm14360_vm0  ;;  %v3431_v25 = vpop.f32.mrf.mxu0 }
 0x210   : > { %v3562_v15 = vsel %vm14364_vm6, %v3520_v4, %v3521_v9  ;;  %v3748_v32 = vadd.f32 %v3747_v54, %v3746_v3  ;;  %vm14365_vm10 = vmmov %vm14358_vm7  ;;  %v3613_v51 = vadd.f32 %v3581_v2, %v11036_v42  ;;  %v3650_v12 = vadd.f32 %v3649_v33, %v3648_v44 }
 0x211   : > { %v3749_v59 = vsel %vm14365_vm10, %v3713_v5, 0.0  ;;  %v3616_v61 = vadd.f32 %v3562_v15, %v11079_v30  ;;  %vm14366_vm13 = vmmov %vm14360_vm0  ;;  %v14371_v30 = vld [vmem:[#allocation46_spill] sm:$0xff]  ;;  %v11249_v48 = vpop.f32.mrf.mxu0 }
 0x212   : > { %v3563_v37 = vsel %vm14366_vm13, %v3519_v47, %v3520_v4  ;;  %vm14367_vm7 = vmmov %vm14360_vm0  ;;  %v3750_v34 = vadd.f32 %v3749_v59, %v3748_v32  ;;  %v3651_v31 = vsel %vm14359_vm8, %v3613_v51, 0.0  ;;  %v3715_v3 = vmul.f32 %v3613_v51, %v3613_v51 }
 0x213   : > { %v3564_v60 = vsel %vm14367_vm7, %v3518_v7, %v3519_v47  ;;  %vm14368_vm0 = vmmov %vm14359_vm8  ;;  %v3718_v58 = vmul.f32 %v3616_v61, %v3616_v61  ;;  %v3583_v4 = vsel %vm10070_vm2, 0.0, %v3563_v37  ;;  %v3652_v11 = vadd.f32 %v3651_v31, %v3650_v12 }
 0x214   : > { %3817 = vst.msk [vmem:[%s11110_s6 + $0x38] sm:$0xff] %vm14368_vm0, %v3613_v51  ;;  %vm14369_vm6 = vmmov %vm14368_vm0  ;;  %v3614_v7 = vadd.f32 %v3564_v60, %v11057_v63  ;;  %v3752_v33 = vadd.f32 %v3751_v6, %v3750_v34  ;;  %v3615_v8 = vadd.f32 %v3583_v4, %v11071_v28  ;;  %v3522_v47 = vrot.slane %v3431_v25, 1  ;;  %v3434_v6 = vpop.f32.mrf.mxu0  ;;  %v8774_v25 = vpop.f32.mrf.mxu1 }
 0x215   : > { %v3657_v42 = vsel %vm14369_vm6, %v3616_v61, 0.0  ;;  %vm14370_vm10 = vmmov %vm14368_vm0  ;;  %vm14378_vm2 = vcmp.lt.s32.totalorder %v9638_v52, 7  ;;  %v3525_v24 = vrot.slane %v11249_v48, 1 }
 0x216   : > { %3820 = vst.msk [vmem:[%s11110_s6 + $0x50] sm:$0xff] %vm14370_vm10, %v3616_v61  ;;  %vm14372_vm13 = vmmov %vm14368_vm0  ;;  %v3716_v15 = vmul.f32 %v3614_v7, %v3614_v7  ;;  %v3717_v59 = vmul.f32 %v3615_v8, %v3615_v8  ;;  %v3561_v51 = vsel %vm14378_vm2, %v3521_v9, %v3522_v47  ;;  %v3523_v61 = vrot.slane %v3434_v6, 1 }
 0x217   : > { %v3753_v5 = vsel %vm14372_vm13, %v3715_v3, 0.0  ;;  %vm14373_vm7 = vmmov %vm14368_vm0  ;;  %3818 = vst.msk [vmem:[%s11110_s6 + $0x40] sm:$0xff] %vm14368_vm0, %v3614_v7  ;;  %v3585_v31 = vsel %vm10102_vm15, 0.0, %v3561_v51  ;;  %v8797_v3 = vpop.f32.mrf.mxu0 }
 0x218   : > { %v3759_v54 = vsel %vm14373_vm7, %v3718_v58, 0.0  ;;  %vm14374_vm8 = vmmov %vm14368_vm0  ;;  %v3754_v44 = vadd.f32 %v3753_v5, %v3752_v33  ;;  %v3617_v58 = vadd.f32 %v3585_v31, %v11061_v29  ;;  %v3559_v9 = vsel %vm14378_vm2, %v3523_v61, %v3524_v13 }
 0x219   : > { %v3653_v2 = vsel %vm14374_vm8, %v3614_v7, 0.0  ;;  %vm14375_vm6 = vmmov %vm14368_vm0  ;;  %v3587_v48 = vsel %vm10125_vm1, 0.0, %v3559_v9 }
 0x21a   : > { %v3654_v32 = vadd.f32 %v3653_v2, %v3652_v11  ;;  %v3655_v63 = vsel %vm14375_vm6, %v3615_v8, 0.0  ;;  %vm14376_vm10 = vmmov %vm14368_vm0  ;;  %v3447_v2 = vpop.f32.mrf.mxu0  ;;  %v3659_v29 = vsel %vm14375_vm6, %v3617_v58, 0.0 }
 0x21b   : > { %3819 = vst.msk [vmem:[%s11110_s6 + $0x48] sm:$0xff] %vm14376_vm10, %v3615_v8  ;;  %vm14377_vm13 = vmmov %vm14368_vm0 }
 0x21c   : > { %v3755_v28 = vsel %vm14377_vm13, %v3716_v15, 0.0  ;;  %v3656_v37 = vadd.f32 %v3655_v63, %v3654_v32  ;;  %vm14379_vm7 = vmmov %vm14368_vm0  ;;  %v3719_v15 = vmul.f32 %v3617_v58, %v3617_v58  ;;  %v8798_v63 = vpop.f32.mrf.mxu0 }
 0x21d   : > { %v3756_v60 = vadd.f32 %v3755_v28, %v3754_v44  ;;  %v3757_v34 = vsel %vm14379_vm7, %v3717_v59, 0.0  ;;  %vm14381_vm8 = vmmov %vm14378_vm2  ;;  %v3619_v44 = vadd.f32 %v3587_v48, %v11087_v17  ;;  %v3529_v31 = vrot.slane %v8798_v63, 1  ;;  %v14636_v63 = vld [vmem:[#allocation10_spill] sm:$0xff] }
 0x21e   : > { %v3558_v4 = vsel %vm14381_vm8, %v3524_v13, %v3525_v24  ;;  %vm14382_vm0 = vmmov %vm14378_vm2  ;;  %v3658_v33 = vadd.f32 %v3657_v42, %v3656_v37 }
 0x21f   : > { %v3560_v7 = vsel %vm14382_vm0, %v3522_v47, %v3523_v61  ;;  %v3758_v11 = vadd.f32 %v3757_v34, %v3756_v60  ;;  %v3620_v5 = vadd.f32 %v3558_v4, %v11103_v18  ;;  %vm14384_vm10 = vmmov %vm14375_vm6  ;;  %v11281_v47 = vadd.f32 %v8774_v25, %v11027_v1  ;;  %v3450_v61 = vpop.f32.mrf.mxu0 }
 0x220   : > { %3821 = vst.msk [vmem:[%s11110_s6 + $0x58] sm:$0xff] %vm14384_vm10, %v3617_v58  ;;  %v3618_v13 = vadd.f32 %v3560_v7, %v11075_v46  ;;  %v3660_v42 = vadd.f32 %v3659_v29, %v3658_v33  ;;  %vm14385_vm13 = vmmov %vm14375_vm6  ;;  %v3721_v17 = vmul.f32 %v3619_v44, %v3619_v44  ;;  %v3528_v60 = vrot.slane %v8797_v3, 1 }
 0x221   : > { %v3760_v18 = vadd.f32 %v3759_v54, %v3758_v11  ;;  %v3722_v32 = vmul.f32 %v3620_v5, %v3620_v5  ;;  %3824 = vst.msk [vmem:[%s11110_s6 + $0x70] sm:$0xff] %vm14385_vm13, %v3620_v5  ;;  %vm14386_vm7 = vmmov %vm14375_vm6  ;;  %v11294_v54 = vadd.f32 %v11155_v19, %v11064_v21  ;;  %v3526_v34 = vrot.slane %v3447_v2, 1  ;;  %v8801_v7 = vpop.f32.mrf.mxu0 }
 0x222   : > { %v3761_v59 = vsel %vm14386_vm7, %v3719_v15, 0.0  ;;  %vm14387_vm8 = vmmov %vm14375_vm6  ;;  %v3720_v51 = vmul.f32 %v3618_v13, %v3618_v13  ;;  %v3527_v9 = vrot.slane %v3450_v61, 1 }
 0x223   : > { %v3661_v6 = vsel %vm14387_vm8, %v3618_v13, 0.0  ;;  %vm14388_vm2 = vmmov %vm14375_vm6  ;;  %v3762_v46 = vadd.f32 %v3761_v59, %v3760_v18 }
 0x224   : > { %v3663_v28 = vsel %vm14388_vm2, %v3619_v44, 0.0  ;;  %vm14389_vm0 = vmmov %vm14388_vm2  ;;  %v3662_v1 = vadd.f32 %v3661_v6, %v3660_v42  ;;  %vm14395_vm2 = vcmp.lt.s32.totalorder %v9638_v52, 7  ;;  %v3532_v6 = vrot.slane %v8801_v7, 1  ;;  %v14409_v7 = vld [vmem:[#allocation51_spill] sm:$0xff] }
 0x225   : > { %3822 = vst.msk [vmem:[%s11110_s6 + $0x60] sm:$0xff] %vm14389_vm0, %v3618_v13  ;;  %vm14390_vm6 = vmmov %vm14389_vm0  ;;  %v3557_v21 = vsel %vm14395_vm2, %v3525_v24, %v3526_v34  ;;  %v3463_v13 = vpop.f32.mrf.mxu0 }
 0x226   : > { %3823 = vst.msk [vmem:[%s11110_s6 + $0x68] sm:$0xff] %vm14390_vm6, %v3619_v44  ;;  %vm14391_vm10 = vmmov %vm14389_vm0  ;;  %v3664_v25 = vadd.f32 %v3663_v28, %v3662_v1  ;;  %v3589_v2 = vsel %vm10158_vm3, 0.0, %v3557_v21  ;;  %v3530_v42 = vrot.slane %v3463_v13, 1 }
 0x227   : > { %v3763_v37 = vsel %vm14391_vm10, %v3720_v51, 0.0  ;;  %vm14392_vm13 = vmmov %vm14389_vm0  ;;  %v3621_v44 = vadd.f32 %v3589_v2, %v11083_v22 }
 0x228   : > { %v3764_v58 = vadd.f32 %v3763_v37, %v3762_v46  ;;  %v3765_v4 = vsel %vm14392_vm13, %v3721_v17, 0.0  ;;  %vm14393_vm7 = vmmov %vm14389_vm0 }
 0x229   : > { %v3665_v11 = vsel %vm14393_vm7, %v3620_v5, 0.0  ;;  %vm14394_vm8 = vmmov %vm14389_vm0  ;;  %v3723_v28 = vmul.f32 %v3621_v44, %v3621_v44 }
 0x22a   : > { %v3767_v33 = vsel %vm14394_vm8, %v3722_v32, 0.0  ;;  %vm14396_vm0 = vmmov %vm14395_vm2  ;;  %v3766_v3 = vadd.f32 %v3765_v4, %v3764_v58  ;;  %v3666_v29 = vadd.f32 %v3665_v11, %v3664_v25 }
 0x22b   : > { %v3554_v19 = vsel %vm14396_vm0, %v3528_v60, %v3529_v31  ;;  %vm14398_vm6 = vmmov %vm14396_vm0  ;;  %v3553_v61 = vsel %vm14396_vm0, %v3529_v31, %v3530_v42 }
 0x22c   : > { %v3624_v15 = vadd.f32 %v3554_v19, %v11117_v50  ;;  %v3555_v5 = vsel %vm14398_vm6, %v3527_v9, %v3528_v60  ;;  %vm14399_vm10 = vmmov %vm14396_vm0  ;;  %v3768_v18 = vadd.f32 %v3767_v33, %v3766_v3  ;;  %v11317_v50 = vpop.f32.mrf.mxu0 }
 0x22d   : > { %v3556_v24 = vsel %vm14399_vm10, %v3526_v34, %v3527_v9  ;;  %vm14400_vm13 = vmmov %vm14393_vm7  ;;  %v3591_v59 = vsel %vm14211_vm12, 0.0, %v3555_v5  ;;  %v3533_v37 = vrot.slane %v11317_v50, 1 }
 0x22e   : > { %v3673_v32 = vsel %vm14400_vm13, %v3624_v15, 0.0  ;;  %3828 = vst.msk [vmem:[%s11110_s6 + $0x90] sm:$0xff] %vm14393_vm7, %v3624_v15  ;;  %vm14402_vm8 = vmmov %vm14393_vm7  ;;  %v3622_v51 = vadd.f32 %v3556_v24, %v11091_v53  ;;  %v3623_v46 = vadd.f32 %v3591_v59, %v11099_v45  ;;  %v3726_v17 = vmul.f32 %v3624_v15, %v3624_v15  ;;  %v3466_v60 = vpop.f32.mrf.mxu0 }
 0x22f   : > { %v3667_v22 = vsel %vm14402_vm8, %v3621_v44, 0.0  ;;  %vm14403_vm2 = vmmov %vm14393_vm7  ;;  %v3531_v3 = vrot.slane %v3466_v60, 1 }
 0x230   : > { %3825 = vst.msk [vmem:[%s11110_s6 + $0x78] sm:$0xff] %vm14403_vm2, %v3621_v44  ;;  %v3668_v1 = vadd.f32 %v3667_v22, %v3666_v29  ;;  %vm14404_vm6 = vmmov %vm14403_vm2  ;;  %v3724_v4 = vmul.f32 %v3622_v51, %v3622_v51  ;;  %v3725_v9 = vmul.f32 %v3623_v46, %v3623_v46  ;;  %v8805_v11 = vpop.f32.mrf.mxu0 }
 0x231   : > { %v3769_v34 = vsel %vm14404_vm6, %v3723_v28, 0.0  ;;  %vm14405_vm10 = vmmov %vm14403_vm2 }
 0x232   : > { %v3669_v25 = vsel %vm14405_vm10, %v3622_v51, 0.0  ;;  %vm14406_vm13 = vmmov %vm14403_vm2  ;;  %v3770_v53 = vadd.f32 %v3769_v34, %v3768_v18  ;;  %v3479_v44 = vpop.f32.mrf.mxu0 }
 0x233   : > { %v3671_v58 = vsel %vm14406_vm13, %v3623_v46, 0.0  ;;  %vm14407_vm7 = vmmov %vm14403_vm2  ;;  %v3670_v45 = vadd.f32 %v3669_v25, %v3668_v1 }
 0x234   : > { %3826 = vst.msk [vmem:[%s11110_s6 + $0x80] sm:$0xff] %vm14407_vm7, %v3622_v51  ;;  %vm14408_vm8 = vmmov %vm14403_vm2  ;;  %vm14410_vm2 = vnez %v14409_v7 }
 0x235   : > { %3827 = vst.msk [vmem:[%s11110_s6 + $0x88] sm:$0xff] %vm14408_vm8, %v3623_v46  ;;  %v3593_v31 = vsel %vm14410_vm2, 0.0, %v3553_v61  ;;  %vm14411_vm0 = vmmov %vm14404_vm6  ;;  %vm14412_vm6 = vcmp.lt.s32.totalorder %v9638_v52, 7  ;;  %v3672_v2 = vadd.f32 %v3671_v58, %v3670_v45 }
 0x236   : > { %v3771_v33 = vsel %vm14411_vm0, %v3724_v4, 0.0  ;;  %v3625_v21 = vadd.f32 %v3593_v31, %v11095_v40  ;;  %v3550_v19 = vsel %vm14412_vm6, %v3532_v6, %v3533_v37  ;;  %vm14413_vm10 = vmmov %vm14411_vm0  ;;  %v3534_v4 = vrot.slane %v3479_v44, 1 }
 0x237   : > { %v3772_v29 = vadd.f32 %v3771_v33, %v3770_v53  ;;  %v3773_v15 = vsel %vm14413_vm10, %v3725_v9, 0.0  ;;  %v3628_v13 = vadd.f32 %v3550_v19, %v11140_v55  ;;  %vm14414_vm13 = vmmov %vm14411_vm0  ;;  %v3674_v22 = vadd.f32 %v3673_v32, %v3672_v2  ;;  %v11353_v55 = vpop.f32.mrf.mxu0 }
 0x238   : > { %v3675_v5 = vsel %vm14414_vm13, %v3625_v21, 0.0  ;;  %v3727_v24 = vmul.f32 %v3625_v21, %v3625_v21  ;;  %vm14415_vm7 = vmmov %vm14411_vm0  ;;  %v3536_v32 = vrot.slane %v8805_v11, 1  ;;  %v3537_v53 = vrot.slane %v11353_v55, 1 }
 0x239   : > { %3829 = vst.msk [vmem:[%s11110_s6 + $0x98] sm:$0xff] %vm14415_vm7, %v3625_v21  ;;  %vm14416_vm8 = vmmov %vm14412_vm6  ;;  %v3774_v50 = vadd.f32 %v3773_v15, %v3772_v29  ;;  %v3730_v46 = vmul.f32 %v3628_v13, %v3628_v13  ;;  %v3676_v61 = vadd.f32 %v3675_v5, %v3674_v22  ;;  %v3482_v34 = vpop.f32.mrf.mxu0  ;;  %v14430_v15 = vld [vmem:[#allocation12_spill] sm:$0xff] }
 0x23a   : > { %v3551_v40 = vsel %vm14416_vm8, %v3531_v3, %v3532_v6  ;;  %vm14417_vm0 = vmmov %vm14412_vm6  ;;  %v3535_v19 = vrot.slane %v3482_v34, 1 }
 0x23b   : > { %v3552_v18 = vsel %vm14417_vm0, %v3530_v42, %v3531_v3  ;;  %vm14418_vm6 = vmmov %vm14415_vm7  ;;  %v3595_v6 = vsel %vm14243_vm11, 0.0, %v3551_v40 }
 0x23c   : > { %v3775_v59 = vsel %vm14418_vm6, %v3726_v17, 0.0  ;;  %vm14419_vm10 = vmmov %vm14418_vm6  ;;  %v3626_v42 = vadd.f32 %v3552_v18, %v11121_v56  ;;  %v3627_v60 = vadd.f32 %v3595_v6, %v11130_v23  ;;  %v8809_v56 = vpop.f32.mrf.mxu0 }
 0x23d   : > { %v3681_v28 = vsel %vm14419_vm10, %v3628_v13, 0.0  ;;  %vm14420_vm2 = vmmov %vm14418_vm6  ;;  %v3776_v17 = vadd.f32 %v3775_v59, %v3774_v50  ;;  %vm14427_vm10 = vcmp.lt.s32.totalorder %v9638_v52, 7  ;;  %v14434_v50 = vld [vmem:[#allocation13_spill] sm:$0xff] }
 0x23e   : > { %3832 = vst.msk [vmem:[%s11110_s6 + $0xb0] sm:$0xff] %vm14420_vm2, %v3628_v13  ;;  %vm14421_vm13 = vmmov %vm14420_vm2  ;;  %v3728_v58 = vmul.f32 %v3626_v42, %v3626_v42  ;;  %v3729_v33 = vmul.f32 %v3627_v60, %v3627_v60  ;;  %v3549_v11 = vsel %vm14427_vm10, %v3533_v37, %v3534_v4  ;;  %v3495_v44 = vpop.f32.mrf.mxu0 }
 0x23f   : > { %v3777_v51 = vsel %vm14421_vm13, %v3727_v24, 0.0  ;;  %vm14423_vm7 = vmmov %vm14420_vm2  ;;  %3830 = vst.msk [vmem:[%s11110_s6 + $0xa0] sm:$0xff] %vm14420_vm2, %v3626_v42 }
 0x240   : > { %v3677_v25 = vsel %vm14423_vm7, %v3626_v42, 0.0  ;;  %v3778_v45 = vadd.f32 %v3777_v51, %v3776_v17  ;;  %vm14424_vm8 = vmmov %vm14420_vm2  ;;  %v8810_v51 = vpop.f32.mrf.mxu0 }
 0x241   : > { %v3678_v9 = vadd.f32 %v3677_v25, %v3676_v61  ;;  %v3679_v31 = vsel %vm14424_vm8, %v3627_v60, 0.0  ;;  %vm14425_vm0 = vmmov %vm14420_vm2  ;;  %vm14431_vm2 = vnez %v14430_v15  ;;  %v3540_v25 = vrot.slane %v8809_v56, 1 }
 0x242   : > { %3831 = vst.msk [vmem:[%s11110_s6 + $0xa8] sm:$0xff] %vm14425_vm0, %v3627_v60  ;;  %vm14426_vm6 = vmmov %vm14425_vm0  ;;  %v3597_v13 = vsel %vm14431_vm2, 0.0, %v3549_v11 }
 0x243   : > { %v3779_v23 = vsel %vm14426_vm6, %v3728_v58, 0.0  ;;  %vm14428_vm13 = vmmov %vm14427_vm10  ;;  %v3680_v3 = vadd.f32 %v3679_v31, %v3678_v9  ;;  %v3629_v5 = vadd.f32 %v3597_v13, %v11125_v62  ;;  %vm14435_vm6 = vnez %v14434_v50 }
 0x244   : > { %v3546_v21 = vsel %vm14428_vm13, %v3536_v32, %v3537_v53  ;;  %v3780_v2 = vadd.f32 %v3779_v23, %v3778_v45  ;;  %vm14429_vm7 = vmmov %vm14425_vm0  ;;  %v3538_v31 = vrot.slane %v3495_v44, 1 }
 0x245   : > { %v3781_v29 = vsel %vm14429_vm7, %v3729_v33, 0.0  ;;  %v3632_v24 = vadd.f32 %v3546_v21, %v11159_v49  ;;  %vm14432_vm8 = vmmov %vm14427_vm10  ;;  %v3682_v59 = vadd.f32 %v3681_v28, %v3680_v3  ;;  %v3731_v49 = vmul.f32 %v3629_v5, %v3629_v5  ;;  %3833 = vst.msk [vmem:[%s11110_s6 + $0xb8] sm:$0xff] %vm14429_vm7, %v3629_v5 }
 0x246   : > { %v3547_v37 = vsel %vm14432_vm8, %v3535_v19, %v3536_v32  ;;  %vm14433_vm0 = vmmov %vm14432_vm8  ;;  %v3782_v18 = vadd.f32 %v3781_v29, %v3780_v2  ;;  %v3541_v33 = vrot.slane %v8810_v51, 1  ;;  %v3288_v2 = vpop.f32.mrf.mxu1 }
 0x247   : > { %v3548_v40 = vsel %vm14433_vm0, %v3534_v4, %v3535_v19  ;;  %v3599_v22 = vsel %vm14435_vm6, 0.0, %v3547_v37  ;;  %vm14436_vm10 = vmmov %vm14429_vm7  ;;  %v3734_v42 = vmul.f32 %v3632_v24, %v3632_v24 }
 0x248   : > { %v3630_v55 = vadd.f32 %v3548_v40, %v11143_v16  ;;  %v3783_v6 = vsel %vm14436_vm10, %v3730_v46, 0.0  ;;  %vm14437_vm13 = vmmov %vm14429_vm7  ;;  %v3631_v28 = vadd.f32 %v3599_v22, %v11153_v41  ;;  %v3498_v16 = vpop.f32.mrf.mxu0 }
 0x249   : > { %v3683_v62 = vsel %vm14437_vm13, %v3629_v5, 0.0  ;;  %vm14438_vm8 = vmmov %vm14429_vm7  ;;  %v3784_v17 = vadd.f32 %v3783_v6, %v3782_v18  ;;  %v3539_v23 = vrot.slane %v3498_v16, 1  ;;  %v14456_v6 = vld [vmem:[#allocation16_spill] sm:$0xff] }
 0x24a   : > { %3836 = vst.msk [vmem:[%s11110_s6 + $0xd0] sm:$0xff] %vm14438_vm8, %v3632_v24  ;;  %v3684_v61 = vadd.f32 %v3683_v62, %v3682_v59  ;;  %vm14439_vm0 = vmmov %vm14429_vm7  ;;  %v3732_v34 = vmul.f32 %v3630_v55, %v3630_v55  ;;  %v3733_v9 = vmul.f32 %v3631_v28, %v3631_v28 }
 0x24b   : > { %v3685_v60 = vsel %vm14439_vm0, %v3630_v55, 0.0  ;;  %vm14440_vm6 = vmmov %vm14439_vm0 }
 0x24c   : > { %3834 = vst.msk [vmem:[%s11110_s6 + $0xc0] sm:$0xff] %vm14440_vm6, %v3630_v55  ;;  %vm14441_vm2 = vmmov %vm14439_vm0  ;;  %v3686_v4 = vadd.f32 %v3685_v60, %v3684_v61  ;;  %v3329_v55 = vadd.f32 %v3288_v2, %v11067_v43  ;;  %v11435_v43 = vld [vmem:[%s13735_s2 + $0x38] sm:$0xff]  }
 0x24d   : > { %v3785_v46 = vsel %vm14441_vm2, %v3731_v49, 0.0  ;;  %vm14442_vm10 = vmmov %vm14439_vm0  ;;  %8919 = vmatprep.subr.bf16.mxu0 %v11435_v43 }
 0x24e   : > { %v3689_v32 = vsel %vm14442_vm10, %v3632_v24, 0.0  ;;  %v3786_v58 = vadd.f32 %v3785_v46, %v3784_v17  ;;  %vm14443_vm13 = vmmov %vm14439_vm0  ;;  %v14452_v24 = vld [vmem:[#allocation15_spill] sm:$0xff] }
 0x24f   : > { %v3687_v45 = vsel %vm14443_vm13, %v3631_v28, 0.0  ;;  %vm14444_vm7 = vmmov %vm14439_vm0 }
 0x250   : > { %3835 = vst.msk [vmem:[%s11110_s6 + $0xc8] sm:$0xff] %vm14444_vm7, %v3631_v28  ;;  %vm14445_vm8 = vmmov %vm14439_vm0  ;;  %v3688_v21 = vadd.f32 %v3687_v45, %v3686_v4 }
 0x251   : > { %v3787_v41 = vsel %vm14445_vm8, %v3732_v34, 0.0  ;;  %vm14446_vm6 = vmmov %vm14439_vm0  ;;  %vm14453_vm8 = vnez %v14452_v24 }
 0x252   : > { %v3791_v11 = vsel %vm14446_vm6, %v3734_v42, 0.0  ;;  %v3788_v19 = vadd.f32 %v3787_v41, %v3786_v58  ;;  %vm14447_vm2 = vmmov %vm14439_vm0  ;;  %vm14448_vm0 = vcmp.lt.s32.totalorder %v9638_v52, 7  ;;  %v3690_v40 = vadd.f32 %v3689_v32, %v3688_v21 }
 0x253   : > { %v3789_v3 = vsel %vm14447_vm2, %v3733_v9, 0.0  ;;  %v3545_v56 = vsel %vm14448_vm0, %v3537_v53, %v3538_v31  ;;  %vm14449_vm10 = vmmov %vm14448_vm0  ;;  %vm14457_vm2 = vnez %v14456_v6 }
 0x254   : > { %v3542_v29 = vsel %vm14449_vm10, %v3540_v25, %v3541_v33  ;;  %vm14450_vm13 = vmmov %vm14448_vm0  ;;  %v3790_v5 = vadd.f32 %v3789_v3, %v3788_v19  ;;  %v3601_v37 = vsel %vm14453_vm8, 0.0, %v3545_v56 }
 0x255   : > { %v3573_v13 = vsel %vm14450_vm13, %v3541_v33, %v3510_v26  ;;  %vm14451_vm7 = vmmov %vm14448_vm0  ;;  %v3633_v59 = vadd.f32 %v3601_v37, %v11146_v10  ;;  %v3636_v27 = vadd.f32 %v3542_v29, %v11294_v54 }
 0x256   : > { %v3543_v44 = vsel %vm14451_vm7, %v3539_v23, %v3540_v25  ;;  %v3605_v18 = vsel %vm10342_vm4, 0.0, %v3573_v13  ;;  %vm14455_vm6 = vmmov %vm14448_vm0  ;;  %v3792_v51 = vadd.f32 %v3791_v11, %v3790_v5  ;;  %vm14458_vm0 = vcmask 261120  }
 0x257   : > { %v3637_v26 = vadd.f32 %v3605_v18, %v11281_v47  ;;  %v3544_v22 = vsel %vm14455_vm6, %v3538_v31, %v3539_v23  ;;  %v3603_v62 = vsel %vm14457_vm2, 0.0, %v3543_v44  ;;  %v3691_v42 = vsel %vm14458_vm0, %v3633_v59, 0.0  ;;  %vm14459_vm10 = vmmov %vm14458_vm0 }
 0x258   : > { %v3634_v49 = vadd.f32 %v3544_v22, %v11207_v57  ;;  %v3735_v10 = vmul.f32 %v3633_v59, %v3633_v59  ;;  %3837 = vst.msk [vmem:[%s11110_s6 + $0xd8] sm:$0xff] %vm14459_vm10, %v3633_v59  ;;  %vm14460_vm13 = vmmov %vm14458_vm0  ;;  %v3692_v47 = vadd.f32 %v3691_v42, %v3690_v40  ;;  %v3635_v54 = vadd.f32 %v3603_v62, %v3329_v55  ;;  %v11456_v42 = vld [vmem:[%s11110_s6] sm:$0xff] }
 0x259   : > { %3840 = vst.msk [vmem:[%s11110_s6 + $0xf0] sm:$0xff] %vm14460_vm13, %v3636_v27  ;;  %vm14461_vm7 = vmmov %vm14458_vm0  ;;  %v3738_v16 = vmul.f32 %v3636_v27, %v3636_v27  ;;  %v3739_v45 = vmul.f32 %v3637_v26, %v3637_v26 }
 0x25a   : > { %3841 = vst.msk [vmem:[%s11110_s6 + $0xf8] sm:$0xff] %vm14461_vm7, %v3637_v26  ;;  %vm14462_vm6 = vmmov %vm14458_vm0  ;;  %v3736_v17 = vmul.f32 %v3634_v49, %v3634_v49  ;;  %v3737_v32 = vmul.f32 %v3635_v54, %v3635_v54 }
 0x25b   : > { %3838 = vst.msk [vmem:[%s11110_s6 + $0xe0] sm:$0xff] %vm14462_vm6, %v3634_v49  ;;  %vm14463_vm2 = vmmov %vm14458_vm0  ;;  %v3801_v19 = vsel %vm14458_vm0, %v3739_v45, 0.0 }
 0x25c   : > { %v3793_v57 = vsel %vm14463_vm2, %v3735_v10, 0.0  ;;  %vm14464_vm4 = vmmov %vm14458_vm0  ;;  %3839 = vst.msk [vmem:[%s11110_s6 + $0xe8] sm:$0xff] %vm14458_vm0, %v3635_v54  ;;  %v11459_v10 = vld [vmem:[%s11110_s6 + $0x8] sm:$0xff] }
 0x25d   : > { %v3693_v61 = vsel %vm14464_vm4, %v3634_v49, 0.0  ;;  %v3794_v28 = vadd.f32 %v3793_v57, %v3792_v51  ;;  %vm14465_vm10 = vmmov %vm14458_vm0  ;;  %v11468_v57 = vld [vmem:[%s11110_s6 + $0x20] sm:$0xff] }
 0x25e   : > { %v3694_v60 = vadd.f32 %v3693_v61, %v3692_v47  ;;  %v3695_v46 = vsel %vm14465_vm10, %v3635_v54, 0.0  ;;  %vm14466_vm13 = vmmov %vm14458_vm0  ;;  %v11462_v47 = vld [vmem:[%s11110_s6 + $0x10] sm:$0xff]  ;;  %v11465_v54 = vld [vmem:[%s11110_s6 + $0x18] sm:$0xff]  ;;  %vm14471_vm10 = vcmask 257024  }
 0x25f   : > { %v3795_v34 = vsel %vm14466_vm13, %v3736_v17, 0.0  ;;  %vm14467_vm7 = vmmov %vm14458_vm0  ;;  %v11471_v61 = vld [vmem:[%s11110_s6 + $0x28] sm:$0xff]  ;;  %v11474_v17 = vld [vmem:[%s11110_s6 + $0x30] sm:$0xff] }
 0x260   : > { %v3696_v25 = vadd.f32 %v3695_v46, %v3694_v60  ;;  %v3796_v58 = vadd.f32 %v3795_v34, %v3794_v28  ;;  %v3697_v4 = vsel %vm14467_vm7, %v3636_v27, 0.0  ;;  %vm14468_vm2 = vmmov %vm14458_vm0  ;;  %v11477_v28 = vld [vmem:[%s11110_s6 + $0x38] sm:$0xff]  ;;  %v11482_v46 = vld [vmem:[%s11110_s6 + $0x50] sm:$0xff] }
 0x261   : > { %v3797_v9 = vsel %vm14468_vm2, %v3737_v32, 0.0  ;;  %vm14469_vm4 = vmmov %vm14458_vm0  ;;  %v11485_v32 = vld [vmem:[%s11110_s6 + $0x40] sm:$0xff]  ;;  %v11488_v34 = vld [vmem:[%s11110_s6 + $0x48] sm:$0xff] }
 0x262   : > { %v3698_v41 = vadd.f32 %v3697_v4, %v3696_v25  ;;  %v3798_v31 = vadd.f32 %v3797_v9, %v3796_v58  ;;  %v3699_v33 = vsel %vm14469_vm4, %v3637_v26, 0.0  ;;  %vm14470_vm6 = vmmov %vm14458_vm0  ;;  %v3876_v60 = vld [vmem:[%s11110_s6 + $0xe0] sm:$0xff]  ;;  %v11491_v25 = vld [vmem:[%s11110_s6 + $0x58] sm:$0xff] }
 0x263   : > { %v3799_v23 = vsel %vm14470_vm6, %v3738_v16, 0.0  ;;  %v3877_v16 = vld [vmem:[%s11110_s6 + $0xe8] sm:$0xff]  ;;  %vm14472_vm13 = vmmov %vm14471_vm10 }
 0x264   : > { %v3700_v11 = vadd.f32 %v3699_v33, %v3698_v41  ;;  %v3800_v21 = vadd.f32 %v3799_v23, %v3798_v31  ;;  %v11500_v41 = vld [vmem:[%s11110_s6 + $0x70] sm:$0xff]  ;;  %v11503_v31 = vld [vmem:[%s11110_s6 + $0x60] sm:$0xff]  ;;  %v11506_v33 = vld [vmem:[%s11110_s6 + $0x68] sm:$0xff] }
 0x265   : > { %vm14473_vm7 = vmmov %vm14471_vm10 }
 0x266   : > { %v3701_v3 = vrot.slane %v3700_v11, 4  ;;  %v3802_v2 = vadd.f32 %v3801_v19, %v3800_v21  ;;  %vm14474_vm2 = vmmov %vm14473_vm7 }
 0x267   : > { %vm14475_vm4 = vmmov %vm14474_vm2 }
 0x268   : > { %v3702_v56 = vadd.f32 %v3701_v3, %v3700_v11  ;;  %v3803_v29 = vrot.slane %v3802_v2, 4  ;;  %v3863_v3 = vld [vmem:[%s11110_s6 + $0x78] sm:$0xff]  ;;  %vm14476_vm6 = vmmov %vm14474_vm2 }
 0x269   : > { %vm14477_vm0 = vmmov %vm14474_vm2 }
 0x26a   : > { %v3703_v13 = vrot.slane %v3702_v56, 2  ;;  %v3804_v44 = vadd.f32 %v3803_v29, %v3802_v2  ;;  %v11518_v2 = vld [vmem:[%s11110_s6 + $0x90] sm:$0xff]  ;;  %vm14482_vm8 = vmmov %vm14477_vm0 }
 0x26b   : > { %vm14493_vm11 = vmmov %vm14477_vm0 }
 0x26c   : > { %v3704_v5 = vadd.f32 %v3703_v13, %v3702_v56  ;;  %v3805_v37 = vrot.slane %v3804_v44, 2  ;;  %v3864_v56 = vld [vmem:[%s11110_s6 + $0x80] sm:$0xff] }
 0x26e   : > { %v3705_v40 = vrot.slane %v3704_v5, 1  ;;  %v3806_v18 = vadd.f32 %v3805_v37, %v3804_v44  ;;  %v3865_v37 = vld [vmem:[%s11110_s6 + $0x88] sm:$0xff] }
 0x270   : > { %v3706_v59 = vadd.f32 %v3705_v40, %v3704_v5  ;;  %v3807_v27 = vrot.slane %v3806_v18, 1  ;;  %v3867_v40 = vld [vmem:[%s11110_s6 + $0x98] sm:$0xff] }
 0x272   : > { %v3808_v26 = vadd.f32 %v3807_v27, %v3806_v18  ;;  %v11451_v22 = vmul.f32 0.00390625, %v3706_v59  ;;  %v3870_v18 = vld [vmem:[%s11110_s6 + $0xb0] sm:$0xff] }
 0x274   : > { %v3843_v55 = vmul.f32 0.00390625, %v3808_v26  ;;  %v3844_v51 = vmul.f32 %v11451_v22, %v11451_v22  ;;  %v3908_v58 = vsub.f32 %v3876_v60, %v11451_v22  ;;  %v3909_v4 = vsub.f32 %v3877_v16, %v11451_v22 }
 0x275   : > { %v3880_v45 = vsub.f32 %v11456_v42, %v11451_v22  ;;  %v3881_v9 = vsub.f32 %v11459_v10, %v11451_v22  ;;  %v3882_v23 = vsub.f32 %v11462_v47, %v11451_v22  ;;  %v3883_v11 = vsub.f32 %v11465_v54, %v11451_v22 }
 0x276   : > { %v3845_v62 = vsub.f32 %v3843_v55, %v3844_v51  ;;  %v3884_v21 = vsub.f32 %v11468_v57, %v11451_v22  ;;  %v3885_v19 = vsub.f32 %v11471_v61, %v11451_v22  ;;  %v3886_v29 = vsub.f32 %v11474_v17, %v11451_v22  ;;  %v3868_v51 = vld [vmem:[%s11110_s6 + $0xa0] sm:$0xff]  ;;  %v3874_v57 = vld [vmem:[%s11110_s6 + $0xd0] sm:$0xff]  ;;  %v3873_v17 = vld [vmem:[%s11110_s6 + $0xc8] sm:$0xff] }
 0x277   : > { %v3887_v13 = vsub.f32 %v11477_v28, %v11451_v22  ;;  %v3888_v44 = vsub.f32 %v11485_v32, %v11451_v22  ;;  %v3889_v5 = vsub.f32 %v11488_v34, %v11451_v22  ;;  %v3890_v59 = vsub.f32 %v11482_v46, %v11451_v22  ;;  %v3872_v61 = vld [vmem:[%s11110_s6 + $0xc0] sm:$0xff]  ;;  %v3875_v32 = vld [vmem:[%s11110_s6 + $0xd8] sm:$0xff]  ;;  %v3878_v34 = vld [vmem:[%s11110_s6 + $0xf0] sm:$0xff] }
 0x278   : > { %v3846_v49 = vadd.f32 1e-05, %v3845_v62  ;;  %v3891_v27 = vsub.f32 %v11491_v25, %v11451_v22  ;;  %v3892_v26 = vsub.f32 %v11503_v31, %v11451_v22  ;;  %v3893_v55 = vsub.f32 %v11506_v33, %v11451_v22  ;;  %v3869_v62 = vld [vmem:[%s11110_s6 + $0xa8] sm:$0xff]  ;;  %v3879_v25 = vld [vmem:[%s11110_s6 + $0xf8] sm:$0xff] }
 0x279   : > { %v3894_v42 = vsub.f32 %v11500_v41, %v11451_v22  ;;  %v3895_v10 = vsub.f32 %v3863_v3, %v11451_v22  ;;  %v3896_v47 = vsub.f32 %v3864_v56, %v11451_v22  ;;  %v3897_v54 = vsub.f32 %v3865_v37, %v11451_v22 }
 0x27a   : > { %9276 = vrsqrt.f32 %v3846_v49  ;;  %v3871_v49 = vld [vmem:[%s11110_s6 + $0xb8] sm:$0xff]  ;;  %v3898_v28 = vsub.f32 %v11518_v2, %v11451_v22  ;;  %v3899_v60 = vsub.f32 %v3867_v40, %v11451_v22  ;;  %v3900_v16 = vsub.f32 %v3868_v51, %v11451_v22 }
 0x27b   : > { %v3901_v46 = vsub.f32 %v3869_v62, %v11451_v22  ;;  %v3902_v41 = vsub.f32 %v3870_v18, %v11451_v22  ;;  %v3903_v31 = vsub.f32 %v3871_v49, %v11451_v22  ;;  %v3904_v33 = vsub.f32 %v3872_v61, %v11451_v22 }
 0x27c   : > { %v3905_v3 = vsub.f32 %v3873_v17, %v11451_v22  ;;  %v3906_v2 = vsub.f32 %v3874_v57, %v11451_v22  ;;  %v3907_v37 = vsub.f32 %v3875_v32, %v11451_v22  ;;  %v3910_v40 = vsub.f32 %v3878_v34, %v11451_v22 }
 0x27d   : > { %v3911_v51 = vsub.f32 %v3879_v25, %v11451_v22 }
 0x287   : > { %v9277_v56 = vpop.eup %9276 }
 0x288   : > { %v3940_v62 = vmul.f32 %v9277_v56, %v3908_v58  ;;  %v3941_v6 = vmul.f32 %v9277_v56, %v3909_v4  ;;  %v11567_v53 = vmul.f32 %v9277_v56, %v3880_v45  ;;  %v11569_v18 = vmul.f32 %v9277_v56, %v3881_v9 }
 0x289   : > { %v11571_v49 = vmul.f32 %v9277_v56, %v3882_v23  ;;  %v11573_v61 = vmul.f32 %v9277_v56, %v3883_v11  ;;  %v11575_v17 = vmul.f32 %v9277_v56, %v3884_v21  ;;  %v11577_v24 = vmul.f32 %v9277_v56, %v3885_v19 }
 0x28a   : > { %v3972_v57 = vmax.f32 %v3940_v62, 0.0  ;;  %v3973_v32 = vmax.f32 %v3941_v6, 0.0  ;;  %v11579_v50 = vmul.f32 %v9277_v56, %v3886_v29  ;;  %v11581_v34 = vmul.f32 %v9277_v56, %v3887_v13 }
 0x28b   : > { %v11583_v22 = vmul.f32 %v9277_v56, %v3888_v44  ;;  %v11585_v58 = vmul.f32 %v9277_v56, %v3889_v5  ;;  %v11587_v4 = vmul.f32 %v9277_v56, %v3890_v59  ;;  %v11589_v45 = vmul.f32 %v9277_v56, %v3891_v27 }
 0x28c   : > { %v8159_v9 = vpack.c.bf16 %v3972_v57, %v3972_v57  ;;  %v8160_v23 = vpack.c.bf16 %v3973_v32, %v3973_v32  ;;  %v11591_v11 = vmul.f32 %v9277_v56, %v3892_v26  ;;  %v11593_v21 = vmul.f32 %v9277_v56, %v3893_v55 }
 0x28d   : > { %v11595_v19 = vmul.f32 %v9277_v56, %v3894_v42  ;;  %v11597_v6 = vmul.f32 %v9277_v56, %v3895_v10  ;;  %v11599_v29 = vmul.f32 %v9277_v56, %v3896_v47  ;;  %v11601_v13 = vmul.f32 %v9277_v56, %v3897_v54 }
 0x28e   : > { %4132 = vst.msk [vmem:[#allocation2 + $0x78] sm:$0xf] %vm14471_vm10, %v8159_v9  ;;  %v11605_v44 = vmul.f32 %v9277_v56, %v3898_v28  ;;  %v11607_v5 = vmul.f32 %v9277_v56, %v3899_v60  ;;  %v11609_v59 = vmul.f32 %v9277_v56, %v3900_v16  ;;  %v11611_v27 = vmul.f32 %v9277_v56, %v3901_v46  ;;  %vm14478_vm10 = vmmov %vm14477_vm0 }
 0x28f   : > { %4133 = vst.msk [vmem:[#allocation2 + $0x7c] sm:$0xf] %vm14472_vm13, %v8160_v23  ;;  %v11613_v26 = vmul.f32 %v9277_v56, %v3902_v41  ;;  %v11615_v55 = vmul.f32 %v9277_v56, %v3903_v31  ;;  %v11617_v42 = vmul.f32 %v9277_v56, %v3904_v33  ;;  %v11619_v10 = vmul.f32 %v9277_v56, %v3905_v3  ;;  %vm14479_vm13 = vmmov %vm14477_vm0 }
 0x290   : > { %v11621_v47 = vmul.f32 %v9277_v56, %v3906_v2  ;;  %v11623_v54 = vmul.f32 %v9277_v56, %v3907_v37  ;;  %v11625_v28 = vmul.f32 %v9277_v56, %v3910_v40  ;;  %v11627_v60 = vmul.f32 %v9277_v56, %v3911_v51 }
 0x291   : > { %v3944_v16 = vmax.f32 %v11567_v53, 0.0  ;;  %v3945_v46 = vmax.f32 %v11569_v18, 0.0  ;;  %v3946_v25 = vmax.f32 %v11571_v49, 0.0  ;;  %v3947_v41 = vmax.f32 %v11573_v61, 0.0 }
 0x292   : > { %v3948_v31 = vmax.f32 %v11575_v17, 0.0  ;;  %v3949_v33 = vmax.f32 %v11577_v24, 0.0  ;;  %v3950_v3 = vmax.f32 %v11579_v50, 0.0  ;;  %v3951_v2 = vmax.f32 %v11581_v34, 0.0 }
 0x293   : > { %v3952_v37 = vmax.f32 %v11583_v22, 0.0  ;;  %v3953_v56 = vmax.f32 %v11585_v58, 0.0  ;;  %v3954_v53 = vmax.f32 %v11587_v4, 0.0  ;;  %v3955_v40 = vmax.f32 %v11589_v45, 0.0 }
 0x294   : > { %v3956_v51 = vmax.f32 %v11591_v11, 0.0  ;;  %v3957_v62 = vmax.f32 %v11593_v21, 0.0  ;;  %v3958_v18 = vmax.f32 %v11595_v19, 0.0  ;;  %v3959_v24 = vmax.f32 %v11597_v6, 0.0 }
 0x295   : > { %v3960_v50 = vmax.f32 %v11599_v29, 0.0  ;;  %v3961_v49 = vmax.f32 %v11601_v13, 0.0  ;;  %v3962_v61 = vmax.f32 %v11605_v44, 0.0  ;;  %v3963_v17 = vmax.f32 %v11607_v5, 0.0 }
 0x296   : > { %v3964_v57 = vmax.f32 %v11609_v59, 0.0  ;;  %v3965_v32 = vmax.f32 %v11611_v27, 0.0  ;;  %v3966_v34 = vmax.f32 %v11613_v26, 0.0  ;;  %v3967_v22 = vmax.f32 %v11615_v55, 0.0 }
 0x297   : > { %v3968_v58 = vmax.f32 %v11617_v42, 0.0  ;;  %v3969_v4 = vmax.f32 %v11619_v10, 0.0  ;;  %v3970_v45 = vmax.f32 %v11621_v47, 0.0  ;;  %v3971_v9 = vmax.f32 %v11623_v54, 0.0 }
 0x298   : > { %v3974_v23 = vmax.f32 %v11625_v28, 0.0  ;;  %v3975_v11 = vmax.f32 %v11627_v60, 0.0  ;;  %v8131_v21 = vpack.c.bf16 %v3944_v16, %v3944_v16  ;;  %v8132_v19 = vpack.c.bf16 %v3945_v46, %v3945_v46 }
 0x299   : > { %v8133_v6 = vpack.c.bf16 %v3946_v25, %v3946_v25  ;;  %v8134_v29 = vpack.c.bf16 %v3947_v41, %v3947_v41  ;;  %v8135_v13 = vpack.c.bf16 %v3948_v31, %v3948_v31  ;;  %v8136_v44 = vpack.c.bf16 %v3949_v33, %v3949_v33 }
 0x29a   : > { %v8137_v5 = vpack.c.bf16 %v3950_v3, %v3950_v3  ;;  %v8138_v59 = vpack.c.bf16 %v3951_v2, %v3951_v2  ;;  %v8139_v27 = vpack.c.bf16 %v3952_v37, %v3952_v37  ;;  %v8140_v26 = vpack.c.bf16 %v3953_v56, %v3953_v56  ;;  %4104 = vst.msk [vmem:[#allocation2 + $0x8] sm:$0xf] %vm14473_vm7, %v8131_v21  ;;  %vm14480_vm7 = vmmov %vm14477_vm0 }
 0x29b   : > { %4105 = vst.msk [vmem:[#allocation2 + $0xc] sm:$0xf] %vm14474_vm2, %v8132_v19  ;;  %v8141_v55 = vpack.c.bf16 %v3954_v53, %v3954_v53  ;;  %v8142_v42 = vpack.c.bf16 %v3955_v40, %v3955_v40  ;;  %v8143_v10 = vpack.c.bf16 %v3956_v51, %v3956_v51  ;;  %v8144_v47 = vpack.c.bf16 %v3957_v62, %v3957_v62  ;;  %vm14481_vm2 = vmmov %vm14477_vm0  ;;  %v9224_v62 = vld [vmem:[%s13735_s2 + $0x20] sm:$0xff]   ;;  %v9231_v19 = vld [vmem:[#allocation2 + $0x78] sm:$0xff]  }
 0x29c   : > { %4106 = vst.msk [vmem:[#allocation2 + $0x10] sm:$0xf] %vm14475_vm4, %v8133_v6  ;;  %v8145_v54 = vpack.c.bf16 %v3958_v18, %v3958_v18  ;;  %v8146_v28 = vpack.c.bf16 %v3959_v24, %v3959_v24  ;;  %v8147_v60 = vpack.c.bf16 %v3960_v50, %v3960_v50  ;;  %v8148_v16 = vpack.c.bf16 %v3961_v49, %v3961_v49  ;;  %vm14483_vm4 = vmmov %vm14477_vm0  ;;  %v9234_v50 = vld [vmem:[%s13735_s2 + $0x30] sm:$0xff]   ;;  %v9280_v49 = vld [vmem:[%s13735_s2 + $0x28] sm:$0xff]  }
 0x29d   : > { %4107 = vst.msk [vmem:[#allocation2 + $0x14] sm:$0xf] %vm14476_vm6, %v8134_v29  ;;  %v8149_v46 = vpack.c.bf16 %v3962_v61, %v3962_v61  ;;  %v8150_v25 = vpack.c.bf16 %v3963_v17, %v3963_v17  ;;  %v8151_v41 = vpack.c.bf16 %v3964_v57, %v3964_v57  ;;  %v8152_v31 = vpack.c.bf16 %v3965_v32, %v3965_v32  ;;  %vm14484_vm6 = vmmov %vm14477_vm0  ;;  %v9235_v61 = vld [vmem:[%s13735_s2 + $0x48] sm:$0xff]   ;;  %v9252_v17 = vld [vmem:[%s13735_s2 + $0x58] sm:$0xff]  }
 0x29e   : > { %4108 = vst.msk [vmem:[#allocation2 + $0x18] sm:$0xf] %vm14477_vm0, %v8135_v13  ;;  %4116 = vst.msk [vmem:[#allocation2 + $0x38] sm:$0xf] %vm14477_vm0, %v8143_v10  ;;  %v8153_v33 = vpack.c.bf16 %v3966_v34, %v3966_v34  ;;  %v8154_v3 = vpack.c.bf16 %v3967_v22, %v3967_v22  ;;  %v8155_v2 = vpack.c.bf16 %v3968_v58, %v3968_v58  ;;  %v9281_v29 = vld [vmem:[#allocation2] sm:$0xff]  }
 0x29f   : > { %4109 = vst.msk [vmem:[#allocation2 + $0x1c] sm:$0xf] %vm14478_vm10, %v8136_v44  ;;  %vm14485_vm10 = vmmov %vm14477_vm0  ;;  %v8156_v37 = vpack.c.bf16 %v3969_v4, %v3969_v4  ;;  %v8157_v56 = vpack.c.bf16 %v3970_v45, %v3970_v45  ;;  %v8158_v53 = vpack.c.bf16 %v3971_v9, %v3971_v9  ;;  %v8161_v40 = vpack.c.bf16 %v3974_v23, %v3974_v23  ;;  %v9244_v44 = vld [vmem:[%s13735_s2 + $0x40] sm:$0xff]  }
 0x2a0   : > { %4110 = vst.msk [vmem:[#allocation2 + $0x20] sm:$0xf] %vm14479_vm13, %v8137_v5  ;;  %vm14486_vm13 = vmmov %vm14477_vm0  ;;  %v8162_v51 = vpack.c.bf16 %v3975_v11, %v3975_v11 }
 0x2a1   : > { %4111 = vst.msk [vmem:[#allocation2 + $0x24] sm:$0xf] %vm14480_vm7, %v8138_v59  ;;  %vm14487_vm7 = vmmov %vm14477_vm0  ;;  %v9253_v59 = vld [vmem:[%s13735_s2 + $0x50] sm:$0xff]  }
 0x2a2   : > { %4112 = vst.msk [vmem:[#allocation2 + $0x28] sm:$0xf] %vm14481_vm2, %v8139_v27  ;;  %vm14489_vm2 = vmmov %vm14477_vm0  ;;  %v11692_v18 = vld [vmem:[#allocation2 + $0x8] sm:$0xff]  }
 0x2a3   : > { %4113 = vst.msk [vmem:[#allocation2 + $0x2c] sm:$0xf] %vm14482_vm8, %v8140_v26  ;;  %vm14488_vm8 = vmmov %vm14477_vm0  ;;  %v11789_v6 = vld [vmem:[#allocation2 + $0x8] sm:$0xff]  }
 0x2a4   : > { %4114 = vst.msk [vmem:[#allocation2 + $0x30] sm:$0xf] %vm14483_vm4, %v8141_v55  ;;  %vm14490_vm4 = vmmov %vm14477_vm0  ;;  %v11694_v24 = vld [vmem:[#allocation2 + $0x10] sm:$0xff]   ;;  %v9254_v27 = vld [vmem:[%s13735_s2 + $0x68] sm:$0xff]  }
 0x2a5   : > { %4115 = vst.msk [vmem:[#allocation2 + $0x34] sm:$0xf] %vm14484_vm6, %v8142_v42  ;;  %vm14491_vm6 = vmmov %vm14477_vm0  ;;  %v9236_v13 = vld [vmem:[#allocation2 + $0x10] sm:$0xff]   ;;  %v9256_v55 = vld [vmem:[%s13735_s2 + $0x78] sm:$0xff]  }
 0x2a6   : > { %4117 = vst.msk [vmem:[#allocation2 + $0x3c] sm:$0xf] %vm14485_vm10, %v8144_v47  ;;  %vm14492_vm10 = vmmov %vm14477_vm0  ;;  %v11717_v57 = vld [vmem:[#allocation2 + $0x18] sm:$0xff]  }
 0x2a7   : > { %4118 = vst.msk [vmem:[#allocation2 + $0x40] sm:$0xf] %vm14486_vm13, %v8145_v54  ;;  %vm14494_vm13 = vmmov %vm14477_vm0  ;;  %v9237_v5 = vld [vmem:[#allocation2 + $0x18] sm:$0xff]  }
 0x2a8   : > { %4119 = vst.msk [vmem:[#allocation2 + $0x44] sm:$0xf] %vm14487_vm7, %v8146_v28  ;;  %vm14495_vm7 = vmmov %vm14477_vm0  ;;  %v11719_v32 = vld [vmem:[#allocation2 + $0x20] sm:$0xff]  }
 0x2a9   : > { %4120 = vst.msk [vmem:[#allocation2 + $0x48] sm:$0xf] %vm14488_vm8, %v8147_v60  ;;  %vm14496_vm8 = vmmov %vm14477_vm0  ;;  %v9238_v26 = vld [vmem:[#allocation2 + $0x20] sm:$0xff]  }
 0x2aa   : > { %4121 = vst.msk [vmem:[#allocation2 + $0x4c] sm:$0xf] %vm14489_vm2, %v8148_v16  ;;  %vm14497_vm2 = vmmov %vm14477_vm0  ;;  %v9239_v42 = vld [vmem:[#allocation2 + $0x28] sm:$0xff]  }
 0x2ab   : > { %4122 = vst.msk [vmem:[#allocation2 + $0x50] sm:$0xf] %vm14490_vm4, %v8149_v46  ;;  %vm14498_vm4 = vmmov %vm14477_vm0 }
 0x2ac   : > { %4123 = vst.msk [vmem:[#allocation2 + $0x54] sm:$0xf] %vm14491_vm6, %v8150_v25  ;;  %vm14499_vm6 = vmmov %vm14477_vm0  ;;  %v11731_v34 = vld [vmem:[#allocation2 + $0x30] sm:$0xff]  }
 0x2ad   : > { %4124 = vst.msk [vmem:[#allocation2 + $0x58] sm:$0xf] %vm14477_vm0, %v8151_v41  ;;  %4135 = vst.msk [vmem:[#allocation2 + $0x84] sm:$0xf] %vm14477_vm0, %v8162_v51  ;;  %v11741_v22 = vld [vmem:[#allocation2 + $0x38] sm:$0xff]   ;;  %v9240_v10 = vld [vmem:[#allocation2 + $0x30] sm:$0xff]  }
 0x2ae   : > { %4125 = vst.msk [vmem:[#allocation2 + $0x5c] sm:$0xf] %vm14492_vm10, %v8152_v31  ;;  %v9241_v47 = vld [vmem:[#allocation2 + $0x38] sm:$0xff]   ;;  %v11906_v51 = vld [vmem:[#allocation2 + $0x20] sm:$0xff]  }
 0x2af   : > { %4126 = vst.msk [vmem:[#allocation2 + $0x60] sm:$0xf] %vm14493_vm11, %v8153_v33  ;;  %vm14500_vm11 = vcmask 261120   ;;  %v11743_v58 = vld [vmem:[#allocation2 + $0x40] sm:$0xff]   ;;  %v9250_v31 = vld [vmem:[#allocation2 + $0x78] sm:$0xff]  }
 0x2b0   : > { %4127 = vst.msk [vmem:[#allocation2 + $0x64] sm:$0xf] %vm14494_vm13, %v8154_v3  ;;  %8816 = vmatmul.mubr.msk.bf16.vlgmr.msra.gmra.mxu1 %vm14500_vm11, %v11692_v18  ;;  %vm14501_vm10 = vmmov %vm14500_vm11  ;;  %v9242_v54 = vld [vmem:[#allocation2 + $0x40] sm:$0xff]  }
 0x2b1   : > { %4128 = vst.msk [vmem:[#allocation2 + $0x68] sm:$0xf] %vm14495_vm7, %v8155_v2  ;;  %8852 = vmatmul.mubr.msk.bf16.vlgmr.msra.gmra.mxu0 %vm14501_vm10, %v11692_v18  ;;  %8884 = vmatpush3.bf16.msra.mxu1 %v9280_v49  ;;  %vm14502_vm13 = vmmov %vm14501_vm10  ;;  %v11753_v4 = vld [vmem:[#allocation2 + $0x48] sm:$0xff]   ;;  %v9255_v3 = vld [vmem:[%s13735_s2 + $0x60] sm:$0xff]  }
 0x2b2   : > { %4129 = vst.msk [vmem:[#allocation2 + $0x6c] sm:$0xf] %vm14496_vm8, %v8156_v37  ;;  %8819 = vmatprep.mubr.msk.bf16.mxu1 %vm14502_vm13, %v11694_v24  ;;  %vm14503_vm7 = vmmov %vm14501_vm10  ;;  %8885 = vmatprep.subr.bf16.mxu1 %v9224_v62  ;;  %v9243_v28 = vld [vmem:[#allocation2 + $0x48] sm:$0xff]   ;;  %v9258_v2 = vld [vmem:[%s13735_s2 + $0x70] sm:$0xff]  }
 0x2b3   : > { %4130 = vst.msk [vmem:[#allocation2 + $0x70] sm:$0xf] %vm14497_vm2, %v8157_v56  ;;  %8855 = vmatprep.mubr.msk.bf16.mxu0 %vm14503_vm7, %v11694_v24  ;;  %8920 = vmatpush3.bf16.msra.mxu0 %v11435_v43  ;;  %vm14504_vm8 = vmmov %vm14503_vm7  ;;  %v11729_v43 = vld [vmem:[#allocation2 + $0x28] sm:$0xff]   ;;  %v11755_v45 = vld [vmem:[#allocation2 + $0x50] sm:$0xff]  }
 0x2b4   : > { %4131 = vst.msk [vmem:[#allocation2 + $0x74] sm:$0xf] %vm14498_vm4, %v8158_v53  ;;  %8921 = vmatprep.subr.bf16.mxu0 %v9234_v50  ;;  %vm14505_vm2 = vmmov %vm14503_vm7  ;;  %v9245_v60 = vld [vmem:[#allocation2 + $0x50] sm:$0xff]   ;;  %v9259_v37 = vld [vmem:[%s13735_s2 + $0x88] sm:$0xff]  }
 0x2b5   : > { %4134 = vst.msk [vmem:[#allocation2 + $0x80] sm:$0xf] %vm14499_vm6, %v8161_v40  ;;  %8886 = vmatpush3.bf16.msra.mxu1 %v9224_v62  ;;  %vm14506_vm4 = vmmov %vm14505_vm2  ;;  %v11765_v9 = vld [vmem:[#allocation2 + $0x58] sm:$0xff]   ;;  %v11893_v56 = vld [vmem:[#allocation2 + $0x10] sm:$0xff]  }
 0x2b6   : > { %8955 = vmatprep.subr.bf16.mxu1 %v9235_v61  ;;  %vm14507_vm6 = vmmov %vm14505_vm2  ;;  %v9246_v16 = vld [vmem:[#allocation2 + $0x58] sm:$0xff]   ;;  %v9268_v40 = vld [vmem:[%s13735_s2 + $0x80] sm:$0xff]  }
 0x2b7   : > { %8922 = vmatpush3.bf16.msra.mxu0 %v9234_v50  ;;  %vm14508_vm0 = vmmov %vm14505_vm2  ;;  %v11767_v23 = vld [vmem:[#allocation2 + $0x60] sm:$0xff]   ;;  %v11901_v53 = vld [vmem:[#allocation2 + $0x18] sm:$0xff]  }
 0x2b8   : > { %8820 = vmatmul.mubr.msk.bf16.gmra.mxu1 %vm14504_vm8, %v11717_v57  ;;  %8991 = vmatprep.subr.bf16.mxu0 %v9252_v17  ;;  %vm14509_vm11 = vmmov %vm14508_vm0  ;;  %v9247_v46 = vld [vmem:[#allocation2 + $0x60] sm:$0xff]  }
 0x2b9   : > { %8856 = vmatmul.mubr.msk.bf16.gmra.mxu0 %vm14505_vm2, %v11717_v57  ;;  %8823 = vmatprep.mubr.msk.bf16.mxu1 %vm14506_vm4, %v11719_v32  ;;  %vm14510_vm10 = vmmov %vm14508_vm0  ;;  %v11777_v11 = vld [vmem:[#allocation2 + $0x68] sm:$0xff]  }
 0x2ba   : > { %8859 = vmatprep.mubr.msk.bf16.mxu0 %vm14507_vm6, %v11719_v32  ;;  %vm14511_vm13 = vmmov %vm14508_vm0  ;;  %v9248_v25 = vld [vmem:[#allocation2 + $0x68] sm:$0xff]  }
 0x2bb   : > { %vm14512_vm7 = vmmov %vm14508_vm0  ;;  %v11779_v21 = vld [vmem:[#allocation2 + $0x70] sm:$0xff]  }
 0x2bc   : > { %vm14513_vm8 = vmmov %vm14508_vm0  ;;  %v9249_v41 = vld [vmem:[#allocation2 + $0x70] sm:$0xff]   ;;  %v9251_v33 = vld [vmem:[#allocation2 + $0x80] sm:$0xff]  }
 0x2bd   : > { %vm14514_vm2 = vmmov %vm14508_vm0 }
 0x2be   : > { %vm14515_vm4 = vmmov %vm14508_vm0 }
 0x2bf   : > { %vm14516_vm6 = vmmov %vm14508_vm0 }
 0x2c0   : > { %8824 = vmatmul.mubr.msk.bf16.gmra.mxu1 %vm14508_vm0, %v11729_v43  ;;  %vm14570_vm12 = vmmov %vm14508_vm0 }
 0x2c1   : > { %8860 = vmatmul.mubr.msk.bf16.gmra.mxu0 %vm14509_vm11, %v11729_v43  ;;  %8827 = vmatprep.mubr.msk.bf16.mxu1 %vm14510_vm10, %v11731_v34  ;;  %vm14517_vm11 = vmmov %vm14508_vm0 }
 0x2c2   : > { %8863 = vmatprep.mubr.msk.bf16.mxu0 %vm14511_vm13, %v11731_v34  ;;  %vm14518_vm10 = vmmov %vm14508_vm0 }
 0x2c3   : > { %vm14519_vm13 = vmmov %vm14508_vm0 }
 0x2c4   : > { %vm14571_vm3 = vmmov %vm14508_vm0 }
 0x2c8   : > { %8828 = vmatmul.mubr.msk.bf16.gmra.mxu1 %vm14512_vm7, %v11741_v22  ;;  %vm14520_vm7 = vmmov %vm14508_vm0 }
 0x2c9   : > { %8864 = vmatmul.mubr.msk.bf16.gmra.mxu0 %vm14513_vm8, %v11741_v22  ;;  %8831 = vmatprep.mubr.msk.bf16.mxu1 %vm14514_vm2, %v11743_v58  ;;  %vm14521_vm8 = vmmov %vm14508_vm0 }
 0x2ca   : > { %8867 = vmatprep.mubr.msk.bf16.mxu0 %vm14515_vm4, %v11743_v58  ;;  %vm14522_vm2 = vmmov %vm14508_vm0 }
 0x2cb   : > { %vm14523_vm4 = vmmov %vm14508_vm0 }
 0x2d0   : > { %8832 = vmatmul.mubr.msk.bf16.gmra.mxu1 %vm14516_vm6, %v11753_v4  ;;  %vm14524_vm6 = vmmov %vm14508_vm0 }
 0x2d1   : > { %8868 = vmatmul.mubr.msk.bf16.gmra.mxu0 %vm14508_vm0, %v11753_v4  ;;  %8835 = vmatprep.mubr.msk.bf16.mxu1 %vm14517_vm11, %v11755_v45  ;;  %vm14525_vm11 = vmmov %vm14508_vm0 }
 0x2d2   : > { %8871 = vmatprep.mubr.msk.bf16.mxu0 %vm14518_vm10, %v11755_v45  ;;  %vm14526_vm10 = vmmov %vm14508_vm0 }
 0x2d8   : > { %8836 = vmatmul.mubr.msk.bf16.gmra.mxu1 %vm14519_vm13, %v11765_v9  ;;  %vm14527_vm13 = vmmov %vm14508_vm0 }
 0x2d9   : > { %8872 = vmatmul.mubr.msk.bf16.gmra.mxu0 %vm14520_vm7, %v11765_v9  ;;  %8839 = vmatprep.mubr.msk.bf16.mxu1 %vm14521_vm8, %v11767_v23  ;;  %vm14528_vm7 = vmmov %vm14508_vm0 }
 0x2da   : > { %8875 = vmatprep.mubr.msk.bf16.mxu0 %vm14522_vm2, %v11767_v23  ;;  %vm14529_vm8 = vmmov %vm14508_vm0 }
 0x2db   : > { %vm14530_vm2 = vmmov %vm14508_vm0 }
 0x2e0   : > { %8840 = vmatmul.mubr.msk.bf16.gmra.mxu1 %vm14523_vm4, %v11777_v11  ;;  %vm14531_vm4 = vmmov %vm14508_vm0 }
 0x2e1   : > { %8876 = vmatmul.mubr.msk.bf16.gmra.mxu0 %vm14524_vm6, %v11777_v11  ;;  %8843 = vmatprep.mubr.msk.bf16.mxu1 %vm14508_vm0, %v11779_v21  ;;  %vm14532_vm6 = vmmov %vm14508_vm0 }
 0x2e2   : > { %8879 = vmatprep.mubr.msk.bf16.mxu0 %vm14525_vm11, %v11779_v21  ;;  %vm14533_vm11 = vmmov %vm14508_vm0 }
 0x2e8   : > { %8844 = vmatmul.mubr.msk.bf16.gmra.mxu1 %vm14526_vm10, %v9231_v19  ;;  %vm14534_vm10 = vmmov %vm14508_vm0 }
 0x2e9   : > { %8880 = vmatmul.mubr.msk.bf16.gmra.mxu0 %vm14527_vm13, %v9231_v19  ;;  %8887 = vmatprep.mubr.msk.bf16.mxu1 %vm14529_vm8, %v9281_v29  ;;  %vm14535_vm13 = vmmov %vm14508_vm0 }
 0x2ea   : > { %8923 = vmatprep.mubr.msk.bf16.mxu0 %vm14528_vm7, %v11789_v6  ;;  %vm14536_vm7 = vmmov %vm14508_vm0 }
 0x2eb   : > { %vm14537_vm8 = vmmov %vm14508_vm0 }
 0x2f0   : > { %8888 = vmatmul.mubr.msk.bf16.vlgmr.msra.gmra.mxu1 %vm14530_vm2, %v11692_v18  ;;  %vm14538_vm2 = vmmov %vm14508_vm0 }
 0x2f1   : > { %8924 = vmatmul.mubr.msk.bf16.vlgmr.msra.gmra.mxu0 %vm14531_vm4, %v9236_v13  ;;  %8956 = vmatpush3.bf16.msra.mxu1 %v9235_v61  ;;  %vm14539_vm4 = vmmov %vm14508_vm0 }
 0x2f2   : > { %8891 = vmatprep.mubr.msk.bf16.mxu1 %vm14532_vm6, %v11694_v24  ;;  %8927 = vmatprep.mubr.msk.bf16.mxu0 %vm14508_vm0, %v9237_v5  ;;  %vm14540_vm6 = vmmov %vm14508_vm0 }
 0x2f3   : > { %8957 = vmatprep.subr.bf16.mxu1 %v9244_v44  ;;  %8992 = vmatpush3.bf16.msra.mxu0 %v9252_v17 }
 0x2f4   : > { %8993 = vmatprep.subr.bf16.mxu0 %v9253_v59 }
 0x2f5   : > { %8958 = vmatpush3.bf16.msra.mxu1 %v9244_v44 }
 0x2f6   : > { %9027 = vmatprep.subr.bf16.mxu1 %v9254_v27 }
 0x2f7   : > { %8994 = vmatpush3.bf16.msra.mxu0 %v9253_v59 }
 0x2f8   : > { %8892 = vmatmul.mubr.msk.bf16.gmra.mxu1 %vm14533_vm11, %v11717_v57  ;;  %9063 = vmatprep.subr.bf16.mxu0 %v9256_v55  ;;  %vm14541_vm11 = vmmov %vm14508_vm0 }
 0x2f9   : > { %8928 = vmatmul.mubr.msk.bf16.gmra.mxu0 %vm14534_vm10, %v9238_v26  ;;  %8895 = vmatprep.mubr.msk.bf16.mxu1 %vm14535_vm13, %v11719_v32  ;;  %vm14542_vm10 = vmmov %vm14508_vm0 }
 0x2fa   : > { %8931 = vmatprep.mubr.msk.bf16.mxu0 %vm14536_vm7, %v9239_v42  ;;  %vm14543_vm13 = vmmov %vm14508_vm0 }
 0x2fb   : > { %vm14544_vm7 = vmmov %vm14508_vm0 }
 0x300   : > { %8896 = vmatmul.mubr.msk.bf16.gmra.mxu1 %vm14537_vm8, %v11729_v43  ;;  %vm14545_vm8 = vmmov %vm14508_vm0 }
 0x301   : > { %8932 = vmatmul.mubr.msk.bf16.gmra.mxu0 %vm14538_vm2, %v9240_v10  ;;  %8899 = vmatprep.mubr.msk.bf16.mxu1 %vm14539_vm4, %v11731_v34  ;;  %vm14546_vm2 = vmmov %vm14508_vm0  ;;  %v11920_v34 = vld [vmem:[#allocation2 + $0x28] sm:$0xff]  }
 0x302   : > { %8935 = vmatprep.mubr.msk.bf16.mxu0 %vm14540_vm6, %v9241_v47  ;;  %vm14547_vm4 = vmmov %vm14508_vm0 }
 0x303   : > { %vm14548_vm6 = vmmov %vm14508_vm0 }
 0x308   : > { %8900 = vmatmul.mubr.msk.bf16.gmra.mxu1 %vm14508_vm0, %v11741_v22 }
 0x309   : > { %8936 = vmatmul.mubr.msk.bf16.gmra.mxu0 %vm14541_vm11, %v9242_v54  ;;  %8903 = vmatprep.mubr.msk.bf16.mxu1 %vm14542_vm10, %v11743_v58  ;;  %vm14549_vm11 = vmmov %vm14508_vm0 }
 0x30a   : > { %8939 = vmatprep.mubr.msk.bf16.mxu0 %vm14543_vm13, %v9243_v28  ;;  %vm14550_vm10 = vmmov %vm14508_vm0 }
 0x30b   : > { %vm14551_vm13 = vmmov %vm14508_vm0 }
 0x310   : > { %8904 = vmatmul.mubr.msk.bf16.gmra.mxu1 %vm14544_vm7, %v11753_v4  ;;  %vm14552_vm7 = vmmov %vm14508_vm0 }
 0x311   : > { %8940 = vmatmul.mubr.msk.bf16.gmra.mxu0 %vm14545_vm8, %v9245_v60  ;;  %8907 = vmatprep.mubr.msk.bf16.mxu1 %vm14546_vm2, %v11755_v45  ;;  %vm14553_vm8 = vmmov %vm14508_vm0  ;;  %v11925_v45 = vld [vmem:[#allocation2 + $0x30] sm:$0xff]  }
 0x312   : > { %8943 = vmatprep.mubr.msk.bf16.mxu0 %vm14547_vm4, %v9246_v16  ;;  %vm14554_vm2 = vmmov %vm14508_vm0 }
 0x313   : > { %vm14555_vm4 = vmmov %vm14508_vm0 }
 0x318   : > { %8908 = vmatmul.mubr.msk.bf16.gmra.mxu1 %vm14548_vm6, %v11765_v9  ;;  %vm14556_vm6 = vmmov %vm14508_vm0 }
 0x319   : > { %8944 = vmatmul.mubr.msk.bf16.gmra.mxu0 %vm14508_vm0, %v9247_v46  ;;  %8911 = vmatprep.mubr.msk.bf16.mxu1 %vm14549_vm11, %v11767_v23  ;;  %vm14557_vm11 = vmmov %vm14508_vm0 }
 0x31a   : > { %8947 = vmatprep.mubr.msk.bf16.mxu0 %vm14550_vm10, %v9248_v25  ;;  %vm14558_vm10 = vmmov %vm14508_vm0 }
 0x320   : > { %8912 = vmatmul.mubr.msk.bf16.gmra.mxu1 %vm14551_vm13, %v11777_v11  ;;  %vm14559_vm13 = vmmov %vm14508_vm0 }
 0x321   : > { %8948 = vmatmul.mubr.msk.bf16.gmra.mxu0 %vm14552_vm7, %v9249_v41  ;;  %8915 = vmatprep.mubr.msk.bf16.mxu1 %vm14553_vm8, %v11779_v21  ;;  %vm14560_vm7 = vmmov %vm14508_vm0 }
 0x322   : > { %8951 = vmatprep.mubr.msk.bf16.mxu0 %vm14554_vm2, %v9250_v31  ;;  %vm14561_vm8 = vmmov %vm14508_vm0 }
 0x323   : > { %vm14562_vm2 = vmmov %vm14508_vm0 }
 0x328   : > { %8916 = vmatmul.mubr.msk.bf16.gmra.mxu1 %vm14555_vm4, %v9231_v19  ;;  %vm14563_vm4 = vmmov %vm14508_vm0 }
 0x329   : > { %8952 = vmatmul.mubr.msk.bf16.gmra.mxu0 %vm14556_vm6, %v9251_v33  ;;  %8959 = vmatprep.mubr.msk.bf16.mxu1 %vm14508_vm0, %v11789_v6  ;;  %vm14564_vm6 = vmmov %vm14508_vm0 }
 0x32a   : > { %8995 = vmatprep.mubr.msk.bf16.mxu0 %vm14557_vm11, %v11789_v6  ;;  %vm14565_vm11 = vmmov %vm14508_vm0 }
 0x330   : > { %8960 = vmatmul.mubr.msk.bf16.vlgmr.msra.gmra.mxu1 %vm14558_vm10, %v9236_v13  ;;  %vm14566_vm10 = vmmov %vm14508_vm0 }
 0x331   : > { %8996 = vmatmul.mubr.msk.bf16.vlgmr.msra.gmra.mxu0 %vm14559_vm13, %v9236_v13  ;;  %9028 = vmatpush3.bf16.msra.mxu1 %v9254_v27  ;;  %vm14567_vm13 = vmmov %vm14508_vm0 }
 0x332   : > { %8963 = vmatprep.mubr.msk.bf16.mxu1 %vm14560_vm7, %v9237_v5  ;;  %8999 = vmatprep.mubr.msk.bf16.mxu0 %vm14561_vm8, %v9237_v5  ;;  %vm14568_vm7 = vmmov %vm14508_vm0 }
 0x333   : > { %9029 = vmatprep.subr.bf16.mxu1 %v9255_v3  ;;  %9064 = vmatpush3.bf16.msra.mxu0 %v9256_v55  ;;  %vm14569_vm8 = vmmov %vm14508_vm0 }
 0x334   : > { %9065 = vmatprep.subr.bf16.mxu0 %v9258_v2 }
 0x335   : > { %9030 = vmatpush3.bf16.msra.mxu1 %v9255_v3 }
 0x336   : > { %9099 = vmatprep.subr.bf16.mxu1 %v9259_v37 }
 0x337   : > { %9066 = vmatpush3.bf16.msra.mxu0 %v9258_v2 }
 0x338   : > { %8964 = vmatmul.mubr.msk.bf16.gmra.mxu1 %vm14562_vm2, %v9238_v26  ;;  %vm14572_vm2 = vmmov %vm14508_vm0 }
 0x339   : > { %9000 = vmatmul.mubr.msk.bf16.gmra.mxu0 %vm14563_vm4, %v9238_v26  ;;  %8967 = vmatprep.mubr.msk.bf16.mxu1 %vm14564_vm6, %v9239_v42  ;;  %vm14573_vm4 = vmmov %vm14508_vm0 }
 0x33a   : > { %9003 = vmatprep.mubr.msk.bf16.mxu0 %vm14508_vm0, %v9239_v42  ;;  %vm14574_vm6 = vmmov %vm14508_vm0 }
 0x340   : > { %8968 = vmatmul.mubr.msk.bf16.gmra.mxu1 %vm14565_vm11, %v9240_v10  ;;  %vm14575_vm11 = vmmov %vm14508_vm0 }
 0x341   : > { %9004 = vmatmul.mubr.msk.bf16.gmra.mxu0 %vm14566_vm10, %v9240_v10  ;;  %8971 = vmatprep.mubr.msk.bf16.mxu1 %vm14567_vm13, %v9241_v47  ;;  %vm14576_vm10 = vmmov %vm14508_vm0 }
 0x342   : > { %9007 = vmatprep.mubr.msk.bf16.mxu0 %vm14568_vm7, %v9241_v47  ;;  %vm14577_vm13 = vmmov %vm14508_vm0 }
 0x343   : > { %vm14578_vm7 = vmmov %vm14508_vm0 }
 0x348   : > { %8972 = vmatmul.mubr.msk.bf16.gmra.mxu1 %vm14569_vm8, %v9242_v54  ;;  %vm14579_vm8 = vmmov %vm14508_vm0 }
 0x349   : > { %9008 = vmatmul.mubr.msk.bf16.gmra.mxu0 %vm14570_vm12, %v9242_v54  ;;  %8975 = vmatprep.mubr.msk.bf16.mxu1 %vm14571_vm3, %v9243_v28  ;;  %vm14580_vm12 = vmmov %vm14508_vm0  ;;  %v14600_v54 = vld [vmem:[#allocation4_spill] sm:$0xff] }
 0x34a   : > { %9011 = vmatprep.mubr.msk.bf16.mxu0 %vm14572_vm2, %v9243_v28  ;;  %vm14581_vm3 = vmmov %vm14508_vm0 }
 0x34b   : > { %vm14582_vm2 = vmmov %vm14508_vm0 }
 0x350   : > { %8976 = vmatmul.mubr.msk.bf16.gmra.mxu1 %vm14573_vm4, %v9245_v60  ;;  %vm14583_vm4 = vmmov %vm14508_vm0 }
 0x351   : > { %9012 = vmatmul.mubr.msk.bf16.gmra.mxu0 %vm14574_vm6, %v9245_v60  ;;  %8979 = vmatprep.mubr.msk.bf16.mxu1 %vm14508_vm0, %v9246_v16  ;;  %vm14584_vm6 = vmmov %vm14508_vm0 }
 0x352   : > { %9015 = vmatprep.mubr.msk.bf16.mxu0 %vm14575_vm11, %v9246_v16  ;;  %vm14585_vm11 = vmmov %vm14508_vm0 }
 0x358   : > { %8980 = vmatmul.mubr.msk.bf16.gmra.mxu1 %vm14576_vm10, %v9247_v46  ;;  %vm14586_vm10 = vmmov %vm14508_vm0 }
 0x359   : > { %9016 = vmatmul.mubr.msk.bf16.gmra.mxu0 %vm14577_vm13, %v9247_v46  ;;  %8983 = vmatprep.mubr.msk.bf16.mxu1 %vm14578_vm7, %v9248_v25  ;;  %vm14587_vm13 = vmmov %vm14508_vm0  ;;  %v11953_v46 = vld [vmem:[#allocation2 + $0x38] sm:$0xff]  }
 0x35a   : > { %9019 = vmatprep.mubr.msk.bf16.mxu0 %vm14579_vm8, %v9248_v25  ;;  %vm14588_vm7 = vmmov %vm14508_vm0 }
 0x35b   : > { %vm14589_vm8 = vmmov %vm14508_vm0 }
 0x360   : > { %8984 = vmatmul.mubr.msk.bf16.gmra.mxu1 %vm14580_vm12, %v9249_v41  ;;  %vm14590_vm12 = vmmov %vm14508_vm0 }
 0x361   : > { %9020 = vmatmul.mubr.msk.bf16.gmra.mxu0 %vm14581_vm3, %v9249_v41  ;;  %8987 = vmatprep.mubr.msk.bf16.mxu1 %vm14582_vm2, %v9250_v31  ;;  %vm14591_vm3 = vcmp.lt.s32.totalorder %v9638_v52, 1  ;;  %vm14592_vm2 = vmmov %vm14508_vm0 }
 0x362   : > { %9023 = vmatprep.mubr.msk.bf16.mxu0 %vm14583_vm4, %v9250_v31  ;;  %vm14593_vm4 = vmmov %vm14508_vm0 }
 0x368   : > { %8988 = vmatmul.mubr.msk.bf16.gmra.mxu1 %vm14584_vm6, %v9251_v33  ;;  %vm14594_vm6 = vmmov %vm14591_vm3 }
 0x369   : > { %9024 = vmatmul.mubr.msk.bf16.gmra.mxu0 %vm14508_vm0, %v9251_v33  ;;  %9031 = vmatprep.mubr.msk.bf16.mxu1 %vm14585_vm11, %v11893_v56  ;;  %vm14595_vm0 = vmmov %vm14591_vm3  ;;  %v11959_v33 = vld [vmem:[#allocation2 + $0x40] sm:$0xff]  }
 0x36a   : > { %9067 = vmatprep.mubr.msk.bf16.mxu0 %vm14586_vm10, %v11893_v56  ;;  %vm14596_vm11 = vmmov %vm14592_vm2 }
 0x36b   : > { %vm14597_vm10 = vmmov %vm14592_vm2 }
 0x370   : > { %v8817_v62 = vpop.f32.mrf.mxu1  ;;  %9032 = vmatmul.mubr.msk.bf16.vlgmr.msra.gmra.mxu1 %vm14587_vm13, %v11901_v53  ;;  %vm14599_vm13 = vmmov %vm14595_vm0 }
 0x371   : > { %v8853_v18 = vpop.f32.mrf.mxu0  ;;  %9068 = vmatmul.mubr.msk.bf16.vlgmr.msra.gmra.mxu0 %vm14588_vm7, %v11901_v53  ;;  %9100 = vmatpush3.bf16.msra.mxu1 %v9259_v37  ;;  %v4475_v17 = vrot.slane %v8817_v62, 7  ;;  %vm14601_vm7 = vnez %v14600_v54 }
 0x372   : > { %9035 = vmatprep.mubr.msk.bf16.mxu1 %vm14589_vm8, %v11906_v51  ;;  %9071 = vmatprep.mubr.msk.bf16.mxu0 %vm14590_vm12, %v11906_v51  ;;  %v11916_v24 = vpop.f32.mrf.mxu1  ;;  %vm14602_vm8 = vmmov %vm14595_vm0 }
 0x373   : > { %v11918_v50 = vpop.f32.mrf.mxu0  ;;  %9101 = vmatprep.subr.bf16.mxu1 %v9268_v40  ;;  %v13885_v22 = vrot.slane %v11916_v24, 7  ;;  %vm14603_vm12 = vmmov %vm14592_vm2 }
 0x374   : > { %v8818_v49 = vpop.f32.mrf.mxu1 }
 0x375   : > { %v8854_v61 = vpop.f32.mrf.mxu0  ;;  %v4476_v57 = vrot.slane %v8818_v49, 7  ;;  %9102 = vmatpush3.bf16.msra.mxu1 %v9268_v40 }
 0x376   : > { %v4349_v32 = vpop.f32.mrf.mxu1 }
 0x377   : > { %v4655_v43 = vpop.f32.mrf.mxu0  ;;  %v4533_v58 = vsel %vm14591_vm3, %v4475_v17, %v4476_v57  ;;  %v4474_v4 = vrot.slane %v4349_v32, 7  ;;  %vm14604_vm3 = vmmov %vm14592_vm2 }
 0x378   : > { %v11927_v9 = vadd.f32 %v8854_v61, %v4533_v58  ;;  %v8821_v23 = vpop.f32.mrf.mxu1  ;;  %9036 = vmatmul.mubr.msk.bf16.gmra.mxu1 %vm14592_vm2, %v11920_v34  ;;  %vm14605_vm2 = vmmov %vm14595_vm0 }
 0x379   : > { %v8857_v11 = vpop.f32.mrf.mxu0  ;;  %9072 = vmatmul.mubr.msk.bf16.gmra.mxu0 %vm14593_vm4, %v11920_v34  ;;  %v4534_v21 = vsel %vm14594_vm6, %v4474_v4, %v4475_v17  ;;  %v4535_v19 = vsel %vm14595_vm0, %v13885_v22, %v4474_v4  ;;  %9039 = vmatprep.mubr.msk.bf16.mxu1 %vm14596_vm11, %v11925_v45  ;;  %v4479_v42 = vrot.slane %v8821_v23, 7  ;;  %vm14606_vm4 = vmmov %vm14595_vm0 }
 0x37a   : > { %9075 = vmatprep.mubr.msk.bf16.mxu0 %vm14597_vm10, %v11925_v45  ;;  %v4539_v29 = vsel %vm14292_vm9, 0.0, %v4534_v21  ;;  %v11945_v13 = vadd.f32 %v4655_v43, %v4535_v19  ;;  %v4362_v44 = vpop.f32.mrf.mxu1  ;;  %vm14607_vm6 = vmmov %vm14604_vm3 }
 0x37b   : > { %v4668_v5 = vpop.f32.mrf.mxu0  ;;  %v4477_v59 = vrot.slane %v4362_v44, 7  ;;  %v11947_v27 = vadd.f32 %v8853_v18, %v4539_v29  ;;  %vm14608_vm0 = vmmov %vm14604_vm3  ;;  %v14611_v29 = vld [vmem:[#allocation6_spill] sm:$0xff] }
 0x37c   : > { %v8822_v26 = vpop.f32.mrf.mxu1  ;;  %vm14610_vm11 = vmmov %vm14605_vm2  ;;  %vm14612_vm10 = vnez %v14611_v29 }
 0x37d   : > { %v8858_v55 = vpop.f32.mrf.mxu0  ;;  %v4532_v10 = vsel %vm14599_vm13, %v4476_v57, %v4477_v59  ;;  %v4480_v47 = vrot.slane %v8822_v26, 7  ;;  %v11985_v26 = vld [vmem:[#allocation2 + $0x48] sm:$0xff]   ;;  %vm14613_vm13 = vmmov %vm14605_vm2 }
 0x37e   : > { %v4541_v28 = vsel %vm14601_vm7, 0.0, %v4532_v10  ;;  %v4365_v60 = vpop.f32.mrf.mxu1  ;;  %v11991_v10 = vld [vmem:[#allocation2 + $0x50] sm:$0xff]  }
 0x37f   : > { %v4671_v16 = vpop.f32.mrf.mxu0  ;;  %v11955_v25 = vadd.f32 %v4668_v5, %v4541_v28  ;;  %v4529_v41 = vsel %vm14602_vm8, %v4479_v42, %v4480_v47  ;;  %v4478_v31 = vrot.slane %v4365_v60, 7  ;;  %vm14614_vm8 = vmmov %vm14608_vm0 }
 0x380   : > { %v11961_v3 = vadd.f32 %v8858_v55, %v4529_v41  ;;  %v8825_v2 = vpop.f32.mrf.mxu1  ;;  %9040 = vmatmul.mubr.msk.bf16.gmra.mxu1 %vm14603_vm12, %v11953_v46  ;;  %vm14615_vm12 = vmmov %vm14608_vm0 }
 0x381   : > { %v8861_v37 = vpop.f32.mrf.mxu0  ;;  %9076 = vmatmul.mubr.msk.bf16.gmra.mxu0 %vm14604_vm3, %v11953_v46  ;;  %v4530_v40 = vsel %vm14605_vm2, %v4478_v31, %v4479_v42  ;;  %v4531_v62 = vsel %vm14606_vm4, %v4477_v59, %v4478_v31  ;;  %9043 = vmatprep.mubr.msk.bf16.mxu1 %vm14607_vm6, %v11959_v33  ;;  %v4483_v23 = vrot.slane %v8825_v2, 7  ;;  %vm14616_vm3 = vmmov %vm14605_vm2  ;;  %v14619_v31 = vld [vmem:[#allocation7_spill] sm:$0xff] }
 0x382   : > { %9079 = vmatprep.mubr.msk.bf16.mxu0 %vm14608_vm0, %v11959_v33  ;;  %v4543_v49 = vsel %vm14303_vm5, 0.0, %v4530_v40  ;;  %v11977_v61 = vadd.f32 %v4671_v16, %v4531_v62  ;;  %v4378_v17 = vpop.f32.mrf.mxu1  ;;  %vm14617_vm4 = vmmov %vm14608_vm0 }
 0x383   : > { %v4684_v57 = vpop.f32.mrf.mxu0  ;;  %v4481_v32 = vrot.slane %v4378_v17, 7  ;;  %v11979_v43 = vadd.f32 %v8857_v11, %v4543_v49  ;;  %vm14618_vm6 = vmmov %vm14608_vm0  ;;  %vm14620_vm0 = vnez %v14619_v31 }
 0x384   : > { %v8826_v58 = vpop.f32.mrf.mxu1 }
 0x385   : > { %v8862_v4 = vpop.f32.mrf.mxu0  ;;  %v4528_v21 = vsel %vm14610_vm11, %v4480_v47, %v4481_v32  ;;  %v4484_v19 = vrot.slane %v8826_v58, 7  ;;  %vm14621_vm11 = vmmov %vm14605_vm2 }
 0x386   : > { %v4545_v44 = vsel %vm14612_vm10, 0.0, %v4528_v21  ;;  %v4381_v5 = vpop.f32.mrf.mxu1 }
 0x387   : > { %v4687_v59 = vpop.f32.mrf.mxu0  ;;  %v11987_v55 = vadd.f32 %v4684_v57, %v4545_v44  ;;  %v4525_v11 = vsel %vm14613_vm13, %v4483_v23, %v4484_v19  ;;  %v4482_v42 = vrot.slane %v4381_v5, 7  ;;  %v14622_v44 = vld [vmem:[#allocation8_spill] sm:$0xff] }
 0x388   : > { %v11993_v28 = vadd.f32 %v8862_v4, %v4525_v11  ;;  %v8829_v60 = vpop.f32.mrf.mxu1  ;;  %9044 = vmatmul.mubr.msk.bf16.gmra.mxu1 %vm14614_vm8, %v11985_v26  ;;  %vm14623_vm13 = vnez %v14622_v44  ;;  %vm14625_vm8 = vmmov %vm14605_vm2 }
 0x389   : > { %v8865_v47 = vpop.f32.mrf.mxu0  ;;  %9080 = vmatmul.mubr.msk.bf16.gmra.mxu0 %vm14615_vm12, %v11985_v26  ;;  %v4526_v16 = vsel %vm14616_vm3, %v4482_v42, %v4483_v23  ;;  %v4527_v41 = vsel %vm14605_vm2, %v4481_v32, %v4482_v42  ;;  %9047 = vmatprep.mubr.msk.bf16.mxu1 %vm14617_vm4, %v11991_v10  ;;  %v4487_v23 = vrot.slane %v8829_v60, 7  ;;  %vm14627_vm12 = vmmov %vm14617_vm4 }
 0x38a   : > { %9083 = vmatprep.mubr.msk.bf16.mxu0 %vm14618_vm6, %v11991_v10  ;;  %v4547_v2 = vsel %vm14620_vm0, 0.0, %v4526_v16  ;;  %v12009_v40 = vadd.f32 %v4687_v59, %v4527_v41  ;;  %v4394_v62 = vpop.f32.mrf.mxu1  ;;  %v12017_v16 = vld [vmem:[#allocation2 + $0x58] sm:$0xff]   ;;  %vm14628_vm3 = vmmov %vm14617_vm4 }
 0x38b   : > { %v4700_v49 = vpop.f32.mrf.mxu0  ;;  %v4485_v17 = vrot.slane %v4394_v62, 7  ;;  %v12011_v57 = vadd.f32 %v8861_v37, %v4547_v2  ;;  %v12023_v2 = vld [vmem:[#allocation2 + $0x60] sm:$0xff]   ;;  %vm14629_vm4 = vmmov %vm14605_vm2 }
 0x38c   : > { %v8830_v58 = vpop.f32.mrf.mxu1  ;;  %vm14630_vm6 = vmmov %vm14628_vm3 }
 0x38d   : > { %v8866_v4 = vpop.f32.mrf.mxu0  ;;  %v4524_v32 = vsel %vm14621_vm11, %v4484_v19, %v4485_v17  ;;  %v4488_v21 = vrot.slane %v8830_v58, 7  ;;  %vm14631_vm11 = vmmov %vm14628_vm3 }
 0x38e   : > { %v4549_v5 = vsel %vm14623_vm13, 0.0, %v4524_v32  ;;  %v4397_v11 = vpop.f32.mrf.mxu1 }
 0x38f   : > { %v4703_v42 = vpop.f32.mrf.mxu0  ;;  %v12019_v59 = vadd.f32 %v4700_v49, %v4549_v5  ;;  %v4521_v37 = vsel %vm14625_vm8, %v4487_v23, %v4488_v21  ;;  %v4486_v41 = vrot.slane %v4397_v11, 7 }
 0x390   : > { %v12025_v60 = vadd.f32 %v8866_v4, %v4521_v37  ;;  %v8833_v62 = vpop.f32.mrf.mxu1  ;;  %9048 = vmatmul.mubr.msk.bf16.gmra.mxu1 %vm14627_vm12, %v12017_v16  ;;  %v14632_v4 = vld [vmem:[#allocation9_spill] sm:$0xff]  ;;  %vm14635_vm12 = vmmov %vm14605_vm2 }
 0x391   : > { %14624 = vst [vmem:[#allocation55_spill] sm:$0xff] %v12019_v59  ;;  %v8869_v19 = vpop.f32.mrf.mxu0  ;;  %9084 = vmatmul.mubr.msk.bf16.gmra.mxu0 %vm14628_vm3, %v12017_v16  ;;  %v4522_v49 = vsel %vm14605_vm2, %v4486_v41, %v4487_v23  ;;  %v4523_v58 = vsel %vm14629_vm4, %v4485_v17, %v4486_v41  ;;  %9051 = vmatprep.mubr.msk.bf16.mxu1 %vm14630_vm6, %v12023_v2  ;;  %vm14633_vm8 = vnez %v14632_v4  ;;  %v4491_v7 = vrot.slane %v8833_v62, 7  ;;  %vm14642_vm4 = vmmov %vm14630_vm6 }
 0x392   : > { %14626 = vst [vmem:[#allocation43_spill] sm:$0xff] %v12025_v60  ;;  %9087 = vmatprep.mubr.msk.bf16.mxu0 %vm14631_vm11, %v12023_v2  ;;  %v4551_v32 = vsel %vm14633_vm8, 0.0, %v4522_v49  ;;  %v12041_v5 = vadd.f32 %v4703_v42, %v4523_v58  ;;  %v4410_v11 = vpop.f32.mrf.mxu1  ;;  %vm14637_vm3 = vnez %v14636_v63  ;;  %v12049_v49 = vld [vmem:[#allocation2 + $0x68] sm:$0xff]   ;;  %vm14643_vm6 = vmmov %vm14642_vm4 }
 0x393   : > { %v4716_v37 = vpop.f32.mrf.mxu0  ;;  %v4489_v22 = vrot.slane %v4410_v11, 7  ;;  %v12043_v15 = vadd.f32 %v8865_v47, %v4551_v32  ;;  %14638 = vst [vmem:[#allocation38_spill] sm:$0xff] %v12049_v49  ;;  %v12055_v32 = vld [vmem:[#allocation2 + $0x70] sm:$0xff]   ;;  %vm14644_vm11 = vmmov %vm14605_vm2 }
 0x394   : > { %14634 = vst [vmem:[#allocation34_spill] sm:$0xff] %v12041_v5  ;;  %v8834_v23 = vpop.f32.mrf.mxu1  ;;  %14640 = vst [vmem:[#allocation45_spill] sm:$0xff] %v12055_v32  ;;  %v14652_v5 = vld [vmem:[#allocation14_spill] sm:$0xff] }
 0x395   : > { %v8870_v1 = vpop.f32.mrf.mxu0  ;;  %v4520_v17 = vsel %vm14635_vm12, %v4488_v21, %v4489_v22  ;;  %v4492_v41 = vrot.slane %v8834_v23, 7  ;;  %vm14645_vm12 = vmmov %vm14605_vm2 }
 0x396   : > { %v4553_v60 = vsel %vm14637_vm3, 0.0, %v4520_v17  ;;  %v4413_v48 = vpop.f32.mrf.mxu1 }
 0x397   : > { %v4719_v44 = vpop.f32.mrf.mxu0  ;;  %v12051_v42 = vadd.f32 %v4716_v37, %v4553_v60  ;;  %v4517_v47 = vsel %vm14605_vm2, %v4491_v7, %v4492_v41  ;;  %v4490_v58 = vrot.slane %v4413_v48, 7  ;;  %vm14646_vm2 = vmmov %vm14642_vm4  ;;  %v14648_v48 = vld [vmem:[#allocation11_spill] sm:$0xff] }
 0x398   : > { %v12057_v62 = vadd.f32 %v8870_v1, %v4517_v47  ;;  %v8837_v11 = vpop.f32.mrf.mxu1  ;;  %9052 = vmatmul.mubr.msk.bf16.gmra.mxu1 %vm14642_vm4, %v12049_v49  ;;  %vm14647_vm3 = vmmov %vm14646_vm2  ;;  %vm14649_vm13 = vnez %v14648_v48 }
 0x399   : > { %14639 = vst [vmem:[#allocation19_spill] sm:$0xff] %v12051_v42  ;;  %v8873_v21 = vpop.f32.mrf.mxu0  ;;  %9088 = vmatmul.mubr.msk.bf16.gmra.mxu0 %vm14643_vm6, %v12049_v49  ;;  %v4518_v60 = vsel %vm14644_vm11, %v4490_v58, %v4491_v7  ;;  %v4519_v37 = vsel %vm14645_vm12, %v4489_v22, %v4490_v58  ;;  %9055 = vmatprep.mubr.msk.bf16.mxu1 %vm14646_vm2, %v12055_v32  ;;  %v4495_v49 = vrot.slane %v8837_v11, 7  ;;  %vm14651_vm4 = vmmov %vm14644_vm11  ;;  %vm14653_vm6 = vnez %v14652_v5 }
 0x39a   : > { %14641 = vst [vmem:[#allocation31_spill] sm:$0xff] %v12057_v62  ;;  %9091 = vmatprep.mubr.msk.bf16.mxu0 %vm14647_vm3, %v12055_v32  ;;  %v4555_v1 = vsel %vm14649_vm13, 0.0, %v4518_v60  ;;  %v12073_v23 = vadd.f32 %v4719_v44, %v4519_v37  ;;  %v4426_v17 = vpop.f32.mrf.mxu1  ;;  %v12081_v60 = vld [vmem:[#allocation2 + $0x78] sm:$0xff]   ;;  %vm14656_vm3 = vmmov %vm14651_vm4 }
 0x39b   : > { %v4732_v47 = vpop.f32.mrf.mxu0  ;;  %v4493_v62 = vrot.slane %v4426_v17, 7  ;;  %v12075_v42 = vadd.f32 %v8869_v19, %v4555_v1  ;;  %14654 = vst [vmem:[#allocation23_spill] sm:$0xff] %v12081_v60  ;;  %v12087_v1 = vld [vmem:[#allocation2 + $0x80] sm:$0xff]   ;;  %vm14659_vm11 = vmmov %vm14646_vm2 }
 0x39c   : > { %14650 = vst [vmem:[#allocation36_spill] sm:$0xff] %v12073_v23  ;;  %v8838_v7 = vpop.f32.mrf.mxu1  ;;  %14657 = vst [vmem:[#allocation56_spill] sm:$0xff] %v12087_v1 }
 0x39d   : > { %v8874_v63 = vpop.f32.mrf.mxu0  ;;  %v4516_v22 = vsel %vm14651_vm4, %v4492_v41, %v4493_v62  ;;  %v4496_v58 = vrot.slane %v8838_v7, 7  ;;  %vm14660_vm12 = vmmov %vm14646_vm2 }
 0x39e   : > { %v4557_v32 = vsel %vm14653_vm6, 0.0, %v4516_v22  ;;  %v4429_v59 = vpop.f32.mrf.mxu1  ;;  %vm14661_vm2 = vmmov %vm14656_vm3 }
 0x39f   : > { %v4735_v48 = vpop.f32.mrf.mxu0  ;;  %v12083_v44 = vadd.f32 %v4732_v47, %v4557_v32  ;;  %v4513_v19 = vsel %vm14656_vm3, %v4495_v49, %v4496_v58  ;;  %v4494_v37 = vrot.slane %v4429_v59, 7  ;;  %vm14662_vm4 = vmmov %vm14661_vm2 }
 0x3a0   : > { %v12089_v11 = vadd.f32 %v8874_v63, %v4513_v19  ;;  %v8841_v17 = vpop.f32.mrf.mxu1  ;;  %9056 = vmatmul.mubr.msk.bf16.gmra.mxu1 %vm14659_vm11, %v12081_v60  ;;  %vm14663_vm3 = vmmov %vm14659_vm11  ;;  %v14665_v63 = vld [vmem:[#allocation17_spill] sm:$0xff] }
 0x3a1   : > { %14655 = vst [vmem:[#allocation57_spill] sm:$0xff] %v12083_v44  ;;  %v8877_v41 = vpop.f32.mrf.mxu0  ;;  %9092 = vmatmul.mubr.msk.bf16.gmra.mxu0 %vm14660_vm12, %v12081_v60  ;;  %v4514_v32 = vsel %vm14661_vm2, %v4494_v37, %v4495_v49  ;;  %v4515_v47 = vsel %vm14662_vm4, %v4493_v62, %v4494_v37  ;;  %9059 = vmatprep.mubr.msk.bf16.mxu1 %vm14663_vm3, %v12087_v1  ;;  %vm14664_vm6 = vmmov %vm14663_vm3  ;;  %vm14666_vm13 = vnez %v14665_v63  ;;  %v12109_v60 = vld [vmem:[#allocation2 + $0x88] sm:$0xff]   ;;  %v4499_v62 = vrot.slane %v8841_v17, 7 }
 0x3a2   : > { %14658 = vst [vmem:[#allocation58_spill] sm:$0xff] %v12089_v11  ;;  %9095 = vmatprep.mubr.msk.bf16.mxu0 %vm14664_vm6, %v12087_v1  ;;  %v4559_v59 = vsel %vm14666_vm13, 0.0, %v4514_v32  ;;  %v12105_v7 = vadd.f32 %v4735_v48, %v4515_v47  ;;  %v4442_v22 = vpop.f32.mrf.mxu1  ;;  %vm14669_vm11 = vmmov %vm14661_vm2  ;;  %v14670_v1 = vld [vmem:[#allocation22_spill] sm:$0xff] }
 0x3a3   : > { %v4748_v19 = vpop.f32.mrf.mxu0  ;;  %v4497_v11 = vrot.slane %v4442_v22, 7  ;;  %v12107_v44 = vadd.f32 %v8873_v21, %v4559_v59  ;;  %vm14671_vm6 = vnez %v14670_v1  ;;  %vm14673_vm12 = vmmov %vm14661_vm2  ;;  %v14760_v18 = vld [vmem:[#allocation36_spill] sm:$0xff] }
 0x3a4   : > { %14667 = vst [vmem:[#allocation35_spill] sm:$0xff] %v12105_v7  ;;  %v8842_v49 = vpop.f32.mrf.mxu1  ;;  %vm14675_vm2 = vmmov %vm14663_vm3 }
 0x3a5   : > { %14668 = vst [vmem:[#allocation18_spill] sm:$0xff] %v12107_v44  ;;  %v8878_v5 = vpop.f32.mrf.mxu0  ;;  %v4512_v37 = vsel %vm14669_vm11, %v4496_v58, %v4497_v11  ;;  %v4500_v23 = vrot.slane %v8842_v49, 7  ;;  %vm14676_vm4 = vmmov %vm14675_vm2 }
 0x3a6   : > { %v4561_v63 = vsel %vm14671_vm6, 0.0, %v4512_v37  ;;  %v4445_v32 = vpop.f32.mrf.mxu1  ;;  %vm14677_vm3 = vmmov %vm14669_vm11 }
 0x3a7   : > { %v4751_v48 = vpop.f32.mrf.mxu0  ;;  %v12115_v47 = vadd.f32 %v4748_v19, %v4561_v63  ;;  %v4509_v21 = vsel %vm14673_vm12, %v4499_v62, %v4500_v23  ;;  %v4498_v59 = vrot.slane %v4445_v32, 7  ;;  %vm14678_vm11 = vmmov %vm14677_vm3  ;;  %v14680_v63 = vld [vmem:[#allocation25_spill] sm:$0xff] }
 0x3a8   : > { %v12119_v22 = vadd.f32 %v8878_v5, %v4509_v21  ;;  %v8845_v7 = vpop.f32.mrf.mxu1  ;;  %9060 = vmatmul.mubr.msk.bf16.gmra.mxu1 %vm14675_vm2, %v12109_v60  ;;  %vm14679_vm6 = vmmov %vm14675_vm2  ;;  %vm14681_vm12 = vnez %v14680_v63 }
 0x3a9   : > { %14672 = vst [vmem:[#allocation62_spill] sm:$0xff] %v12115_v47  ;;  %v8881_v44 = vpop.f32.mrf.mxu0  ;;  %9096 = vmatmul.mubr.msk.bf16.gmra.mxu0 %vm14676_vm4, %v12109_v60  ;;  %v4510_v58 = vsel %vm14677_vm3, %v4498_v59, %v4499_v62  ;;  %v4511_v17 = vsel %vm14678_vm11, %v4497_v11, %v4498_v59  ;;  %9103 = vmatprep.mubr.msk.bf16.mxu1 %vm14679_vm6, %v11893_v56  ;;  %v4503_v1 = vrot.slane %v8845_v7, 7  ;;  %vm14682_vm2 = vmmov %vm14677_vm3  ;;  %vm14683_vm4 = vnez %v14308_v35 }
 0x3aa   : > { %14674 = vst [vmem:[#allocation60_spill] sm:$0xff] %v12119_v22  ;;  %v4563_v5 = vsel %vm14681_vm12, 0.0, %v4510_v58  ;;  %v12133_v19 = vadd.f32 %v4751_v48, %v4511_v17  ;;  %v4458_v49 = vpop.f32.mrf.mxu1  ;;  %v14685_v48 = vrot.slane %v11916_v24, 7  ;;  %vm14686_vm6 = vmmov %vm14682_vm2  ;;  %vm14688_vm11 = vnez %v14315_v14 }
 0x3ab   : > { %v4764_v37 = vpop.f32.mrf.mxu0  ;;  %v4501_v32 = vrot.slane %v4458_v49, 7  ;;  %v12135_v21 = vadd.f32 %v8877_v41, %v4563_v5  ;;  %vm14687_vm3 = vmmov %vm14682_vm2 }
 0x3ac   : > { %v8846_v22 = vpop.f32.mrf.mxu1  ;;  %vm14692_vm12 = vmmov %vm14687_vm3 }
 0x3ad   : > { %v8882_v47 = vpop.f32.mrf.mxu0  ;;  %v4508_v62 = vsel %vm14682_vm2, %v4500_v23, %v4501_v32  ;;  %v4504_v11 = vrot.slane %v8846_v22, 7  ;;  %vm14690_vm2 = vcmask 261120  }
 0x3ae   : > { %v4565_v56 = vsel %vm14683_vm4, 0.0, %v4508_v62  ;;  %v4461_v59 = vpop.f32.mrf.mxu1  ;;  %vm14691_vm4 = vmmov %vm14687_vm3 }
 0x3af   : > { %v4767_v63 = vpop.f32.mrf.mxu0  ;;  %v12141_v58 = vadd.f32 %v4764_v37, %v4565_v56  ;;  %v4536_v41 = vsel %vm14686_vm6, %v4504_v11, %v14685_v48  ;;  %v4505_v17 = vsel %vm14687_vm3, %v4503_v1, %v4504_v11  ;;  %v4502_v7 = vrot.slane %v4461_v59, 7  ;;  %vm14693_vm6 = vmmov %vm14690_vm2 }
 0x3b0   : > { %v4537_v23 = vsel %vm14688_vm11, 0.0, %v4536_v41  ;;  %v12151_v22 = vadd.f32 %v8882_v47, %v4505_v17  ;;  %v8889_v5 = vpop.f32.mrf.mxu1  ;;  %9104 = vmatmul.mubr.msk.bf16.vlgmr.msra.gmra.mxu1 %vm14690_vm2, %v11901_v53  ;;  %vm14694_vm3 = vnez %v14318_v36 }
 0x3b1   : > { %14684 = vst [vmem:[#allocation59_spill] sm:$0xff] %v12141_v58  ;;  %v8925_v49 = vpop.f32.mrf.mxu0  ;;  %v4506_v24 = vsel %vm14691_vm4, %v4502_v7, %v4503_v1  ;;  %v4507_v37 = vsel %vm14692_vm12, %v4501_v32, %v4502_v7  ;;  %9107 = vmatprep.mubr.msk.bf16.mxu1 %vm14693_vm6, %v11906_v51  ;;  %v4779_v53 = vadd.f32 %v11918_v50, %v4537_v23  ;;  %v4991_v41 = vrot.slane %v8889_v5, 1 }
 0x3b2   : > { %14689 = vst [vmem:[#allocation61_spill] sm:$0xff] %v12151_v22  ;;  %v4567_v62 = vsel %vm14694_vm3, 0.0, %v4506_v24  ;;  %v12163_v11 = vadd.f32 %v4767_v63, %v4507_v37  ;;  %v12165_v47 = vpop.f32.mrf.mxu1  ;;  %v5457_v32 = vrot.slane %v8925_v49, 7  ;;  %vm14696_vm12 = vcmp.lt.s32.totalorder %v9638_v52, 7  ;;  %vm14699_vm3 = vmmov %vm14691_vm4 }
 0x3b3   : > { %v12167_v56 = vpop.f32.mrf.mxu0  ;;  %v12170_v59 = vadd.f32 %v8881_v44, %v4567_v62  ;;  %v13893_v50 = vrot.slane %v12165_v47, 1  ;;  %vm14697_vm6 = vmmov %vm14696_vm12 }
 0x3b4   : > { %14695 = vst [vmem:[#allocation64_spill] sm:$0xff] %v12163_v11  ;;  %v8890_v1 = vpop.f32.mrf.mxu1  ;;  %v13900_v44 = vrot.slane %v12167_v56, 7 }
 0x3b5   : > { %v8926_v48 = vpop.f32.mrf.mxu0  ;;  %v4992_v17 = vrot.slane %v8890_v1, 1 }
 0x3b6   : > { %v5458_v7 = vrot.slane %v8926_v48, 7  ;;  %v4865_v51 = vpop.f32.mrf.mxu1 }
 0x3b7   : > { %v5331_v22 = vpop.f32.mrf.mxu0  ;;  %v5049_v63 = vsel %vm14696_vm12, %v4991_v41, %v4992_v17  ;;  %v4990_v24 = vrot.slane %v4865_v51, 1  ;;  %vm14698_vm12 = vmmov %vm14690_vm2 }
 0x3b8   : > { %v5456_v37 = vrot.slane %v5331_v22, 7  ;;  %v5515_v11 = vsel %vm14691_vm4, %v5457_v32, %v5458_v7  ;;  %v8893_v23 = vpop.f32.mrf.mxu1  ;;  %9108 = vmatmul.mubr.msk.bf16.gmra.mxu1 %vm14690_vm2, %v11920_v34  ;;  %v5087_v5 = vadd.f32 %v5049_v63, %v11947_v27  ;;  %vm14700_vm4 = vmmov %vm14697_vm6  ;;  %vm14701_vm2 = vnez %v14339_v20 }
 0x3b9   : > { %v8929_v62 = vpop.f32.mrf.mxu0  ;;  %v5050_v49 = vsel %vm14697_vm6, %v4990_v24, %v4991_v41  ;;  %9111 = vmatprep.mubr.msk.bf16.mxu1 %vm14698_vm12, %v11925_v45  ;;  %v5051_v34 = vsel %vm14700_vm4, %v13893_v50, %v4990_v24  ;;  %vm14702_vm6 = vmmov %vm14699_vm3 }
 0x3ba   : > { %v5516_v22 = vsel %vm14699_vm3, %v5456_v37, %v5457_v32  ;;  %v4878_v1 = vpop.f32.mrf.mxu1  ;;  %v5054_v27 = vsel %vm14701_vm2, 0.0, %v5050_v49  ;;  %v5517_v45 = vsel %vm14702_vm6, %v13900_v44, %v5456_v37  ;;  %v12201_v35 = vadd.f32 %v5051_v34, %v4779_v53  ;;  %vm14703_vm3 = vmmov %vm14700_vm4 }
 0x3bb   : > { %v5344_v48 = vpop.f32.mrf.mxu0  ;;  %v5521_v51 = vsel %vm14292_vm9, 0.0, %v5516_v22  ;;  %v4993_v41 = vrot.slane %v4878_v1, 1  ;;  %v4995_v22 = vrot.slane %v8893_v23, 1  ;;  %v5086_v58 = vadd.f32 %v5054_v27, %v11945_v13  ;;  %vm14704_vm12 = vmmov %vm14702_vm6 }
 0x3bc   : > { %v5459_v32 = vrot.slane %v5344_v48, 7  ;;  %v12199_v63 = vadd.f32 %v5521_v51, %v5087_v5  ;;  %v8894_v6 = vpop.f32.mrf.mxu1  ;;  %v5461_v37 = vrot.slane %v8929_v62, 7  ;;  %vm14705_vm4 = vnez %v14346_v0  ;;  %vm14706_vm6 = vmmov %vm14703_vm3 }
 0x3bd   : > { %v8930_v36 = vpop.f32.mrf.mxu0  ;;  %v5048_v24 = vsel %vm14703_vm3, %v4992_v17, %v4993_v41  ;;  %v4996_v49 = vrot.slane %v8894_v6, 1  ;;  %v12210_v5 = vadd.f32 %v5517_v45, %v5086_v58  ;;  %vm14707_vm3 = vcmask 261120   ;;  %vm14708_vm9 = vmmov %vm14706_vm6 }
 0x3be   : > { %v5462_v50 = vrot.slane %v8930_v36, 7  ;;  %v5514_v20 = vsel %vm14704_vm12, %v5458_v7, %v5459_v32  ;;  %v4881_v1 = vpop.f32.mrf.mxu1  ;;  %v5056_v53 = vsel %vm14705_vm4, 0.0, %v5048_v24  ;;  %vm14709_vm2 = vmmov %vm14707_vm3  ;;  %vm14712_vm4 = vnez %v14354_v39 }
 0x3bf   : > { %v5347_v48 = vpop.f32.mrf.mxu0  ;;  %v5045_v23 = vsel %vm14706_vm6, %v4995_v22, %v4996_v49  ;;  %v4994_v13 = vrot.slane %v4881_v1, 1  ;;  %v5088_v17 = vadd.f32 %v5056_v53, %v11927_v9  ;;  %vm14710_vm6 = vmmov %vm14704_vm12 }
 0x3c0   : > { %v5460_v51 = vrot.slane %v5347_v48, 7  ;;  %v8897_v6 = vpop.f32.mrf.mxu1  ;;  %9112 = vmatmul.mubr.msk.bf16.gmra.mxu1 %vm14707_vm3, %v11953_v46  ;;  %v5091_v7 = vadd.f32 %v5045_v23, %v11979_v43  ;;  %v5511_v62 = vsel %vm14704_vm12, %v5461_v37, %v5462_v50  ;;  %vm14711_vm3 = vmmov %vm14708_vm9 }
 0x3c1   : > { %v8933_v36 = vpop.f32.mrf.mxu0  ;;  %v5046_v58 = vsel %vm14708_vm9, %v4994_v13, %v4995_v22  ;;  %9115 = vmatprep.mubr.msk.bf16.mxu1 %vm14709_vm2, %v11959_v33  ;;  %v12224_v34 = vadd.f32 %v5515_v11, %v5088_v17  ;;  %v5047_v46 = vsel %vm14711_vm3, %v4993_v41, %v4994_v13  ;;  %vm14713_vm12 = vmmov %vm14710_vm6  ;;  %v4999_v48 = vrot.slane %v8897_v6, 1 }
 0x3c2   : > { %v4894_v27 = vpop.f32.mrf.mxu1  ;;  %v5512_v45 = vsel %vm14710_vm6, %v5460_v51, %v5461_v37  ;;  %v5058_v43 = vsel %vm14712_vm4, 0.0, %v5046_v58  ;;  %v5513_v24 = vsel %vm14713_vm12, %v5459_v32, %v5460_v51  ;;  %v5089_v11 = vadd.f32 %v5047_v46, %v11955_v25  ;;  %vm14714_vm9 = vmmov %vm14711_vm3 }
 0x3c3   : > { %v5360_v9 = vpop.f32.mrf.mxu0  ;;  %v4997_v22 = vrot.slane %v4894_v27, 1  ;;  %v5525_v33 = vsel %vm14303_vm5, 0.0, %v5512_v45  ;;  %v5523_v41 = vsel %vm14601_vm7, 0.0, %v5514_v20  ;;  %v5090_v13 = vadd.f32 %v5058_v43, %v11977_v61  ;;  %vm14715_vm2 = vmmov %vm14710_vm6 }
 0x3c4   : > { %v5463_v1 = vrot.slane %v5360_v9, 7  ;;  %v8898_v53 = vpop.f32.mrf.mxu1  ;;  %v12237_v37 = vadd.f32 %v5525_v33, %v5091_v7  ;;  %v12244_v58 = vadd.f32 %v5523_v41, %v5089_v11  ;;  %v5465_v27 = vrot.slane %v8933_v36, 7  ;;  %vm14716_vm6 = vmmov %vm14711_vm3 }
 0x3c5   : > { %v8934_v23 = vpop.f32.mrf.mxu0  ;;  %v5044_v32 = vsel %vm14714_vm9, %v4996_v49, %v4997_v22  ;;  %v5000_v51 = vrot.slane %v8898_v53, 1  ;;  %v12248_v7 = vadd.f32 %v5513_v24, %v5090_v13  ;;  %vm14717_vm3 = vcmask 261120   ;;  %vm14718_vm12 = vmmov %vm14715_vm2 }
 0x3c6   : > { %v5466_v17 = vrot.slane %v8934_v23, 7  ;;  %v4897_v9 = vpop.f32.mrf.mxu1  ;;  %v5060_v6 = vsel %vm14363_vm14, 0.0, %v5044_v32  ;;  %v5510_v20 = vsel %vm14715_vm2, %v5462_v50, %v5463_v1  ;;  %vm14719_vm9 = vmmov %vm14716_vm6  ;;  %vm14723_vm5 = vnez %v14371_v30 }
 0x3c7   : > { %v5363_v25 = vpop.f32.mrf.mxu0  ;;  %v5041_v61 = vsel %vm14716_vm6, %v4999_v48, %v5000_v51  ;;  %v4998_v45 = vrot.slane %v4897_v9, 1  ;;  %v5092_v46 = vadd.f32 %v5060_v6, %v11961_v3  ;;  %vm14720_vm2 = vmmov %vm14717_vm3 }
 0x3c8   : > { %v5464_v49 = vrot.slane %v5363_v25, 7  ;;  %v8901_v43 = vpop.f32.mrf.mxu1  ;;  %9116 = vmatmul.mubr.msk.bf16.gmra.mxu1 %vm14717_vm3, %v11985_v26  ;;  %v5095_v36 = vadd.f32 %v5041_v61, %v12011_v57  ;;  %v5507_v24 = vsel %vm14718_vm12, %v5465_v27, %v5466_v17  ;;  %vm14721_vm6 = vmmov %vm14718_vm12 }
 0x3c9   : > { %v8937_v33 = vpop.f32.mrf.mxu0  ;;  %v5042_v50 = vsel %vm14719_vm9, %v4998_v45, %v4999_v48  ;;  %9119 = vmatprep.mubr.msk.bf16.mxu1 %vm14720_vm2, %v11991_v10  ;;  %v12264_v11 = vadd.f32 %v5511_v62, %v5092_v46  ;;  %vm14722_vm3 = vmmov %vm14719_vm9  ;;  %v5003_v32 = vrot.slane %v8901_v43, 1 }
 0x3ca   : > { %v4910_v53 = vpop.f32.mrf.mxu1  ;;  %v5508_v23 = vsel %vm14721_vm6, %v5464_v49, %v5465_v27  ;;  %v5043_v26 = vsel %vm14722_vm3, %v4997_v22, %v4998_v45  ;;  %v5062_v57 = vsel %vm14723_vm5, 0.0, %v5042_v50  ;;  %vm14724_vm12 = vmmov %vm14721_vm6  ;;  %v5527_v22 = vsel %vm14612_vm10, 0.0, %v5510_v20 }
 0x3cb   : > { %v5376_v3 = vpop.f32.mrf.mxu0  ;;  %v5509_v41 = vsel %vm14724_vm12, %v5463_v1, %v5464_v49  ;;  %v5001_v48 = vrot.slane %v4910_v53, 1  ;;  %v5529_v10 = vsel %vm14620_vm0, 0.0, %v5508_v23  ;;  %v5093_v62 = vadd.f32 %v5043_v26, %v11987_v55  ;;  %vm14725_vm9 = vmmov %vm14722_vm3 }
 0x3cc   : > { %v5467_v13 = vrot.slane %v5376_v3, 7  ;;  %v8902_v9 = vpop.f32.mrf.mxu1  ;;  %v12277_v27 = vadd.f32 %v5529_v10, %v5095_v36  ;;  %v5094_v6 = vadd.f32 %v5062_v57, %v12009_v40  ;;  %v5469_v46 = vrot.slane %v8937_v33, 7  ;;  %vm14726_vm2 = vmmov %vm14721_vm6 }
 0x3cd   : > { %v8938_v25 = vpop.f32.mrf.mxu0  ;;  %v5040_v1 = vsel %vm14725_vm9, %v5000_v51, %v5001_v48  ;;  %v5004_v61 = vrot.slane %v8902_v9, 1  ;;  %v12284_v49 = vadd.f32 %v5527_v22, %v5093_v62  ;;  %vm14727_vm6 = vmmov %vm14722_vm3  ;;  %vm14728_vm3 = vcmask 261120  }
 0x3ce   : > { %v5470_v45 = vrot.slane %v8938_v25, 7  ;;  %v4913_v50 = vpop.f32.mrf.mxu1  ;;  %v5064_v43 = vsel %vm10102_vm15, 0.0, %v5040_v1  ;;  %v12288_v36 = vadd.f32 %v5509_v41, %v5094_v6  ;;  %v5506_v20 = vsel %vm14726_vm2, %v5466_v17, %v5467_v13  ;;  %vm14729_vm12 = vmmov %vm14726_vm2 }
 0x3cf   : > { %v5379_v55 = vpop.f32.mrf.mxu0  ;;  %v5037_v40 = vsel %vm14727_vm6, %v5003_v32, %v5004_v61  ;;  %v5002_v53 = vrot.slane %v4913_v50, 1  ;;  %v5096_v3 = vadd.f32 %v5064_v43, %v11993_v28  ;;  %vm14730_vm9 = vmmov %vm14727_vm6  ;;  %v14738_v43 = vld [vmem:[#allocation34_spill] sm:$0xff] }
 0x3d0   : > { %v5468_v51 = vrot.slane %v5379_v55, 7  ;;  %v8905_v23 = vpop.f32.mrf.mxu1  ;;  %9120 = vmatmul.mubr.msk.bf16.gmra.mxu1 %vm14728_vm3, %v12017_v16  ;;  %v5099_v33 = vadd.f32 %v5037_v40, %v12043_v15  ;;  %v5503_v57 = vsel %vm14729_vm12, %v5469_v46, %v5470_v45  ;;  %vm14731_vm2 = vmmov %vm14728_vm3  ;;  %v14736_v55 = vld [vmem:[#allocation8_spill] sm:$0xff] }
 0x3d1   : > { %v8941_v26 = vpop.f32.mrf.mxu0  ;;  %v5038_v17 = vsel %vm14730_vm9, %v5002_v53, %v5003_v32  ;;  %9123 = vmatprep.mubr.msk.bf16.mxu1 %vm14731_vm2, %v12023_v2  ;;  %v12304_v41 = vadd.f32 %v5507_v24, %v5096_v3  ;;  %vm14732_vm6 = vmmov %vm14729_vm12  ;;  %v14735_v24 = vld [vmem:[#allocation55_spill] sm:$0xff]  ;;  %v5007_v6 = vrot.slane %v8905_v23, 1  ;;  %v14740_v23 = vld [vmem:[#allocation49_spill] sm:$0xff] }
 0x3d2   : > { %v4926_v10 = vpop.f32.mrf.mxu1  ;;  %v5504_v62 = vsel %vm14732_vm6, %v5468_v51, %v5469_v46  ;;  %vm14733_vm3 = vmmov %vm14730_vm9  ;;  %v5066_v15 = vsel %vm10125_vm1, 0.0, %v5038_v17  ;;  %vm14737_vm9 = vnez %v14736_v55  ;;  %v5473_v17 = vrot.slane %v8941_v26, 7  ;;  %v14745_v26 = vld [vmem:[#allocation38_spill] sm:$0xff] }
 0x3d3   : > { %v5392_v28 = vpop.f32.mrf.mxu0  ;;  %v5039_v16 = vsel %vm14733_vm3, %v5001_v48, %v5002_v53  ;;  %vm14734_vm12 = vmmov %vm14732_vm6  ;;  %v5005_v32 = vrot.slane %v4926_v10, 1  ;;  %v5533_v2 = vsel %vm14633_vm8, 0.0, %v5504_v62  ;;  %v5531_v48 = vsel %vm14737_vm9, 0.0, %v5506_v20 }
 0x3d4   : > { %v5505_v9 = vsel %vm14734_vm12, %v5467_v13, %v5468_v51  ;;  %v5471_v25 = vrot.slane %v5392_v28, 7  ;;  %v5097_v22 = vadd.f32 %v5039_v16, %v14735_v24  ;;  %v8906_v1 = vpop.f32.mrf.mxu1  ;;  %v12317_v46 = vadd.f32 %v5533_v2, %v5099_v33  ;;  %vm14739_vm2 = vmmov %vm14733_vm3  ;;  %v14744_v2 = vld [vmem:[#allocation43_spill] sm:$0xff] }
 0x3d5   : > { %v8942_v50 = vpop.f32.mrf.mxu0  ;;  %v5098_v40 = vadd.f32 %v5066_v15, %v14738_v43  ;;  %v5036_v13 = vsel %vm14739_vm2, %v5004_v61, %v5005_v32  ;;  %v5008_v53 = vrot.slane %v8906_v1, 1  ;;  %vm14741_vm6 = vnez %v14740_v23  ;;  %vm14742_vm3 = vmmov %vm14734_vm12  ;;  %v14750_v43 = vld [vmem:[#allocation45_spill] sm:$0xff]  ;;  %v14783_v23 = vld [vmem:[#allocation35_spill] sm:$0xff] }
 0x3d6   : > { %v5474_v51 = vrot.slane %v8942_v50, 7  ;;  %v12324_v3 = vadd.f32 %v5531_v48, %v5097_v22  ;;  %v4929_v10 = vpop.f32.mrf.mxu1  ;;  %v5068_v62 = vsel %vm14741_vm6, 0.0, %v5036_v13  ;;  %v5502_v20 = vsel %vm14742_vm3, %v5470_v45, %v5471_v25  ;;  %vm14743_vm12 = vmmov %vm14739_vm2 }
 0x3d7   : > { %v5395_v28 = vpop.f32.mrf.mxu0  ;;  %v12328_v33 = vadd.f32 %v5505_v9, %v5098_v40  ;;  %v5033_v16 = vsel %vm14743_vm12, %v5007_v6, %v5008_v53  ;;  %v5006_v15 = vrot.slane %v4929_v10, 1  ;;  %v5100_v24 = vadd.f32 %v5068_v62, %v14744_v2  ;;  %vm14747_vm8 = vmmov %vm14742_vm3  ;;  %v14752_v40 = vld [vmem:[#allocation10_spill] sm:$0xff] }
 0x3d8   : > { %v5472_v61 = vrot.slane %v5395_v28, 7  ;;  %v8909_v22 = vpop.f32.mrf.mxu1  ;;  %vm14746_vm2 = vcmask 261120   ;;  %v5103_v50 = vadd.f32 %v5033_v16, %v12075_v42  ;;  %v5499_v9 = vsel %vm14747_vm8, %v5473_v17, %v5474_v51  ;;  %vm14748_vm9 = vmmov %vm14743_vm12  ;;  %v14755_v16 = vld [vmem:[#allocation19_spill] sm:$0xff] }
 0x3d9   : > { %v8945_v1 = vpop.f32.mrf.mxu0  ;;  %9124 = vmatmul.mubr.msk.bf16.gmra.mxu1 %vm14746_vm2, %v14745_v26  ;;  %v5034_v45 = vsel %vm14748_vm9, %v5006_v15, %v5007_v6  ;;  %vm14749_vm3 = vmmov %vm14748_vm9  ;;  %vm14753_vm1 = vnez %v14752_v40  ;;  %v12348_v62 = vadd.f32 %v5503_v57, %v5100_v24  ;;  %v14756_v26 = vld [vmem:[#allocation50_spill] sm:$0xff] }
 0x3da   : > { %v5035_v48 = vsel %vm14749_vm3, %v5005_v32, %v5006_v15  ;;  %vm14751_vm12 = vmmov %vm14746_vm2  ;;  %v5535_v13 = vsel %vm14753_vm1, 0.0, %v5502_v20  ;;  %v4942_v10 = vpop.f32.mrf.mxu1  ;;  %v14758_v15 = vld [vmem:[#allocation11_spill] sm:$0xff]  ;;  %v5011_v20 = vrot.slane %v8909_v22, 1 }
 0x3db   : > { %9127 = vmatprep.mubr.msk.bf16.mxu1 %vm14751_vm12, %v14750_v43  ;;  %v5408_v28 = vpop.f32.mrf.mxu0  ;;  %vm14754_vm2 = vmmov %vm14747_vm8  ;;  %v5101_v2 = vadd.f32 %v5035_v48, %v14755_v16  ;;  %vm14757_vm8 = vnez %v14756_v26  ;;  %v5009_v44 = vrot.slane %v4942_v10, 1  ;;  %vm14759_vm9 = vnez %v14758_v15  ;;  %v14763_v22 = vld [vmem:[#allocation51_spill] sm:$0xff] }
 0x3dc   : > { %v5500_v42 = vsel %vm14754_vm2, %v5472_v61, %v5473_v17  ;;  %v5070_v6 = vsel %vm14757_vm8, 0.0, %v5034_v45  ;;  %v5475_v32 = vrot.slane %v5408_v28, 7  ;;  %v8910_v4 = vpop.f32.mrf.mxu1  ;;  %vm14761_vm3 = vmmov %vm14754_vm2  ;;  %vm14762_vm12 = vcmp.lt.s32.totalorder %v9638_v52, 7 }
 0x3dd   : > { %v5537_v43 = vsel %vm14759_vm9, 0.0, %v5500_v42  ;;  %v5102_v40 = vadd.f32 %v5070_v6, %v14760_v18  ;;  %v8946_v55 = vpop.f32.mrf.mxu0  ;;  %v12360_v24 = vadd.f32 %v5535_v13, %v5101_v2  ;;  %v5501_v17 = vsel %vm14761_vm3, %v5471_v25, %v5472_v61  ;;  %vm14765_vm9 = vmmov %vm14761_vm3  ;;  %v14767_v2 = vld [vmem:[#allocation31_spill] sm:$0xff] }
 0x3de   : > { %v12358_v57 = vadd.f32 %v5537_v43, %v5103_v50  ;;  %v5032_v45 = vsel %vm14762_vm12, %v5008_v53, %v5009_v44  ;;  %v5012_v48 = vrot.slane %v8910_v4, 1  ;;  %v5478_v10 = vrot.slane %v8946_v55, 7  ;;  %v4945_v16 = vpop.f32.mrf.mxu1  ;;  %vm14766_vm1 = vmmov %vm14762_vm12 }
 0x3df   : > { %v12366_v28 = vadd.f32 %v5501_v17, %v5102_v40  ;;  %v5477_v42 = vrot.slane %v8945_v1, 7  ;;  %v5411_v18 = vpop.f32.mrf.mxu0  ;;  %vm14764_vm2 = vnez %v14763_v22  ;;  %v5498_v50 = vsel %vm14765_vm9, %v5474_v51, %v5475_v32  ;;  %v14768_v40 = vld [vmem:[#allocation23_spill] sm:$0xff]  ;;  %v14770_v1 = vld [vmem:[#allocation18_spill] sm:$0xff]  ;;  %vm14771_vm12 = vmmov %vm14765_vm9 }
 0x3e0   : > { %v5072_v6 = vsel %vm14764_vm2, 0.0, %v5032_v45  ;;  %v5029_v13 = vsel %vm14766_vm1, %v5011_v20, %v5012_v48  ;;  %v5010_v25 = vrot.slane %v4945_v16, 1  ;;  %v5476_v61 = vrot.slane %v5411_v18, 7  ;;  %v8913_v4 = vpop.f32.mrf.mxu1  ;;  %vm14772_vm8 = vmmov %vm14766_vm1  ;;  %v14774_v16 = vld [vmem:[#allocation56_spill] sm:$0xff]  ;;  %v14776_v18 = vld [vmem:[#allocation14_spill] sm:$0xff] }
 0x3e1   : > { %v5104_v53 = vadd.f32 %v5072_v6, %v14767_v2  ;;  %v8949_v55 = vpop.f32.mrf.mxu0  ;;  %vm14769_vm3 = vcmask 261120   ;;  %v5107_v43 = vadd.f32 %v5029_v13, %v14770_v1  ;;  %v5495_v17 = vsel %vm14771_vm12, %v5477_v42, %v5478_v10  ;;  %vm14773_vm9 = vmmov %vm14766_vm1  ;;  %v14779_v1 = vld [vmem:[#allocation57_spill] sm:$0xff] }
 0x3e2   : > { %9128 = vmatmul.mubr.msk.bf16.gmra.mxu1 %vm14769_vm3, %v14768_v40  ;;  %v5030_v51 = vsel %vm14772_vm8, %v5010_v25, %v5011_v20  ;;  %v5031_v45 = vsel %vm14773_vm9, %v5009_v44, %v5010_v25  ;;  %vm14775_vm1 = vmmov %vm14769_vm3  ;;  %vm14777_vm2 = vnez %v14776_v18  ;;  %v4958_v2 = vpop.f32.mrf.mxu1  ;;  %v14780_v22 = vld [vmem:[#allocation53_spill] sm:$0xff] }
 0x3e3   : > { %9131 = vmatprep.mubr.msk.bf16.mxu1 %vm14775_vm1, %v14774_v16  ;;  %v5539_v6 = vsel %vm14777_vm2, 0.0, %v5498_v50  ;;  %v5424_v15 = vpop.f32.mrf.mxu0  ;;  %v12388_v40 = vadd.f32 %v5499_v9, %v5104_v53  ;;  %vm14778_vm3 = vmmov %vm14771_vm12  ;;  %v5105_v26 = vadd.f32 %v5031_v45, %v14779_v1  ;;  %vm14781_vm8 = vnez %v14780_v22 }
 0x3e4   : > { %v5496_v13 = vsel %vm14778_vm3, %v5476_v61, %v5477_v42  ;;  %v5074_v20 = vsel %vm14781_vm8, 0.0, %v5030_v51  ;;  %v5013_v8 = vrot.slane %v4958_v2, 1  ;;  %v5479_v44 = vrot.slane %v5424_v15, 7  ;;  %v8914_v31 = vpop.f32.mrf.mxu1  ;;  %vm14784_vm12 = vmmov %vm14778_vm3 }
 0x3e5   : > { %v5541_v16 = vsel %vm14666_vm13, 0.0, %v5496_v13  ;;  %v5106_v18 = vadd.f32 %v5074_v20, %v14783_v23  ;;  %v5015_v50 = vrot.slane %v8913_v4, 1  ;;  %v8950_v29 = vpop.f32.mrf.mxu0  ;;  %v12400_v53 = vadd.f32 %v5539_v6, %v5105_v26  ;;  %v14785_v4 = vld [vmem:[#allocation12_spill] sm:$0xff]  ;;  %vm14787_vm13 = vmmov %vm14773_vm9  ;;  %v14788_v6 = vld [vmem:[#allocation58_spill] sm:$0xff] }
 0x3e6   : > { %v12398_v9 = vadd.f32 %v5541_v16, %v5107_v43  ;;  %v5497_v42 = vsel %vm14784_vm12, %v5475_v32, %v5476_v61  ;;  %v5028_v51 = vsel %vm14773_vm9, %v5012_v48, %v5013_v8  ;;  %v5016_v45 = vrot.slane %v8914_v31, 1  ;;  %v4961_v1 = vpop.f32.mrf.mxu1  ;;  %vm14790_vm9 = vmmov %vm14778_vm3 }
 0x3e7   : > { %v5482_v15 = vrot.slane %v8950_v29, 7  ;;  %v12406_v2 = vadd.f32 %v5497_v42, %v5106_v18  ;;  %v5481_v13 = vrot.slane %v8949_v55, 7  ;;  %v5427_v23 = vpop.f32.mrf.mxu0  ;;  %vm14786_vm1 = vnez %v14785_v4  ;;  %v14793_v42 = vld [vmem:[#allocation22_spill] sm:$0xff]  ;;  %v14799_v4 = vld [vmem:[#allocation25_spill] sm:$0xff] }
 0x3e8   : > { %v5076_v20 = vsel %vm14786_vm1, 0.0, %v5028_v51  ;;  %v5494_v26 = vsel %vm14778_vm3, %v5478_v10, %v5479_v44  ;;  %v5025_v43 = vsel %vm14787_vm13, %v5015_v50, %v5016_v45  ;;  %v5014_v32 = vrot.slane %v4961_v1, 1  ;;  %v8917_v31 = vpop.f32.mrf.mxu1  ;;  %vm14791_vm3 = vmmov %vm14787_vm13 }
 0x3e9   : > { %v5480_v61 = vrot.slane %v5427_v23, 7  ;;  %v5108_v48 = vadd.f32 %v5076_v20, %v14788_v6  ;;  %v12415_v29 = vpop.f32.mrf.mxu0  ;;  %vm14789_vm12 = vcmask 261120   ;;  %v5111_v55 = vadd.f32 %v5025_v43, %v12135_v21  ;;  %vm14792_vm13 = vmmov %vm14791_vm3  ;;  %v14796_v21 = vld [vmem:[#allocation62_spill] sm:$0xff]  ;;  %v14797_v6 = vld [vmem:[#allocation13_spill] sm:$0xff] }
 0x3ea   : > { %9132 = vmatmul.mubr.msk.bf16.gmra.mxu1 %vm14789_vm12, %v12109_v60  ;;  %v5491_v18 = vsel %vm14790_vm9, %v5481_v13, %v5482_v15  ;;  %v5026_v10 = vsel %vm14791_vm3, %v5014_v32, %v5015_v50  ;;  %v5027_v16 = vsel %vm14792_vm13, %v5013_v8, %v5014_v32  ;;  %vm14794_vm2 = vnez %v14793_v42  ;;  %v4974_v1 = vpop.f32.mrf.mxu1  ;;  %vm14795_vm12 = vmmov %vm14790_vm9 }
 0x3eb   : > { %v5543_v51 = vsel %vm14794_vm2, 0.0, %v5494_v26  ;;  %v5440_v23 = vpop.f32.mrf.mxu0  ;;  %v12428_v20 = vadd.f32 %v5495_v17, %v5108_v48  ;;  %v5492_v60 = vsel %vm14795_vm12, %v5480_v61, %v5481_v13  ;;  %v5109_v43 = vadd.f32 %v5027_v16, %v14796_v21  ;;  %vm14801_vm13 = vmmov %vm14795_vm12 }
 0x3ec   : > { %vm14798_vm9 = vnez %v14797_v6  ;;  %v5017_v22 = vrot.slane %v4974_v1, 1  ;;  %v5483_v50 = vrot.slane %v5440_v23, 7  ;;  %vm14800_vm3 = vnez %v14799_v4  ;;  %v8918_v42 = vpop.f32.mrf.mxu1  ;;  %vm14805_vm2 = vmmov %vm14801_vm13  ;;  %v14824_v4 = vld [vmem:[#allocation61_spill] sm:$0xff] }
 0x3ed   : > { %v5078_v25 = vsel %vm14798_vm9, 0.0, %v5026_v10  ;;  %v5545_v8 = vsel %vm14800_vm3, 0.0, %v5492_v60  ;;  %v5019_v26 = vrot.slane %v8917_v31, 1  ;;  %v8954_v30 = vpop.f32.mrf.mxu0  ;;  %v12440_v48 = vadd.f32 %v5543_v51, %v5109_v43 }
 0x3ee   : > { %v5110_v32 = vadd.f32 %v5078_v25, %v12133_v19  ;;  %v12438_v17 = vadd.f32 %v5545_v8, %v5111_v55  ;;  %v5493_v13 = vsel %vm14801_vm13, %v5479_v44, %v5480_v61  ;;  %vm14802_vm12 = vcmp.lt.s32.totalorder %v9638_v52, 7  ;;  %v4977_v60 = vpop.f32.mrf.mxu1  ;;  %v14803_v19 = vld [vmem:[#allocation15_spill] sm:$0xff] }
 0x3ef   : > { %v5024_v10 = vsel %vm14802_vm12, %v5016_v45, %v5017_v22  ;;  %v5020_v16 = vrot.slane %v8918_v42, 1  ;;  %v5486_v1 = vrot.slane %v8954_v30, 7  ;;  %v5443_v21 = vpop.f32.mrf.mxu0  ;;  %vm14804_vm3 = vnez %v14803_v19  ;;  %vm14806_vm9 = vmmov %vm14802_vm12 }
 0x3f0   : > { %v12446_v23 = vadd.f32 %v5493_v13, %v5110_v32  ;;  %v5080_v25 = vsel %vm14804_vm3, 0.0, %v5024_v10  ;;  %v5490_v31 = vsel %vm14805_vm2, %v5482_v15, %v5483_v50  ;;  %v14807_v44 = vrot.slane %v12165_v47, 1  ;;  %vm14808_vm13 = vmmov %vm14806_vm9  ;;  %v8961_v51 = vpop.f32.mrf.mxu1  ;;  %v14811_v32 = vld [vmem:[#allocation60_spill] sm:$0xff] }
 0x3f1   : > { %v5021_v55 = vsel %vm14806_vm9, %v5019_v26, %v5020_v16  ;;  %v5018_v61 = vrot.slane %v4977_v60, 1  ;;  %v5484_v30 = vrot.slane %v5443_v21, 7  ;;  %v5485_v42 = vrot.slane %v12415_v29, 7  ;;  %v12459_v43 = vpop.f32.mrf.mxu0  ;;  %vm14810_vm12 = vmmov %vm14805_vm2 }
 0x3f2   : > { %v5052_v45 = vsel %vm14808_vm13, %v5020_v16, %v14807_v44  ;;  %v14809_v8 = vrot.slane %v12167_v56, 7  ;;  %v5112_v13 = vadd.f32 %v5080_v25, %v14811_v32  ;;  %v5115_v10 = vadd.f32 %v5021_v55, %v12170_v59  ;;  %vm14812_vm2 = vmmov %vm14806_vm9  ;;  %v5634_v56 = vpop.f32.mrf.mxu1  ;;  %v14817_v25 = vld [vmem:[#allocation59_spill] sm:$0xff] }
 0x3f3   : > { %v5022_v47 = vsel %vm14812_vm2, %v5018_v61, %v5019_v26  ;;  %vm14813_vm9 = vmmov %vm14812_vm2  ;;  %v12472_v29 = vadd.f32 %v8961_v51, %v12199_v63  ;;  %v12476_v21 = vpop.f32.mrf.mxu0  ;;  %v14820_v63 = vld [vmem:[#allocation30_spill] sm:$0xff]  ;;  %v14822_v51 = vld [vmem:[#allocation21_spill] sm:$0xff] }
 0x3f4   : > { %v5518_v15 = vsel %vm14810_vm12, %v5486_v1, %v14809_v8  ;;  %v5023_v16 = vsel %vm14813_vm9, %v5017_v22, %v5018_v61  ;;  %14815 = vst [vmem:[#allocation26_spill] sm:$0xff] %v12476_v21  ;;  %v12478_v44 = vadd.f32 %v5491_v18, %v5112_v13  ;;  %vm14816_vm13 = vmmov %vm14810_vm12  ;;  %v14818_v8 = vld [vmem:[#allocation33_spill] sm:$0xff]  ;;  %vm14821_vm2 = vnez %v14820_v63  ;;  %v8962_v32 = vpop.f32.mrf.mxu1 }
 0x3f5   : > { %14814 = vst [vmem:[#allocation66_spill] sm:$0xff] %v12472_v29  ;;  %v5519_v60 = vsel %vm14688_vm11, 0.0, %v5518_v15  ;;  %v5488_v59 = vsel %vm14816_vm13, %v5484_v30, %v5485_v42  ;;  %v5113_v55 = vadd.f32 %v5023_v16, %v14817_v25  ;;  %vm14819_vm12 = vnez %v14818_v8  ;;  %v12490_v14 = vpop.f32.mrf.mxu0  ;;  %vm14830_vm11 = vmmov %vm14816_vm13 }
 0x3f6   : > { %v5551_v26 = vadd.f32 %v5519_v60, %v12201_v35  ;;  %v5549_v22 = vsel %vm14819_vm12, 0.0, %v5488_v59  ;;  %v5547_v61 = vsel %vm14821_vm2, 0.0, %v5490_v31  ;;  %vm14823_vm9 = vnez %v14822_v51  ;;  %v14826_v60 = vld [vmem:[#allocation16_spill] sm:$0xff]  ;;  %v5637_v59 = vpop.f32.mrf.mxu1 }
 0x3f7   : > { %v5084_v15 = vsel %vm14823_vm9, 0.0, %v5052_v45  ;;  %v12492_v18 = vadd.f32 %v5549_v22, %v5115_v10  ;;  %v12494_v13 = vadd.f32 %v5547_v61, %v5113_v55  ;;  %v12500_v35 = vadd.f32 %v8962_v32, %v12224_v34  ;;  %v12506_v8 = vpop.f32.mrf.mxu0  ;;  %v14829_v55 = vld [vmem:[#allocation64_spill] sm:$0xff] }
 0x3f8   : > { %v5116_v16 = vadd.f32 %v5084_v15, %v14824_v4  ;;  %v12497_v25 = vadd.f32 %v5634_v56, %v5551_v26  ;;  %v5487_v31 = vsel %vm14816_vm13, %v5485_v42, %v5486_v1  ;;  %vm14827_vm12 = vnez %v14826_v60  ;;  %14828 = vst [vmem:[#allocation24_spill] sm:$0xff] %v12506_v8  ;;  %v8965_v34 = vpop.f32.mrf.mxu1 }
 0x3f9   : > { %v5082_v45 = vsel %vm14827_vm12, 0.0, %v5022_v47  ;;  %v5489_v4 = vsel %vm14830_vm11, %v5483_v50, %v5484_v30  ;;  %v12514_v56 = vadd.f32 %v5637_v59, %v12210_v5  ;;  %v12516_v26 = vpop.f32.mrf.mxu0  ;;  %v12521_v42 = vadd.f32 %v8965_v34, %v12237_v37 }
 0x3fa   : > { %14825 = vst [vmem:[#allocation63_spill] sm:$0xff] %v12497_v25  ;;  %v12508_v10 = vadd.f32 %v5487_v31, %v5116_v16  ;;  %v5114_v22 = vadd.f32 %v5082_v45, %v14829_v55  ;;  %v5650_v47 = vpop.f32.mrf.mxu1  ;;  %vm14846_vm11 = vcmp.lt.s32.totalorder %v9638_v52, 7 }
 0x3fb   : > { %14831 = vst [vmem:[#allocation65_spill] sm:$0xff] %v12514_v56  ;;  %14832 = vst [vmem:[#allocation71_spill] sm:$0xff] %v12521_v42  ;;  %v12523_v61 = vpop.f32.mrf.mxu0  ;;  %v12526_v15 = vadd.f32 %v5650_v47, %v12244_v58 }
 0x3fc   : > { %v12518_v1 = vadd.f32 %v5489_v4, %v5114_v22  ;;  %v8966_v32 = vpop.f32.mrf.mxu1  ;;  %vm14847_vm13 = vmmov %vm14846_vm11 }
 0x3fd   : > { %v12528_v16 = vpop.f32.mrf.mxu0  ;;  %v12531_v5 = vadd.f32 %v8966_v32, %v12264_v11  ;;  %vm14850_vm2 = vmmov %vm14846_vm11 }
 0x3fe   : > { %v5653_v50 = vpop.f32.mrf.mxu1 }
 0x3ff   : > { %v12533_v30 = vpop.f32.mrf.mxu0  ;;  %v12536_v31 = vadd.f32 %v5653_v50, %v12248_v7 }
 0x400   : > { %v8969_v37 = vpop.f32.mrf.mxu1 }
 0x401   : > { %v12538_v45 = vpop.f32.mrf.mxu0  ;;  %v12541_v59 = vadd.f32 %v8969_v37, %v12277_v27 }
 0x402   : > { %v5666_v58 = vpop.f32.mrf.mxu1 }
 0x403   : > { %v12543_v55 = vpop.f32.mrf.mxu0  ;;  %v12546_v22 = vadd.f32 %v5666_v58, %v12284_v49 }
 0x404   : > { %v8970_v11 = vpop.f32.mrf.mxu1 }
 0x405   : > { %v12548_v4 = vpop.f32.mrf.mxu0  ;;  %v12551_v34 = vadd.f32 %v8970_v11, %v12304_v41 }
 0x406   : > { %v5669_v7 = vpop.f32.mrf.mxu1 }
 0x407   : > { %v12553_v47 = vpop.f32.mrf.mxu0  ;;  %v12556_v32 = vadd.f32 %v5669_v7, %v12288_v36 }
 0x408   : > { %v8973_v27 = vpop.f32.mrf.mxu1 }
 0x409   : > { %v12558_v50 = vpop.f32.mrf.mxu0  ;;  %v12561_v37 = vadd.f32 %v8973_v27, %v12317_v46 }
 0x40a   : > { %v5682_v49 = vpop.f32.mrf.mxu1 }
 0x40b   : > { %v12563_v58 = vpop.f32.mrf.mxu0  ;;  %v12566_v63 = vadd.f32 %v5682_v49, %v12324_v3 }
 0x40c   : > { %v8974_v41 = vpop.f32.mrf.mxu1 }
 0x40d   : > { %v12568_v11 = vpop.f32.mrf.mxu0  ;;  %v12571_v25 = vadd.f32 %v8974_v41, %v12348_v62 }
 0x40e   : > { %v5685_v36 = vpop.f32.mrf.mxu1  ;;  %v5986_v12 = vrot.slane %v12568_v11, 1 }
 0x40f   : > { %v12573_v7 = vpop.f32.mrf.mxu0  ;;  %v12576_v42 = vadd.f32 %v5685_v36, %v12328_v33 }
 0x410   : > { %v8977_v46 = vpop.f32.mrf.mxu1 }
 0x411   : > { %v12578_v27 = vpop.f32.mrf.mxu0  ;;  %v12581_v51 = vadd.f32 %v8977_v46, %v12358_v57 }
 0x412   : > { %v5698_v3 = vpop.f32.mrf.mxu1 }
 0x413   : > { %14833 = vst [vmem:[#allocation72_spill] sm:$0xff] %v12581_v51  ;;  %v12583_v49 = vpop.f32.mrf.mxu0  ;;  %v12586_v56 = vadd.f32 %v5698_v3, %v12360_v24 }
 0x414   : > { %v8978_v62 = vpop.f32.mrf.mxu1 }
 0x415   : > { %v12588_v41 = vpop.f32.mrf.mxu0  ;;  %v12591_v6 = vadd.f32 %v8978_v62, %v12388_v40 }
 0x416   : > { %v5701_v33 = vpop.f32.mrf.mxu1 }
 0x417   : > { %v12593_v36 = vpop.f32.mrf.mxu0  ;;  %v12596_v19 = vadd.f32 %v5701_v33, %v12366_v28 }
 0x418   : > { %v8981_v57 = vpop.f32.mrf.mxu1 }
 0x419   : > { %14834 = vst [vmem:[#allocation68_spill] sm:$0xff] %v12596_v19  ;;  %v12598_v46 = vpop.f32.mrf.mxu0  ;;  %v12601_v29 = vadd.f32 %v8981_v57, %v12398_v9 }
 0x41a   : > { %v5714_v24 = vpop.f32.mrf.mxu1 }
 0x41b   : > { %14835 = vst [vmem:[#allocation73_spill] sm:$0xff] %v12601_v29  ;;  %v12603_v3 = vpop.f32.mrf.mxu0  ;;  %v12606_v8 = vadd.f32 %v5714_v24, %v12400_v53 }
 0x41c   : > { %v8982_v40 = vpop.f32.mrf.mxu1 }
 0x41d   : > { %14836 = vst [vmem:[#allocation67_spill] sm:$0xff] %v12606_v8  ;;  %v12608_v62 = vpop.f32.mrf.mxu0  ;;  %v12611_v21 = vadd.f32 %v8982_v40, %v12428_v20 }
 0x41e   : > { %v5717_v28 = vpop.f32.mrf.mxu1 }
 0x41f   : > { %14837 = vst [vmem:[#allocation70_spill] sm:$0xff] %v12611_v21  ;;  %v12613_v33 = vpop.f32.mrf.mxu0  ;;  %v12616_v19 = vadd.f32 %v5717_v28, %v12406_v2 }
 0x420   : > { %v8985_v9 = vpop.f32.mrf.mxu1 }
 0x421   : > { %14838 = vst [vmem:[#allocation74_spill] sm:$0xff] %v12616_v19  ;;  %v12618_v57 = vpop.f32.mrf.mxu0  ;;  %v12621_v29 = vadd.f32 %v8985_v9, %v12438_v17 }
 0x422   : > { %14839 = vst [vmem:[#allocation27_spill] sm:$0xff] %v12618_v57  ;;  %v5730_v53 = vpop.f32.mrf.mxu1 }
 0x423   : > { %14840 = vst [vmem:[#allocation29_spill] sm:$0xff] %v12621_v29  ;;  %v12623_v24 = vpop.f32.mrf.mxu0  ;;  %v12626_v8 = vadd.f32 %v5730_v53, %v12440_v48  ;;  %v5975_v53 = vrot.slane %v12523_v61, 1 }
 0x424   : > { %v8986_v20 = vpop.f32.mrf.mxu1 }
 0x425   : > { %14841 = vst [vmem:[#allocation20_spill] sm:$0xff] %v12626_v8  ;;  %v12628_v40 = vpop.f32.mrf.mxu0  ;;  %v12631_v21 = vadd.f32 %v8986_v20, %v12478_v44 }
 0x426   : > { %v5733_v2 = vpop.f32.mrf.mxu1 }
 0x427   : > { %14842 = vst [vmem:[#allocation28_spill] sm:$0xff] %v12631_v21  ;;  %v12633_v28 = vpop.f32.mrf.mxu0  ;;  %v12636_v19 = vadd.f32 %v5733_v2, %v12446_v23  ;;  %v13912_v2 = vrot.slane %v12490_v14, 1 }
 0x428   : > { %v8989_v17 = vpop.f32.mrf.mxu1 }
 0x429   : > { %v9025_v9 = vpop.f32.mrf.mxu0  ;;  %v5791_v29 = vadd.f32 %v8989_v17, %v12492_v18 }
 0x42a   : > { %v5746_v57 = vpop.f32.mrf.mxu1  ;;  %v6001_v21 = vrot.slane %v9025_v9, 1 }
 0x42b   : > { %v12639_v51 = vpop.f32.mrf.mxu0  ;;  %v12642_v48 = vadd.f32 %v5746_v57, %v12494_v13 }
 0x42c   : > { %v8990_v44 = vpop.f32.mrf.mxu1 }
 0x42d   : > { %14843 = vst [vmem:[#allocation75_spill] sm:$0xff] %v12642_v48  ;;  %v12645_v20 = vpop.f32.mrf.mxu0  ;;  %v12648_v8 = vadd.f32 %v8990_v44, %v12508_v10  ;;  %v6030_v10 = vsel %vm14847_vm13, %v13912_v2, %v5975_v53  ;;  %v5979_v2 = vrot.slane %v12543_v55, 1 }
 0x42e   : > { %v13911_v23 = vrot.slane %v12645_v20, 1  ;;  %v5749_v18 = vpop.f32.mrf.mxu1 }
 0x42f   : > { %14844 = vst [vmem:[#allocation42_spill] sm:$0xff] %v12648_v8  ;;  %v12652_v17 = vpop.f32.mrf.mxu0  ;;  %v5790_v61 = vadd.f32 %v5749_v18, %v12518_v1 }
 0x430   : > { %14845 = vst [vmem:[#allocation52_spill] sm:$0xff] %v12652_v17  ;;  %v6003_v13 = vsel %vm14846_vm11, %v6001_v21, %v13911_v23  ;;  %v13914_v57 = vrot.slane %v12652_v17, 1  ;;  %v12666_v44 = vpop.f32.mrf.mxu1  ;;  %vm14852_vm11 = vnez %v14346_v0  ;;  %v5976_v17 = vrot.slane %v12533_v30, 1 }
 0x431   : > { %v12664_v9 = vadd.f32 %v6003_v13, %v5791_v29  ;;  %v12668_v8 = vpop.f32.mrf.mxu0  ;;  %v6038_v29 = vsel %vm14852_vm11, 0.0, %v6030_v10 }
 0x432   : > { %14849 = vst [vmem:[#allocation37_spill] sm:$0xff] %v12668_v8  ;;  %v6004_v23 = vsel %vm14850_vm2, %v13914_v57, %v6001_v21  ;;  %v12674_v48 = vpop.f32.mrf.mxu1  ;;  %v13918_v21 = vrot.slane %v12666_v44, 7  ;;  %v6070_v60 = vadd.f32 %v6038_v29, %v12500_v35  ;;  %vm14856_vm2 = vcmp.lt.s32.totalorder %v9638_v52, 1 }
 0x433   : > { %14848 = vst [vmem:[#allocation69_spill] sm:$0xff] %v12664_v9  ;;  %v12676_v1 = vpop.f32.mrf.mxu0  ;;  %v6064_v18 = vsel %vm14827_vm12, 0.0, %v6004_v23  ;;  %vm14859_vm12 = vmmov %vm14847_vm13 }
 0x434   : > { %14851 = vst [vmem:[#allocation54_spill] sm:$0xff] %v12676_v1  ;;  %v12682_v13 = vadd.f32 %v6064_v18, %v5790_v61  ;;  %v9034_v9 = vpop.f32.mrf.mxu1  ;;  %v13919_v1 = vrot.slane %v12528_v16, 1  ;;  %v13920_v61 = vrot.slane %v12516_v26, 1  ;;  %vm14860_vm11 = vmmov %vm14859_vm12 }
 0x435   : > { %v12685_v8 = vpop.f32.mrf.mxu0  ;;  %v6440_v57 = vrot.slane %v9034_v9, 7  ;;  %v6029_v29 = vsel %vm14860_vm11, %v5975_v53, %v5976_v17  ;;  %vm14863_vm11 = vmmov %vm14856_vm2 }
 0x436   : > { %14853 = vst [vmem:[#allocation4_spill] sm:$0xff] %v12682_v13  ;;  %14854 = vst [vmem:[#allocation55_spill] sm:$0xff] %v12685_v8  ;;  %v12691_v23 = vpop.f32.mrf.mxu1  ;;  %v6026_v30 = vsel %vm14847_vm13, %v13919_v1, %v5979_v2  ;;  %v6028_v18 = vsel %vm14859_vm12, %v5976_v17, %v13920_v61  ;;  %v6071_v1 = vadd.f32 %v6029_v29, %v12526_v15 }
 0x437   : > { %v12693_v0 = vpop.f32.mrf.mxu0  ;;  %v6497_v55 = vsel %vm14856_vm2, %v13918_v21, %v6440_v57  ;;  %v6040_v61 = vsel %vm14712_vm4, 0.0, %v6028_v18  ;;  %vm14861_vm12 = vmmov %vm14856_vm2  ;;  %v5981_v18 = vrot.slane %v12538_v45, 1 }
 0x438   : > { %14855 = vst [vmem:[#allocation34_spill] sm:$0xff] %v12693_v0  ;;  %v12704_v10 = vadd.f32 %v6497_v55, %v6070_v60  ;;  %v12706_v9 = vpop.f32.mrf.mxu1  ;;  %v6042_v60 = vsel %vm14363_vm14, 0.0, %v6026_v30  ;;  %v5983_v55 = vrot.slane %v12563_v58, 1  ;;  %v5982_v30 = vrot.slane %v12548_v4, 1  ;;  %vm14864_vm2 = vmmov %vm14847_vm13 }
 0x439   : > { %v12708_v35 = vpop.f32.mrf.mxu0  ;;  %v13922_v53 = vrot.slane %v12706_v9, 7  ;;  %v6074_v15 = vadd.f32 %v6042_v60, %v12531_v5  ;;  %v6072_v5 = vadd.f32 %v6040_v61, %v12536_v31  ;;  %vm14867_vm13 = vmmov %vm14864_vm2 }
 0x43a   : > { %14857 = vst [vmem:[#allocation43_spill] sm:$0xff] %v12704_v10  ;;  %14858 = vst [vmem:[#allocation38_spill] sm:$0xff] %v12708_v35  ;;  %v6326_v21 = vpop.f32.mrf.mxu1  ;;  %v5980_v10 = vrot.slane %v12553_v47, 1  ;;  %v6022_v54 = vsel %vm14864_vm2, %v5982_v30, %v5983_v55 }
 0x43b   : > { %v12716_v13 = vpop.f32.mrf.mxu0  ;;  %v6441_v0 = vrot.slane %v6326_v21, 7  ;;  %v6046_v61 = vsel %vm10102_vm15, 0.0, %v6022_v54 }
 0x43c   : > { %v9038_v35 = vpop.f32.mrf.mxu1 }
 0x43d   : > { %v12722_v8 = vpop.f32.mrf.mxu0  ;;  %v6496_v17 = vsel %vm14861_vm12, %v6440_v57, %v6441_v0  ;;  %v6444_v21 = vrot.slane %v9038_v35, 7  ;;  %vm14868_vm12 = vmmov %vm14863_vm11 }
 0x43e   : > { %v6505_v58 = vsel %vm14601_vm7, 0.0, %v6496_v17  ;;  %v12734_v29 = vpop.f32.mrf.mxu1  ;;  %vm14866_vm7 = vmmov %vm14864_vm2 }
 0x43f   : > { %v12736_v38 = vpop.f32.mrf.mxu0  ;;  %v12739_v47 = vadd.f32 %v6505_v58, %v6071_v1  ;;  %v6493_v57 = vsel %vm14863_vm11, %v13922_v53, %v6444_v21  ;;  %v13924_v4 = vrot.slane %v12734_v29, 7  ;;  %v6024_v45 = vsel %vm14866_vm7, %v5980_v10, %v5981_v18  ;;  %vm14869_vm11 = vmmov %vm14864_vm2 }
 0x440   : > { %14862 = vst [vmem:[#allocation45_spill] sm:$0xff] %v12736_v38  ;;  %v12748_v35 = vadd.f32 %v6493_v57, %v6074_v15  ;;  %v9041_v60 = vpop.f32.mrf.mxu1  ;;  %v6025_v1 = vsel %vm14867_vm13, %v5979_v2, %v5980_v10  ;;  %v6023_v39 = vsel %vm14869_vm11, %v5981_v18, %v5982_v30  ;;  %vm14871_vm2 = vmmov %vm14868_vm12 }
 0x441   : > { %v12751_v17 = vpop.f32.mrf.mxu0  ;;  %v6495_v58 = vsel %vm14868_vm12, %v6441_v0, %v13924_v4  ;;  %v6075_v2 = vadd.f32 %v6025_v1, %v12546_v22  ;;  %v6447_v4 = vrot.slane %v9041_v60, 7  ;;  %v6078_v22 = vadd.f32 %v6046_v61, %v12551_v34  ;;  %vm14873_vm7 = vmmov %vm14871_vm2 }
 0x442   : > { %14865 = vst [vmem:[#allocation19_spill] sm:$0xff] %v12751_v17  ;;  %v12761_v53 = vadd.f32 %v6495_v58, %v6072_v5  ;;  %v6342_v15 = vpop.f32.mrf.mxu1  ;;  %v5987_v17 = vrot.slane %v12583_v49, 1  ;;  %v6044_v5 = vsel %vm14723_vm5, 0.0, %v6024_v45  ;;  %v5984_v58 = vrot.slane %v12573_v7, 1  ;;  %vm14874_vm13 = vmmov %vm14869_vm11 }
 0x443   : > { %v12763_v57 = vpop.f32.mrf.mxu0  ;;  %v6445_v31 = vrot.slane %v6342_v15, 7  ;;  %v5985_v0 = vrot.slane %v12558_v50, 1  ;;  %v6076_v34 = vadd.f32 %v6044_v5, %v12556_v32 }
 0x444   : > { %v9042_v10 = vpop.f32.mrf.mxu1  ;;  %v6018_v11 = vsel %vm14874_vm13, %v5986_v12, %v5987_v17  ;;  %vm14884_vm13 = vmmov %vm14871_vm2 }
 0x445   : > { %v12771_v38 = vpop.f32.mrf.mxu0  ;;  %v6492_v15 = vsel %vm14871_vm2, %v6444_v21, %v6445_v31  ;;  %v6448_v54 = vrot.slane %v9042_v10, 7  ;;  %v6077_v21 = vadd.f32 %v6023_v39, %v12541_v59 }
 0x446   : > { %v6509_v49 = vsel %vm14612_vm10, 0.0, %v6492_v15  ;;  %v6345_v18 = vpop.f32.mrf.mxu1  ;;  %vm14876_vm10 = vmmov %vm14869_vm11 }
 0x447   : > { %v12782_v1 = vpop.f32.mrf.mxu0  ;;  %v12785_v45 = vadd.f32 %v6509_v49, %v6075_v2  ;;  %v6489_v7 = vsel %vm14873_vm7, %v6447_v4, %v6448_v54  ;;  %v6446_v60 = vrot.slane %v6345_v18, 7  ;;  %v6020_v50 = vsel %vm14876_vm10, %v5984_v58, %v5985_v0  ;;  %vm14877_vm12 = vmmov %vm14876_vm10 }
 0x448   : > { %v12792_v10 = vadd.f32 %v6489_v7, %v6078_v22  ;;  %v9045_v61 = vpop.f32.mrf.mxu1  ;;  %v6021_v2 = vsel %vm14877_vm12, %v5983_v55, %v5984_v58  ;;  %vm14878_vm11 = vmmov %vm14871_vm2  ;;  %v6050_v55 = vsel %vm14741_vm6, 0.0, %v6018_v11  ;;  %v5991_v58 = vrot.slane %v12603_v3, 1 }
 0x449   : > { %v12795_v15 = vpop.f32.mrf.mxu0  ;;  %v6490_v30 = vsel %vm14878_vm11, %v6446_v60, %v6447_v4  ;;  %v6491_v39 = vsel %vm14871_vm2, %v6445_v31, %v6446_v60  ;;  %vm14881_vm7 = vmmov %vm14876_vm10  ;;  %v6079_v31 = vadd.f32 %v6021_v2, %v12566_v63  ;;  %v6451_v59 = vrot.slane %v9045_v61, 7 }
 0x44a   : > { %14875 = vst [vmem:[#allocation36_spill] sm:$0xff] %v12795_v15  ;;  %v6511_v49 = vsel %vm14620_vm0, 0.0, %v6490_v30  ;;  %v12807_v22 = vadd.f32 %v6491_v39, %v6076_v34  ;;  %v6358_v32 = vpop.f32.mrf.mxu1  ;;  %v6019_v4 = vsel %vm14881_vm7, %v5985_v0, %v5986_v12  ;;  %v14882_v34 = vld [vmem:[#allocation48_spill] sm:$0xff]  ;;  %v6082_v63 = vadd.f32 %v6050_v55, %v12571_v25  ;;  %vm14887_vm12 = vmmov %vm14871_vm2 }
 0x44b   : > { %v12809_v5 = vpop.f32.mrf.mxu0  ;;  %v12811_v18 = vadd.f32 %v6511_v49, %v6077_v21  ;;  %v6449_v7 = vrot.slane %v6358_v32, 7  ;;  %vm14883_vm0 = vnez %v14882_v34  ;;  %v5988_v21 = vrot.slane %v12593_v36, 1  ;;  %v14885_v12 = vld [vmem:[#allocation8_spill] sm:$0xff]  ;;  %vm14888_vm11 = vmmov %vm14881_vm7 }
 0x44c   : > { %v9046_v60 = vpop.f32.mrf.mxu1  ;;  %v6048_v39 = vsel %vm14883_vm0, 0.0, %v6020_v50  ;;  %v5990_v32 = vrot.slane %v12588_v41, 1  ;;  %vm14886_vm10 = vnez %v14885_v12  ;;  %v5989_v15 = vrot.slane %v12578_v27, 1  ;;  %vm14890_vm2 = vmmov %vm14881_vm7 }
 0x44d   : > { %v12819_v30 = vpop.f32.mrf.mxu0  ;;  %v6488_v49 = vsel %vm14884_vm13, %v6448_v54, %v6449_v7  ;;  %v6452_v11 = vrot.slane %v9046_v60, 7  ;;  %v6081_v54 = vadd.f32 %v6019_v4, %v12561_v37  ;;  %v6080_v25 = vadd.f32 %v6048_v39, %v12576_v42  ;;  %vm14891_vm7 = vmmov %vm14890_vm2  ;;  %v14894_v4 = vld [vmem:[#allocation9_spill] sm:$0xff] }
 0x44e   : > { %v6513_v3 = vsel %vm14886_vm10, 0.0, %v6488_v49  ;;  %v6361_v0 = vpop.f32.mrf.mxu1  ;;  %v6014_v41 = vsel %vm14888_vm11, %v5990_v32, %v5991_v58  ;;  %v6016_v27 = vsel %vm14890_vm2, %v5988_v21, %v5989_v15  ;;  %vm14892_vm13 = vmmov %vm14887_vm12 }
 0x44f   : > { %v12830_v2 = vpop.f32.mrf.mxu0  ;;  %v12833_v50 = vadd.f32 %v6513_v3, %v6079_v31  ;;  %v6485_v36 = vsel %vm14887_vm12, %v6451_v59, %v6452_v11  ;;  %v6450_v61 = vrot.slane %v6361_v0, 7  ;;  %v6017_v31 = vsel %vm14891_vm7, %v5987_v17, %v5988_v21  ;;  %vm14893_vm10 = vmmov %vm14887_vm12  ;;  %v14897_v17 = vld [vmem:[#allocation51_spill] sm:$0xff] }
 0x450   : > { %v12840_v60 = vadd.f32 %v6485_v36, %v6082_v63  ;;  %v9049_v55 = vpop.f32.mrf.mxu1  ;;  %vm14895_vm12 = vnez %v14894_v4  ;;  %v5973_v0 = vrot.slane %v12459_v43, 1  ;;  %vm14898_vm11 = vnez %v14897_v17 }
 0x451   : > { %v12843_v49 = vpop.f32.mrf.mxu0  ;;  %v6486_v12 = vsel %vm14892_vm13, %v6450_v61, %v6451_v59  ;;  %v6487_v37 = vsel %vm14893_vm10, %v6449_v7, %v6450_v61  ;;  %v6054_v21 = vsel %vm14898_vm11, 0.0, %v6014_v41  ;;  %v6015_v59 = vsel %vm14890_vm2, %v5989_v15, %v5990_v32  ;;  %vm14901_vm13 = vmmov %vm14893_vm10  ;;  %v14905_v15 = vld [vmem:[#allocation10_spill] sm:$0xff] }
 0x452   : > { %14889 = vst [vmem:[#allocation31_spill] sm:$0xff] %v12843_v49  ;;  %v6515_v3 = vsel %vm14895_vm12, 0.0, %v6486_v12  ;;  %v12855_v63 = vadd.f32 %v6487_v37, %v6080_v25  ;;  %v6374_v42 = vpop.f32.mrf.mxu1  ;;  %v5995_v7 = vrot.slane %v12623_v24, 1  ;;  %v6083_v61 = vadd.f32 %v6017_v31, %v12586_v56  ;;  %v14899_v12 = vld [vmem:[#allocation50_spill] sm:$0xff]  ;;  %vm14904_vm10 = vmmov %vm14890_vm2 }
 0x453   : > { %v12857_v39 = vpop.f32.mrf.mxu0  ;;  %v12860_v36 = vadd.f32 %v6515_v3, %v6081_v54  ;;  %v6453_v34 = vrot.slane %v6374_v42, 7  ;;  %vm14900_vm7 = vnez %v14899_v12  ;;  %v5992_v4 = vrot.slane %v12613_v33, 1  ;;  %vm14907_vm2 = vmmov %vm14901_vm13 }
 0x454   : > { %v9050_v25 = vpop.f32.mrf.mxu1  ;;  %v6052_v37 = vsel %vm14900_vm7, 0.0, %v6016_v27  ;;  %v6455_v43 = vrot.slane %v9049_v55, 7  ;;  %v14903_v41 = vrot.slane %v12490_v14, 1  ;;  %v5994_v56 = vrot.slane %v12608_v62, 1  ;;  %v14908_v14 = vld [vmem:[#allocation72_spill] sm:$0xff]  ;;  %vm14912_vm11 = vmmov %vm14907_vm2 }
 0x455   : > { %14896 = vst [vmem:[#allocation23_spill] sm:$0xff] %v12860_v36  ;;  %v6484_v54 = vsel %vm14901_vm13, %v6452_v11, %v6453_v34  ;;  %v6456_v3 = vrot.slane %v9050_v25, 7  ;;  %v12873_v42 = vpop.f32.mrf.mxu0  ;;  %vm14906_vm12 = vnez %v14905_v15  ;;  %v6086_v27 = vadd.f32 %v6054_v21, %v12591_v6  ;;  %vm14909_vm13 = vmmov %vm14904_vm10  ;;  %v14910_v15 = vld [vmem:[#allocation68_spill] sm:$0xff] }
 0x456   : > { %14902 = vst [vmem:[#allocation18_spill] sm:$0xff] %v12873_v42  ;;  %v6031_v24 = vsel %vm14904_vm10, %v5973_v0, %v14903_v41  ;;  %v6517_v32 = vsel %vm14906_vm12, 0.0, %v6484_v54  ;;  %v6377_v33 = vpop.f32.mrf.mxu1  ;;  %v5993_v55 = vrot.slane %v12598_v46, 1  ;;  %v6085_v17 = vadd.f32 %v6015_v59, %v14908_v14  ;;  %vm14911_vm12 = vmmov %vm14904_vm10  ;;  %v14919_v42 = vld [vmem:[#allocation66_spill] sm:$0xff] }
 0x457   : > { %v12884_v31 = vadd.f32 %v6517_v32, %v6083_v61  ;;  %v6481_v11 = vsel %vm14907_vm2, %v6455_v43, %v6456_v3  ;;  %v6454_v25 = vrot.slane %v6377_v33, 7  ;;  %v6010_v41 = vsel %vm14909_vm13, %v5994_v56, %v5995_v7  ;;  %v12902_v61 = vpop.f32.mrf.mxu0  ;;  %v14914_v32 = vld [vmem:[#allocation26_spill] sm:$0xff]  ;;  %v14915_v33 = vld [vmem:[#allocation11_spill] sm:$0xff] }
 0x458   : > { %v12891_v62 = vadd.f32 %v6481_v11, %v6086_v27  ;;  %v6084_v54 = vadd.f32 %v6052_v37, %v14910_v15  ;;  %v9053_v12 = vpop.f32.mrf.mxu1  ;;  %v6012_v6 = vsel %vm14904_vm10, %v5992_v4, %v5993_v55  ;;  %v6013_v46 = vsel %vm14911_vm12, %v5991_v58, %v5992_v4  ;;  %14913 = vst [vmem:[#allocation56_spill] sm:$0xff] %v12902_v61  ;;  %v14917_v15 = vld [vmem:[#allocation24_spill] sm:$0xff]  ;;  %v14920_v27 = vld [vmem:[#allocation67_spill] sm:$0xff] }
 0x459   : > { %v6482_v21 = vsel %vm14912_vm11, %v6454_v25, %v6455_v43  ;;  %v6483_v59 = vsel %vm14907_vm2, %v6453_v34, %v6454_v25  ;;  %vm14916_vm13 = vnez %v14915_v33  ;;  %v5972_v49 = vrot.slane %v14917_v15, 1  ;;  %vm14923_vm11 = vmmov %vm14907_vm2  ;;  %v14929_v4 = vld [vmem:[#allocation27_spill] sm:$0xff] }
 0x45a   : > { %v6519_v37 = vsel %vm14916_vm13, 0.0, %v6482_v21  ;;  %v12907_v11 = vadd.f32 %v6483_v59, %v6084_v54  ;;  %v6390_v14 = vpop.f32.mrf.mxu1  ;;  %v6058_v43 = vsel %vm14786_vm1, 0.0, %v6010_v41  ;;  %v12915_v34 = vadd.f32 %v6031_v24, %v14919_v42  ;;  %vm14927_vm2 = vmmov %vm14904_vm10 }
 0x45b   : > { %v12910_v36 = vadd.f32 %v6519_v37, %v6085_v17  ;;  %v6457_v58 = vrot.slane %v6390_v14, 7  ;;  %v6087_v61 = vadd.f32 %v6013_v46, %v14920_v27  ;;  %v6056_v54 = vsel %vm14781_vm8, 0.0, %v6012_v6  ;;  %v12922_v17 = vpop.f32.mrf.mxu0  ;;  %v14924_v14 = vld [vmem:[#allocation14_spill] sm:$0xff]  ;;  %vm14928_vm13 = vmmov %vm14923_vm11 }
 0x45c   : > { %v9054_v33 = vpop.f32.mrf.mxu1  ;;  %v5996_v59 = vrot.slane %v12633_v28, 1  ;;  %v6459_v15 = vrot.slane %v9053_v12, 7  ;;  %14922 = vst [vmem:[#allocation57_spill] sm:$0xff] %v12922_v17  ;;  %v6011_v42 = vsel %vm14904_vm10, %v5993_v55, %v5994_v56  ;;  %v5998_v24 = vrot.slane %v12628_v40, 1  ;;  %v14926_v27 = vld [vmem:[#allocation70_spill] sm:$0xff]  ;;  %vm14934_vm10 = vmmov %vm14927_vm2 }
 0x45d   : > { %v6480_v37 = vsel %vm14923_vm11, %v6456_v3, %v6457_v58  ;;  %v6460_v41 = vrot.slane %v9054_v33, 7  ;;  %vm14925_vm12 = vnez %v14924_v14  ;;  %v6090_v25 = vadd.f32 %v6058_v43, %v14926_v27  ;;  %vm14931_vm11 = vmmov %vm14927_vm2  ;;  %v14932_v43 = vld [vmem:[#allocation74_spill] sm:$0xff]  ;;  %v14933_v27 = vld [vmem:[#allocation73_spill] sm:$0xff] }
 0x45e   : > { %v6521_v46 = vsel %vm14925_vm12, 0.0, %v6480_v37  ;;  %v6393_v6 = vpop.f32.mrf.mxu1  ;;  %v6032_v28 = vsel %vm14927_vm2, %v5972_v49, %v5973_v0  ;;  %v5997_v21 = vrot.slane %v14929_v4, 1  ;;  %v14930_v56 = vrot.slane %v12639_v51, 1  ;;  %vm14935_vm12 = vmmov %vm14928_vm13 }
 0x45f   : > { %v12934_v12 = vadd.f32 %v6521_v46, %v6087_v61  ;;  %v6477_v3 = vsel %vm14928_vm13, %v6459_v15, %v6460_v41  ;;  %v6458_v33 = vrot.slane %v6393_v6, 7  ;;  %v6088_v37 = vadd.f32 %v6056_v54, %v14932_v43  ;;  %v12949_v46 = vpop.f32.mrf.mxu0  ;;  %vm14936_vm2 = vmmov %vm14935_vm12  ;;  %v14938_v54 = vld [vmem:[#allocation17_spill] sm:$0xff] }
 0x460   : > { %v6006_v40 = vsel %vm14931_vm11, %v5998_v24, %v14930_v56  ;;  %v12943_v55 = vadd.f32 %v6477_v3, %v6090_v25  ;;  %v9057_v14 = vpop.f32.mrf.mxu1  ;;  %v6089_v0 = vadd.f32 %v6011_v42, %v14933_v27  ;;  %v6009_v61 = vsel %vm14934_vm10, %v5995_v7, %v5996_v59  ;;  %vm14937_vm13 = vmmov %vm14934_vm10 }
 0x461   : > { %v6478_v4 = vsel %vm14935_vm12, %v6458_v33, %v6459_v15  ;;  %v6479_v6 = vsel %vm14936_vm2, %v6457_v58, %v6458_v33  ;;  %v6008_v25 = vsel %vm14937_vm13, %v5996_v59, %v5997_v21  ;;  %v6438_v3 = vrot.slane %v12691_v23, 7  ;;  %vm14943_vm12 = vmmov %vm14934_vm10 }
 0x462   : > { %vm14939_vm11 = vnez %v14938_v54  ;;  %v12960_v42 = vadd.f32 %v6479_v6, %v6088_v37  ;;  %v6406_v43 = vpop.f32.mrf.mxu1  ;;  %v6007_v7 = vsel %vm14934_vm10, %v5997_v21, %v5998_v24  ;;  %v6062_v58 = vsel %vm14804_vm3, 0.0, %v6006_v40  ;;  %vm14946_vm2 = vmmov %vm14934_vm10  ;;  %v14947_v6 = vld [vmem:[#allocation39_spill] sm:$0xff]  ;;  %v14949_v24 = vld [vmem:[#allocation20_spill] sm:$0xff] }
 0x463   : > { %v6523_v56 = vsel %vm14939_vm11, 0.0, %v6478_v4  ;;  %v6461_v15 = vrot.slane %v6406_v43, 7  ;;  %v14942_v33 = vrot.slane %v14914_v32, 1  ;;  %v14944_v59 = vrot.slane %v12528_v16, 1 }
 0x464   : > { %v12964_v27 = vadd.f32 %v6523_v56, %v6089_v0  ;;  %v14945_v37 = vrot.slane %v12516_v26, 1  ;;  %vm14948_vm13 = vnez %v14947_v6  ;;  %v6091_v0 = vadd.f32 %v6009_v61, %v14949_v24  ;;  %v9058_v54 = vpop.f32.mrf.mxu1  ;;  %v12981_v56 = vpop.f32.mrf.mxu0  ;;  %v14953_v26 = vld [vmem:[#allocation29_spill] sm:$0xff]  ;;  %v14958_v24 = vld [vmem:[#allocation28_spill] sm:$0xff] }
 0x465   : > { %v6033_v23 = vsel %vm14943_vm12, %v14942_v33, %v5972_v49  ;;  %v6036_v21 = vsel %vm14948_vm13, 0.0, %v6032_v28  ;;  %v6463_v40 = vrot.slane %v9057_v14, 7  ;;  %vm14950_vm11 = vcmp.lt.s32.totalorder %v9638_v52, 1  ;;  %v14951_v33 = vld [vmem:[#allocation13_spill] sm:$0xff] }
 0x466   : > { %14940 = vst [vmem:[#allocation35_spill] sm:$0xff] %v12964_v27  ;;  %v6027_v4 = vsel %vm14946_vm2, %v14945_v37, %v14944_v59  ;;  %v6476_v43 = vsel %vm14950_vm11, %v6460_v41, %v6461_v15  ;;  %v6464_v49 = vrot.slane %v9058_v54, 7  ;;  %vm14952_vm10 = vnez %v14951_v33  ;;  %vm14955_vm12 = vmmov %vm14950_vm11  ;;  %v14956_v37 = vld [vmem:[#allocation22_spill] sm:$0xff]  ;;  %v6409_v14 = vpop.f32.mrf.mxu1 }
 0x467   : > { %v6060_v16 = vsel %vm14952_vm10, 0.0, %v6008_v25  ;;  %v6093_v17 = vadd.f32 %v6007_v7, %v14953_v26  ;;  %v14954_v59 = vrot.slane %v12666_v44, 7  ;;  %vm14957_vm2 = vnez %v14956_v37 }
 0x468   : > { %v6525_v61 = vsel %vm14957_vm2, 0.0, %v6476_v43  ;;  %v6094_v6 = vadd.f32 %v6062_v58, %v14958_v24  ;;  %v6437_v27 = vrot.slane %v12674_v48, 7  ;;  %v6473_v25 = vsel %vm14950_vm11, %v6463_v40, %v6464_v49  ;;  %vm14964_vm2 = vmmov %vm14950_vm11  ;;  %v9061_v37 = vpop.f32.mrf.mxu1  ;;  %v13019_v24 = vpop.f32.mrf.mxu0 }
 0x469   : > { %v6498_v28 = vsel %vm14955_vm12, %v6438_v3, %v14954_v59  ;;  %v12996_v41 = vadd.f32 %v6525_v61, %v6091_v0  ;;  %v6462_v54 = vrot.slane %v6409_v14, 7  ;;  %v14959_v7 = vrot.slane %v14914_v32, 1  ;;  %v14965_v61 = vld [vmem:[#allocation3_spill] sm:$0xff]  ;;  %vm14967_vm3 = vmmov %vm14964_vm2  ;;  %v14970_v14 = vld [vmem:[#allocation52_spill] sm:$0xff] }
 0x46a   : > { %v14960_v44 = vrot.slane %v12645_v20, 1  ;;  %vm14961_vm12 = vcmp.lt.s32.totalorder %v9638_v52, 7  ;;  %v14962_v43 = vrot.slane %v12706_v9, 7  ;;  %v14963_v58 = vrot.slane %v12734_v29, 7  ;;  %vm14969_vm10 = vmmov %vm14964_vm2 }
 0x46b   : > { %v13012_v0 = vadd.f32 %v6473_v25, %v6094_v6  ;;  %v6092_v59 = vadd.f32 %v6060_v16, %v12636_v19  ;;  %vm14966_vm11 = vnez %v14965_v61  ;;  %v6499_v20 = vsel %vm14967_vm3, %v6437_v27, %v6438_v3  ;;  %v14974_v16 = vld [vmem:[#allocation65_spill] sm:$0xff] }
 0x46c   : > { %v6034_v26 = vsel %vm14961_vm12, %v14960_v44, %v14959_v7  ;;  %v6494_v48 = vsel %vm14964_vm2, %v14963_v58, %v14962_v43  ;;  %v6503_v32 = vsel %vm14966_vm11, 0.0, %v6498_v28  ;;  %vm14968_vm12 = vmmov %vm14964_vm2  ;;  %v6475_v29 = vsel %vm14969_vm10, %v6461_v15, %v6462_v54  ;;  %v14975_v7 = vld [vmem:[#allocation25_spill] sm:$0xff]  ;;  %v6422_v43 = vpop.f32.mrf.mxu1 }
 0x46d   : > { %v6474_v9 = vsel %vm14968_vm12, %v6462_v54, %v6463_v40  ;;  %v14971_v6 = vrot.slane %v14970_v14, 1  ;;  %v14972_v25 = vrot.slane %v12639_v51, 1  ;;  %vm14973_vm2 = vcmp.lt.s32.totalorder %v9638_v52, 7  ;;  %v14977_v58 = vld [vmem:[#allocation5_spill] sm:$0xff]  ;;  %v14980_v14 = vld [vmem:[#allocation71_spill] sm:$0xff] }
 0x46e   : > { %v6068_v28 = vadd.f32 %v6036_v21, %v14974_v16  ;;  %vm14976_vm11 = vnez %v14975_v7  ;;  %v13034_v44 = vadd.f32 %v6475_v29, %v6092_v59  ;;  %vm14978_vm3 = vnez %v14977_v58  ;;  %v14979_v54 = vld [vmem:[#allocation21_spill] sm:$0xff]  ;;  %v13044_v16 = vpop.f32.mrf.mxu0  ;;  %v14981_v29 = vld [vmem:[#allocation75_spill] sm:$0xff] }
 0x46f   : > { %v6005_v19 = vsel %vm14973_vm2, %v14972_v25, %v14971_v6  ;;  %v6527_v3 = vsel %vm14976_vm11, 0.0, %v6474_v9  ;;  %v6507_v40 = vsel %vm14978_vm3, 0.0, %v6494_v48  ;;  %v6465_v15 = vrot.slane %v6422_v43, 7  ;;  %v9062_v25 = vpop.f32.mrf.mxu1  ;;  %v14982_v48 = vld [vmem:[#allocation63_spill] sm:$0xff]  ;;  %vm14986_vm2 = vmmov %vm14969_vm10 }
 0x470   : > { %v13038_v61 = vadd.f32 %v6527_v3, %v6093_v17  ;;  %v6066_v51 = vsel %vm14823_vm9, 0.0, %v6034_v26  ;;  %v6073_v33 = vadd.f32 %v6027_v4, %v14980_v14  ;;  %v6535_v6 = vadd.f32 %v6503_v32, %v12915_v34  ;;  %v14983_v26 = vld [vmem:[#allocation30_spill] sm:$0xff]  ;;  %vm14987_vm11 = vmmov %vm14986_vm2 }
 0x471   : > { %v6534_v21 = vadd.f32 %v6499_v20, %v6068_v28  ;;  %v6467_v59 = vrot.slane %v9061_v37, 7  ;;  %v6468_v9 = vrot.slane %v9062_v25, 7  ;;  %v6095_v7 = vadd.f32 %v6005_v19, %v14981_v29  ;;  %v6425_v58 = vpop.f32.mrf.mxu1  ;;  %v14985_v14 = vld [vmem:[#allocation42_spill] sm:$0xff]  ;;  %v14988_v28 = vld [vmem:[#allocation43_spill] sm:$0xff] }
 0x472   : > { %v6472_v17 = vsel %vm14969_vm10, %v6464_v49, %v6465_v15  ;;  %v6067_v3 = vadd.f32 %v6033_v23, %v14982_v48  ;;  %v6539_v43 = vadd.f32 %v6507_v40, %v6073_v33  ;;  %vm14984_vm12 = vnez %v14983_v26  ;;  %v14989_v49 = vld [vmem:[#allocation55_spill] sm:$0xff]  ;;  %v14990_v23 = vld [vmem:[#allocation34_spill] sm:$0xff]  ;;  %v14992_v48 = vld [vmem:[#allocation32_spill] sm:$0xff] }
 0x473   : > { %v6529_v4 = vsel %vm14984_vm12, 0.0, %v6472_v17  ;;  %v6098_v34 = vadd.f32 %v6066_v51, %v14985_v14  ;;  %v6500_v32 = vsel %vm14986_vm2, %v6468_v9, %v6437_v27  ;;  %v6466_v20 = vrot.slane %v6425_v58, 7  ;;  %v9105_v40 = vpop.f32.mrf.mxu1  ;;  %v14991_v17 = vld [vmem:[#allocation37_spill] sm:$0xff]  ;;  %vm14994_vm10 = vmmov %vm14986_vm2 }
 0x474   : > { %v13055_v37 = vadd.f32 %v6529_v4, %v6095_v7  ;;  %v6469_v19 = vsel %vm14987_vm11, %v6467_v59, %v6468_v9  ;;  %v13061_v25 = vadd.f32 %v14989_v49, %v14988_v28  ;;  %v6744_v33 = vadd.f32 %v14990_v23, %v6534_v21  ;;  %v6712_v9 = vpop.f32.mrf.mxu0  ;;  %v14995_v26 = vld [vmem:[#allocation45_spill] sm:$0xff] }
 0x475   : > { %v13064_v29 = vadd.f32 %v6469_v19, %v6098_v34  ;;  %v6745_v51 = vadd.f32 %v14991_v17, %v6535_v6  ;;  %v13069_v27 = vadd.f32 %v12716_v13, %v12739_v47  ;;  %v13073_v7 = vadd.f32 %v12722_v8, %v12748_v35  ;;  %v14996_v6 = vld [vmem:[#allocation33_spill] sm:$0xff]  ;;  %v13085_v13 = vpop.f32.mrf.mxu1  ;;  %v14998_v47 = vld [vmem:[#allocation38_spill] sm:$0xff]  ;;  %v15000_v19 = vld [vmem:[#allocation4_spill] sm:$0xff] }
 0x476   : > { %vm14993_vm3 = vnez %v14992_v48  ;;  %v6470_v21 = vsel %vm14994_vm10, %v6466_v20, %v6467_v59  ;;  %v13081_v4 = vadd.f32 %v14995_v26, %v12761_v53  ;;  %vm14997_vm12 = vnez %v14996_v6  ;;  %v14999_v53 = vld [vmem:[#allocation69_spill] sm:$0xff]  ;;  %v15005_v48 = vld [vmem:[#allocation36_spill] sm:$0xff]  ;;  %v15008_v26 = vld [vmem:[#allocation54_spill] sm:$0xff] }
 0x477   : > { %v6501_v58 = vsel %vm14993_vm3, 0.0, %v6500_v32  ;;  %v6531_v14 = vsel %vm14997_vm12, 0.0, %v6470_v21  ;;  %v6471_v8 = vsel %vm14986_vm2, %v6465_v15, %v6466_v20  ;;  %v13090_v35 = vadd.f32 %v14998_v47, %v6539_v43  ;;  %v15001_v20 = vld [vmem:[#allocation19_spill] sm:$0xff] }
 0x478   : > { %v13094_v34 = vadd.f32 %v12763_v57, %v12785_v45  ;;  %v13098_v59 = vadd.f32 %v12771_v38, %v12792_v10  ;;  %v13101_v32 = vadd.f32 %v6531_v14, %v14999_v53  ;;  %v13104_v28 = vadd.f32 %v6471_v8, %v15000_v19  ;;  %v9106_v45 = vpop.f32.mrf.mxu1 }
 0x479   : > { %v13108_v15 = vadd.f32 %v12782_v1, %v12807_v22  ;;  %v13112_v43 = vadd.f32 %v12809_v5, %v12833_v50  ;;  %v6533_v57 = vadd.f32 %v6501_v58, %v6067_v3  ;;  %v13116_v38 = vadd.f32 %v15001_v20, %v12811_v18  ;;  %v9094_v1 = vpop.f32.mrf.mxu0  ;;  %v15002_v50 = vld [vmem:[#allocation18_spill] sm:$0xff]  ;;  %v15003_v18 = vld [vmem:[#allocation56_spill] sm:$0xff] }
 0x47a   : > { %v13120_v10 = vadd.f32 %v12819_v30, %v12840_v60  ;;  %v13124_v49 = vadd.f32 %v12830_v2, %v12855_v63  ;;  %v6955_v22 = vrot.slane %v9105_v40, 1  ;;  %v6956_v23 = vrot.slane %v9106_v45, 1  ;;  %v6829_v30 = vpop.f32.mrf.mxu1  ;;  %v15004_v60 = vld [vmem:[#allocation23_spill] sm:$0xff] }
 0x47b   : > { %v13128_v5 = vadd.f32 %v12857_v39, %v12884_v31  ;;  %v13132_v3 = vadd.f32 %v15002_v50, %v12891_v62  ;;  %v13136_v17 = vadd.f32 %v15003_v18, %v12907_v11  ;;  %v13140_v2 = vadd.f32 %v15005_v48, %v15004_v60  ;;  %v15007_v40 = vld [vmem:[#allocation31_spill] sm:$0xff]  ;;  %v6715_v47 = vpop.f32.mrf.mxu0 }
 0x47c   : > { %v6953_v63 = vrot.slane %v13085_v13, 1  ;;  %vm15006_vm11 = vcmp.lt.s32.totalorder %v9638_v52, 7  ;;  %v6954_v31 = vrot.slane %v6829_v30, 1  ;;  %v13147_v62 = vadd.f32 %v15007_v40, %v12910_v36  ;;  %v9109_v14 = vpop.f32.mrf.mxu1 }
 0x47d   : > { %v7013_v39 = vsel %vm15006_vm11, %v6955_v22, %v6956_v23  ;;  %v13151_v11 = vadd.f32 %v12949_v46, %v12934_v12  ;;  %v13155_v58 = vadd.f32 %v12981_v56, %v12943_v55  ;;  %v6743_v6 = vadd.f32 %v15008_v26, %v6533_v57  ;;  %vm15009_vm3 = vmmov %vm15006_vm11  ;;  %v15011_v46 = vld [vmem:[#allocation35_spill] sm:$0xff]  ;;  %v15012_v55 = vld [vmem:[#allocation57_spill] sm:$0xff]  ;;  %v13185_v20 = vpop.f32.mrf.mxu0 }
 0x47e   : > { %v7051_v21 = vadd.f32 %v7013_v39, %v6745_v51  ;;  %v13160_v8 = vadd.f32 %v13019_v24, %v12960_v42  ;;  %v7014_v36 = vsel %vm15009_vm3, %v6954_v31, %v6955_v22  ;;  %vm15010_vm10 = vmmov %vm15009_vm3  ;;  %v13170_v56 = vadd.f32 %v15012_v55, %v15011_v46  ;;  %v6842_v57 = vpop.f32.mrf.mxu1 }
 0x47f   : > { %v7015_v12 = vsel %vm15010_vm10, %v6953_v63, %v6954_v31  ;;  %v13173_v51 = vadd.f32 %v6712_v9, %v12996_v41  ;;  %v13176_v42 = vadd.f32 %v9094_v1, %v13012_v0  ;;  %vm15013_vm12 = vcmask 261120   ;;  %v15021_v31 = vld [vmem:[#allocation40_spill] sm:$0xff] }
 0x480   : > { %7255 = vst.msk [vmem:[%s11110_s6 + $0x10] sm:$0xff] %vm15013_vm12, %v7051_v21  ;;  %v7018_v53 = vsel %vm14948_vm13, 0.0, %v7014_v36  ;;  %v7049_v19 = vadd.f32 %v7015_v12, %v6743_v6  ;;  %v13183_v45 = vadd.f32 %v6715_v47, %v13034_v44  ;;  %v6957_v50 = vrot.slane %v6842_v57, 1  ;;  %vm15015_vm2 = vmmov %vm15013_vm12  ;;  %v9110_v30 = vpop.f32.mrf.mxu1  ;;  %v6728_v6 = vpop.f32.mrf.mxu0 }
 0x481   : > { %v7050_v22 = vadd.f32 %v7018_v53, %v6744_v33  ;;  %v13189_v41 = vadd.f32 %v13044_v16, %v13038_v61  ;;  %v7153_v0 = vmul.f32 %v7051_v21, %v7051_v21  ;;  %vm15016_vm11 = vmmov %vm15015_vm2  ;;  %v6959_v18 = vrot.slane %v9109_v14, 1 }
 0x482   : > { %v7081_v9 = vsel %vm15015_vm2, %v7049_v19, 0.0  ;;  %v7151_v1 = vmul.f32 %v7049_v19, %v7049_v19  ;;  %7253 = vst.msk [vmem:[%s11110_s6] sm:$0xff] %vm15016_vm11, %v7049_v19  ;;  %vm15017_vm13 = vmmov %vm15015_vm2  ;;  %v7012_v33 = vsel %vm15010_vm10, %v6956_v23, %v6957_v50  ;;  %v6960_v48 = vrot.slane %v9110_v30, 1  ;;  %v6845_v26 = vpop.f32.mrf.mxu1 }
 0x483   : > { %v7082_v60 = vsel %vm15017_vm13, %v7050_v22, 0.0  ;;  %v7152_v44 = vmul.f32 %v7050_v22, %v7050_v22  ;;  %vm15018_vm3 = vmmov %vm15015_vm2  ;;  %v6958_v23 = vrot.slane %v6845_v26, 1 }
 0x484   : > { %7254 = vst.msk [vmem:[%s11110_s6 + $0x8] sm:$0xff] %vm15018_vm3, %v7050_v22  ;;  %vm15019_vm12 = vmmov %vm15015_vm2  ;;  %v7083_v16 = vadd.f32 %v7082_v60, %v7081_v9  ;;  %v9113_v24 = vpop.f32.mrf.mxu1  ;;  %v13217_v22 = vadd.f32 %v6728_v6, %v13055_v37 }
 0x485   : > { %v7084_v61 = vsel %vm15019_vm12, %v7051_v21, 0.0  ;;  %vm15020_vm9 = vmmov %vm15015_vm2  ;;  %vm15022_vm2 = vnez %v15021_v31  ;;  %v7186_v21 = vsel %vm15018_vm3, %v7153_v0, 0.0 }
 0x486   : > { %v7183_v39 = vsel %vm15020_vm9, %v7151_v1, 0.0  ;;  %v7020_v40 = vsel %vm15022_vm2, 0.0, %v7012_v33  ;;  %vm15023_vm11 = vmmov %vm15018_vm3  ;;  %v7085_v12 = vadd.f32 %v7084_v61, %v7083_v16  ;;  %v6963_v61 = vrot.slane %v9113_v24, 1 }
 0x487   : > { %v7184_v14 = vsel %vm15023_vm11, %v7152_v44, 0.0  ;;  %v7052_v47 = vadd.f32 %v7020_v40, %v13061_v25  ;;  %vm15024_vm13 = vmmov %vm15010_vm10 }
 0x488   : > { %v7009_v36 = vsel %vm15024_vm13, %v6959_v18, %v6960_v48  ;;  %v7185_v46 = vadd.f32 %v7184_v14, %v7183_v39  ;;  %vm15025_vm9 = vmmov %vm15018_vm3 }
 0x489   : > { %v7055_v55 = vadd.f32 %v7009_v36, %v13090_v35  ;;  %v7086_v53 = vsel %vm15025_vm9, %v7052_v47, 0.0  ;;  %v7154_v19 = vmul.f32 %v7052_v47, %v7052_v47  ;;  %vm15026_vm10 = vmmov %vm15018_vm3  ;;  %v6858_v35 = vpop.f32.mrf.mxu1 }
 0x48a   : > { %7256 = vst.msk [vmem:[%s11110_s6 + $0x18] sm:$0xff] %vm15026_vm10, %v7052_v47  ;;  %vm15027_vm12 = vmmov %vm15024_vm13  ;;  %v7187_v0 = vadd.f32 %v7186_v21, %v7185_v46  ;;  %v7087_v9 = vadd.f32 %v7086_v53, %v7085_v12  ;;  %v6961_v16 = vrot.slane %v6858_v35, 1 }
 0x48b   : > { %v7010_v25 = vsel %vm15027_vm12, %v6958_v23, %v6959_v18  ;;  %vm15028_vm2 = vmmov %vm15027_vm12  ;;  %v7157_v1 = vmul.f32 %v7055_v55, %v7055_v55  ;;  %v7092_v60 = vsel %vm15018_vm3, %v7055_v55, 0.0  ;;  %v9114_v39 = vpop.f32.mrf.mxu1 }
 0x48c   : > { %v7011_v57 = vsel %vm15028_vm2, %v6957_v50, %v6958_v23  ;;  %vm15029_vm11 = vmmov %vm15018_vm3  ;;  %v7022_v18 = vsel %vm14712_vm4, 0.0, %v7010_v25  ;;  %v6964_v6 = vrot.slane %v9114_v39, 1 }
 0x48d   : > { %7259 = vst.msk [vmem:[%s11110_s6 + $0x30] sm:$0xff] %vm15029_vm11, %v7055_v55  ;;  %vm15030_vm13 = vmmov %vm15018_vm3  ;;  %v7053_v50 = vadd.f32 %v7011_v57, %v13069_v27  ;;  %v7054_v37 = vadd.f32 %v7022_v18, %v13081_v4  ;;  %vm15037_vm11 = vcmp.lt.s32.totalorder %v9638_v52, 7  ;;  %v6861_v4 = vpop.f32.mrf.mxu1 }
 0x48e   : > { %v7188_v30 = vsel %vm15030_vm13, %v7154_v19, 0.0  ;;  %vm15032_vm9 = vmmov %vm15018_vm3  ;;  %v7008_v27 = vsel %vm15037_vm11, %v6960_v48, %v6961_v16  ;;  %v6962_v55 = vrot.slane %v6861_v4, 1 }
 0x48f   : > { %v7189_v33 = vadd.f32 %v7188_v30, %v7187_v0  ;;  %v7194_v31 = vsel %vm15032_vm9, %v7157_v1, 0.0  ;;  %vm15033_vm10 = vmmov %vm15018_vm3  ;;  %v7155_v26 = vmul.f32 %v7053_v50, %v7053_v50  ;;  %v7156_v36 = vmul.f32 %v7054_v37, %v7054_v37  ;;  %v9117_v57 = vpop.f32.mrf.mxu1 }
 0x490   : > { %v7088_v40 = vsel %vm15033_vm10, %v7053_v50, 0.0  ;;  %vm15034_vm12 = vmmov %vm15018_vm3  ;;  %v7024_v12 = vsel %vm14363_vm14, 0.0, %v7008_v27  ;;  %v6967_v1 = vrot.slane %v9117_v57, 1 }
 0x491   : > { %7257 = vst.msk [vmem:[%s11110_s6 + $0x20] sm:$0xff] %vm15034_vm12, %v7053_v50  ;;  %v7089_v14 = vadd.f32 %v7088_v40, %v7087_v9  ;;  %vm15035_vm2 = vmmov %vm15018_vm3  ;;  %v7056_v25 = vadd.f32 %v7024_v12, %v13073_v7  ;;  %v6874_v50 = vpop.f32.mrf.mxu1 }
 0x492   : > { %v7090_v47 = vsel %vm15035_vm2, %v7054_v37, 0.0  ;;  %vm15036_vm4 = vmmov %vm15035_vm2  ;;  %v6965_v27 = vrot.slane %v6874_v50, 1 }
 0x493   : > { %7258 = vst.msk [vmem:[%s11110_s6 + $0x28] sm:$0xff] %vm15036_vm4, %v7054_v37  ;;  %vm15038_vm13 = vmmov %vm15035_vm2  ;;  %v7091_v24 = vadd.f32 %v7090_v47, %v7089_v14  ;;  %v7158_v18 = vmul.f32 %v7056_v25, %v7056_v25 }
 0x494   : > { %v7190_v23 = vsel %vm15038_vm13, %v7155_v26, 0.0  ;;  %vm15040_vm3 = vmmov %vm15037_vm11  ;;  %7260 = vst.msk [vmem:[%s11110_s6 + $0x38] sm:$0xff] %vm15035_vm2, %v7056_v25  ;;  %v13259_v26 = vpop.f32.mrf.mxu1 }
 0x495   : > { %v7005_v46 = vsel %vm15040_vm3, %v6963_v61, %v6964_v6  ;;  %v7191_v53 = vadd.f32 %v7190_v23, %v7189_v33  ;;  %vm15041_vm9 = vmmov %vm15035_vm2  ;;  %v7093_v30 = vadd.f32 %v7092_v60, %v7091_v24 }
 0x496   : > { %v7192_v19 = vsel %vm15041_vm9, %v7156_v36, 0.0  ;;  %v7059_v48 = vadd.f32 %v7005_v46, %v13116_v38  ;;  %vm15042_vm10 = vmmov %vm15040_vm3  ;;  %v6968_v46 = vrot.slane %v13259_v26, 1 }
 0x497   : > { %v7006_v0 = vsel %vm15042_vm10, %v6962_v55, %v6963_v61  ;;  %vm15043_vm14 = vmmov %vm15040_vm3  ;;  %v7193_v35 = vadd.f32 %v7192_v19, %v7191_v53 }
 0x498   : > { %v7007_v9 = vsel %vm15043_vm14, %v6961_v16, %v6962_v55  ;;  %vm15044_vm12 = vmmov %vm15035_vm2  ;;  %v7161_v33 = vmul.f32 %v7059_v48, %v7059_v48  ;;  %v7026_v37 = vsel %vm14723_vm5, 0.0, %v7006_v0  ;;  %v9098_v0 = vpop.f32.mrf.mxu0 }
 0x499   : > { %v7094_v44 = vsel %vm15044_vm12, %v7056_v25, 0.0  ;;  %vm15045_vm4 = vmmov %vm15035_vm2  ;;  %v7057_v61 = vadd.f32 %v7007_v9, %v13094_v34  ;;  %v7195_v60 = vadd.f32 %v7194_v31, %v7193_v35  ;;  %v7058_v40 = vadd.f32 %v7026_v37, %v13108_v15  ;;  %v6877_v31 = vpop.f32.mrf.mxu1 }
 0x49a   : > { %v7100_v7 = vsel %vm15045_vm4, %v7059_v48, 0.0  ;;  %vm15046_vm11 = vmmov %vm15035_vm2  ;;  %v7095_v16 = vadd.f32 %v7094_v44, %v7093_v30  ;;  %v6966_v55 = vrot.slane %v6877_v31, 1 }
 0x49b   : > { %7263 = vst.msk [vmem:[%s11110_s6 + $0x50] sm:$0xff] %vm15046_vm11, %v7059_v48  ;;  %vm15048_vm13 = vmmov %vm15035_vm2  ;;  %v7159_v36 = vmul.f32 %v7057_v61, %v7057_v61  ;;  %v7160_v21 = vmul.f32 %v7058_v40, %v7058_v40  ;;  %v9121_v48 = vpop.f32.mrf.mxu1 }
 0x49c   : > { %v7196_v39 = vsel %vm15048_vm13, %v7158_v18, 0.0  ;;  %vm15049_vm3 = vmmov %vm15035_vm2 }
 0x49d   : > { %v7202_v14 = vsel %vm15049_vm3, %v7161_v33, 0.0  ;;  %vm15050_vm9 = vmmov %vm15035_vm2  ;;  %v7197_v4 = vadd.f32 %v7196_v39, %v7195_v60  ;;  %v6890_v37 = vpop.f32.mrf.mxu1  ;;  %v13291_v60 = vadd.f32 %v9098_v0, %v13064_v29 }
 0x49e   : > { %v7096_v47 = vsel %vm15050_vm9, %v7057_v61, 0.0  ;;  %vm15051_vm10 = vmmov %vm15035_vm2 }
 0x49f   : > { %7261 = vst.msk [vmem:[%s11110_s6 + $0x40] sm:$0xff] %vm15051_vm10, %v7057_v61  ;;  %v7097_v23 = vadd.f32 %v7096_v47, %v7095_v16  ;;  %vm15052_vm5 = vmmov %vm15035_vm2 }
 0x4a0   : > { %v7098_v34 = vsel %vm15052_vm5, %v7058_v40, 0.0  ;;  %vm15053_vm14 = vmmov %vm15035_vm2 }
 0x4a1   : > { %7262 = vst.msk [vmem:[%s11110_s6 + $0x48] sm:$0xff] %vm15053_vm14, %v7058_v40  ;;  %vm15054_vm12 = vmmov %vm15035_vm2  ;;  %vm15055_vm2 = vcmp.lt.s32.totalorder %v9638_v52, 7  ;;  %v7099_v24 = vadd.f32 %v7098_v34, %v7097_v23  ;;  %v9122_v40 = vpop.f32.mrf.mxu1  ;;  %v6971_v34 = vrot.slane %v9121_v48, 1 }
 0x4a2   : > { %v7198_v15 = vsel %vm15054_vm12, %v7159_v36, 0.0  ;;  %v7004_v12 = vsel %vm15055_vm2, %v6964_v6, %v6965_v27  ;;  %vm15056_vm4 = vmmov %vm15049_vm3  ;;  %v6972_v31 = vrot.slane %v9122_v40, 1 }
 0x4a3   : > { %v7199_v53 = vadd.f32 %v7198_v15, %v7197_v4  ;;  %v7200_v19 = vsel %vm15056_vm4, %v7160_v21, 0.0  ;;  %v7028_v57 = vsel %vm10102_vm15, 0.0, %v7004_v12  ;;  %vm15058_vm11 = vmmov %vm15055_vm2  ;;  %v7101_v18 = vadd.f32 %v7100_v7, %v7099_v24  ;;  %v6893_v4 = vpop.f32.mrf.mxu1 }
 0x4a4   : > { %v7060_v9 = vadd.f32 %v7028_v57, %v13098_v59  ;;  %v7001_v35 = vsel %vm15058_vm11, %v6967_v1, %v6968_v46  ;;  %vm15059_vm13 = vmmov %vm15055_vm2  ;;  %v6969_v21 = vrot.slane %v6890_v37, 1  ;;  %v6970_v24 = vrot.slane %v6893_v4, 1 }
 0x4a5   : > { %v7002_v6 = vsel %vm15059_vm13, %v6966_v55, %v6967_v1  ;;  %vm15060_vm3 = vmmov %vm15055_vm2  ;;  %v7201_v44 = vadd.f32 %v7200_v19, %v7199_v53  ;;  %v7063_v50 = vadd.f32 %v7001_v35, %v13140_v2  ;;  %v9125_v53 = vpop.f32.mrf.mxu1 }
 0x4a6   : > { %v7003_v30 = vsel %vm15060_vm3, %v6965_v27, %v6966_v55  ;;  %v7030_v38 = vsel %vm14883_vm0, 0.0, %v7002_v6  ;;  %vm15062_vm15 = vmmov %vm15056_vm4  ;;  %v7162_v61 = vmul.f32 %v7060_v9, %v7060_v9 }
 0x4a7   : > { %v7102_v59 = vsel %vm15062_vm15, %v7060_v9, 0.0  ;;  %vm15063_vm9 = vmmov %vm15056_vm4  ;;  %v7061_v1 = vadd.f32 %v7003_v30, %v13112_v43  ;;  %v7062_v16 = vadd.f32 %v7030_v38, %v13124_v49  ;;  %v7203_v2 = vadd.f32 %v7202_v14, %v7201_v44  ;;  %v6906_v6 = vpop.f32.mrf.mxu1 }
 0x4a8   : > { %7264 = vst.msk [vmem:[%s11110_s6 + $0x58] sm:$0xff] %vm15063_vm9, %v7060_v9  ;;  %v7103_v7 = vadd.f32 %v7102_v59, %v7101_v18  ;;  %v7165_v39 = vmul.f32 %v7063_v50, %v7063_v50  ;;  %vm15064_vm10 = vmmov %vm15056_vm4  ;;  %v13304_v14 = vadd.f32 %v13185_v20, %v13101_v32  ;;  %vm15074_vm15 = vcmp.lt.s32.totalorder %v9638_v52, 7 }
 0x4a9   : > { %7267 = vst.msk [vmem:[%s11110_s6 + $0x70] sm:$0xff] %vm15064_vm10, %v7063_v50  ;;  %vm15065_vm0 = vmmov %vm15056_vm4  ;;  %v7163_v27 = vmul.f32 %v7061_v1, %v7061_v1  ;;  %v7164_v49 = vmul.f32 %v7062_v16, %v7062_v16  ;;  %v7000_v32 = vsel %vm15074_vm15, %v6968_v46, %v6969_v21  ;;  %v6973_v18 = vrot.slane %v6906_v6, 1 }
 0x4aa   : > { %v7204_v26 = vsel %vm15065_vm0, %v7162_v61, 0.0  ;;  %vm15066_vm5 = vmmov %vm15065_vm0  ;;  %v7032_v0 = vsel %vm14741_vm6, 0.0, %v7000_v32  ;;  %v6975_v59 = vrot.slane %v9125_v53, 1 }
 0x4ab   : > { %v7104_v47 = vsel %vm15066_vm5, %v7061_v1, 0.0  ;;  %vm15067_vm14 = vmmov %vm15065_vm0  ;;  %v7205_v43 = vadd.f32 %v7204_v26, %v7203_v2  ;;  %v7064_v30 = vadd.f32 %v7032_v0, %v13120_v10 }
 0x4ac   : > { %v7106_v36 = vsel %vm15067_vm14, %v7062_v16, 0.0  ;;  %vm15068_vm12 = vmmov %vm15065_vm0  ;;  %v7105_v29 = vadd.f32 %v7104_v47, %v7103_v7 }
 0x4ad   : > { %7265 = vst.msk [vmem:[%s11110_s6 + $0x60] sm:$0xff] %vm15068_vm12, %v7061_v1  ;;  %vm15069_vm2 = vmmov %vm15065_vm0  ;;  %v7166_v61 = vmul.f32 %v7064_v30, %v7064_v30 }
 0x4ae   : > { %7266 = vst.msk [vmem:[%s11110_s6 + $0x68] sm:$0xff] %vm15069_vm2, %v7062_v16  ;;  %vm15070_vm4 = vmmov %vm15065_vm0  ;;  %v7107_v15 = vadd.f32 %v7106_v36, %v7105_v29 }
 0x4af   : > { %v7206_v23 = vsel %vm15070_vm4, %v7163_v27, 0.0  ;;  %vm15071_vm11 = vmmov %vm15065_vm0 }
 0x4b0   : > { %v7207_v12 = vadd.f32 %v7206_v23, %v7205_v43  ;;  %v7208_v55 = vsel %vm15071_vm11, %v7164_v49, 0.0  ;;  %vm15072_vm13 = vmmov %vm15065_vm0  ;;  %v15089_v49 = vld [vmem:[#allocation51_spill] sm:$0xff] }
 0x4b1   : > { %v7108_v19 = vsel %vm15072_vm13, %v7063_v50, 0.0  ;;  %vm15073_vm3 = vmmov %vm15065_vm0 }
 0x4b2   : > { %v7210_v25 = vsel %vm15073_vm3, %v7165_v39, 0.0  ;;  %vm15075_vm9 = vmmov %vm15074_vm15  ;;  %v7209_v57 = vadd.f32 %v7208_v55, %v7207_v12  ;;  %v7109_v9 = vadd.f32 %v7108_v19, %v7107_v15  ;;  %vm15090_vm15 = vnez %v15089_v49 }
 0x4b3   : > { %v6997_v20 = vsel %vm15075_vm9, %v6971_v34, %v6972_v31  ;;  %vm15077_vm10 = vmmov %vm15075_vm9 }
 0x4b4   : > { %v7067_v35 = vadd.f32 %v6997_v20, %v13147_v62  ;;  %v6998_v44 = vsel %vm15077_vm10, %v6970_v24, %v6971_v34  ;;  %vm15078_vm0 = vmmov %vm15075_vm9  ;;  %v7211_v50 = vadd.f32 %v7210_v25, %v7209_v57  ;;  %v13327_v62 = vpop.f32.mrf.mxu1 }
 0x4b5   : > { %v6999_v46 = vsel %vm15078_vm0, %v6969_v21, %v6970_v24  ;;  %vm15079_vm5 = vmmov %vm15069_vm2  ;;  %v7034_v37 = vsel %vm14900_vm7, 0.0, %v6998_v44  ;;  %v6976_v40 = vrot.slane %v13327_v62, 1 }
 0x4b6   : > { %v7116_v33 = vsel %vm15079_vm5, %v7067_v35, 0.0  ;;  %vm15080_vm14 = vmmov %vm15069_vm2  ;;  %v7065_v1 = vadd.f32 %v6999_v46, %v13128_v5  ;;  %v7066_v16 = vadd.f32 %v7034_v37, %v13136_v17  ;;  %v7169_v2 = vmul.f32 %v7067_v35, %v7067_v35  ;;  %v6909_v26 = vpop.f32.mrf.mxu1 }
 0x4b7   : > { %7271 = vst.msk [vmem:[%s11110_s6 + $0x90] sm:$0xff] %vm15080_vm14, %v7067_v35  ;;  %vm15082_vm6 = vmmov %vm15069_vm2  ;;  %v6974_v15 = vrot.slane %v6909_v26, 1 }
 0x4b8   : > { %v7110_v10 = vsel %vm15082_vm6, %v7064_v30, 0.0  ;;  %vm15083_vm12 = vmmov %vm15069_vm2  ;;  %v7167_v43 = vmul.f32 %v7065_v1, %v7065_v1  ;;  %7270 = vst.msk [vmem:[%s11110_s6 + $0x88] sm:$0xff] %vm15073_vm3, %v7066_v16  ;;  %v7168_v29 = vmul.f32 %v7066_v16, %v7066_v16  ;;  %v9129_v23 = vpop.f32.mrf.mxu1 }
 0x4b9   : > { %7268 = vst.msk [vmem:[%s11110_s6 + $0x78] sm:$0xff] %vm15083_vm12, %v7064_v30  ;;  %v7111_v7 = vadd.f32 %v7110_v10, %v7109_v9  ;;  %vm15084_vm2 = vmmov %vm15078_vm0 }
 0x4ba   : > { %v6996_v39 = vsel %vm15084_vm2, %v6972_v31, %v6973_v18  ;;  %vm15085_vm7 = vmmov %vm15073_vm3  ;;  %v6922_v19 = vpop.f32.mrf.mxu1 }
 0x4bb   : > { %v7212_v47 = vsel %vm15085_vm7, %v7166_v61, 0.0  ;;  %vm15086_vm4 = vmmov %vm15073_vm3  ;;  %v7036_v4 = vsel %vm15090_vm15, 0.0, %v6996_v39  ;;  %v6977_v10 = vrot.slane %v6922_v19, 1 }
 0x4bc   : > { %v7112_v36 = vsel %vm15086_vm4, %v7065_v1, 0.0  ;;  %vm15087_vm11 = vmmov %vm15073_vm3  ;;  %v7213_v5 = vadd.f32 %v7212_v47, %v7211_v50  ;;  %v7068_v21 = vadd.f32 %v7036_v4, %v13132_v3 }
 0x4bd   : > { %v7114_v27 = vsel %vm15087_vm11, %v7066_v16, 0.0  ;;  %vm15088_vm13 = vmmov %vm15073_vm3  ;;  %v7113_v17 = vadd.f32 %v7112_v36, %v7111_v7 }
 0x4be   : > { %7269 = vst.msk [vmem:[%s11110_s6 + $0x80] sm:$0xff] %vm15088_vm13, %v7065_v1  ;;  %vm15091_vm9 = vmmov %vm15073_vm3  ;;  %v7170_v32 = vmul.f32 %v7068_v21, %v7068_v21 }
 0x4bf   : > { %v7214_v34 = vsel %vm15091_vm9, %v7167_v43, 0.0  ;;  %vm15092_vm10 = vmmov %vm15078_vm0  ;;  %v7115_v12 = vadd.f32 %v7114_v27, %v7113_v17 }
 0x4c0   : > { %v6993_v31 = vsel %vm15092_vm10, %v6975_v59, %v6976_v40  ;;  %v7215_v55 = vadd.f32 %v7214_v34, %v7213_v5  ;;  %vm15093_vm0 = vmmov %vm15073_vm3 }
 0x4c1   : > { %v7216_v24 = vsel %vm15093_vm0, %v7168_v29, 0.0  ;;  %v7071_v53 = vadd.f32 %v6993_v31, %v13170_v56  ;;  %vm15094_vm5 = vmmov %vm15093_vm0  ;;  %v7117_v0 = vadd.f32 %v7116_v33, %v7115_v12  ;;  %v13363_v56 = vpop.f32.mrf.mxu1  ;;  %v6979_v33 = vrot.slane %v9129_v23, 1  ;;  %v15114_v31 = vld [vmem:[#allocation13_spill] sm:$0xff] }
 0x4c2   : > { %v7118_v25 = vsel %vm15094_vm5, %v7068_v21, 0.0  ;;  %vm15095_vm14 = vmmov %vm15093_vm0  ;;  %v7217_v48 = vadd.f32 %v7216_v24, %v7215_v55  ;;  %v6980_v61 = vrot.slane %v13363_v56, 1 }
 0x4c3   : > { %7272 = vst.msk [vmem:[%s11110_s6 + $0x98] sm:$0xff] %vm15095_vm14, %v7068_v21  ;;  %vm15096_vm6 = vmmov %vm15084_vm2  ;;  %v7173_v6 = vmul.f32 %v7071_v53, %v7071_v53  ;;  %v6925_v37 = vpop.f32.mrf.mxu1 }
 0x4c4   : > { %v6994_v3 = vsel %vm15096_vm6, %v6974_v15, %v6975_v59  ;;  %vm15097_vm12 = vmmov %vm15084_vm2  ;;  %v6978_v47 = vrot.slane %v6925_v37, 1  ;;  %v6731_v37 = vpop.f32.mrf.mxu0 }
 0x4c5   : > { %v6995_v20 = vsel %vm15097_vm12, %v6973_v18, %v6974_v15  ;;  %vm15098_vm2 = vmmov %vm15093_vm0  ;;  %v7038_v44 = vsel %vm14781_vm8, 0.0, %v6994_v3  ;;  %v7119_v18 = vadd.f32 %v7118_v25, %v7117_v0  ;;  %vm15115_vm12 = vnez %v15114_v31 }
 0x4c6   : > { %v7218_v57 = vsel %vm15098_vm2, %v7169_v2, 0.0  ;;  %vm15099_vm7 = vmmov %vm15093_vm0  ;;  %v7069_v46 = vadd.f32 %v6995_v20, %v13151_v11  ;;  %v7070_v38 = vadd.f32 %v7038_v44, %v13160_v8  ;;  %v9133_v11 = vpop.f32.mrf.mxu1 }
 0x4c7   : > { %v7124_v9 = vsel %vm15099_vm7, %v7071_v53, 0.0  ;;  %vm15100_vm4 = vmmov %vm15093_vm0  ;;  %v7219_v50 = vadd.f32 %v7218_v57, %v7217_v48  ;;  %v6983_v0 = vrot.slane %v9133_v11, 1 }
 0x4c8   : > { %7275 = vst.msk [vmem:[%s11110_s6 + $0xb0] sm:$0xff] %vm15100_vm4, %v7071_v53  ;;  %vm15101_vm11 = vmmov %vm15093_vm0  ;;  %v7171_v62 = vmul.f32 %v7069_v46, %v7069_v46  ;;  %v7172_v2 = vmul.f32 %v7070_v38, %v7070_v38  ;;  %v6938_v29 = vpop.f32.mrf.mxu1 }
 0x4c9   : > { %v7220_v35 = vsel %vm15101_vm11, %v7170_v32, 0.0  ;;  %vm15103_vm13 = vmmov %vm15093_vm0  ;;  %v6981_v30 = vrot.slane %v6938_v29, 1 }
 0x4ca   : > { %v7120_v59 = vsel %vm15103_vm13, %v7069_v46, 0.0  ;;  %vm15104_vm3 = vmmov %vm15093_vm0  ;;  %v7221_v1 = vadd.f32 %v7220_v35, %v7219_v50  ;;  %v9134_v55 = vpop.f32.mrf.mxu1 }
 0x4cb   : > { %7273 = vst.msk [vmem:[%s11110_s6 + $0xa0] sm:$0xff] %vm15104_vm3, %v7069_v46  ;;  %v7121_v16 = vadd.f32 %v7120_v59, %v7119_v18  ;;  %vm15105_vm8 = vmmov %vm15093_vm0  ;;  %v6984_v44 = vrot.slane %v9134_v55, 1 }
 0x4cc   : > { %v7122_v7 = vsel %vm15105_vm8, %v7070_v38, 0.0  ;;  %vm15106_vm15 = vmmov %vm15093_vm0 }
 0x4cd   : > { %7274 = vst.msk [vmem:[%s11110_s6 + $0xa8] sm:$0xff] %vm15106_vm15, %v7070_v38  ;;  %vm15107_vm9 = vmmov %vm15093_vm0  ;;  %v7123_v36 = vadd.f32 %v7122_v7, %v7121_v16  ;;  %v15132_v7 = vld [vmem:[#allocation15_spill] sm:$0xff] }
 0x4ce   : > { %v7222_v8 = vsel %vm15107_vm9, %v7171_v62, 0.0  ;;  %vm15108_vm10 = vmmov %vm15096_vm6 }
 0x4cf   : > { %v6992_v39 = vsel %vm15108_vm10, %v6976_v40, %v6977_v10  ;;  %vm15109_vm0 = vmmov %vm15096_vm6  ;;  %v7223_v27 = vadd.f32 %v7222_v8, %v7221_v1  ;;  %v7125_v21 = vadd.f32 %v7124_v9, %v7123_v36  ;;  %v15136_v36 = vld [vmem:[#allocation16_spill] sm:$0xff] }
 0x4d0   : > { %v6989_v26 = vsel %vm15109_vm0, %v6979_v33, %v6980_v61  ;;  %vm15110_vm5 = vmmov %vm15098_vm2  ;;  %v7040_v17 = vsel %vm14786_vm1, 0.0, %v6992_v39 }
 0x4d1   : > { %v7224_v43 = vsel %vm15110_vm5, %v7172_v2, 0.0  ;;  %v7072_v49 = vadd.f32 %v7040_v17, %v13155_v58  ;;  %v7075_v4 = vadd.f32 %v6989_v26, %v13189_v41  ;;  %vm15112_vm14 = vmmov %vm15109_vm0  ;;  %v6772_v26 = vadd.f32 %v6731_v37, %v13104_v28  ;;  %v13466_v37 = vld [vmem:[%s11110_s6 + $0x8] sm:$0xff] }
 0x4d2   : > { %v6990_v40 = vsel %vm15112_vm14, %v6978_v47, %v6979_v33  ;;  %vm15113_vm6 = vmmov %vm15109_vm0  ;;  %v7225_v34 = vadd.f32 %v7224_v43, %v7223_v27 }
 0x4d3   : > { %v6991_v23 = vsel %vm15113_vm6, %v6977_v10, %v6978_v47  ;;  %v7042_v15 = vsel %vm15115_vm12, 0.0, %v6990_v40  ;;  %vm15116_vm1 = vmmov %vm15098_vm2  ;;  %v7174_v41 = vmul.f32 %v7072_v49, %v7072_v49  ;;  %v7177_v53 = vmul.f32 %v7075_v4, %v7075_v4 }
 0x4d4   : > { %v7073_v12 = vadd.f32 %v6991_v23, %v13173_v51  ;;  %v7226_v24 = vsel %vm15116_vm1, %v7173_v6, 0.0  ;;  %vm15117_vm2 = vmmov %vm15116_vm1  ;;  %v7074_v32 = vadd.f32 %v7042_v15, %v13183_v45  ;;  %v6941_v51 = vpop.f32.mrf.mxu1  ;;  %v6985_v62 = vsel %vm15113_vm6, %v6983_v0, %v6984_v44 }
 0x4d5   : > { %v7126_v58 = vsel %vm15117_vm2, %v7072_v49, 0.0  ;;  %vm15118_vm7 = vmmov %vm15116_vm1  ;;  %v7227_v25 = vadd.f32 %v7226_v24, %v7225_v34  ;;  %v6982_v46 = vrot.slane %v6941_v51, 1  ;;  %vm15133_vm2 = vnez %v15132_v7  ;;  %v13484_v7 = vld [vmem:[%s11110_s6 + $0x50] sm:$0xff] }
 0x4d6   : > { %7276 = vst.msk [vmem:[%s11110_s6 + $0xb8] sm:$0xff] %vm15118_vm7, %v7072_v49  ;;  %vm15119_vm4 = vmmov %vm15116_vm1  ;;  %v7127_v19 = vadd.f32 %v7126_v58, %v7125_v21  ;;  %v7175_v48 = vmul.f32 %v7073_v12, %v7073_v12  ;;  %v7176_v6 = vmul.f32 %v7074_v32, %v7074_v32  ;;  %vm15134_vm7 = vnez %v14979_v54 }
 0x4d7   : > { %7279 = vst.msk [vmem:[%s11110_s6 + $0xd0] sm:$0xff] %vm15119_vm4, %v7075_v4  ;;  %vm15120_vm11 = vmmov %vm15116_vm1  ;;  %v7079_v8 = vadd.f32 %v6985_v62, %v13304_v14  ;;  %v13472_v62 = vld [vmem:[%s11110_s6 + $0x30] sm:$0xff] }
 0x4d8   : > { %v7128_v3 = vsel %vm15120_vm11, %v7073_v12, 0.0  ;;  %vm15121_vm13 = vmmov %vm15116_vm1  ;;  %vm15137_vm11 = vnez %v15136_v36  ;;  %v7304_v36 = vld [vmem:[%s11110_s6 + $0x68] sm:$0xff] }
 0x4d9   : > { %7277 = vst.msk [vmem:[%s11110_s6 + $0xc0] sm:$0xff] %vm15121_vm13, %v7073_v12  ;;  %vm15122_vm3 = vmmov %vm15116_vm1  ;;  %v7129_v56 = vadd.f32 %v7128_v3, %v7127_v19  ;;  %v7181_v29 = vmul.f32 %v7079_v8, %v7079_v8 }
 0x4da   : > { %v7228_v20 = vsel %vm15122_vm3, %v7174_v41, 0.0  ;;  %vm15123_vm8 = vmmov %vm15116_vm1 }
 0x4db   : > { %v7132_v57 = vsel %vm15123_vm8, %v7075_v4, 0.0  ;;  %v7229_v9 = vadd.f32 %v7228_v20, %v7227_v25  ;;  %vm15124_vm15 = vmmov %vm15116_vm1 }
 0x4dc   : > { %v7130_v35 = vsel %vm15124_vm15, %v7074_v32, 0.0  ;;  %vm15125_vm9 = vmmov %vm15116_vm1 }
 0x4dd   : > { %7278 = vst.msk [vmem:[%s11110_s6 + $0xc8] sm:$0xff] %vm15125_vm9, %v7074_v32  ;;  %vm15126_vm10 = vmmov %vm15116_vm1  ;;  %v7131_v50 = vadd.f32 %v7130_v35, %v7129_v56 }
 0x4de   : > { %v7230_v45 = vsel %vm15126_vm10, %v7175_v48, 0.0  ;;  %vm15127_vm0 = vmmov %vm15116_vm1 }
 0x4df   : > { %v7234_v18 = vsel %vm15127_vm0, %v7177_v53, 0.0  ;;  %v7231_v38 = vadd.f32 %v7230_v45, %v7229_v9  ;;  %vm15128_vm5 = vmmov %vm15127_vm0  ;;  %v7133_v11 = vadd.f32 %v7132_v57, %v7131_v50 }
 0x4e0   : > { %v7232_v33 = vsel %vm15128_vm5, %v7176_v6, 0.0  ;;  %vm15129_vm14 = vmmov %vm15113_vm6 }
 0x4e1   : > { %v6988_v59 = vsel %vm15129_vm14, %v6980_v61, %v6981_v30  ;;  %vm15130_vm12 = vmmov %vm15113_vm6  ;;  %v7233_v16 = vadd.f32 %v7232_v33, %v7231_v38  ;;  %v13460_v38 = vld [vmem:[%s11110_s6 + $0x10] sm:$0xff]  ;;  %v13463_v33 = vld [vmem:[%s11110_s6] sm:$0xff] }
 0x4e2   : > { %v7016_v10 = vsel %vm15130_vm12, %v6984_v44, %v6953_v63  ;;  %vm15131_vm1 = vmmov %vm15113_vm6  ;;  %v7044_v2 = vsel %vm15133_vm2, 0.0, %v6988_v59  ;;  %v13469_v59 = vld [vmem:[%s11110_s6 + $0x18] sm:$0xff] }
 0x4e3   : > { %v6986_v1 = vsel %vm15131_vm1, %v6982_v46, %v6983_v0  ;;  %v7048_v61 = vsel %vm15134_vm7, 0.0, %v7016_v10  ;;  %v7076_v13 = vadd.f32 %v7044_v2, %v13176_v42  ;;  %vm15135_vm4 = vmmov %vm15131_vm1  ;;  %v7235_v47 = vadd.f32 %v7234_v18, %v7233_v16  ;;  %v13475_v10 = vld [vmem:[%s11110_s6 + $0x20] sm:$0xff]  ;;  %v13481_v16 = vld [vmem:[%s11110_s6 + $0x38] sm:$0xff] }
 0x4e4   : > { %v7080_v63 = vadd.f32 %v7048_v61, %v13291_v60  ;;  %v6987_v39 = vsel %vm15135_vm4, %v6981_v30, %v6982_v46  ;;  %v7046_v27 = vsel %vm15137_vm11, 0.0, %v6986_v1  ;;  %vm15138_vm13 = vmmov %vm15127_vm0  ;;  %v13478_v1 = vld [vmem:[%s11110_s6 + $0x28] sm:$0xff]  ;;  %v13487_v2 = vld [vmem:[%s11110_s6 + $0x40] sm:$0xff] }
 0x4e5   : > { %v7077_v54 = vadd.f32 %v6987_v39, %v13217_v22  ;;  %v7134_v43 = vsel %vm15138_vm13, %v7076_v13, 0.0  ;;  %v7178_v5 = vmul.f32 %v7076_v13, %v7076_v13  ;;  %vm15139_vm3 = vmmov %vm15127_vm0  ;;  %v7078_v42 = vadd.f32 %v7046_v27, %v6772_v26  ;;  %v13493_v61 = vld [vmem:[%s11110_s6 + $0x58] sm:$0xff] }
 0x4e6   : > { %7280 = vst.msk [vmem:[%s11110_s6 + $0xd8] sm:$0xff] %vm15139_vm3, %v7076_v13  ;;  %vm15140_vm8 = vmmov %vm15127_vm0  ;;  %v7135_v52 = vadd.f32 %v7134_v43, %v7133_v11  ;;  %v7182_v31 = vmul.f32 %v7080_v63, %v7080_v63  ;;  %v13490_v11 = vld [vmem:[%s11110_s6 + $0x48] sm:$0xff]  ;;  %v13496_v13 = vld [vmem:[%s11110_s6 + $0x70] sm:$0xff] }
 0x4e7   : > { %7283 = vst.msk [vmem:[%s11110_s6 + $0xf0] sm:$0xff] %vm15140_vm8, %v7079_v8  ;;  %vm15141_vm15 = vmmov %vm15127_vm0  ;;  %v7136_v60 = vsel %vm15127_vm0, %v7077_v54, 0.0  ;;  %v7179_v14 = vmul.f32 %v7077_v54, %v7077_v54  ;;  %v7180_v4 = vmul.f32 %v7078_v42, %v7078_v42  ;;  %v7306_v27 = vld [vmem:[%s11110_s6 + $0x78] sm:$0xff] }
 0x4e8   : > { %7284 = vst.msk [vmem:[%s11110_s6 + $0xf8] sm:$0xff] %vm15141_vm15, %v7080_v63  ;;  %vm15142_vm9 = vmmov %vm15127_vm0  ;;  %v7137_v22 = vadd.f32 %v7136_v60, %v7135_v52  ;;  %v7308_v60 = vld [vmem:[%s11110_s6 + $0x88] sm:$0xff] }
 0x4e9   : > { %7281 = vst.msk [vmem:[%s11110_s6 + $0xe0] sm:$0xff] %vm15142_vm9, %v7077_v54  ;;  %vm15143_vm10 = vmmov %vm15127_vm0  ;;  %v13512_v54 = vld [vmem:[%s11110_s6 + $0x90] sm:$0xff] }
 0x4ea   : > { %v7236_v28 = vsel %vm15143_vm10, %v7178_v5, 0.0  ;;  %vm15144_vm5 = vmmov %vm15127_vm0 }
 0x4eb   : > { %v7237_v17 = vadd.f32 %v7236_v28, %v7235_v47  ;;  %7282 = vst.msk [vmem:[%s11110_s6 + $0xe8] sm:$0xff] %vm15144_vm5, %v7078_v42  ;;  %vm15145_vm14 = vmmov %vm15127_vm0  ;;  %v7307_v28 = vld [vmem:[%s11110_s6 + $0x80] sm:$0xff] }
 0x4ec   : > { %v7138_v49 = vsel %vm15145_vm14, %v7078_v42, 0.0  ;;  %vm15146_vm6 = vmmov %vm15127_vm0 }
 0x4ed   : > { %v7238_v40 = vsel %vm15146_vm6, %v7179_v14, 0.0  ;;  %v7139_v23 = vadd.f32 %v7138_v49, %v7137_v22  ;;  %vm15147_vm12 = vmmov %vm15127_vm0  ;;  %v7310_v14 = vld [vmem:[%s11110_s6 + $0x98] sm:$0xff] }
 0x4ee   : > { %v7239_v34 = vadd.f32 %v7238_v40, %v7237_v17  ;;  %v7140_v21 = vsel %vm15147_vm12, %v7079_v8, 0.0  ;;  %vm15148_vm1 = vmmov %vm15127_vm0  ;;  %v13499_v8 = vld [vmem:[%s11110_s6 + $0x60] sm:$0xff] }
 0x4ef   : > { %v7240_v15 = vsel %vm15148_vm1, %v7180_v4, 0.0  ;;  %v7141_v12 = vadd.f32 %v7140_v21, %v7139_v23  ;;  %vm15149_vm2 = vmmov %vm15127_vm0  ;;  %v13534_v4 = vld [vmem:[%s11110_s6 + $0xb0] sm:$0xff]  ;;  %v7311_v40 = vld [vmem:[%s11110_s6 + $0xa0] sm:$0xff] }
 0x4f0   : > { %v7241_v55 = vadd.f32 %v7240_v15, %v7239_v34  ;;  %v7142_v24 = vsel %vm15149_vm2, %v7080_v63, 0.0  ;;  %vm15150_vm7 = vmmov %vm15127_vm0  ;;  %v7312_v23 = vld [vmem:[%s11110_s6 + $0xa8] sm:$0xff] }
 0x4f1   : > { %v7242_v58 = vsel %vm15150_vm7, %v7181_v29, 0.0  ;;  %v7143_v41 = vadd.f32 %v7142_v24, %v7141_v12  ;;  %vm15151_vm4 = vmmov %vm15127_vm0  ;;  %v7314_v12 = vld [vmem:[%s11110_s6 + $0xb8] sm:$0xff]  ;;  %v7315_v24 = vld [vmem:[%s11110_s6 + $0xc0] sm:$0xff] }
 0x4f2   : > { %v7243_v53 = vadd.f32 %v7242_v58, %v7241_v55  ;;  %v7244_v19 = vsel %vm15151_vm4, %v7182_v31, 0.0  ;;  %v13546_v55 = vld [vmem:[%s11110_s6 + $0xd0] sm:$0xff]  ;;  %vm15153_vm11 = vmmov %vm15127_vm0 }
 0x4f3   : > { %v7144_v25 = vrot.slane %v7143_v41, 4  ;;  %vm15154_vm13 = vmmov %vm15127_vm0 }
 0x4f4   : > { %v7245_v32 = vadd.f32 %v7244_v19, %v7243_v53  ;;  %vm15155_vm3 = vmmov %vm15127_vm0 }
 0x4f5   : > { %v7145_v3 = vadd.f32 %v7144_v25, %v7143_v41  ;;  %v7316_v25 = vld [vmem:[%s11110_s6 + $0xc8] sm:$0xff]  ;;  %vm15156_vm8 = vmmov %vm15127_vm0 }
 0x4f6   : > { %v7246_v51 = vrot.slane %v7245_v32, 4  ;;  %vm15157_vm15 = vmmov %vm15127_vm0 }
 0x4f7   : > { %v7146_v20 = vrot.slane %v7145_v3, 2  ;;  %vm15158_vm9 = vmmov %vm15127_vm0 }
 0x4f8   : > { %v7247_v57 = vadd.f32 %v7246_v51, %v7245_v32  ;;  %v7318_v32 = vld [vmem:[%s11110_s6 + $0xd8] sm:$0xff]  ;;  %vm15159_vm10 = vmmov %vm15127_vm0 }
 0x4f9   : > { %v7147_v48 = vadd.f32 %v7146_v20, %v7145_v3  ;;  %v7321_v3 = vld [vmem:[%s11110_s6 + $0xf0] sm:$0xff]  ;;  %vm15160_vm5 = vmmov %vm15127_vm0 }
 0x4fa   : > { %v7248_v0 = vrot.slane %v7247_v57, 2  ;;  %vm15161_vm14 = vmmov %vm15127_vm0 }
 0x4fb   : > { %v7148_v9 = vrot.slane %v7147_v48, 1  ;;  %vm15162_vm6 = vmmov %vm15127_vm0 }
 0x4fc   : > { %v7249_v56 = vadd.f32 %v7248_v0, %v7247_v57  ;;  %v7322_v0 = vld [vmem:[%s11110_s6 + $0xf8] sm:$0xff]  ;;  %vm15163_vm12 = vmmov %vm15127_vm0 }
 0x4fd   : > { %v7149_v35 = vadd.f32 %v7148_v9, %v7147_v48  ;;  %v7319_v9 = vld [vmem:[%s11110_s6 + $0xe0] sm:$0xff]  ;;  %vm15164_vm1 = vmmov %vm15127_vm0 }
 0x4fe   : > { %v7250_v6 = vrot.slane %v7249_v56, 1  ;;  %vm15165_vm2 = vmmov %vm15127_vm0 }
 0x4ff   : > { %v13455_v30 = vmul.f32 0.00390625, %v7149_v35  ;;  %vm15166_vm7 = vmmov %vm15127_vm0 }
 0x500   : > { %v7251_v45 = vadd.f32 %v7250_v6, %v7249_v56  ;;  %v7320_v56 = vld [vmem:[%s11110_s6 + $0xe8] sm:$0xff]  ;;  %vm15167_vm4 = vmmov %vm15127_vm0 }
 0x501   : > { %v7287_v46 = vmul.f32 %v13455_v30, %v13455_v30  ;;  %v7323_v63 = vsub.f32 %v13463_v33, %v13455_v30  ;;  %v7324_v39 = vsub.f32 %v13466_v37, %v13455_v30  ;;  %v7325_v26 = vsub.f32 %v13460_v38, %v13455_v30 }
 0x502   : > { %v7286_v44 = vmul.f32 0.00390625, %v7251_v45  ;;  %v7326_v47 = vsub.f32 %v13469_v59, %v13455_v30  ;;  %v7327_v43 = vsub.f32 %v13475_v10, %v13455_v30  ;;  %v7328_v5 = vsub.f32 %v13478_v1, %v13455_v30 }
 0x503   : > { %v7329_v52 = vsub.f32 %v13472_v62, %v13455_v30  ;;  %v7330_v42 = vsub.f32 %v13481_v16, %v13455_v30  ;;  %v7331_v17 = vsub.f32 %v13487_v2, %v13455_v30  ;;  %v7332_v22 = vsub.f32 %v13490_v11, %v13455_v30 }
 0x504   : > { %v7288_v18 = vsub.f32 %v7286_v44, %v7287_v46  ;;  %v7333_v29 = vsub.f32 %v13484_v7, %v13455_v30  ;;  %v7334_v49 = vsub.f32 %v13493_v61, %v13455_v30  ;;  %v7335_v34 = vsub.f32 %v13499_v8, %v13455_v30 }
 0x505   : > { %v7336_v21 = vsub.f32 %v7304_v36, %v13455_v30  ;;  %v7337_v31 = vsub.f32 %v13496_v13, %v13455_v30  ;;  %v7338_v15 = vsub.f32 %v7306_v27, %v13455_v30  ;;  %v7339_v58 = vsub.f32 %v7307_v28, %v13455_v30  ;;  %v7388_v36 = vld [vmem:[%s9354_s29 + $0x8] sm:$0xff]  ;;  %v7389_v27 = vld [vmem:[%s9354_s29 + $0x10] sm:$0xff]  ;;  %v7391_v28 = vld [vmem:[%s9354_s29 + $0x20] sm:$0xff] }
 0x506   : > { %v7289_v50 = vadd.f32 1e-05, %v7288_v18  ;;  %v7340_v41 = vsub.f32 %v7308_v60, %v13455_v30  ;;  %v7341_v53 = vsub.f32 %v13512_v54, %v13455_v30  ;;  %v7342_v19 = vsub.f32 %v7310_v14, %v13455_v30  ;;  %v7390_v54 = vld [vmem:[%s9354_s29 + $0x18] sm:$0xff]  ;;  %v7392_v60 = vld [vmem:[%s9354_s29 + $0x28] sm:$0xff]  ;;  %v7393_v14 = vld [vmem:[%s9354_s29 + $0x30] sm:$0xff] }
 0x507   : > { %v7343_v51 = vsub.f32 %v7311_v40, %v13455_v30  ;;  %v7344_v20 = vsub.f32 %v7312_v23, %v13455_v30  ;;  %v7345_v57 = vsub.f32 %v13534_v4, %v13455_v30  ;;  %v7346_v48 = vsub.f32 %v7314_v12, %v13455_v30  ;;  %v7395_v40 = vld [vmem:[%s9354_s29 + $0x40] sm:$0xff]  ;;  %v7396_v23 = vld [vmem:[%s9354_s29 + $0x48] sm:$0xff] }
 0x508   : > { %9278 = vrsqrt.f32 %v7289_v50  ;;  %v7347_v35 = vsub.f32 %v7315_v24, %v13455_v30  ;;  %v7348_v6 = vsub.f32 %v7316_v25, %v13455_v30  ;;  %v7349_v45 = vsub.f32 %v13546_v55, %v13455_v30  ;;  %v7398_v55 = vld [vmem:[%s9354_s29 + $0x58] sm:$0xff]  ;;  %v7399_v24 = vld [vmem:[%s9354_s29 + $0x60] sm:$0xff] }
 0x509   : > { %v7350_v44 = vsub.f32 %v7318_v32, %v13455_v30  ;;  %v7351_v18 = vsub.f32 %v7319_v9, %v13455_v30  ;;  %v7352_v50 = vsub.f32 %v7320_v56, %v13455_v30  ;;  %v7353_v38 = vsub.f32 %v7321_v3, %v13455_v30  ;;  %v7401_v32 = vld [vmem:[%s9354_s29 + $0x70] sm:$0xff]  ;;  %v7402_v3 = vld [vmem:[%s9354_s29 + $0x78] sm:$0xff] }
 0x50a   : > { %v7354_v33 = vsub.f32 %v7322_v0, %v13455_v30 }
 0x515   : > { %v9279_v46 = vpop.eup %9278 }
 0x516   : > { %v7355_v37 = vmul.f32 %v9279_v46, %v7323_v63  ;;  %v7356_v59 = vmul.f32 %v9279_v46, %v7324_v39  ;;  %v7357_v62 = vmul.f32 %v9279_v46, %v7325_v26  ;;  %v7358_v10 = vmul.f32 %v9279_v46, %v7326_v47  ;;  %v7387_v47 = vld [vmem:[%s9354_s29] sm:$0xff] }
 0x517   : > { %v7359_v1 = vmul.f32 %v9279_v46, %v7327_v43  ;;  %v7360_v16 = vmul.f32 %v9279_v46, %v7328_v5  ;;  %v7361_v7 = vmul.f32 %v9279_v46, %v7329_v52  ;;  %v7362_v2 = vmul.f32 %v9279_v46, %v7330_v42 }
 0x518   : > { %v7363_v11 = vmul.f32 %v9279_v46, %v7331_v17  ;;  %v7364_v61 = vmul.f32 %v9279_v46, %v7332_v22  ;;  %v7365_v13 = vmul.f32 %v9279_v46, %v7333_v29  ;;  %v7366_v8 = vmul.f32 %v9279_v46, %v7334_v49  ;;  %v7394_v17 = vld [vmem:[%s9354_s29 + $0x38] sm:$0xff] }
 0x519   : > { %v13574_v30 = vmul.f32 %v9279_v46, %v7335_v34  ;;  %v13576_v63 = vmul.f32 %v9279_v46, %v7336_v21  ;;  %v13578_v39 = vmul.f32 %v9279_v46, %v7337_v31  ;;  %v13580_v26 = vmul.f32 %v9279_v46, %v7338_v15  ;;  %v7397_v34 = vld [vmem:[%s9354_s29 + $0x50] sm:$0xff] }
 0x51a   : > { %v13586_v43 = vmul.f32 %v9279_v46, %v7339_v58  ;;  %v13588_v5 = vmul.f32 %v9279_v46, %v7340_v41  ;;  %v13590_v52 = vmul.f32 %v9279_v46, %v7341_v53  ;;  %v13592_v42 = vmul.f32 %v9279_v46, %v7342_v19  ;;  %v7400_v58 = vld [vmem:[%s9354_s29 + $0x68] sm:$0xff] }
 0x51b   : > { %v13598_v22 = vmul.f32 %v9279_v46, %v7343_v51  ;;  %v13600_v29 = vmul.f32 %v9279_v46, %v7344_v20  ;;  %v13602_v49 = vmul.f32 %v9279_v46, %v7345_v57  ;;  %v13604_v4 = vmul.f32 %v9279_v46, %v7346_v48  ;;  %v7403_v51 = vld [vmem:[%s9354_s29 + $0x80] sm:$0xff]  ;;  %v7404_v20 = vld [vmem:[%s9354_s29 + $0x88] sm:$0xff]  ;;  %v7405_v57 = vld [vmem:[%s9354_s29 + $0x90] sm:$0xff] }
 0x51c   : > { %v13609_v21 = vmul.f32 %v9279_v46, %v7347_v35  ;;  %v13611_v31 = vmul.f32 %v9279_v46, %v7348_v6  ;;  %v13613_v15 = vmul.f32 %v9279_v46, %v7349_v45  ;;  %v13615_v12 = vmul.f32 %v9279_v46, %v7350_v44  ;;  %v7406_v48 = vld [vmem:[%s9354_s29 + $0x98] sm:$0xff]  ;;  %v7407_v6 = vld [vmem:[%s9354_s29 + $0xa0] sm:$0xff]  ;;  %v7408_v45 = vld [vmem:[%s9354_s29 + $0xa8] sm:$0xff] }
 0x51d   : > { %v13620_v41 = vmul.f32 %v9279_v46, %v7351_v18  ;;  %v13622_v53 = vmul.f32 %v9279_v46, %v7352_v50  ;;  %v13624_v19 = vmul.f32 %v9279_v46, %v7353_v38  ;;  %v13626_v25 = vmul.f32 %v9279_v46, %v7354_v33  ;;  %v7409_v44 = vld [vmem:[%s9354_s29 + $0xb0] sm:$0xff]  ;;  %v7410_v33 = vld [vmem:[%s9354_s29 + $0xb8] sm:$0xff] }
 0x51e   : > { %v7419_v0 = vadd.f32 %v7387_v47, %v7355_v37  ;;  %v7420_v9 = vadd.f32 %v7388_v36, %v7356_v59  ;;  %v7421_v56 = vadd.f32 %v7389_v27, %v7357_v62  ;;  %v7422_v35 = vadd.f32 %v7390_v54, %v7358_v10  ;;  %v7412_v37 = vld [vmem:[%s9354_s29 + $0xc8] sm:$0xff] }
 0x51f   : > { %15152 = vst [vmem:[#allocation58_spill] sm:$0xff] %v13626_v25  ;;  %v7423_v46 = vadd.f32 %v7391_v28, %v7359_v1  ;;  %v7424_v18 = vadd.f32 %v7392_v60, %v7360_v16  ;;  %v7425_v50 = vadd.f32 %v7393_v14, %v7361_v7  ;;  %v7426_v38 = vadd.f32 %v7394_v17, %v7362_v2  ;;  %v7411_v25 = vld [vmem:[%s9354_s29 + $0xc0] sm:$0xff]  ;;  %v7413_v1 = vld [vmem:[%s9354_s29 + $0xd0] sm:$0xff]  ;;  %v7414_v16 = vld [vmem:[%s9354_s29 + $0xd8] sm:$0xff] }
 0x520   : > { %v7427_v59 = vadd.f32 %v7395_v40, %v7363_v11  ;;  %v7428_v62 = vadd.f32 %v7396_v23, %v7364_v61  ;;  %v7429_v10 = vadd.f32 %v7397_v34, %v7365_v13  ;;  %v7430_v47 = vadd.f32 %v7398_v55, %v7366_v8  ;;  %7451 = vst.msk [vmem:[%s11110_s6] sm:$0xff] %vm15153_vm11, %v7419_v0  ;;  %v7415_v7 = vld [vmem:[%s9354_s29 + $0xe0] sm:$0xff]  ;;  %v7416_v8 = vld [vmem:[%s9354_s29 + $0xe8] sm:$0xff]  ;;  %vm15168_vm11 = vmmov %vm15127_vm0 }
 0x521   : > { %7452 = vst.msk [vmem:[%s11110_s6 + $0x8] sm:$0xff] %vm15154_vm13, %v7420_v9  ;;  %v7431_v2 = vadd.f32 %v7399_v24, %v13574_v30  ;;  %v7432_v11 = vadd.f32 %v7400_v58, %v13576_v63  ;;  %v7433_v61 = vadd.f32 %v7401_v32, %v13578_v39  ;;  %v7434_v13 = vadd.f32 %v7402_v3, %v13580_v26  ;;  %v7417_v30 = vld [vmem:[%s9354_s29 + $0xf0] sm:$0xff]  ;;  %v7418_v63 = vld [vmem:[%s9354_s29 + $0xf8] sm:$0xff]  ;;  %vm15169_vm13 = vmmov %vm15127_vm0 }
 0x522   : > { %7453 = vst.msk [vmem:[%s11110_s6 + $0x10] sm:$0xff] %vm15155_vm3, %v7421_v56  ;;  %v7435_v39 = vadd.f32 %v7403_v51, %v13586_v43  ;;  %v7436_v36 = vadd.f32 %v7404_v20, %v13588_v5  ;;  %v7437_v26 = vadd.f32 %v7405_v57, %v13590_v52  ;;  %v7438_v27 = vadd.f32 %v7406_v48, %v13592_v42  ;;  %vm15170_vm3 = vmmov %vm15127_vm0 }
 0x523   : > { %7454 = vst.msk [vmem:[%s11110_s6 + $0x18] sm:$0xff] %vm15156_vm8, %v7422_v35  ;;  %v7439_v54 = vadd.f32 %v7407_v6, %v13598_v22  ;;  %v7440_v43 = vadd.f32 %v7408_v45, %v13600_v29  ;;  %v7441_v5 = vadd.f32 %v7409_v44, %v13602_v49  ;;  %v7442_v52 = vadd.f32 %v7410_v33, %v13604_v4  ;;  %vm15171_vm8 = vmmov %vm15127_vm0 }
 0x524   : > { %7455 = vst.msk [vmem:[%s11110_s6 + $0x20] sm:$0xff] %vm15157_vm15, %v7423_v46  ;;  %v7443_v42 = vadd.f32 %v7411_v25, %v13609_v21  ;;  %v7444_v28 = vadd.f32 %v7412_v37, %v13611_v31  ;;  %v7445_v60 = vadd.f32 %v7413_v1, %v13613_v15  ;;  %v7446_v14 = vadd.f32 %v7414_v16, %v13615_v12  ;;  %vm15173_vm15 = vmmov %vm15127_vm0 }
 0x525   : > { %7456 = vst.msk [vmem:[%s11110_s6 + $0x28] sm:$0xff] %vm15158_vm9, %v7424_v18  ;;  %v7447_v17 = vadd.f32 %v7415_v7, %v13620_v41  ;;  %v7448_v22 = vadd.f32 %v7416_v8, %v13622_v53  ;;  %v7449_v29 = vadd.f32 %v7417_v30, %v13624_v19  ;;  %vm15174_vm9 = vmmov %vm15127_vm0 }
 0x526   : > { %7457 = vst.msk [vmem:[%s11110_s6 + $0x30] sm:$0xff] %vm15159_vm10, %v7425_v50  ;;  %v15172_v49 = vld [vmem:[#allocation58_spill] sm:$0xff]  ;;  %vm15175_vm10 = vmmov %vm15127_vm0 }
 0x527   : > { %7458 = vst.msk [vmem:[%s11110_s6 + $0x38] sm:$0xff] %vm15127_vm0, %v7426_v38  ;;  %v7450_v4 = vadd.f32 %v7418_v63, %v15172_v49  ;;  %7474 = vst.msk [vmem:[%s11110_s6 + $0xb8] sm:$0xff] %vm15127_vm0, %v7442_v52 }
 0x528   : > { %7459 = vst.msk [vmem:[%s11110_s6 + $0x40] sm:$0xff] %vm15160_vm5, %v7427_v59  ;;  %vm15176_vm5 = vmmov %vm15127_vm0 }
 0x529   : > { %7460 = vst.msk [vmem:[%s11110_s6 + $0x48] sm:$0xff] %vm15161_vm14, %v7428_v62  ;;  %vm15177_vm14 = vmmov %vm15127_vm0 }
 0x52a   : > { %7461 = vst.msk [vmem:[%s11110_s6 + $0x50] sm:$0xff] %vm15162_vm6, %v7429_v10  ;;  %vm15178_vm6 = vmmov %vm15127_vm0 }
 0x52b   : > { %7462 = vst.msk [vmem:[%s11110_s6 + $0x58] sm:$0xff] %vm15163_vm12, %v7430_v47  ;;  %vm15179_vm12 = vmmov %vm15127_vm0 }
 0x52c   : > { %7463 = vst.msk [vmem:[%s11110_s6 + $0x60] sm:$0xff] %vm15164_vm1, %v7431_v2  ;;  %vm15180_vm1 = vmmov %vm15127_vm0 }
 0x52d   : > { %7464 = vst.msk [vmem:[%s11110_s6 + $0x68] sm:$0xff] %vm15165_vm2, %v7432_v11  ;;  %vm15181_vm2 = vmmov %vm15127_vm0 }
 0x52e   : > { %7465 = vst.msk [vmem:[%s11110_s6 + $0x70] sm:$0xff] %vm15166_vm7, %v7433_v61  ;;  %vm15182_vm7 = vmmov %vm15127_vm0 }
 0x52f   : > { %7466 = vst.msk [vmem:[%s11110_s6 + $0x78] sm:$0xff] %vm15167_vm4, %v7434_v13  ;;  %vm15183_vm4 = vmmov %vm15127_vm0 }
 0x530   : > { %7467 = vst.msk [vmem:[%s11110_s6 + $0x80] sm:$0xff] %vm15168_vm11, %v7435_v39 }
 0x531   : > { %7468 = vst.msk [vmem:[%s11110_s6 + $0x88] sm:$0xff] %vm15169_vm13, %v7436_v36 }
 0x532   : > { %7469 = vst.msk [vmem:[%s11110_s6 + $0x90] sm:$0xff] %vm15170_vm3, %v7437_v26 }
 0x533   : > { %7470 = vst.msk [vmem:[%s11110_s6 + $0x98] sm:$0xff] %vm15171_vm8, %v7438_v27 }
 0x534   : > { %7471 = vst.msk [vmem:[%s11110_s6 + $0xa0] sm:$0xff] %vm15173_vm15, %v7439_v54 }
 0x535   : > { %7472 = vst.msk [vmem:[%s11110_s6 + $0xa8] sm:$0xff] %vm15174_vm9, %v7440_v43 }
 0x536   : > { %7473 = vst.msk [vmem:[%s11110_s6 + $0xb0] sm:$0xff] %vm15175_vm10, %v7441_v5 }
 0x537   : > { %7475 = vst.msk [vmem:[%s11110_s6 + $0xc0] sm:$0xff] %vm15176_vm5, %v7443_v42 }
 0x538   : > { %7476 = vst.msk [vmem:[%s11110_s6 + $0xc8] sm:$0xff] %vm15177_vm14, %v7444_v28 }
 0x539   : > { %7477 = vst.msk [vmem:[%s11110_s6 + $0xd0] sm:$0xff] %vm15178_vm6, %v7445_v60 }
 0x53a   : > { %7478 = vst.msk [vmem:[%s11110_s6 + $0xd8] sm:$0xff] %vm15179_vm12, %v7446_v14 }
 0x53b   : > { %7479 = vst.msk [vmem:[%s11110_s6 + $0xe0] sm:$0xff] %vm15180_vm1, %v7447_v17 }
 0x53c   : > { %7480 = vst.msk [vmem:[%s11110_s6 + $0xe8] sm:$0xff] %vm15181_vm2, %v7448_v22 }
 0x53d   : > { %7481 = vst.msk [vmem:[%s11110_s6 + $0xf0] sm:$0xff] %vm15182_vm7, %v7449_v29 }
 0x53e   : > { %7482 = vst.msk [vmem:[%s11110_s6 + $0xf8] sm:$0xff] %vm15183_vm4, %v7450_v4 }
 0x53f PF: > { %s13_s12 = sadd.s32 1, %s9288_s12  }
 0x540   : > { %p10_p4 = scmp.ge.s32.totalorder %s13_s12, 4  }
 0x542   :  { %12 = sbr.rel (!%p10_p4) target bundleno = 1 (0x1), region = 78 }

</bundles_post_ra>
